<compile_context>
chip_gen: v6e
topology: v6e:2x2x1
jax: 0.10.0
libtpu: 0.0.40
codegen_flags: <defaults>
</compile_context>

<pallas_src>
import functools

import jax
import jax.numpy as jnp
from jax.experimental import pallas as pl
from jax.experimental.pallas import tpu as pltpu

EPS = 1e-5
_PREC = jax.lax.Precision.HIGHEST          # reference only


def _round_up(x, m):
    return (x + m - 1) // m * m


def _vmem_limit_bytes():
    """Per-generation scoped-VMEM budget (3/4 of physical, capped at 96 MiB)."""
    try:
        cap = int(pltpu.get_tpu_info().vmem_capacity_bytes)
        return int(max(32 * 1024 * 1024, min(cap * 3 // 4, 96 * 1024 * 1024)))
    except Exception:                      # query unavailable -> safe default
        return 32 * 1024 * 1024


def _pick_tile_m(m, cin, itemsize=2):
    """Row tile for the (M, Cin) passes.

    Targets ~4 MiB per x block (amortizes ~0.35us/step grid overhead, keeps
    the MXU's M dimension large).  Prefers an exact divisor of M that is a
    multiple of 8 (no pad rows); otherwise falls back to padding M, in which
    case pass B masks the pad rows out of the BN2 statistics.
    """
    cap = max(256, min(4096, (4 * 1024 * 1024) // max(cin * itemsize, 1)))
    m8 = _round_up(m, 8)
    if m8 <= cap:
        return m8                                    # single tile, no waste
    for t in range(cap - cap % 8, 255, -8):          # largest divisor <= cap
        if m % t == 0:
            return t
    return cap                                       # padded + masked path


# --------------------------------------------------------------------------
# Pass A: BN1 batch statistics (per-channel sum / sum-of-squares over N*H*W),
# accumulated tile-by-tile into resident (1, Cin) output blocks.
# Pad rows of x are zero -> contribute nothing (we divide by the true M later).
# --------------------------------------------------------------------------
def _bn1_stats_kernel(x_ref, sum_ref, sumsq_ref):
    @pl.when(pl.program_id(0) == 0)
    def _():
        sum_ref[...] = jnp.zeros_like(sum_ref)
        sumsq_ref[...] = jnp.zeros_like(sumsq_ref)

    x = x_ref[...].astype(jnp.float32)                    # bf16 -> f32
    sum_ref[...] += jnp.sum(x, axis=0, keepdims=True)
    sumsq_ref[...] += jnp.sum(x * x, axis=0, keepdims=True)
    # TODO(synk): switch to shifted/Welford accumulation if |mean| >> std at
    #             very large M (one-pass E[x^2]-mean^2 cancellation).


# --------------------------------------------------------------------------
# Pass B: BN1 (from prefetched stats) + ReLU + 1x1 conv (bf16 MXU matmul),
# pipelined over M tiles.  Also accumulates BN2 batch statistics of the
# bottleneck output and emits scale2/shift2 on the last tile, so kernel 2
# only applies an affine + ReLU.
# --------------------------------------------------------------------------
def _bottleneck_apply_kernel(sum1_ref, sumsq1_ref, g1_ref, b1_ref, w1_ref,
                             g2_ref, b2_ref, x_ref,
                             y_ref, scale2_ref, shift2_ref,
                             s1_sc, t1_sc, ysum_sc, ysumsq_sc,
                             *, m_valid, tile_m, need_mask):
    i = pl.program_id(0)
    inv_m = 1.0 / m_valid

    @pl.when(i == 0)
    def _():
        mean1 = sum1_ref[...] * inv_m
        var1 = sumsq1_ref[...] * inv_m - mean1 * mean1    # biased var (torch BN train)
        s1 = g1_ref[...] * jax.lax.rsqrt(var1 + EPS)
        s1_sc[...] = s1
        t1_sc[...] = b1_ref[...] - mean1 * s1
        ysum_sc[...] = jnp.zeros_like(ysum_sc)
        ysumsq_sc[...] = jnp.zeros_like(ysumsq_sc)

    x = x_ref[...].astype(jnp.float32)                    # bf16 -> f32
    h = jnp.maximum(x * s1_sc[...] + t1_sc[...], 0.0)     # BN1 + ReLU
    if need_mask:
        # Pad rows would yield h = ReLU(shift1) != 0; zero them so both the
        # matmul output (discarded) and the BN2 stats stay correct.
        rid = jax.lax.broadcasted_iota(jnp.int32, h.shape, 0) + i * tile_m
        h = jnp.where(rid < m_valid, h, 0.0)

    y = jnp.dot(h.astype(jnp.bfloat16), w1_ref[...],      # 1x1 conv == matmul
                preferred_element_type=jnp.float32)       # (tile_m, Cmid) f32
    y_ref[...] = y.astype(y_ref.dtype)                    # bf16 to HBM

    ysum_sc[...] += jnp.sum(y, axis=0, keepdims=True)     # BN2 stats (one-pass)
    ysumsq_sc[...] += jnp.sum(y * y, axis=0, keepdims=True)

    @pl.when(i == pl.num_programs(0) - 1)
    def _():
        mean2 = ysum_sc[...] * inv_m
        var2 = ysumsq_sc[...] * inv_m - mean2 * mean2
        s2 = g2_ref[...] * jax.lax.rsqrt(var2 + EPS)
        scale2_ref[...] = s2
        shift2_ref[...] = b2_ref[...] - mean2 * s2


# --------------------------------------------------------------------------
# Kernel 2: BN2 affine + ReLU + 3x3 "same" conv for one batch element.
# Zero padding is applied AFTER BN+ReLU (matching PyTorch conv).  The conv is
# 9 accumulating K=Cmid MXU matmuls over shifted windows of the halo-padded
# buffer (no im2col slab -> far less VMEM and no store-bound slab writeback).
# Output is (H*W, Cout) f32, unpadded channels (fewest HBM write bytes).
# --------------------------------------------------------------------------
def _bn_relu_conv3x3_kernel(y_ref, scale_ref, shift_ref, w_ref, o_ref, hpad_ref):
    H, W, C = y_ref.shape[1], y_ref.shape[2], y_ref.shape[3]
    HW = H * W
    cout = o_ref.shape[2]

    # BN2 affine + ReLU in f32, bf16 operands for the MXU.
    h = jnp.maximum(y_ref[0].astype(jnp.float32) * scale_ref[...] + shift_ref[...], 0.0)
    h = h.astype(jnp.bfloat16)                            # (H, W, Cmid)

    # Zero only the 1-pixel halo (thin strips); interior overwritten below.
    # Re-done every grid step so the batch axis can be sharded ("parallel").
    wp = hpad_ref.shape[1]
    zrow = jnp.zeros((1, wp, C), jnp.bfloat16)
    hpad_ref[0:1, :, :] = zrow
    hpad_ref[H + 1:H + 2, :, :] = zrow
    zcol = jnp.zeros((H + 2, 1, C), jnp.bfloat16)
    hpad_ref[:, 0:1, :] = zcol
    hpad_ref[:, W + 1:W + 2, :] = zcol
    hpad_ref[1:H + 1, 1:W + 1, :] = h

    # 3x3 conv = sum over 9 taps of (H*W, Cmid) @ (Cmid, Cout), f32 accumulate.
    acc = jnp.zeros((HW, cout), jnp.float32)
    for k in range(9):
        di, dj = k // 3, k % 3
        patch = hpad_ref[di:di + H, dj:dj + W, :].reshape(HW, C)   # bf16 window
        acc = acc + jnp.dot(patch, w_ref[k], preferred_element_type=jnp.float32)

    o_ref[0] = acc            # (H*W, Cout); NHWC reshape is metadata-only outside
    # TODO(synk): for very large spatials (>=112x112) add an H-tile grid axis
    #             with a 1-row halo to deepen the pipeline / balance v7x cores.


# --------------------------------------------------------------------------
# Wrapper
# --------------------------------------------------------------------------
@jax.jit
def dense_layer_forward(x_nchw, params):
    g1, b1, w1 = params["gamma1"], params["beta1"], params["w1"]   # w1: (Cmid, Cin)
    g2, b2, w2 = params["gamma2"], params["beta2"], params["w2"]   # w2: (Cout, Cmid, 3, 3)
    N, Cin, H, W = x_nchw.shape
    Cmid, Cout = w1.shape[0], w2.shape[0]
    M = N * H * W
    vmem_limit = _vmem_limit_bytes()

    # x is read twice (stats + apply): carry it in bf16 to halve HBM traffic.
    x_flat = jnp.transpose(x_nchw, (0, 2, 3, 1)).reshape(M, Cin).astype(jnp.bfloat16)

    tile_m = _pick_tile_m(M, Cin)
    m_pad = _round_up(M, tile_m)
    if m_pad != M:
        x_flat = jnp.pad(x_flat, ((0, m_pad - M), (0, 0)))
    n_tiles = m_pad // tile_m

    # ---- pass A: BN1 batch statistics -------------------------------------
    sum1, sumsq1 = pl.pallas_call(
        _bn1_stats_kernel,
        grid=(n_tiles,),
        in_specs=[pl.BlockSpec((tile_m, Cin), lambda i: (i, 0))],
        out_specs=(pl.BlockSpec((1, Cin), lambda i: (0, 0)),
                   pl.BlockSpec((1, Cin), lambda i: (0, 0))),
        out_shape=(jax.ShapeDtypeStruct((1, Cin), jnp.float32),
                   jax.ShapeDtypeStruct((1, Cin), jnp.float32)),
        compiler_params=pltpu.CompilerParams(
            dimension_semantics=("arbitrary",), vmem_limit_bytes=vmem_limit),
    )(x_flat)

    # ---- pass B: BN1 + ReLU + 1x1 conv, M-tiled pipeline; BN2 stats fused ---
    y_flat, scale2, shift2 = pl.pallas_call(
        functools.partial(_bottleneck_apply_kernel, m_valid=M, tile_m=tile_m,
                          need_mask=(m_pad != M)),
        grid=(n_tiles,),
        in_specs=[
            pl.BlockSpec((1, Cin), lambda i: (0, 0)),        # sum1
            pl.BlockSpec((1, Cin), lambda i: (0, 0)),        # sumsq1
            pl.BlockSpec((1, Cin), lambda i: (0, 0)),        # gamma1
            pl.BlockSpec((1, Cin), lambda i: (0, 0)),        # beta1
            pl.BlockSpec((Cin, Cmid), lambda i: (0, 0)),     # w1^T (bf16)
            pl.BlockSpec((1, Cmid), lambda i: (0, 0)),       # gamma2
            pl.BlockSpec((1, Cmid), lambda i: (0, 0)),       # beta2
            pl.BlockSpec((tile_m, Cin), lambda i: (i, 0)),   # x tile (bf16)
        ],
        out_specs=(pl.BlockSpec((tile_m, Cmid), lambda i: (i, 0)),
                   pl.BlockSpec((1, Cmid), lambda i: (0, 0)),
                   pl.BlockSpec((1, Cmid), lambda i: (0, 0))),
        out_shape=(jax.ShapeDtypeStruct((m_pad, Cmid), jnp.bfloat16),   # bf16 y
                   jax.ShapeDtypeStruct((1, Cmid), jnp.float32),
                   jax.ShapeDtypeStruct((1, Cmid), jnp.float32)),
        scratch_shapes=[pltpu.VMEM((1, Cin), jnp.float32),    # scale1
                        pltpu.VMEM((1, Cin), jnp.float32),    # shift1
                        pltpu.VMEM((1, Cmid), jnp.float32),   # sum(y)
                        pltpu.VMEM((1, Cmid), jnp.float32)],  # sum(y*y)
        compiler_params=pltpu.CompilerParams(
            dimension_semantics=("arbitrary",), vmem_limit_bytes=vmem_limit),
    )(sum1, sumsq1, g1[None, :], b1[None, :],
      w1.T.astype(jnp.bfloat16), g2[None, :], b2[None, :], x_flat)

    y_nhwc = y_flat[:M].reshape(N, H, W, Cmid)

    # ---- kernel 2: BN2 affine + ReLU + 3x3 conv (pad=1) --------------------
    wpad = _round_up(W + 2, 16)                    # bf16 packs 16 sublane rows/vreg
    w2_taps = jnp.transpose(w2, (2, 3, 1, 0)).reshape(9, Cmid, Cout).astype(jnp.bfloat16)

    out_flat = pl.pallas_call(
        _bn_relu_conv3x3_kernel,
        grid=(N,),
        in_specs=[
            pl.BlockSpec((1, H, W, Cmid), lambda n: (n, 0, 0, 0)),
            pl.BlockSpec((1, Cmid), lambda n: (0, 0)),
            pl.BlockSpec((1, Cmid), lambda n: (0, 0)),
            pl.BlockSpec((9, Cmid, Cout), lambda n: (0, 0, 0)),
        ],
        out_specs=pl.BlockSpec((1, H * W, Cout), lambda n: (n, 0, 0)),
        out_shape=jax.ShapeDtypeStruct((N, H * W, Cout), jnp.float32),
        scratch_shapes=[pltpu.VMEM((H + 2, wpad, Cmid), jnp.bfloat16)],  # halo buf
        compiler_params=pltpu.CompilerParams(
            dimension_semantics=("parallel",),     # batch elems independent
            vmem_limit_bytes=vmem_limit),
    )(y_nhwc, scale2, shift2, w2_taps)

    # drop_rate == 0.0  ->  F.dropout is a no-op.
    # TODO(synk): drop_rate > 0 -> build the mask in-kernel with pltpu.prng_seed /
    #             pltpu.prng_random_bits.
    # TODO(synk): running_mean/running_var momentum updates are not produced
    #             (forward output only).
    out = out_flat.reshape(N, H, W, Cout)
    return jnp.transpose(out, (0, 3, 1, 2))        # back to NCHW


# --------------------------------------------------------------------------
# Pure-JAX reference (mirrors the PyTorch forward exactly, f32 / HIGHEST)
# --------------------------------------------------------------------------
def reference_forward(x, params):
    g1, b1, w1 = params["gamma1"], params["beta1"], params["w1"]
    g2, b2, w2 = params["gamma2"], params["beta2"], params["w2"]
    dn = ("NCHW", "OIHW", "NCHW")

    mean1 = x.mean(axis=(0, 2, 3), keepdims=True)
    var1 = ((x - mean1) ** 2).mean(axis=(0, 2, 3), keepdims=True)
    xn = (x - mean1) / jnp.sqrt(var1 + EPS) * g1.reshape(1, -1, 1, 1) + b1.reshape(1, -1, 1, 1)
    h = jnp.maximum(xn, 0.0)
    y = jax.lax.conv_general_dilated(
        h, w1.reshape(w1.shape[0], w1.shape[1], 1, 1), (1, 1), "VALID",
        dimension_numbers=dn, precision=_PREC)

    mean2 = y.mean(axis=(0, 2, 3), keepdims=True)
    var2 = ((y - mean2) ** 2).mean(axis=(0, 2, 3), keepdims=True)
    yn = (y - mean2) / jnp.sqrt(var2 + EPS) * g2.reshape(1, -1, 1, 1) + b2.reshape(1, -1, 1, 1)
    h2 = jnp.maximum(yn, 0.0)
    out = jax.lax.conv_general_dilated(
        h2, w2, (1, 1), ((1, 1), (1, 1)),
        dimension_numbers=dn, precision=_PREC)
    return out


if __name__ == "__main__":
    key = jax.random.PRNGKey(0)
    N, Cin, H, W = 2, 4, 16, 16
    growth_rate, bn_size = 8, 4
    Cmid, Cout = bn_size * growth_rate, growth_rate          # 32, 8

    k1, k2, k3 = jax.random.split(key, 3)
    x = jax.random.normal(k1, (N, Cin, H, W), jnp.float32)
    params = dict(
        gamma1=jnp.ones((Cin,), jnp.float32),                # BatchNorm2d default init
        beta1=jnp.zeros((Cin,), jnp.float32),
        w1=0.2 * jax.random.normal(k2, (Cmid, Cin), jnp.float32),         # conv1 1x1 weight
        gamma2=jnp.ones((Cmid,), jnp.float32),
        beta2=jnp.zeros((Cmid,), jnp.float32),
        w2=0.1 * jax.random.normal(k3, (Cout, Cmid, 3, 3), jnp.float32),  # conv2 3x3 weight
    )

    out = jax.block_until_ready(dense_layer_forward(x, params))
    ref = jax.block_until_ready(reference_forward(x, params))

    assert out.shape == (N, Cout, H, W), out.shape
    max_diff = float(jnp.max(jnp.abs(out - ref)))
    scale = float(jnp.max(jnp.abs(ref)))
    # Kernel carries x and y in bf16 and uses bf16 MXU operands; reference is
    # f32 / Precision.HIGHEST, so tolerance scales with the output magnitude.
    assert max_diff < 0.05 * max(scale, 1.0), (
        f"mismatch vs reference: max abs diff = {max_diff}, ref max = {scale}")

    print("KERNEL_OK")
</pallas_src>

<mosaic_0001>
module attributes {stable_mosaic.version = 11 : i64} {
  func.func @_bn1_stats_kernel(%arg0: i32, %arg1: memref<512x4xbf16, #tpu.memory_space<vmem>>, %arg2: memref<1x4xf32, #tpu.memory_space<vmem>>, %arg3: memref<1x4xf32, #tpu.memory_space<vmem>>) attributes {dimension_semantics = [#tpu.dimension_semantics<arbitrary>], iteration_bounds = array<i64: 1>, scalar_prefetch = 0 : i64, scratch_operands = 0 : i64, tpu.core_type = #tpu.core_type<tc>, window_params = [{transform_indices = @transform_0, window_bounds = array<i64: 512, 4>}, {pipeline_mode = #tpu.pipeline_mode<synchronous>, transform_indices = @transform_1, window_bounds = array<i64: 1, 4>}, {pipeline_mode = #tpu.pipeline_mode<synchronous>, transform_indices = @transform_2, window_bounds = array<i64: 1, 4>}]} {
    %c0_i32 = arith.constant 0 : i32
    %0 = arith.cmpi eq, %arg0, %c0_i32 : i32
    %1 = arith.extui %0 : i1 to i32
    %c0_i32_0 = arith.constant 0 : i32
    %2 = arith.cmpi ne, %1, %c0_i32_0 : i32
    scf.if %2 {
      %cst_11 = arith.constant 0.000000e+00 : f32
      %16 = vector.broadcast %cst_11 : f32 to vector<1x4xf32>
      %c0_12 = arith.constant 0 : index
      %c0_13 = arith.constant 0 : index
      %17 = vector.load %arg2[%c0_12, %c0_13] : memref<1x4xf32, #tpu.memory_space<vmem>>, vector<1x4xf32>
      tpu.vector_store %arg2[%c0_12, %c0_13], %16 {strides = array<i32>} : memref<1x4xf32, #tpu.memory_space<vmem>>, vector<1x4xf32>,
      %cst_14 = arith.constant 0.000000e+00 : f32
      %18 = vector.broadcast %cst_14 : f32 to vector<1x4xf32>
      %c0_15 = arith.constant 0 : index
      %c0_16 = arith.constant 0 : index
      %19 = vector.load %arg3[%c0_15, %c0_16] : memref<1x4xf32, #tpu.memory_space<vmem>>, vector<1x4xf32>
      tpu.vector_store %arg3[%c0_15, %c0_16], %18 {strides = array<i32>} : memref<1x4xf32, #tpu.memory_space<vmem>>, vector<1x4xf32>,
    } else {
    }
    %c0 = arith.constant 0 : index
    %c0_1 = arith.constant 0 : index
    %3 = vector.load %arg1[%c0, %c0_1] : memref<512x4xbf16, #tpu.memory_space<vmem>>, vector<512x4xbf16>
    %4 = arith.extf %3 : vector<512x4xbf16> to vector<512x4xf32>
    %c0_2 = arith.constant 0 : index
    %c0_3 = arith.constant 0 : index
    %5 = vector.load %arg2[%c0_2, %c0_3] : memref<1x4xf32, #tpu.memory_space<vmem>>, vector<1x4xf32>
    %cst = arith.constant dense<0.000000e+00> : vector<4xf32>
    %6 = vector.multi_reduction <add>, %4, %cst [0] : vector<512x4xf32> to vector<4xf32>
    %7 = vector.shape_cast %6 : vector<4xf32> to vector<1x4xf32>
    %8 = arith.addf %5, %7 : vector<1x4xf32>
    %c0_4 = arith.constant 0 : index
    %c0_5 = arith.constant 0 : index
    %9 = vector.load %arg2[%c0_4, %c0_5] : memref<1x4xf32, #tpu.memory_space<vmem>>, vector<1x4xf32>
    tpu.vector_store %arg2[%c0_4, %c0_5], %8 {strides = array<i32>} : memref<1x4xf32, #tpu.memory_space<vmem>>, vector<1x4xf32>,
    %c0_6 = arith.constant 0 : index
    %c0_7 = arith.constant 0 : index
    %10 = vector.load %arg3[%c0_6, %c0_7] : memref<1x4xf32, #tpu.memory_space<vmem>>, vector<1x4xf32>
    %11 = arith.mulf %4, %4 : vector<512x4xf32>
    %cst_8 = arith.constant dense<0.000000e+00> : vector<4xf32>
    %12 = vector.multi_reduction <add>, %11, %cst_8 [0] : vector<512x4xf32> to vector<4xf32>
    %13 = vector.shape_cast %12 : vector<4xf32> to vector<1x4xf32>
    %14 = arith.addf %10, %13 : vector<1x4xf32>
    %c0_9 = arith.constant 0 : index
    %c0_10 = arith.constant 0 : index
    %15 = vector.load %arg3[%c0_9, %c0_10] : memref<1x4xf32, #tpu.memory_space<vmem>>, vector<1x4xf32>
    tpu.vector_store %arg3[%c0_9, %c0_10], %14 {strides = array<i32>} : memref<1x4xf32, #tpu.memory_space<vmem>>, vector<1x4xf32>,
    return
  }
  func.func @transform_0(%arg0: i32) -> (i32, i32) {
    %c0_i32 = arith.constant 0 : i32
    %c0_i32_0 = arith.constant 0 : i32
    return %arg0, %c0_i32 : i32, i32
  }
  func.func @transform_1(%arg0: i32) -> (i32, i32) {
    %c0_i32 = arith.constant 0 : i32
    %c0_i32_0 = arith.constant 0 : i32
    %c0_i32_1 = arith.constant 0 : i32
    return %c0_i32, %c0_i32_0 : i32, i32
  }
  func.func @transform_2(%arg0: i32) -> (i32, i32) {
    %c0_i32 = arith.constant 0 : i32
    %c0_i32_0 = arith.constant 0 : i32
    %c0_i32_1 = arith.constant 0 : i32
    return %c0_i32, %c0_i32_0 : i32, i32
  }
}

module attributes {stable_mosaic.version = 11 : i64} {
  func.func @_bn_relu_conv3x3_kernel(%arg0: i32, %arg1: memref<1x16x16x32xbf16, #tpu.memory_space<vmem>>, %arg2: memref<1x32xf32, #tpu.memory_space<vmem>>, %arg3: memref<1x32xf32, #tpu.memory_space<vmem>>, %arg4: memref<9x32x8xbf16, #tpu.memory_space<vmem>>, %arg5: memref<1x256x8xf32, #tpu.memory_space<vmem>>, %arg6: memref<18x32x32xbf16, #tpu.memory_space<vmem>>) attributes {dimension_semantics = [#tpu.dimension_semantics<parallel>], iteration_bounds = array<i64: 2>, scalar_prefetch = 0 : i64, scratch_operands = 1 : i64, tpu.core_type = #tpu.core_type<tc>, window_params = [{transform_indices = @transform_0, window_bounds = array<i64: 1, 16, 16, 32>}, {pipeline_mode = #tpu.pipeline_mode<synchronous>, transform_indices = @transform_1, window_bounds = array<i64: 1, 32>}, {pipeline_mode = #tpu.pipeline_mode<synchronous>, transform_indices = @transform_2, window_bounds = array<i64: 1, 32>}, {pipeline_mode = #tpu.pipeline_mode<synchronous>, transform_indices = @transform_3, window_bounds = array<i64: 9, 32, 8>}, {transform_indices = @transform_4, window_bounds = array<i64: 1, 256, 8>}]} {
    %c0 = arith.constant 0 : index
    %c0_0 = arith.constant 0 : index
    %c0_1 = arith.constant 0 : index
    %c0_2 = arith.constant 0 : index
    %0 = vector.load %arg1[%c0, %c0_0, %c0_1, %c0_2] : memref<1x16x16x32xbf16, #tpu.memory_space<vmem>>, vector<1x16x16x32xbf16>
    %1 = vector.shape_cast %0 : vector<1x16x16x32xbf16> to vector<16x16x32xbf16>
    %2 = arith.extf %1 : vector<16x16x32xbf16> to vector<16x16x32xf32>
    %c0_3 = arith.constant 0 : index
    %c0_4 = arith.constant 0 : index
    %3 = vector.load %arg2[%c0_3, %c0_4] : memref<1x32xf32, #tpu.memory_space<vmem>>, vector<1x32xf32>
    %4 = vector.shape_cast %3 : vector<1x32xf32> to vector<1x1x32xf32>
    %5 = vector.broadcast %4 : vector<1x1x32xf32> to vector<16x16x32xf32>
    %6 = arith.mulf %2, %5 : vector<16x16x32xf32>
    %c0_5 = arith.constant 0 : index
    %c0_6 = arith.constant 0 : index
    %7 = vector.load %arg3[%c0_5, %c0_6] : memref<1x32xf32, #tpu.memory_space<vmem>>, vector<1x32xf32>
    %8 = vector.shape_cast %7 : vector<1x32xf32> to vector<1x1x32xf32>
    %9 = vector.broadcast %8 : vector<1x1x32xf32> to vector<16x16x32xf32>
    %10 = arith.addf %6, %9 : vector<16x16x32xf32>
    %cst = arith.constant 0.000000e+00 : f32
    %11 = vector.broadcast %cst : f32 to vector<16x16x32xf32>
    %12 = arith.maximumf %10, %11 : vector<16x16x32xf32>
    %13 = arith.truncf %12 : vector<16x16x32xf32> to vector<16x16x32xbf16>
    %cst_7 = arith.constant 0.000000e+00 : bf16
    %14 = vector.broadcast %cst_7 : bf16 to vector<1x32x32xbf16>
    %c0_8 = arith.constant 0 : index
    %c0_9 = arith.constant 0 : index
    %c0_10 = arith.constant 0 : index
    %15 = vector.load %arg6[%c0_8, %c0_9, %c0_10] : memref<18x32x32xbf16, #tpu.memory_space<vmem>>, vector<1x32x32xbf16>
    tpu.vector_store %arg6[%c0_8, %c0_9, %c0_10], %14 {strides = array<i32>} : memref<18x32x32xbf16, #tpu.memory_space<vmem>>, vector<1x32x32xbf16>,
    %c17 = arith.constant 17 : index
    %c0_11 = arith.constant 0 : index
    %c0_12 = arith.constant 0 : index
    %16 = vector.load %arg6[%c17, %c0_11, %c0_12] : memref<18x32x32xbf16, #tpu.memory_space<vmem>>, vector<1x32x32xbf16>
    tpu.vector_store %arg6[%c17, %c0_11, %c0_12], %14 {strides = array<i32>} : memref<18x32x32xbf16, #tpu.memory_space<vmem>>, vector<1x32x32xbf16>,
    %cst_13 = arith.constant 0.000000e+00 : bf16
    %17 = vector.broadcast %cst_13 : bf16 to vector<18x1x32xbf16>
    %c0_14 = arith.constant 0 : index
    %c0_15 = arith.constant 0 : index
    %c0_16 = arith.constant 0 : index
    %18 = vector.load %arg6[%c0_14, %c0_15, %c0_16] : memref<18x32x32xbf16, #tpu.memory_space<vmem>>, vector<18x1x32xbf16>
    tpu.vector_store %arg6[%c0_14, %c0_15, %c0_16], %17 {strides = array<i32>} : memref<18x32x32xbf16, #tpu.memory_space<vmem>>, vector<18x1x32xbf16>,
    %c0_17 = arith.constant 0 : index
    %c17_18 = arith.constant 17 : index
    %c0_19 = arith.constant 0 : index
    %19 = vector.load %arg6[%c0_17, %c17_18, %c0_19] : memref<18x32x32xbf16, #tpu.memory_space<vmem>>, vector<18x1x32xbf16>
    tpu.vector_store %arg6[%c0_17, %c17_18, %c0_19], %17 {strides = array<i32>} : memref<18x32x32xbf16, #tpu.memory_space<vmem>>, vector<18x1x32xbf16>,
    %c1 = arith.constant 1 : index
    %c1_20 = arith.constant 1 : index
    %c0_21 = arith.constant 0 : index
    %20 = vector.load %arg6[%c1, %c1_20, %c0_21] : memref<18x32x32xbf16, #tpu.memory_space<vmem>>, vector<16x16x32xbf16>
    tpu.vector_store %arg6[%c1, %c1_20, %c0_21], %13 {strides = array<i32>} : memref<18x32x32xbf16, #tpu.memory_space<vmem>>, vector<16x16x32xbf16>,
    %cst_22 = arith.constant 0.000000e+00 : f32
    %21 = vector.broadcast %cst_22 : f32 to vector<256x8xf32>
    %c0_23 = arith.constant 0 : index
    %c0_24 = arith.constant 0 : index
    %c0_25 = arith.constant 0 : index
    %22 = vector.load %arg6[%c0_23, %c0_24, %c0_25] : memref<18x32x32xbf16, #tpu.memory_space<vmem>>, vector<16x16x32xbf16>
    %23 = vector.shape_cast %22 : vector<16x16x32xbf16> to vector<256x32xbf16>
    %c0_26 = arith.constant 0 : index
    %c0_27 = arith.constant 0 : index
    %c0_28 = arith.constant 0 : index
    %24 = vector.load %arg4[%c0_26, %c0_27, %c0_28] : memref<9x32x8xbf16, #tpu.memory_space<vmem>>, vector<1x32x8xbf16>
    %25 = vector.shape_cast %24 : vector<1x32x8xbf16> to vector<32x8xbf16>
    %cst_29 = arith.constant dense<0.000000e+00> : vector<256x8xf32>
    %26 = tpu.matmul %23, %25, %cst_29 {dimension_numbers = #tpu.dot_dimension_numbers<[1], [0], [0], [1], [0, 0, 1, 1], [], []>} : vector<256x32xbf16>, vector<32x8xbf16>, vector<256x8xf32> -> vector<256x8xf32>
    %27 = arith.addf %21, %26 : vector<256x8xf32>
    %c0_30 = arith.constant 0 : index
    %c1_31 = arith.constant 1 : index
    %c0_32 = arith.constant 0 : index
    %28 = vector.load %arg6[%c0_30, %c1_31, %c0_32] : memref<18x32x32xbf16, #tpu.memory_space<vmem>>, vector<16x16x32xbf16>
    %29 = vector.shape_cast %28 : vector<16x16x32xbf16> to vector<256x32xbf16>
    %c1_33 = arith.constant 1 : index
    %c0_34 = arith.constant 0 : index
    %c0_35 = arith.constant 0 : index
    %30 = vector.load %arg4[%c1_33, %c0_34, %c0_35] : memref<9x32x8xbf16, #tpu.memory_space<vmem>>, vector<1x32x8xbf16>
    %31 = vector.shape_cast %30 : vector<1x32x8xbf16> to vector<32x8xbf16>
    %cst_36 = arith.constant dense<0.000000e+00> : vector<256x8xf32>
    %32 = tpu.matmul %29, %31, %cst_36 {dimension_numbers = #tpu.dot_dimension_numbers<[1], [0], [0], [1], [0, 0, 1, 1], [], []>} : vector<256x32xbf16>, vector<32x8xbf16>, vector<256x8xf32> -> vector<256x8xf32>
    %33 = arith.addf %27, %32 : vector<256x8xf32>
    %c0_37 = arith.constant 0 : index
    %c2 = arith.constant 2 : index
    %c0_38 = arith.constant 0 : index
    %34 = vector.load %arg6[%c0_37, %c2, %c0_38] : memref<18x32x32xbf16, #tpu.memory_space<vmem>>, vector<16x16x32xbf16>
    %35 = vector.shape_cast %34 : vector<16x16x32xbf16> to vector<256x32xbf16>
    %c2_39 = arith.constant 2 : index
    %c0_40 = arith.constant 0 : index
    %c0_41 = arith.constant 0 : index
    %36 = vector.load %arg4[%c2_39, %c0_40, %c0_41] : memref<9x32x8xbf16, #tpu.memory_space<vmem>>, vector<1x32x8xbf16>
    %37 = vector.shape_cast %36 : vector<1x32x8xbf16> to vector<32x8xbf16>
    %cst_42 = arith.constant dense<0.000000e+00> : vector<256x8xf32>
    %38 = tpu.matmul %35, %37, %cst_42 {dimension_numbers = #tpu.dot_dimension_numbers<[1], [0], [0], [1], [0, 0, 1, 1], [], []>} : vector<256x32xbf16>, vector<32x8xbf16>, vector<256x8xf32> -> vector<256x8xf32>
    %39 = arith.addf %33, %38 : vector<256x8xf32>
    %c1_43 = arith.constant 1 : index
    %c0_44 = arith.constant 0 : index
    %c0_45 = arith.constant 0 : index
    %40 = vector.load %arg6[%c1_43, %c0_44, %c0_45] : memref<18x32x32xbf16, #tpu.memory_space<vmem>>, vector<16x16x32xbf16>
    %41 = vector.shape_cast %40 : vector<16x16x32xbf16> to vector<256x32xbf16>
    %c3 = arith.constant 3 : index
    %c0_46 = arith.constant 0 : index
    %c0_47 = arith.constant 0 : index
    %42 = vector.load %arg4[%c3, %c0_46, %c0_47] : memref<9x32x8xbf16, #tpu.memory_space<vmem>>, vector<1x32x8xbf16>
    %43 = vector.shape_cast %42 : vector<1x32x8xbf16> to vector<32x8xbf16>
    %cst_48 = arith.constant dense<0.000000e+00> : vector<256x8xf32>
    %44 = tpu.matmul %41, %43, %cst_48 {dimension_numbers = #tpu.dot_dimension_numbers<[1], [0], [0], [1], [0, 0, 1, 1], [], []>} : vector<256x32xbf16>, vector<32x8xbf16>, vector<256x8xf32> -> vector<256x8xf32>
    %45 = arith.addf %39, %44 : vector<256x8xf32>
    %c1_49 = arith.constant 1 : index
    %c1_50 = arith.constant 1 : index
    %c0_51 = arith.constant 0 : index
    %46 = vector.load %arg6[%c1_49, %c1_50, %c0_51] : memref<18x32x32xbf16, #tpu.memory_space<vmem>>, vector<16x16x32xbf16>
    %47 = vector.shape_cast %46 : vector<16x16x32xbf16> to vector<256x32xbf16>
    %c4 = arith.constant 4 : index
    %c0_52 = arith.constant 0 : index
    %c0_53 = arith.constant 0 : index
    %48 = vector.load %arg4[%c4, %c0_52, %c0_53] : memref<9x32x8xbf16, #tpu.memory_space<vmem>>, vector<1x32x8xbf16>
    %49 = vector.shape_cast %48 : vector<1x32x8xbf16> to vector<32x8xbf16>
    %cst_54 = arith.constant dense<0.000000e+00> : vector<256x8xf32>
    %50 = tpu.matmul %47, %49, %cst_54 {dimension_numbers = #tpu.dot_dimension_numbers<[1], [0], [0], [1], [0, 0, 1, 1], [], []>} : vector<256x32xbf16>, vector<32x8xbf16>, vector<256x8xf32> -> vector<256x8xf32>
    %51 = arith.addf %45, %50 : vector<256x8xf32>
    %c1_55 = arith.constant 1 : index
    %c2_56 = arith.constant 2 : index
    %c0_57 = arith.constant 0 : index
    %52 = vector.load %arg6[%c1_55, %c2_56, %c0_57] : memref<18x32x32xbf16, #tpu.memory_space<vmem>>, vector<16x16x32xbf16>
    %53 = vector.shape_cast %52 : vector<16x16x32xbf16> to vector<256x32xbf16>
    %c5 = arith.constant 5 : index
    %c0_58 = arith.constant 0 : index
    %c0_59 = arith.constant 0 : index
    %54 = vector.load %arg4[%c5, %c0_58, %c0_59] : memref<9x32x8xbf16, #tpu.memory_space<vmem>>, vector<1x32x8xbf16>
    %55 = vector.shape_cast %54 : vector<1x32x8xbf16> to vector<32x8xbf16>
    %cst_60 = arith.constant dense<0.000000e+00> : vector<256x8xf32>
    %56 = tpu.matmul %53, %55, %cst_60 {dimension_numbers = #tpu.dot_dimension_numbers<[1], [0], [0], [1], [0, 0, 1, 1], [], []>} : vector<256x32xbf16>, vector<32x8xbf16>, vector<256x8xf32> -> vector<256x8xf32>
    %57 = arith.addf %51, %56 : vector<256x8xf32>
    %c2_61 = arith.constant 2 : index
    %c0_62 = arith.constant 0 : index
    %c0_63 = arith.constant 0 : index
    %58 = vector.load %arg6[%c2_61, %c0_62, %c0_63] : memref<18x32x32xbf16, #tpu.memory_space<vmem>>, vector<16x16x32xbf16>
    %59 = vector.shape_cast %58 : vector<16x16x32xbf16> to vector<256x32xbf16>
    %c6 = arith.constant 6 : index
    %c0_64 = arith.constant 0 : index
    %c0_65 = arith.constant 0 : index
    %60 = vector.load %arg4[%c6, %c0_64, %c0_65] : memref<9x32x8xbf16, #tpu.memory_space<vmem>>, vector<1x32x8xbf16>
    %61 = vector.shape_cast %60 : vector<1x32x8xbf16> to vector<32x8xbf16>
    %cst_66 = arith.constant dense<0.000000e+00> : vector<256x8xf32>
    %62 = tpu.matmul %59, %61, %cst_66 {dimension_numbers = #tpu.dot_dimension_numbers<[1], [0], [0], [1], [0, 0, 1, 1], [], []>} : vector<256x32xbf16>, vector<32x8xbf16>, vector<256x8xf32> -> vector<256x8xf32>
    %63 = arith.addf %57, %62 : vector<256x8xf32>
    %c2_67 = arith.constant 2 : index
    %c1_68 = arith.constant 1 : index
    %c0_69 = arith.constant 0 : index
    %64 = vector.load %arg6[%c2_67, %c1_68, %c0_69] : memref<18x32x32xbf16, #tpu.memory_space<vmem>>, vector<16x16x32xbf16>
    %65 = vector.shape_cast %64 : vector<16x16x32xbf16> to vector<256x32xbf16>
    %c7 = arith.constant 7 : index
    %c0_70 = arith.constant 0 : index
    %c0_71 = arith.constant 0 : index
    %66 = vector.load %arg4[%c7, %c0_70, %c0_71] : memref<9x32x8xbf16, #tpu.memory_space<vmem>>, vector<1x32x8xbf16>
    %67 = vector.shape_cast %66 : vector<1x32x8xbf16> to vector<32x8xbf16>
    %cst_72 = arith.constant dense<0.000000e+00> : vector<256x8xf32>
    %68 = tpu.matmul %65, %67, %cst_72 {dimension_numbers = #tpu.dot_dimension_numbers<[1], [0], [0], [1], [0, 0, 1, 1], [], []>} : vector<256x32xbf16>, vector<32x8xbf16>, vector<256x8xf32> -> vector<256x8xf32>
    %69 = arith.addf %63, %68 : vector<256x8xf32>
    %c2_73 = arith.constant 2 : index
    %c2_74 = arith.constant 2 : index
    %c0_75 = arith.constant 0 : index
    %70 = vector.load %arg6[%c2_73, %c2_74, %c0_75] : memref<18x32x32xbf16, #tpu.memory_space<vmem>>, vector<16x16x32xbf16>
    %71 = vector.shape_cast %70 : vector<16x16x32xbf16> to vector<256x32xbf16>
    %c8 = arith.constant 8 : index
    %c0_76 = arith.constant 0 : index
    %c0_77 = arith.constant 0 : index
    %72 = vector.load %arg4[%c8, %c0_76, %c0_77] : memref<9x32x8xbf16, #tpu.memory_space<vmem>>, vector<1x32x8xbf16>
    %73 = vector.shape_cast %72 : vector<1x32x8xbf16> to vector<32x8xbf16>
    %cst_78 = arith.constant dense<0.000000e+00> : vector<256x8xf32>
    %74 = tpu.matmul %71, %73, %cst_78 {dimension_numbers = #tpu.dot_dimension_numbers<[1], [0], [0], [1], [0, 0, 1, 1], [], []>} : vector<256x32xbf16>, vector<32x8xbf16>, vector<256x8xf32> -> vector<256x8xf32>
    %75 = arith.addf %69, %74 : vector<256x8xf32>
    %c0_79 = arith.constant 0 : index
    %c0_80 = arith.constant 0 : index
    %c0_81 = arith.constant 0 : index
    %76 = vector.load %arg5[%c0_79, %c0_80, %c0_81] : memref<1x256x8xf32, #tpu.memory_space<vmem>>, vector<1x256x8xf32>
    %77 = vector.shape_cast %76 : vector<1x256x8xf32> to vector<256x8xf32>
    %78 = vector.shape_cast %75 : vector<256x8xf32> to vector<1x256x8xf32>
    tpu.vector_store %arg5[%c0_79, %c0_80, %c0_81], %78 {strides = array<i32>} : memref<1x256x8xf32, #tpu.memory_space<vmem>>, vector<1x256x8xf32>,
    return
  }
  func.func @transform_0(%arg0: i32) -> (i32, i32, i32, i32) {
    %c0_i32 = arith.constant 0 : i32
    %c0_i32_0 = arith.constant 0 : i32
    %c0_i32_1 = arith.constant 0 : i32
    %c0_i32_2 = arith.constant 0 : i32
    return %arg0, %c0_i32, %c0_i32_0, %c0_i32_1 : i32, i32, i32, i32
  }
  func.func @transform_1(%arg0: i32) -> (i32, i32) {
    %c0_i32 = arith.constant 0 : i32
    %c0_i32_0 = arith.constant 0 : i32
    %c0_i32_1 = arith.constant 0 : i32
    return %c0_i32, %c0_i32_0 : i32, i32
  }
  func.func @transform_2(%arg0: i32) -> (i32, i32) {
    %c0_i32 = arith.constant 0 : i32
    %c0_i32_0 = arith.constant 0 : i32
    %c0_i32_1 = arith.constant 0 : i32
    return %c0_i32, %c0_i32_0 : i32, i32
  }
  func.func @transform_3(%arg0: i32) -> (i32, i32, i32) {
    %c0_i32 = arith.constant 0 : i32
    %c0_i32_0 = arith.constant 0 : i32
    %c0_i32_1 = arith.constant 0 : i32
    %c0_i32_2 = arith.constant 0 : i32
    return %c0_i32, %c0_i32_0, %c0_i32_1 : i32, i32, i32
  }
  func.func @transform_4(%arg0: i32) -> (i32, i32, i32) {
    %c0_i32 = arith.constant 0 : i32
    %c0_i32_0 = arith.constant 0 : i32
    %c0_i32_1 = arith.constant 0 : i32
    return %arg0, %c0_i32, %c0_i32_0 : i32, i32, i32
  }
}

module attributes {stable_mosaic.version = 11 : i64} {
  func.func @_bottleneck_apply_kernel(%arg0: i32, %arg1: memref<1x4xf32, #tpu.memory_space<vmem>>, %arg2: memref<1x4xf32, #tpu.memory_space<vmem>>, %arg3: memref<1x4xf32, #tpu.memory_space<vmem>>, %arg4: memref<1x4xf32, #tpu.memory_space<vmem>>, %arg5: memref<4x32xbf16, #tpu.memory_space<vmem>>, %arg6: memref<1x32xf32, #tpu.memory_space<vmem>>, %arg7: memref<1x32xf32, #tpu.memory_space<vmem>>, %arg8: memref<512x4xbf16, #tpu.memory_space<vmem>>, %arg9: memref<512x32xbf16, #tpu.memory_space<vmem>>, %arg10: memref<1x32xf32, #tpu.memory_space<vmem>>, %arg11: memref<1x32xf32, #tpu.memory_space<vmem>>, %arg12: memref<1x4xf32, #tpu.memory_space<vmem>>, %arg13: memref<1x4xf32, #tpu.memory_space<vmem>>, %arg14: memref<1x32xf32, #tpu.memory_space<vmem>>, %arg15: memref<1x32xf32, #tpu.memory_space<vmem>>) attributes {dimension_semantics = [#tpu.dimension_semantics<arbitrary>], iteration_bounds = array<i64: 1>, scalar_prefetch = 0 : i64, scratch_operands = 4 : i64, tpu.core_type = #tpu.core_type<tc>, window_params = [{pipeline_mode = #tpu.pipeline_mode<synchronous>, transform_indices = @transform_0, window_bounds = array<i64: 1, 4>}, {pipeline_mode = #tpu.pipeline_mode<synchronous>, transform_indices = @transform_1, window_bounds = array<i64: 1, 4>}, {pipeline_mode = #tpu.pipeline_mode<synchronous>, transform_indices = @transform_2, window_bounds = array<i64: 1, 4>}, {pipeline_mode = #tpu.pipeline_mode<synchronous>, transform_indices = @transform_3, window_bounds = array<i64: 1, 4>}, {pipeline_mode = #tpu.pipeline_mode<synchronous>, transform_indices = @transform_4, window_bounds = array<i64: 4, 32>}, {pipeline_mode = #tpu.pipeline_mode<synchronous>, transform_indices = @transform_5, window_bounds = array<i64: 1, 32>}, {pipeline_mode = #tpu.pipeline_mode<synchronous>, transform_indices = @transform_6, window_bounds = array<i64: 1, 32>}, {transform_indices = @transform_7, window_bounds = array<i64: 512, 4>}, {transform_indices = @transform_8, window_bounds = array<i64: 512, 32>}, {pipeline_mode = #tpu.pipeline_mode<synchronous>, transform_indices = @transform_9, window_bounds = array<i64: 1, 32>}, {pipeline_mode = #tpu.pipeline_mode<synchronous>, transform_indices = @transform_10, window_bounds = array<i64: 1, 32>}]} {
    %c0_i32 = arith.constant 0 : i32
    %0 = arith.cmpi eq, %arg0, %c0_i32 : i32
    %1 = arith.extui %0 : i1 to i32
    %c0_i32_0 = arith.constant 0 : i32
    %2 = arith.cmpi ne, %1, %c0_i32_0 : i32
    scf.if %2 {
      %c0_23 = arith.constant 0 : index
      %c0_24 = arith.constant 0 : index
      %32 = vector.load %arg1[%c0_23, %c0_24] : memref<1x4xf32, #tpu.memory_space<vmem>>, vector<1x4xf32>
      %cst_25 = arith.constant 0.001953125 : f32
      %33 = vector.broadcast %cst_25 : f32 to vector<1x4xf32>
      %34 = arith.mulf %32, %33 : vector<1x4xf32>
      %c0_26 = arith.constant 0 : index
      %c0_27 = arith.constant 0 : index
      %35 = vector.load %arg2[%c0_26, %c0_27] : memref<1x4xf32, #tpu.memory_space<vmem>>, vector<1x4xf32>
      %cst_28 = arith.constant 0.001953125 : f32
      %36 = vector.broadcast %cst_28 : f32 to vector<1x4xf32>
      %37 = arith.mulf %35, %36 : vector<1x4xf32>
      %38 = arith.mulf %34, %34 : vector<1x4xf32>
      %39 = arith.subf %37, %38 : vector<1x4xf32>
      %c0_29 = arith.constant 0 : index
      %c0_30 = arith.constant 0 : index
      %40 = vector.load %arg3[%c0_29, %c0_30] : memref<1x4xf32, #tpu.memory_space<vmem>>, vector<1x4xf32>
      %cst_31 = arith.constant 9.99999974E-6 : f32
      %41 = vector.broadcast %cst_31 : f32 to vector<1x4xf32>
      %42 = arith.addf %39, %41 : vector<1x4xf32>
      %43 = math.rsqrt %42 : vector<1x4xf32>
      %44 = arith.mulf %40, %43 : vector<1x4xf32>
      %c0_32 = arith.constant 0 : index
      %c0_33 = arith.constant 0 : index
      %45 = vector.load %arg12[%c0_32, %c0_33] : memref<1x4xf32, #tpu.memory_space<vmem>>, vector<1x4xf32>
      tpu.vector_store %arg12[%c0_32, %c0_33], %44 {strides = array<i32>} : memref<1x4xf32, #tpu.memory_space<vmem>>, vector<1x4xf32>,
      %c0_34 = arith.constant 0 : index
      %c0_35 = arith.constant 0 : index
      %46 = vector.load %arg4[%c0_34, %c0_35] : memref<1x4xf32, #tpu.memory_space<vmem>>, vector<1x4xf32>
      %47 = arith.mulf %34, %44 : vector<1x4xf32>
      %48 = arith.subf %46, %47 : vector<1x4xf32>
      %c0_36 = arith.constant 0 : index
      %c0_37 = arith.constant 0 : index
      %49 = vector.load %arg13[%c0_36, %c0_37] : memref<1x4xf32, #tpu.memory_space<vmem>>, vector<1x4xf32>
      tpu.vector_store %arg13[%c0_36, %c0_37], %48 {strides = array<i32>} : memref<1x4xf32, #tpu.memory_space<vmem>>, vector<1x4xf32>,
      %cst_38 = arith.constant 0.000000e+00 : f32
      %50 = vector.broadcast %cst_38 : f32 to vector<1x32xf32>
      %c0_39 = arith.constant 0 : index
      %c0_40 = arith.constant 0 : index
      %51 = vector.load %arg14[%c0_39, %c0_40] : memref<1x32xf32, #tpu.memory_space<vmem>>, vector<1x32xf32>
      tpu.vector_store %arg14[%c0_39, %c0_40], %50 {strides = array<i32>} : memref<1x32xf32, #tpu.memory_space<vmem>>, vector<1x32xf32>,
      %cst_41 = arith.constant 0.000000e+00 : f32
      %52 = vector.broadcast %cst_41 : f32 to vector<1x32xf32>
      %c0_42 = arith.constant 0 : index
      %c0_43 = arith.constant 0 : index
      %53 = vector.load %arg15[%c0_42, %c0_43] : memref<1x32xf32, #tpu.memory_space<vmem>>, vector<1x32xf32>
      tpu.vector_store %arg15[%c0_42, %c0_43], %52 {strides = array<i32>} : memref<1x32xf32, #tpu.memory_space<vmem>>, vector<1x32xf32>,
    } else {
    }
    %c0 = arith.constant 0 : index
    %c0_1 = arith.constant 0 : index
    %3 = vector.load %arg8[%c0, %c0_1] : memref<512x4xbf16, #tpu.memory_space<vmem>>, vector<512x4xbf16>
    %4 = arith.extf %3 : vector<512x4xbf16> to vector<512x4xf32>
    %c0_2 = arith.constant 0 : index
    %c0_3 = arith.constant 0 : index
    %5 = vector.load %arg12[%c0_2, %c0_3] : memref<1x4xf32, #tpu.memory_space<vmem>>, vector<1x4xf32>
    %6 = vector.broadcast %5 : vector<1x4xf32> to vector<512x4xf32>
    %7 = arith.mulf %4, %6 : vector<512x4xf32>
    %c0_4 = arith.constant 0 : index
    %c0_5 = arith.constant 0 : index
    %8 = vector.load %arg13[%c0_4, %c0_5] : memref<1x4xf32, #tpu.memory_space<vmem>>, vector<1x4xf32>
    %9 = vector.broadcast %8 : vector<1x4xf32> to vector<512x4xf32>
    %10 = arith.addf %7, %9 : vector<512x4xf32>
    %cst = arith.constant 0.000000e+00 : f32
    %11 = vector.broadcast %cst : f32 to vector<512x4xf32>
    %12 = arith.maximumf %10, %11 : vector<512x4xf32>
    %13 = arith.truncf %12 : vector<512x4xf32> to vector<512x4xbf16>
    %c0_6 = arith.constant 0 : index
    %c0_7 = arith.constant 0 : index
    %14 = vector.load %arg5[%c0_6, %c0_7] : memref<4x32xbf16, #tpu.memory_space<vmem>>, vector<4x32xbf16>
    %cst_8 = arith.constant dense<0.000000e+00> : vector<512x32xf32>
    %15 = tpu.matmul %13, %14, %cst_8 {dimension_numbers = #tpu.dot_dimension_numbers<[1], [0], [0], [1], [0, 0, 1, 1], [], []>} : vector<512x4xbf16>, vector<4x32xbf16>, vector<512x32xf32> -> vector<512x32xf32>
    %16 = arith.truncf %15 : vector<512x32xf32> to vector<512x32xbf16>
    %c0_9 = arith.constant 0 : index
    %c0_10 = arith.constant 0 : index
    %17 = vector.load %arg9[%c0_9, %c0_10] : memref<512x32xbf16, #tpu.memory_space<vmem>>, vector<512x32xbf16>
    tpu.vector_store %arg9[%c0_9, %c0_10], %16 {strides = array<i32>} : memref<512x32xbf16, #tpu.memory_space<vmem>>, vector<512x32xbf16>,
    %c0_11 = arith.constant 0 : index
    %c0_12 = arith.constant 0 : index
    %18 = vector.load %arg14[%c0_11, %c0_12] : memref<1x32xf32, #tpu.memory_space<vmem>>, vector<1x32xf32>
    %cst_13 = arith.constant dense<0.000000e+00> : vector<32xf32>
    %19 = vector.multi_reduction <add>, %15, %cst_13 [0] : vector<512x32xf32> to vector<32xf32>
    %20 = vector.shape_cast %19 : vector<32xf32> to vector<1x32xf32>
    %21 = arith.addf %18, %20 : vector<1x32xf32>
    %c0_14 = arith.constant 0 : index
    %c0_15 = arith.constant 0 : index
    %22 = vector.load %arg14[%c0_14, %c0_15] : memref<1x32xf32, #tpu.memory_space<vmem>>, vector<1x32xf32>
    tpu.vector_store %arg14[%c0_14, %c0_15], %21 {strides = array<i32>} : memref<1x32xf32, #tpu.memory_space<vmem>>, vector<1x32xf32>,
    %c0_16 = arith.constant 0 : index
    %c0_17 = arith.constant 0 : index
    %23 = vector.load %arg15[%c0_16, %c0_17] : memref<1x32xf32, #tpu.memory_space<vmem>>, vector<1x32xf32>
    %24 = arith.mulf %15, %15 : vector<512x32xf32>
    %cst_18 = arith.constant dense<0.000000e+00> : vector<32xf32>
    %25 = vector.multi_reduction <add>, %24, %cst_18 [0] : vector<512x32xf32> to vector<32xf32>
    %26 = vector.shape_cast %25 : vector<32xf32> to vector<1x32xf32>
    %27 = arith.addf %23, %26 : vector<1x32xf32>
    %c0_19 = arith.constant 0 : index
    %c0_20 = arith.constant 0 : index
    %28 = vector.load %arg15[%c0_19, %c0_20] : memref<1x32xf32, #tpu.memory_space<vmem>>, vector<1x32xf32>
    tpu.vector_store %arg15[%c0_19, %c0_20], %27 {strides = array<i32>} : memref<1x32xf32, #tpu.memory_space<vmem>>, vector<1x32xf32>,
    %c0_i32_21 = arith.constant 0 : i32
    %29 = arith.cmpi eq, %arg0, %c0_i32_21 : i32
    %30 = arith.extui %29 : i1 to i32
    %c0_i32_22 = arith.constant 0 : i32
    %31 = arith.cmpi ne, %30, %c0_i32_22 : i32
    scf.if %31 {
      %c0_23 = arith.constant 0 : index
      %c0_24 = arith.constant 0 : index
      %32 = vector.load %arg14[%c0_23, %c0_24] : memref<1x32xf32, #tpu.memory_space<vmem>>, vector<1x32xf32>
      %cst_25 = arith.constant 0.001953125 : f32
      %33 = vector.broadcast %cst_25 : f32 to vector<1x32xf32>
      %34 = arith.mulf %32, %33 : vector<1x32xf32>
      %c0_26 = arith.constant 0 : index
      %c0_27 = arith.constant 0 : index
      %35 = vector.load %arg15[%c0_26, %c0_27] : memref<1x32xf32, #tpu.memory_space<vmem>>, vector<1x32xf32>
      %cst_28 = arith.constant 0.001953125 : f32
      %36 = vector.broadcast %cst_28 : f32 to vector<1x32xf32>
      %37 = arith.mulf %35, %36 : vector<1x32xf32>
      %38 = arith.mulf %34, %34 : vector<1x32xf32>
      %39 = arith.subf %37, %38 : vector<1x32xf32>
      %c0_29 = arith.constant 0 : index
      %c0_30 = arith.constant 0 : index
      %40 = vector.load %arg6[%c0_29, %c0_30] : memref<1x32xf32, #tpu.memory_space<vmem>>, vector<1x32xf32>
      %cst_31 = arith.constant 9.99999974E-6 : f32
      %41 = vector.broadcast %cst_31 : f32 to vector<1x32xf32>
      %42 = arith.addf %39, %41 : vector<1x32xf32>
      %43 = math.rsqrt %42 : vector<1x32xf32>
      %44 = arith.mulf %40, %43 : vector<1x32xf32>
      %c0_32 = arith.constant 0 : index
      %c0_33 = arith.constant 0 : index
      %45 = vector.load %arg10[%c0_32, %c0_33] : memref<1x32xf32, #tpu.memory_space<vmem>>, vector<1x32xf32>
      tpu.vector_store %arg10[%c0_32, %c0_33], %44 {strides = array<i32>} : memref<1x32xf32, #tpu.memory_space<vmem>>, vector<1x32xf32>,
      %c0_34 = arith.constant 0 : index
      %c0_35 = arith.constant 0 : index
      %46 = vector.load %arg7[%c0_34, %c0_35] : memref<1x32xf32, #tpu.memory_space<vmem>>, vector<1x32xf32>
      %47 = arith.mulf %34, %44 : vector<1x32xf32>
      %48 = arith.subf %46, %47 : vector<1x32xf32>
      %c0_36 = arith.constant 0 : index
      %c0_37 = arith.constant 0 : index
      %49 = vector.load %arg11[%c0_36, %c0_37] : memref<1x32xf32, #tpu.memory_space<vmem>>, vector<1x32xf32>
      tpu.vector_store %arg11[%c0_36, %c0_37], %48 {strides = array<i32>} : memref<1x32xf32, #tpu.memory_space<vmem>>, vector<1x32xf32>,
    } else {
    }
    return
  }
  func.func @transform_0(%arg0: i32) -> (i32, i32) {
    %c0_i32 = arith.constant 0 : i32
    %c0_i32_0 = arith.constant 0 : i32
    %c0_i32_1 = arith.constant 0 : i32
    return %c0_i32, %c0_i32_0 : i32, i32
  }
  func.func @transform_1(%arg0: i32) -> (i32, i32) {
    %c0_i32 = arith.constant 0 : i32
    %c0_i32_0 = arith.constant 0 : i32
    %c0_i32_1 = arith.constant 0 : i32
    return %c0_i32, %c0_i32_0 : i32, i32
  }
  func.func @transform_2(%arg0: i32) -> (i32, i32) {
    %c0_i32 = arith.constant 0 : i32
    %c0_i32_0 = arith.constant 0 : i32
    %c0_i32_1 = arith.constant 0 : i32
    return %c0_i32, %c0_i32_0 : i32, i32
  }
  func.func @transform_3(%arg0: i32) -> (i32, i32) {
    %c0_i32 = arith.constant 0 : i32
    %c0_i32_0 = arith.constant 0 : i32
    %c0_i32_1 = arith.constant 0 : i32
    return %c0_i32, %c0_i32_0 : i32, i32
  }
  func.func @transform_4(%arg0: i32) -> (i32, i32) {
    %c0_i32 = arith.constant 0 : i32
    %c0_i32_0 = arith.constant 0 : i32
    %c0_i32_1 = arith.constant 0 : i32
    return %c0_i32, %c0_i32_0 : i32, i32
  }
  func.func @transform_5(%arg0: i32) -> (i32, i32) {
    %c0_i32 = arith.constant 0 : i32
    %c0_i32_0 = arith.constant 0 : i32
    %c0_i32_1 = arith.constant 0 : i32
    return %c0_i32, %c0_i32_0 : i32, i32
  }
  func.func @transform_6(%arg0: i32) -> (i32, i32) {
    %c0_i32 = arith.constant 0 : i32
    %c0_i32_0 = arith.constant 0 : i32
    %c0_i32_1 = arith.constant 0 : i32
    return %c0_i32, %c0_i32_0 : i32, i32
  }
  func.func @transform_7(%arg0: i32) -> (i32, i32) {
    %c0_i32 = arith.constant 0 : i32
    %c0_i32_0 = arith.constant 0 : i32
    return %arg0, %c0_i32 : i32, i32
  }
  func.func @transform_8(%arg0: i32) -> (i32, i32) {
    %c0_i32 = arith.constant 0 : i32
    %c0_i32_0 = arith.constant 0 : i32
    return %arg0, %c0_i32 : i32, i32
  }
  func.func @transform_9(%arg0: i32) -> (i32, i32) {
    %c0_i32 = arith.constant 0 : i32
    %c0_i32_0 = arith.constant 0 : i32
    %c0_i32_1 = arith.constant 0 : i32
    return %c0_i32, %c0_i32_0 : i32, i32
  }
  func.func @transform_10(%arg0: i32) -> (i32, i32) {
    %c0_i32 = arith.constant 0 : i32
    %c0_i32_0 = arith.constant 0 : i32
    %c0_i32_1 = arith.constant 0 : i32
    return %c0_i32, %c0_i32_0 : i32, i32
  }
}

</mosaic_0001>

<bundles_post_ra>
// kernel: dense_layer_forward.3
= control target key start
LH: loop header
LB: loop body
LE: loop exit
PB: predicated region body
PF: predicated region fallthrough
CT: control target
= control target key end

     0   :  { %vm14_vm0 = vcmask 24576   ;;  %v651_v0 = vmov 0.0   ;;  %vm146_vm1 = vcmask 31744   ;;  %s1446_s1 = inlined_call_operand.vmem [shape: f32[1,4], index: 1, kind: output, shape index: {0}]   ;;  %s1447_s2 = inlined_call_operand.vmem [shape: f32[1,4], index: 2, kind: output, shape index: {1}]   ;;  %s1448_s0 = inlined_call_operand.vmem [shape: bf16[512,4], index: 0, kind: input, shape index: {}]  }
   0x1   :  { %15 = vst.msk [vmem:[%s1446_s1] sm:$0x1] %vm14_vm0, %v651_v0  ;;  %16 = vst.msk [vmem:[%s1447_s2] sm:$0x1] %vm14_vm0, %v651_v0  ;;  %v492_v1 = vld [vmem:[%s1448_s0] sm:$0xff]   ;;  %v619_v2 = vld [vmem:[%s1448_s0 + $0x8] sm:$0xff]  }
   0x2   :  { %v620_v3 = vld [vmem:[%s1448_s0 + $0x10] sm:$0xff]   ;;  %v621_v4 = vld [vmem:[%s1448_s0 + $0x18] sm:$0xff]   ;;  %v622_v5 = vld [vmem:[%s1448_s0 + $0x20] sm:$0xff]   ;;  %v693_v7 = vunpack.c.l.bf16 %v492_v1  ;;  %v695_v8 = vunpack.c.h.bf16 %v492_v1  ;;  %v697_v9 = vunpack.c.l.bf16 %v619_v2  ;;  %v705_v12 = vunpack.c.h.bf16 %v619_v2 }
   0x3   :  { %v623_v6 = vld [vmem:[%s1448_s0 + $0x28] sm:$0xff]   ;;  %v636_v11 = vld [vmem:[%s1448_s0 + $0x90] sm:$0xff]   ;;  %v707_v13 = vunpack.c.l.bf16 %v620_v3  ;;  %v709_v14 = vunpack.c.h.bf16 %v620_v3  ;;  %v711_v15 = vunpack.c.l.bf16 %v621_v4  ;;  %v637_v16 = vld [vmem:[%s1448_s0 + $0x98] sm:$0xff]   ;;  %v719_v18 = vunpack.c.h.bf16 %v621_v4 }
   0x4   :  { %v635_v10 = vld [vmem:[%s1448_s0 + $0x88] sm:$0xff]   ;;  %v638_v17 = vld [vmem:[%s1448_s0 + $0xa0] sm:$0xff]   ;;  %v721_v19 = vunpack.c.l.bf16 %v622_v5  ;;  %v723_v20 = vunpack.c.h.bf16 %v622_v5  ;;  %v725_v21 = vunpack.c.l.bf16 %v623_v6  ;;  %v727_v22 = vunpack.c.h.bf16 %v623_v6  ;;  %v640_v27 = vld [vmem:[%s1448_s0 + $0xb0] sm:$0xff]  }
   0x5   :  { %v729_v23 = vunpack.c.l.bf16 %v635_v10  ;;  %v731_v24 = vunpack.c.h.bf16 %v635_v10  ;;  %v733_v25 = vunpack.c.l.bf16 %v636_v11  ;;  %v639_v26 = vld [vmem:[%s1448_s0 + $0xa8] sm:$0xff]   ;;  %v741_v28 = vunpack.c.h.bf16 %v636_v11  ;;  %v641_v32 = vld [vmem:[%s1448_s0 + $0xb8] sm:$0xff]   ;;  %v642_v34 = vld [vmem:[%s1448_s0 + $0xc0] sm:$0xff]  }
   0x6   :  { %v743_v29 = vunpack.c.l.bf16 %v637_v16  ;;  %v745_v30 = vunpack.c.h.bf16 %v637_v16  ;;  %v747_v31 = vunpack.c.l.bf16 %v638_v17  ;;  %v752_v33 = vunpack.c.h.bf16 %v638_v17  ;;  %v643_v35 = vld [vmem:[%s1448_s0 + $0xc8] sm:$0xff]   ;;  %v644_v42 = vld [vmem:[%s1448_s0 + $0xd0] sm:$0xff]   ;;  %v645_v47 = vld [vmem:[%s1448_s0 + $0xd8] sm:$0xff]  }
   0x7   :  { %v147_v36 = vsel %vm146_vm1, %v693_v7, 0.0  ;;  %v148_v37 = vsel %vm146_vm1, %v695_v8, 0.0  ;;  %v150_v38 = vsel %vm146_vm1, %v697_v9, 0.0  ;;  %v766_v39 = vunpack.c.l.bf16 %v639_v26  ;;  %v646_v48 = vld [vmem:[%s1448_s0 + $0xe0] sm:$0xff]   ;;  %v647_v53 = vld [vmem:[%s1448_s0 + $0xe8] sm:$0xff]   ;;  %v648_v58 = vld [vmem:[%s1448_s0 + $0xf0] sm:$0xff]  }
   0x8   :  { %v768_v40 = vunpack.c.h.bf16 %v639_v26  ;;  %v770_v41 = vunpack.c.l.bf16 %v640_v27  ;;  %v149_v43 = vadd.f32 %v148_v37, %v147_v36  ;;  %v775_v44 = vunpack.c.h.bf16 %v640_v27  ;;  %v649_v59 = vld [vmem:[%s1448_s0 + $0xf8] sm:$0xff]  }
   0x9   :  { %v777_v45 = vunpack.c.l.bf16 %v641_v32  ;;  %v779_v46 = vunpack.c.h.bf16 %v641_v32  ;;  %v152_v49 = vsel %vm146_vm1, %v705_v12, 0.0  ;;  %v789_v50 = vunpack.c.l.bf16 %v642_v34 }
   0xa   :  { %v791_v51 = vunpack.c.h.bf16 %v642_v34  ;;  %v793_v52 = vunpack.c.l.bf16 %v643_v35  ;;  %v151_v54 = vadd.f32 %v150_v38, %v149_v43  ;;  %v798_v55 = vunpack.c.h.bf16 %v643_v35 }
   0xb   :  { %v800_v56 = vunpack.c.l.bf16 %v644_v42  ;;  %v802_v57 = vunpack.c.h.bf16 %v644_v42  ;;  %v154_v60 = vsel %vm146_vm1, %v707_v13, 0.0  ;;  %v812_v61 = vunpack.c.l.bf16 %v645_v47 }
   0xc   :  { %v814_v62 = vunpack.c.h.bf16 %v645_v47  ;;  %v816_v63 = vunpack.c.l.bf16 %v646_v48  ;;  %v153_v0 = vadd.f32 %v152_v49, %v151_v54  ;;  %v818_v1 = vunpack.c.h.bf16 %v646_v48 }
   0xd   :  { %v820_v2 = vunpack.c.l.bf16 %v647_v53  ;;  %v822_v3 = vunpack.c.h.bf16 %v647_v53  ;;  %v156_v4 = vsel %vm146_vm1, %v709_v14, 0.0  ;;  %v826_v5 = vunpack.c.l.bf16 %v648_v58 }
   0xe   :  { %1471 = vst [vmem:[#allocation2_spill] sm:$0xff] %v814_v62  ;;  %1472 = vst [vmem:[#allocation3_spill] sm:$0xff] %v816_v63  ;;  %v828_v6 = vunpack.c.h.bf16 %v648_v58  ;;  %v830_v10 = vunpack.c.l.bf16 %v649_v59  ;;  %v155_v11 = vadd.f32 %v154_v60, %v153_v0  ;;  %v832_v16 = vunpack.c.h.bf16 %v649_v59 }
   0xf   :  { %1473 = vst [vmem:[#allocation4_spill] sm:$0xff] %v818_v1  ;;  %1474 = vst [vmem:[#allocation5_spill] sm:$0xff] %v820_v2  ;;  %v158_v17 = vsel %vm146_vm1, %v711_v15, 0.0  ;;  %v160_v26 = vsel %vm146_vm1, %v719_v18, 0.0  ;;  %v162_v27 = vsel %vm146_vm1, %v721_v19, 0.0  ;;  %v164_v34 = vsel %vm146_vm1, %v723_v20, 0.0 }
  0x10   :  { %1475 = vst [vmem:[#allocation6_spill] sm:$0xff] %v822_v3  ;;  %1476 = vst [vmem:[#allocation7_spill] sm:$0xff] %v826_v5  ;;  %v157_v32 = vadd.f32 %v156_v4, %v155_v11  ;;  %v166_v35 = vsel %vm146_vm1, %v725_v21, 0.0  ;;  %v846_v36 = vsel %vm146_vm1, %v729_v23, 0.0  ;;  %v850_v37 = vsel %vm146_vm1, %v731_v24, 0.0 }
  0x11   :  { %1477 = vst [vmem:[#allocation8_spill] sm:$0xff] %v828_v6  ;;  %1478 = vst [vmem:[#allocation9_spill] sm:$0xff] %v830_v10  ;;  %v854_v38 = vsel %vm146_vm1, %v733_v25, 0.0  ;;  %v858_v42 = vsel %vm146_vm1, %v741_v28, 0.0  ;;  %v862_v43 = vsel %vm146_vm1, %v743_v29, 0.0  ;;  %v866_v48 = vsel %vm146_vm1, %v745_v30, 0.0 }
  0x12   :  { %1479 = vst [vmem:[#allocation10_spill] sm:$0xff] %v832_v16  ;;  %1480 = vst [vmem:[#allocation11_spill] sm:$0xff] %v846_v36  ;;  %v159_v47 = vadd.f32 %v158_v17, %v157_v32  ;;  %v870_v49 = vsel %vm146_vm1, %v747_v31, 0.0  ;;  %v874_v53 = vsel %vm146_vm1, %v752_v33, 0.0  ;;  %v878_v54 = vsel %vm146_vm1, %v766_v39, 0.0 }
  0x13   :  { %1481 = vst [vmem:[#allocation12_spill] sm:$0xff] %v850_v37  ;;  %1482 = vst [vmem:[#allocation13_spill] sm:$0xff] %v854_v38  ;;  %v882_v58 = vsel %vm146_vm1, %v768_v40, 0.0  ;;  %v886_v59 = vsel %vm146_vm1, %v770_v41, 0.0  ;;  %v890_v60 = vsel %vm146_vm1, %v775_v44, 0.0  ;;  %v894_v4 = vsel %vm146_vm1, %v777_v45, 0.0 }
  0x14   :  { %1483 = vst [vmem:[#allocation14_spill] sm:$0xff] %v858_v42  ;;  %1484 = vst [vmem:[#allocation15_spill] sm:$0xff] %v862_v43  ;;  %v161_v0 = vadd.f32 %v160_v26, %v159_v47  ;;  %v898_v11 = vsel %vm146_vm1, %v779_v46, 0.0  ;;  %v902_v17 = vsel %vm146_vm1, %v789_v50, 0.0  ;;  %v906_v32 = vsel %vm146_vm1, %v791_v51, 0.0 }
  0x15   :  { %1485 = vst [vmem:[#allocation16_spill] sm:$0xff] %v866_v48  ;;  %1486 = vst [vmem:[#allocation17_spill] sm:$0xff] %v870_v49  ;;  %v914_v26 = vsel %vm146_vm1, %v798_v55, 0.0  ;;  %v918_v47 = vsel %vm146_vm1, %v800_v56, 0.0 }
  0x16   :  { %1487 = vst [vmem:[#allocation18_spill] sm:$0xff] %v874_v53  ;;  %1488 = vst [vmem:[#allocation19_spill] sm:$0xff] %v878_v54  ;;  %v630_v53 = vld [vmem:[%s1448_s0 + $0x60] sm:$0xff]  }
  0x17   :  { %1489 = vst [vmem:[#allocation20_spill] sm:$0xff] %v882_v58  ;;  %1490 = vst [vmem:[#allocation21_spill] sm:$0xff] %v886_v59 }
  0x18   :  { %1491 = vst [vmem:[#allocation22_spill] sm:$0xff] %v890_v60  ;;  %1492 = vst [vmem:[#allocation23_spill] sm:$0xff] %v894_v4  ;;  %v910_v60 = vsel %vm146_vm1, %v793_v52, 0.0  ;;  %v627_v4 = vld [vmem:[%s1448_s0 + $0x48] sm:$0xff]  }
  0x19   :  { %1493 = vst [vmem:[#allocation24_spill] sm:$0xff] %v898_v11  ;;  %1494 = vst [vmem:[#allocation25_spill] sm:$0xff] %v902_v17  ;;  %v624_v17 = vld [vmem:[%s1448_s0 + $0x30] sm:$0xff]   ;;  %v163_v11 = vadd.f32 %v162_v27, %v161_v0  ;;  %v626_v27 = vld [vmem:[%s1448_s0 + $0x40] sm:$0xff]   ;;  %v943_v0 = vsel %vm146_vm1, %v816_v63, 0.0  ;;  %v999_v43 = vunpack.c.l.bf16 %v627_v4  ;;  %v1001_v42 = vunpack.c.h.bf16 %v627_v4 }
  0x1a   :  { %1495 = vst [vmem:[#allocation26_spill] sm:$0xff] %v906_v32  ;;  %1496 = vst [vmem:[#allocation27_spill] sm:$0xff] %v910_v60  ;;  %v925_v32 = vsel %vm146_vm1, %v802_v57, 0.0  ;;  %v929_v60 = vsel %vm146_vm1, %v812_v61, 0.0  ;;  %v972_v58 = vunpack.c.l.bf16 %v624_v17  ;;  %v997_v48 = vunpack.c.h.bf16 %v626_v27  ;;  %v633_v4 = vld [vmem:[%s1448_s0 + $0x78] sm:$0xff]  }
  0x1b   :  { %1497 = vst [vmem:[#allocation28_spill] sm:$0xff] %v914_v26  ;;  %1498 = vst [vmem:[#allocation29_spill] sm:$0xff] %v918_v47  ;;  %v933_v26 = vsel %vm146_vm1, %v814_v62, 0.0  ;;  %v625_v47 = vld [vmem:[%s1448_s0 + $0x38] sm:$0xff]   ;;  %v165_v59 = vadd.f32 %v164_v34, %v163_v11  ;;  %v628_v34 = vld [vmem:[%s1448_s0 + $0x50] sm:$0xff]   ;;  %v1036_v63 = vunpack.c.l.bf16 %v633_v4 }
  0x1c   :  { %1499 = vst [vmem:[#allocation30_spill] sm:$0xff] %v925_v32  ;;  %1500 = vst [vmem:[#allocation31_spill] sm:$0xff] %v929_v60  ;;  %v947_v32 = vsel %vm146_vm1, %v818_v1, 0.0  ;;  %v951_v60 = vsel %vm146_vm1, %v820_v2, 0.0  ;;  %v629_v11 = vld [vmem:[%s1448_s0 + $0x58] sm:$0xff]   ;;  %v990_v54 = vunpack.c.h.bf16 %v625_v47  ;;  %v170_v38 = vsel %vm146_vm1, %v972_v58, 0.0 }
  0x1d   :  { %1501 = vst [vmem:[#allocation32_spill] sm:$0xff] %v933_v26  ;;  %1502 = vst [vmem:[#allocation33_spill] sm:$0xff] %v943_v0  ;;  %v955_v26 = vsel %vm146_vm1, %v822_v3, 0.0  ;;  %v962_v0 = vsel %vm146_vm1, %v826_v5, 0.0  ;;  %v167_v49 = vadd.f32 %v166_v35, %v165_v59  ;;  %v1011_v37 = vunpack.c.l.bf16 %v628_v34 }
  0x1e   :  { %1503 = vst [vmem:[#allocation34_spill] sm:$0xff] %v947_v32  ;;  %1504 = vst [vmem:[#allocation35_spill] sm:$0xff] %v951_v60  ;;  %v966_v32 = vsel %vm146_vm1, %v828_v6, 0.0  ;;  %v970_v60 = vsel %vm146_vm1, %v830_v10, 0.0  ;;  %v1013_v35 = vunpack.c.h.bf16 %v628_v34  ;;  %v1015_v59 = vunpack.c.l.bf16 %v629_v11 }
  0x1f   :  { %1505 = vst [vmem:[#allocation36_spill] sm:$0xff] %v955_v26  ;;  %1506 = vst [vmem:[#allocation37_spill] sm:$0xff] %v962_v0  ;;  %v974_v26 = vunpack.c.h.bf16 %v624_v17  ;;  %v168_v0 = vsel %vm146_vm1, %v727_v22, 0.0  ;;  %v992_v17 = vunpack.c.l.bf16 %v626_v27  ;;  %v1020_v36 = vunpack.c.h.bf16 %v629_v11 }
  0x20   :  { %1507 = vst [vmem:[#allocation38_spill] sm:$0xff] %v966_v32  ;;  %1508 = vst [vmem:[#allocation39_spill] sm:$0xff] %v970_v60  ;;  %v986_v32 = vsel %vm146_vm1, %v832_v16, 0.0  ;;  %v988_v60 = vunpack.c.l.bf16 %v625_v47  ;;  %v632_v47 = vld [vmem:[%s1448_s0 + $0x70] sm:$0xff]   ;;  %v169_v27 = vadd.f32 %v168_v0, %v167_v49  ;;  %v1022_v16 = vunpack.c.l.bf16 %v630_v53 }
  0x21   :  { %1509 = vst [vmem:[#allocation40_spill] sm:$0xff] %v986_v32  ;;  %1510 = vst [vmem:[#allocation41_spill] sm:$0xff] %v997_v48  ;;  %v631_v32 = vld [vmem:[%s1448_s0 + $0x68] sm:$0xff]   ;;  %v1024_v10 = vunpack.c.h.bf16 %v630_v53  ;;  %v172_v6 = vsel %vm146_vm1, %v974_v26, 0.0  ;;  %v1032_v3 = vunpack.c.l.bf16 %v632_v47  ;;  %v1034_v1 = vunpack.c.h.bf16 %v632_v47 }
  0x22   :  { %1511 = vst [vmem:[#allocation42_spill] sm:$0xff] %v999_v43  ;;  %1512 = vst [vmem:[#allocation43_spill] sm:$0xff] %v1001_v42  ;;  %v1028_v5 = vunpack.c.l.bf16 %v631_v32  ;;  %v1030_v34 = vunpack.c.h.bf16 %v631_v32  ;;  %v171_v2 = vadd.f32 %v170_v38, %v169_v27  ;;  %v1038_v49 = vunpack.c.h.bf16 %v633_v4 }
  0x23   :  { %1513 = vst [vmem:[#allocation44_spill] sm:$0xff] %v1013_v35  ;;  %1514 = vst [vmem:[#allocation45_spill] sm:$0xff] %v1015_v59  ;;  %v174_v53 = vsel %vm146_vm1, %v988_v60, 0.0  ;;  %v176_v11 = vsel %vm146_vm1, %v990_v54, 0.0  ;;  %v178_v32 = vsel %vm146_vm1, %v992_v17, 0.0  ;;  %v180_v62 = vsel %vm146_vm1, %v997_v48, 0.0 }
  0x24   :  { %1515 = vst [vmem:[#allocation46_spill] sm:$0xff] %v1020_v36  ;;  %1516 = vst [vmem:[#allocation47_spill] sm:$0xff] %v1022_v16  ;;  %v173_v0 = vadd.f32 %v172_v6, %v171_v2  ;;  %v182_v38 = vsel %vm146_vm1, %v999_v43, 0.0  ;;  %v184_v47 = vsel %vm146_vm1, %v1001_v42, 0.0  ;;  %v186_v4 = vsel %vm146_vm1, %v1011_v37, 0.0 }
  0x25   :  { %1517 = vst [vmem:[#allocation48_spill] sm:$0xff] %v1024_v10  ;;  %1518 = vst [vmem:[#allocation49_spill] sm:$0xff] %v1028_v5  ;;  %v188_v2 = vsel %vm146_vm1, %v1013_v35, 0.0  ;;  %v1058_v27 = vsel %vm146_vm1, %v1015_v59, 0.0  ;;  %v1062_v48 = vsel %vm146_vm1, %v1020_v36, 0.0  ;;  %v1066_v43 = vsel %vm146_vm1, %v1022_v16, 0.0 }
  0x26   :  { %1519 = vst [vmem:[#allocation50_spill] sm:$0xff] %v1030_v34  ;;  %1520 = vst [vmem:[#allocation51_spill] sm:$0xff] %v1032_v3  ;;  %v175_v6 = vadd.f32 %v174_v53, %v173_v0  ;;  %v1070_v42 = vsel %vm146_vm1, %v1024_v10, 0.0  ;;  %v1074_v35 = vsel %vm146_vm1, %v1028_v5, 0.0  ;;  %v1078_v53 = vsel %vm146_vm1, %v1030_v34, 0.0 }
  0x27   :  { %1521 = vst [vmem:[#allocation52_spill] sm:$0xff] %v1034_v1  ;;  %1522 = vst [vmem:[#allocation53_spill] sm:$0xff] %v1036_v63  ;;  %v1082_v0 = vsel %vm146_vm1, %v1032_v3, 0.0  ;;  %v1086_v16 = vsel %vm146_vm1, %v1034_v1, 0.0  ;;  %v1090_v10 = vsel %vm146_vm1, %v1036_v63, 0.0  ;;  %v284_v5 = vmul.f32 %v693_v7, %v693_v7 }
  0x28   :  { %v177_v36 = vadd.f32 %v176_v11, %v175_v6  ;;  %v285_v34 = vmul.f32 %v695_v8, %v695_v8  ;;  %v286_v59 = vmul.f32 %v697_v9, %v697_v9  ;;  %v287_v11 = vmul.f32 %v705_v12, %v705_v12 }
  0x29   :  { %v288_v6 = vmul.f32 %v707_v13, %v707_v13  ;;  %v289_v63 = vmul.f32 %v709_v14, %v709_v14  ;;  %v290_v3 = vmul.f32 %v711_v15, %v711_v15  ;;  %v291_v7 = vmul.f32 %v719_v18, %v719_v18 }
  0x2a   :  { %v179_v1 = vadd.f32 %v178_v32, %v177_v36  ;;  %v292_v8 = vmul.f32 %v721_v19, %v721_v19  ;;  %v293_v9 = vmul.f32 %v723_v20, %v723_v20  ;;  %v294_v12 = vmul.f32 %v725_v21, %v725_v21 }
  0x2b   :  { %v295_v13 = vmul.f32 %v727_v22, %v727_v22  ;;  %v296_v14 = vmul.f32 %v972_v58, %v972_v58  ;;  %v1120_v15 = vmul.f32 %v974_v26, %v974_v26  ;;  %v1124_v18 = vmul.f32 %v988_v60, %v988_v60 }
  0x2c   :  { %v181_v36 = vadd.f32 %v180_v62, %v179_v1  ;;  %v318_v19 = vmul.f32 %v729_v23, %v729_v23  ;;  %v319_v20 = vmul.f32 %v731_v24, %v731_v24  ;;  %v320_v21 = vmul.f32 %v733_v25, %v733_v25 }
  0x2d   :  { %v321_v22 = vmul.f32 %v741_v28, %v741_v28  ;;  %v322_v1 = vmul.f32 %v743_v29, %v743_v29  ;;  %v323_v58 = vmul.f32 %v745_v30, %v745_v30  ;;  %v324_v60 = vmul.f32 %v747_v31, %v747_v31 }
  0x2e   :  { %v183_v62 = vadd.f32 %v182_v38, %v181_v36  ;;  %v325_v23 = vmul.f32 %v752_v33, %v752_v33  ;;  %v326_v24 = vmul.f32 %v766_v39, %v766_v39  ;;  %v348_v25 = vsel %vm146_vm1, %v284_v5, 0.0 }
  0x2f   :  { %v349_v28 = vsel %vm146_vm1, %v285_v34, 0.0  ;;  %v327_v29 = vmul.f32 %v768_v40, %v768_v40  ;;  %v351_v30 = vsel %vm146_vm1, %v286_v59, 0.0  ;;  %v328_v31 = vmul.f32 %v770_v41, %v770_v41 }
  0x30   :  { %v185_v26 = vadd.f32 %v184_v47, %v183_v62  ;;  %v350_v32 = vadd.f32 %v349_v28, %v348_v25  ;;  %v329_v33 = vmul.f32 %v775_v44, %v775_v44  ;;  %v330_v39 = vmul.f32 %v777_v45, %v777_v45  ;;  %v1526_v28 = vld [vmem:[#allocation5_spill] sm:$0xff] }
  0x31   :  { %v353_v5 = vsel %vm146_vm1, %v287_v11, 0.0  ;;  %v331_v34 = vmul.f32 %v779_v46, %v779_v46  ;;  %v332_v40 = vmul.f32 %v789_v50, %v789_v50  ;;  %v333_v59 = vmul.f32 %v791_v51, %v791_v51  ;;  %v1523_v51 = vld [vmem:[#allocation2_spill] sm:$0xff] }
  0x32   :  { %v187_v38 = vadd.f32 %v186_v4, %v185_v26  ;;  %v352_v47 = vadd.f32 %v351_v30, %v350_v32  ;;  %v334_v41 = vmul.f32 %v793_v52, %v793_v52  ;;  %v335_v44 = vmul.f32 %v798_v55, %v798_v55  ;;  %v1524_v52 = vld [vmem:[#allocation3_spill] sm:$0xff]  ;;  %v1527_v32 = vld [vmem:[#allocation6_spill] sm:$0xff] }
  0x33   :  { %v355_v45 = vsel %vm146_vm1, %v288_v6, 0.0  ;;  %v336_v4 = vmul.f32 %v800_v56, %v800_v56  ;;  %v337_v46 = vmul.f32 %v802_v57, %v802_v57  ;;  %v338_v36 = vmul.f32 %v812_v61, %v812_v61  ;;  %v1525_v6 = vld [vmem:[#allocation4_spill] sm:$0xff]  ;;  %v1528_v30 = vld [vmem:[#allocation7_spill] sm:$0xff] }
  0x34   :  { %v189_v11 = vadd.f32 %v188_v2, %v187_v38  ;;  %v354_v50 = vadd.f32 %v353_v5, %v352_v47  ;;  %v339_v62 = vmul.f32 %v1523_v51, %v1523_v51  ;;  %v340_v25 = vmul.f32 %v1524_v52, %v1524_v52  ;;  %v1529_v38 = vld [vmem:[#allocation8_spill] sm:$0xff]  ;;  %v1531_v52 = vld [vmem:[#allocation10_spill] sm:$0xff] }
  0x35   :  { %v357_v55 = vsel %vm146_vm1, %v289_v63, 0.0  ;;  %v341_v56 = vmul.f32 %v1525_v6, %v1525_v6  ;;  %v342_v57 = vmul.f32 %v1526_v28, %v1526_v28  ;;  %v343_v61 = vmul.f32 %v1527_v32, %v1527_v32 }
  0x36   :  { %v191_v2 = vadd.f32 %v1058_v27, %v189_v11  ;;  %v356_v26 = vadd.f32 %v355_v45, %v354_v50  ;;  %v344_v5 = vmul.f32 %v1528_v30, %v1528_v30  ;;  %v345_v47 = vmul.f32 %v1529_v38, %v1529_v38  ;;  %v1530_v11 = vld [vmem:[#allocation9_spill] sm:$0xff] }
  0x37   :  { %v359_v63 = vsel %vm146_vm1, %v290_v3, 0.0  ;;  %v346_v51 = vmul.f32 %v1530_v11, %v1530_v11  ;;  %v347_v6 = vmul.f32 %v1531_v52, %v1531_v52  ;;  %v361_v50 = vsel %vm146_vm1, %v291_v7, 0.0 }
  0x38   :  { %v193_v27 = vadd.f32 %v1062_v48, %v191_v2  ;;  %v358_v45 = vadd.f32 %v357_v55, %v356_v26  ;;  %v363_v28 = vsel %vm146_vm1, %v292_v8, 0.0  ;;  %v365_v32 = vsel %vm146_vm1, %v293_v9, 0.0 }
  0x39   :  { %v367_v30 = vsel %vm146_vm1, %v294_v12, 0.0  ;;  %v369_v48 = vsel %vm146_vm1, %v295_v13, 0.0  ;;  %v371_v2 = vsel %vm146_vm1, %v296_v14, 0.0  ;;  %v1203_v11 = vsel %vm146_vm1, %v318_v19, 0.0 }
  0x3a   :  { %v195_v38 = vadd.f32 %v1066_v43, %v193_v27  ;;  %v360_v3 = vadd.f32 %v359_v63, %v358_v45  ;;  %v1206_v55 = vsel %vm146_vm1, %v319_v20, 0.0  ;;  %v1209_v7 = vsel %vm146_vm1, %v320_v21, 0.0 }
  0x3b   :  { %v1212_v8 = vsel %vm146_vm1, %v321_v22, 0.0  ;;  %v1216_v12 = vsel %vm146_vm1, %v322_v1, 0.0  ;;  %v1219_v13 = vsel %vm146_vm1, %v323_v58, 0.0  ;;  %v1222_v14 = vsel %vm146_vm1, %v324_v60, 0.0 }
  0x3c   :  { %v197_v9 = vadd.f32 %v1070_v42, %v195_v38  ;;  %v362_v43 = vadd.f32 %v361_v50, %v360_v3  ;;  %v1225_v19 = vsel %vm146_vm1, %v325_v23, 0.0  ;;  %v1228_v20 = vsel %vm146_vm1, %v326_v24, 0.0 }
  0x3d   :  { %v1231_v21 = vsel %vm146_vm1, %v327_v29, 0.0  ;;  %v1235_v1 = vsel %vm146_vm1, %v328_v31, 0.0  ;;  %v1238_v58 = vsel %vm146_vm1, %v329_v33, 0.0  ;;  %v1241_v60 = vsel %vm146_vm1, %v330_v39, 0.0 }
  0x3e   :  { %v199_v42 = vadd.f32 %v1074_v35, %v197_v9  ;;  %v364_v22 = vadd.f32 %v363_v28, %v362_v43  ;;  %v1244_v23 = vsel %vm146_vm1, %v331_v34, 0.0  ;;  %v1247_v24 = vsel %vm146_vm1, %v332_v40, 0.0 }
  0x3f   :  { %v1250_v29 = vsel %vm146_vm1, %v333_v59, 0.0  ;;  %v1254_v31 = vsel %vm146_vm1, %v334_v41, 0.0  ;;  %v1257_v33 = vsel %vm146_vm1, %v335_v44, 0.0  ;;  %v1260_v39 = vsel %vm146_vm1, %v336_v4, 0.0 }
  0x40   :  { %v201_v35 = vadd.f32 %v1078_v53, %v199_v42  ;;  %v366_v26 = vadd.f32 %v365_v32, %v364_v22  ;;  %v1263_v34 = vsel %vm146_vm1, %v337_v46, 0.0  ;;  %v1266_v40 = vsel %vm146_vm1, %v338_v36, 0.0  ;;  %v634_v53 = vld [vmem:[%s1448_s0 + $0x80] sm:$0xff]  }
  0x41   :  { %v1269_v59 = vsel %vm146_vm1, %v339_v62, 0.0  ;;  %v1276_v63 = vsel %vm146_vm1, %v340_v25, 0.0  ;;  %v1279_v4 = vsel %vm146_vm1, %v341_v56, 0.0  ;;  %v1282_v46 = vsel %vm146_vm1, %v342_v57, 0.0 }
  0x42   :  { %v203_v41 = vadd.f32 %v1082_v0, %v201_v35  ;;  %v368_v44 = vadd.f32 %v367_v30, %v366_v26  ;;  %v1285_v36 = vsel %vm146_vm1, %v343_v61, 0.0  ;;  %v1288_v62 = vsel %vm146_vm1, %v344_v5, 0.0  ;;  %v1535_v26 = vld [vmem:[#allocation11_spill] sm:$0xff] }
  0x43   :  { %v1291_v27 = vsel %vm146_vm1, %v345_v47, 0.0  ;;  %v1295_v25 = vsel %vm146_vm1, %v346_v51, 0.0  ;;  %v1298_v56 = vsel %vm146_vm1, %v347_v6, 0.0  ;;  %v1300_v57 = vunpack.c.l.bf16 %v634_v53 }
  0x44   :  { %v205_v0 = vadd.f32 %v1086_v16, %v203_v41  ;;  %v370_v52 = vadd.f32 %v369_v48, %v368_v44  ;;  %v208_v61 = vsel %vm146_vm1, %v1038_v49, 0.0  ;;  %v299_v5 = vmul.f32 %v990_v54, %v990_v54 }
  0x45   :  { %v373_v47 = vsel %vm146_vm1, %v1120_v15, 0.0  ;;  %v1309_v50 = vunpack.c.h.bf16 %v634_v53  ;;  %v210_v51 = vsel %vm146_vm1, %v1300_v57, 0.0  ;;  %v300_v6 = vmul.f32 %v992_v17, %v992_v17  ;;  %v1532_v15 = vld [vmem:[#allocation41_spill] sm:$0xff] }
  0x46   :  { %v207_v16 = vadd.f32 %v1090_v10, %v205_v0  ;;  %v372_v45 = vadd.f32 %v371_v2, %v370_v52  ;;  %v375_v28 = vsel %vm146_vm1, %v1124_v18, 0.0  ;;  %v301_v10 = vmul.f32 %v1532_v15, %v1532_v15  ;;  %v1533_v2 = vld [vmem:[#allocation42_spill] sm:$0xff]  ;;  %v1534_v18 = vld [vmem:[#allocation43_spill] sm:$0xff]  ;;  %v1536_v52 = vld [vmem:[#allocation12_spill] sm:$0xff] }
  0x47   :  { %v212_v54 = vsel %vm146_vm1, %v1309_v50, 0.0  ;;  %v377_v38 = vsel %vm146_vm1, %v299_v5, 0.0  ;;  %v302_v9 = vmul.f32 %v1533_v2, %v1533_v2  ;;  %v379_v17 = vsel %vm146_vm1, %v300_v6, 0.0  ;;  %v1540_v15 = vld [vmem:[#allocation14_spill] sm:$0xff]  ;;  %v1542_v2 = vld [vmem:[#allocation15_spill] sm:$0xff] }
  0x48   :  { %v209_v32 = vadd.f32 %v208_v61, %v207_v16  ;;  %v374_v30 = vadd.f32 %v373_v47, %v372_v45  ;;  %v303_v22 = vmul.f32 %v1534_v18, %v1534_v18  ;;  %v381_v35 = vsel %vm146_vm1, %v301_v10, 0.0  ;;  %v1537_v47 = vld [vmem:[#allocation44_spill] sm:$0xff] }
  0x49   :  { %v304_v44 = vmul.f32 %v1011_v37, %v1011_v37  ;;  %v383_v0 = vsel %vm146_vm1, %v302_v9, 0.0  ;;  %v305_v16 = vmul.f32 %v1537_v47, %v1537_v47 }
  0x4a   :  { %v211_v3 = vadd.f32 %v210_v51, %v209_v32  ;;  %v376_v48 = vadd.f32 %v375_v28, %v374_v30  ;;  %v385_v45 = vsel %vm146_vm1, %v303_v22, 0.0  ;;  %v1538_v51 = vld [vmem:[#allocation13_spill] sm:$0xff]  ;;  %v1544_v22 = vld [vmem:[#allocation16_spill] sm:$0xff] }
  0x4b   :  { %v1539_v32 = vld [vmem:[#allocation45_spill] sm:$0xff] }
  0x4c   :  { %v213_v43 = vadd.f32 %v212_v54, %v211_v3  ;;  %v378_v42 = vadd.f32 %v377_v38, %v376_v48  ;;  %v306_v30 = vmul.f32 %v1539_v32, %v1539_v32  ;;  %v387_v54 = vsel %vm146_vm1, %v304_v44, 0.0  ;;  %v1541_v38 = vld [vmem:[#allocation46_spill] sm:$0xff] }
  0x4d   :  { %v307_v3 = vmul.f32 %v1541_v38, %v1541_v38  ;;  %v389_v48 = vsel %vm146_vm1, %v305_v16, 0.0 }
  0x4e   :  { %v215_v53 = vadd.f32 %v1535_v26, %v213_v43  ;;  %v380_v41 = vadd.f32 %v379_v17, %v378_v42  ;;  %v1543_v43 = vld [vmem:[#allocation47_spill] sm:$0xff]  ;;  %v391_v18 = vsel %vm146_vm1, %v306_v30, 0.0 }
  0x4f   :  { %v308_v42 = vmul.f32 %v1543_v43, %v1543_v43  ;;  %v393_v44 = vsel %vm146_vm1, %v307_v3, 0.0 }
  0x50   :  { %v217_v61 = vadd.f32 %v1536_v52, %v215_v53  ;;  %v382_v5 = vadd.f32 %v381_v35, %v380_v41  ;;  %v1545_v53 = vld [vmem:[#allocation48_spill] sm:$0xff] }
  0x51   :  { %v309_v41 = vmul.f32 %v1545_v53, %v1545_v53  ;;  %v395_v16 = vsel %vm146_vm1, %v308_v42, 0.0 }
  0x52   :  { %v219_v6 = vadd.f32 %v1538_v51, %v217_v61  ;;  %v384_v28 = vadd.f32 %v383_v0, %v382_v5  ;;  %v1546_v0 = vld [vmem:[#allocation17_spill] sm:$0xff] }
  0x53   :  { %v1547_v5 = vld [vmem:[#allocation49_spill] sm:$0xff]  ;;  %v397_v30 = vsel %vm146_vm1, %v309_v41, 0.0 }
  0x54   :  { %v221_v37 = vadd.f32 %v1540_v15, %v219_v6  ;;  %v386_v10 = vadd.f32 %v385_v45, %v384_v28  ;;  %v310_v47 = vmul.f32 %v1547_v5, %v1547_v5  ;;  %v1548_v45 = vld [vmem:[#allocation18_spill] sm:$0xff] }
  0x55   :  { %v1549_v28 = vld [vmem:[#allocation50_spill] sm:$0xff] }
  0x56   :  { %v223_v9 = vadd.f32 %v1542_v2, %v221_v37  ;;  %v388_v17 = vadd.f32 %v387_v54, %v386_v10  ;;  %v311_v32 = vmul.f32 %v1549_v28, %v1549_v28  ;;  %v1550_v54 = vld [vmem:[#allocation19_spill] sm:$0xff]  ;;  %v399_v3 = vsel %vm146_vm1, %v310_v47, 0.0  ;;  %v1558_v28 = vld [vmem:[#allocation24_spill] sm:$0xff] }
  0x57   :  { %v1551_v10 = vld [vmem:[#allocation51_spill] sm:$0xff] }
  0x58   :  { %v225_v35 = vadd.f32 %v1544_v22, %v223_v9  ;;  %v390_v26 = vadd.f32 %v389_v48, %v388_v17  ;;  %v312_v38 = vmul.f32 %v1551_v10, %v1551_v10  ;;  %v1552_v48 = vld [vmem:[#allocation20_spill] sm:$0xff]  ;;  %v401_v42 = vsel %vm146_vm1, %v311_v32, 0.0  ;;  %v1557_v47 = vld [vmem:[#allocation23_spill] sm:$0xff] }
  0x59   :  { %v1553_v17 = vld [vmem:[#allocation52_spill] sm:$0xff] }
  0x5a   :  { %v227_v52 = vadd.f32 %v1546_v0, %v225_v35  ;;  %v392_v61 = vadd.f32 %v391_v18, %v390_v26  ;;  %v313_v43 = vmul.f32 %v1553_v17, %v1553_v17  ;;  %v1554_v18 = vld [vmem:[#allocation21_spill] sm:$0xff]  ;;  %v403_v41 = vsel %vm146_vm1, %v312_v38, 0.0 }
  0x5b   :  { %v1555_v26 = vld [vmem:[#allocation53_spill] sm:$0xff] }
  0x5c   :  { %v229_v51 = vadd.f32 %v1548_v45, %v227_v52  ;;  %v394_v6 = vadd.f32 %v393_v44, %v392_v61  ;;  %v314_v53 = vmul.f32 %v1555_v26, %v1555_v26  ;;  %v1556_v44 = vld [vmem:[#allocation22_spill] sm:$0xff]  ;;  %v315_v61 = vmul.f32 %v1038_v49, %v1038_v49 }
  0x5d   :  { %v405_v5 = vsel %vm146_vm1, %v313_v43, 0.0 }
  0x5e   :  { %v231_v15 = vadd.f32 %v1550_v54, %v229_v51  ;;  %v396_v37 = vadd.f32 %v395_v16, %v394_v6  ;;  %v316_v51 = vmul.f32 %v1300_v57, %v1300_v57  ;;  %v407_v6 = vsel %vm146_vm1, %v314_v53, 0.0  ;;  %v1564_v53 = vld [vmem:[#allocation30_spill] sm:$0xff] }
  0x5f   :  { %v317_v54 = vmul.f32 %v1309_v50, %v1309_v50 }
  0x60   :  { %v233_v2 = vadd.f32 %v1552_v48, %v231_v15  ;;  %v398_v9 = vadd.f32 %v397_v30, %v396_v37  ;;  %v409_v15 = vsel %vm146_vm1, %v315_v61, 0.0  ;;  %v1559_v37 = vld [vmem:[#allocation25_spill] sm:$0xff]  ;;  %v411_v38 = vsel %vm146_vm1, %v316_v51, 0.0 }
  0x61   :  { %v413_v57 = vsel %vm146_vm1, %v317_v54, 0.0 }
  0x62   :  { %v235_v22 = vadd.f32 %v1554_v18, %v233_v2  ;;  %v400_v35 = vadd.f32 %v399_v3, %v398_v9  ;;  %v1560_v3 = vld [vmem:[#allocation26_spill] sm:$0xff]  ;;  %v1561_v9 = vld [vmem:[#allocation27_spill] sm:$0xff] }
  0x64   :  { %v237_v0 = vadd.f32 %v1556_v44, %v235_v22  ;;  %v402_v52 = vadd.f32 %v401_v42, %v400_v35  ;;  %v1562_v42 = vld [vmem:[#allocation28_spill] sm:$0xff]  ;;  %v1563_v35 = vld [vmem:[#allocation29_spill] sm:$0xff] }
  0x66   :  { %v239_v16 = vadd.f32 %v1557_v47, %v237_v0  ;;  %v404_v45 = vadd.f32 %v403_v41, %v402_v52  ;;  %v1565_v0 = vld [vmem:[#allocation31_spill] sm:$0xff] }
  0x68   :  { %v241_v32 = vadd.f32 %v1558_v28, %v239_v16  ;;  %v406_v30 = vadd.f32 %v405_v5, %v404_v45  ;;  %v1566_v5 = vld [vmem:[#allocation32_spill] sm:$0xff]  ;;  %v1567_v45 = vld [vmem:[#allocation33_spill] sm:$0xff]  ;;  %v1568_v28 = vld [vmem:[#allocation34_spill] sm:$0xff] }
  0x6a   :  { %v243_v49 = vadd.f32 %v1559_v37, %v241_v32  ;;  %v408_v10 = vadd.f32 %v407_v6, %v406_v30  ;;  %v1569_v30 = vld [vmem:[#allocation35_spill] sm:$0xff] }
  0x6c   :  { %v245_v48 = vadd.f32 %v1560_v3, %v243_v49  ;;  %v410_v2 = vadd.f32 %v409_v15, %v408_v10  ;;  %v1570_v15 = vld [vmem:[#allocation36_spill] sm:$0xff]  ;;  %v1571_v49 = vld [vmem:[#allocation37_spill] sm:$0xff] }
  0x6e   :  { %v247_v17 = vadd.f32 %v1561_v9, %v245_v48  ;;  %v412_v43 = vadd.f32 %v411_v38, %v410_v2  ;;  %v1572_v38 = vld [vmem:[#allocation38_spill] sm:$0xff]  ;;  %v1573_v48 = vld [vmem:[#allocation39_spill] sm:$0xff] }
  0x70   :  { %v249_v18 = vadd.f32 %v1562_v42, %v247_v17  ;;  %v414_v22 = vadd.f32 %v413_v57, %v412_v43  ;;  %v1574_v57 = vld [vmem:[#allocation40_spill] sm:$0xff] }
  0x72   :  { %v251_v50 = vadd.f32 %v1563_v35, %v249_v18  ;;  %v416_v26 = vadd.f32 %v1203_v11, %v414_v22 }
  0x74   :  { %v253_v41 = vadd.f32 %v1564_v53, %v251_v50  ;;  %v418_v44 = vadd.f32 %v1206_v55, %v416_v26 }
  0x76   :  { %v255_v52 = vadd.f32 %v1565_v0, %v253_v41  ;;  %v420_v61 = vadd.f32 %v1209_v7, %v418_v44 }
  0x78   :  { %v257_v47 = vadd.f32 %v1566_v5, %v255_v52  ;;  %v422_v16 = vadd.f32 %v1212_v8, %v420_v61 }
  0x7a   :  { %v259_v51 = vadd.f32 %v1567_v45, %v257_v47  ;;  %v424_v6 = vadd.f32 %v1216_v12, %v422_v16 }
  0x7c   :  { %v261_v32 = vadd.f32 %v1568_v28, %v259_v51  ;;  %v426_v11 = vadd.f32 %v1219_v13, %v424_v6 }
  0x7e   :  { %v263_v54 = vadd.f32 %v1569_v30, %v261_v32  ;;  %v428_v55 = vadd.f32 %v1222_v14, %v426_v11 }
  0x80   :  { %v265_v37 = vadd.f32 %v1570_v15, %v263_v54  ;;  %v430_v7 = vadd.f32 %v1225_v19, %v428_v55 }
  0x82   :  { %v267_v10 = vadd.f32 %v1571_v49, %v265_v37  ;;  %v432_v8 = vadd.f32 %v1228_v20, %v430_v7 }
  0x84   :  { %v269_v3 = vadd.f32 %v1572_v38, %v267_v10  ;;  %v434_v12 = vadd.f32 %v1231_v21, %v432_v8 }
  0x86   :  { %v271_v2 = vadd.f32 %v1573_v48, %v269_v3  ;;  %v436_v13 = vadd.f32 %v1235_v1, %v434_v12  ;;  %v145_v1 = vld [vmem:[%s1446_s1] sm:$0x1] }
  0x88   :  { %v273_v9 = vadd.f32 %v1574_v57, %v271_v2  ;;  %v438_v14 = vadd.f32 %v1238_v58, %v436_v13 }
  0x8a   :  { %v274_v17 = vrot.slane %v273_v9, 4  ;;  %v440_v43 = vadd.f32 %v1241_v60, %v438_v14 }
  0x8c   :  { %v275_v19 = vadd.f32 %v274_v17, %v273_v9  ;;  %v442_v42 = vadd.f32 %v1244_v23, %v440_v43 }
  0x8e   :  { %v276_v18 = vrot.slane %v275_v19, 2  ;;  %v444_v20 = vadd.f32 %v1247_v24, %v442_v42 }
  0x90   :  { %v277_v22 = vadd.f32 %v276_v18, %v275_v19  ;;  %v446_v21 = vadd.f32 %v1250_v29, %v444_v20 }
  0x92   :  { %v278_v35 = vrot.slane %v277_v22, 1  ;;  %v448_v50 = vadd.f32 %v1254_v31, %v446_v21 }
  0x94   :  { %v279_v58 = vadd.f32 %v278_v35, %v277_v22  ;;  %v450_v26 = vadd.f32 %v1257_v33, %v448_v50 }
  0x96   :  { %v280_v60 = vadd.f32 %v279_v58, %v145_v1  ;;  %v452_v53 = vadd.f32 %v1260_v39, %v450_v26 }
  0x98   :  { %282 = vst.msk [vmem:[%s1446_s1] sm:$0x1] %vm14_vm0, %v280_v60  ;;  %v454_v23 = vadd.f32 %v1263_v34, %v452_v53 }
  0x9a   :  { %v456_v24 = vadd.f32 %v1266_v40, %v454_v23 }
  0x9c   :  { %v458_v29 = vadd.f32 %v1269_v59, %v456_v24 }
  0x9e   :  { %v460_v31 = vadd.f32 %v1276_v63, %v458_v29  ;;  %v283_v63 = vld [vmem:[%s1447_s2] sm:$0x1] }
  0xa0   :  { %v462_v41 = vadd.f32 %v1279_v4, %v460_v31 }
  0xa2   :  { %v464_v33 = vadd.f32 %v1282_v46, %v462_v41 }
  0xa4   :  { %v466_v44 = vadd.f32 %v1285_v36, %v464_v33 }
  0xa6   :  { %v468_v39 = vadd.f32 %v1288_v62, %v466_v44 }
  0xa8   :  { %v470_v0 = vadd.f32 %v1291_v27, %v468_v39 }
  0xaa   :  { %v472_v52 = vadd.f32 %v1295_v25, %v470_v0 }
  0xac   :  { %v474_v34 = vadd.f32 %v1298_v56, %v472_v52 }
  0xae   :  { %v475_v61 = vrot.slane %v474_v34, 4 }
  0xb0   :  { %v476_v40 = vadd.f32 %v475_v61, %v474_v34 }
  0xb2   :  { %v477_v5 = vrot.slane %v476_v40, 2 }
  0xb4   :  { %v478_v59 = vadd.f32 %v477_v5, %v476_v40 }
  0xb6   :  { %v479_v47 = vrot.slane %v478_v59, 1 }
  0xb8   :  { %v480_v4 = vadd.f32 %v479_v47, %v478_v59 }
  0xba   :  { %v481_v46 = vadd.f32 %v480_v4, %v283_v63 }
  0xbc   :  { %482 = vst.msk [vmem:[%s1447_s2] sm:$0x1] %vm14_vm0, %v481_v46 }

// kernel: dense_layer_forward.4
= control target key start
LH: loop header
LB: loop body
LE: loop exit
PB: predicated region body
PF: predicated region fallthrough
CT: control target
= control target key end

     0   :  { %vm520_vm0 = vcmask 1041408   ;;  %vm47_vm1 = vcmask 24576   ;;  %vm423_vm2 = vcmask 31744   ;;  %vm1069_vm3 = vcmask 257024   ;;  %s3192_s4 = inlined_call_operand.vmem [shape: bf16[4,32], index: 4, kind: input, shape index: {}]   ;;  %s3193_s0 = inlined_call_operand.vmem [shape: f32[1,4], index: 0, kind: input, shape index: {}]   ;;  %s3194_s1 = inlined_call_operand.vmem [shape: f32[1,4], index: 1, kind: input, shape index: {}]   ;;  %s3195_s7 = inlined_call_operand.vmem [shape: bf16[512,4], index: 7, kind: input, shape index: {}]   ;;  %s3196_s2 = inlined_call_operand.vmem [shape: f32[1,4], index: 2, kind: input, shape index: {}]   ;;  %s3197_s3 = inlined_call_operand.vmem [shape: f32[1,4], index: 3, kind: input, shape index: {}]   ;;  %s3198_s8 = inlined_call_operand.vmem [shape: bf16[512,32], index: 8, kind: output, shape index: {0}]   ;;  %s3199_s5 = inlined_call_operand.vmem [shape: f32[1,32], index: 5, kind: input, shape index: {}]   ;;  %s3200_s6 = inlined_call_operand.vmem [shape: f32[1,32], index: 6, kind: input, shape index: {}]   ;;  %s3201_s9 = inlined_call_operand.vmem [shape: f32[1,32], index: 9, kind: output, shape index: {1}]   ;;  %s3202_s10 = inlined_call_operand.vmem [shape: f32[1,32], index: 10, kind: output, shape index: {2}]  }
   0x1   :  { %v422_v0 = vld [vmem:[%s3192_s4] sm:$0x3]  ;;  %v2004_v10 = vld [vmem:[%s3195_s7 + $0x8] sm:$0xff]   ;;  %v2009_v11 = vld [vmem:[%s3195_s7 + $0x10] sm:$0xff]   ;;  %vm53_vm4 = vcmask 253952   ;;  %vm1135_vm5 = vcmask 261120  }
   0x2   :  { %v37_v1 = vld [vmem:[%s3193_s0] sm:$0x1]  ;;  %1924 = vmatprep.subr.msk.bf16.mxu0 %vm520_vm0, %v422_v0  ;;  %v522_v3 = vsel %vm520_vm0, %v422_v0, 0  ;;  %1925 = vmatprep.subr.msk.bf16.mxu1 %vm520_vm0, %v422_v0  ;;  %v2014_v12 = vld [vmem:[%s3195_s7 + $0x18] sm:$0xff]   ;;  %v2028_v16 = vld [vmem:[%s3195_s7 + $0x28] sm:$0xff]   ;;  %v1670_v18 = vunpack.c.l.bf16 %v2004_v10  ;;  %v1671_v19 = vunpack.c.h.bf16 %v2004_v10  ;;  %v1674_v20 = vunpack.c.l.bf16 %v2009_v11 }
   0x3   :  { %v39_v2 = vld [vmem:[%s3194_s1] sm:$0x1]  ;;  %v38_v4 = vmul.f32 0.001953125, %v37_v1  ;;  %1857 = vmatpush3.bf16.msra.mxu0 %v522_v3  ;;  %1923 = vmatpush3.bf16.msra.mxu1 %v522_v3  ;;  %v2037_v21 = vld [vmem:[%s3195_s7 + $0x30] sm:$0xff]   ;;  %v2042_v22 = vld [vmem:[%s3195_s7 + $0x38] sm:$0xff]   ;;  %v1675_v24 = vunpack.c.h.bf16 %v2009_v11  ;;  %v1678_v25 = vunpack.c.l.bf16 %v2014_v12  ;;  %v1679_v26 = vunpack.c.h.bf16 %v2014_v12 }
   0x4   :  { %v40_v5 = vmul.f32 0.001953125, %v39_v2  ;;  %v1999_v9 = vld [vmem:[%s3195_s7] sm:$0xff]   ;;  %v2056_v29 = vld [vmem:[%s3195_s7 + $0x48] sm:$0xff]   ;;  %v1686_v32 = vunpack.c.l.bf16 %v2028_v16  ;;  %v1687_v33 = vunpack.c.h.bf16 %v2028_v16  ;;  %v2064_v34 = vld [vmem:[%s3195_s7 + $0x50] sm:$0xff]   ;;  %v1690_v37 = vunpack.c.l.bf16 %v2037_v21 }
   0x5   :  { %v41_v6 = vmul.f32 %v38_v4, %v38_v4  ;;  %v2019_v13 = vld [vmem:[%s3195_s7 + $0x20] sm:$0xff]   ;;  %v1666_v15 = vunpack.c.l.bf16 %v1999_v9  ;;  %v1667_v17 = vunpack.c.h.bf16 %v1999_v9  ;;  %v2069_v35 = vld [vmem:[%s3195_s7 + $0x58] sm:$0xff]   ;;  %v1691_v38 = vunpack.c.h.bf16 %v2037_v21  ;;  %v2090_v46 = vld [vmem:[%s3195_s7 + $0x68] sm:$0xff]  }
   0x6   :  { %v43_v14 = vld [vmem:[%s3196_s2] sm:$0x1]  ;;  %v1682_v27 = vunpack.c.l.bf16 %v2019_v13  ;;  %v1683_v31 = vunpack.c.h.bf16 %v2019_v13  ;;  %v1694_v39 = vunpack.c.l.bf16 %v2042_v22  ;;  %v1695_v40 = vunpack.c.h.bf16 %v2042_v22  ;;  %v2095_v47 = vld [vmem:[%s3195_s7 + $0x70] sm:$0xff]   ;;  %v2104_v52 = vld [vmem:[%s3195_s7 + $0x78] sm:$0xff]  }
   0x7   :  { %v42_v7 = vsub.f32 %v40_v5, %v41_v6  ;;  %v2051_v28 = vld [vmem:[%s3195_s7 + $0x40] sm:$0xff]   ;;  %v1702_v45 = vunpack.c.l.bf16 %v2056_v29  ;;  %v1703_v48 = vunpack.c.h.bf16 %v2056_v29  ;;  %v1706_v49 = vunpack.c.l.bf16 %v2064_v34  ;;  %v2117_v58 = vld [vmem:[%s3195_s7 + $0x88] sm:$0xff]   ;;  %v2122_v59 = vld [vmem:[%s3195_s7 + $0x90] sm:$0xff]  }
   0x8   :  { %v49_v36 = vld [vmem:[%s3197_s3] sm:$0x1]  ;;  %v1698_v43 = vunpack.c.l.bf16 %v2051_v28  ;;  %v1699_v44 = vunpack.c.h.bf16 %v2051_v28  ;;  %v1707_v50 = vunpack.c.h.bf16 %v2064_v34  ;;  %v1710_v51 = vunpack.c.l.bf16 %v2069_v35  ;;  %v2131_v0 = vld [vmem:[%s3195_s7 + $0x98] sm:$0xff]   ;;  %v2146_v6 = vld [vmem:[%s3195_s7 + $0xa8] sm:$0xff]  }
   0x9   :  { %v44_v8 = vadd.f32 1e-05, %v42_v7  ;;  %v2081_v41 = vld [vmem:[%s3195_s7 + $0x60] sm:$0xff]   ;;  %v1711_v55 = vunpack.c.h.bf16 %v2069_v35  ;;  %v1718_v60 = vunpack.c.l.bf16 %v2090_v46  ;;  %v2151_v7 = vld [vmem:[%s3195_s7 + $0xb0] sm:$0xff]  }
   0xa   :  { %v2109_v53 = vld [vmem:[%s3195_s7 + $0x80] sm:$0xff]   ;;  %v1714_v56 = vunpack.c.l.bf16 %v2081_v41  ;;  %v1715_v57 = vunpack.c.h.bf16 %v2081_v41  ;;  %v2323_v35 = vld [vmem:[%s3195_s7 + $0xf0] sm:$0xff]   ;;  %v3203_v41 = vunpack.c.h.bf16 %v2090_v46  ;;  %v3205_v46 = vunpack.c.l.bf16 %v2095_v47 }
   0xb   :  { %1927 = vrsqrt.f32 %v44_v8  ;;  %v2136_v1 = vld [vmem:[%s3195_s7 + $0xa0] sm:$0xff]  }
   0xc   :  { %v2175_v3 = vld [vmem:[%s3195_s7 + $0xc0] sm:$0xff]  }
  0x18   :  { %v1928_v23 = vpop.eup %1927 }
  0x19   :  { %v46_v30 = vmul.f32 %v1928_v23, %v43_v14 }
  0x1b   :  { %48 = vst.msk [vmem:[#allocation2] sm:$0x1] %vm47_vm1, %v46_v30  ;;  %v50_v42 = vmul.f32 %v46_v30, %v38_v4 }
  0x1d   :  { %v51_v54 = vsub.f32 %v49_v36, %v50_v42  ;;  %v2170_v36 = vld [vmem:[%s3195_s7 + $0xb8] sm:$0xff]  }
  0x1f   :  { %52 = vst.msk [vmem:[#allocation3] sm:$0x1] %vm47_vm1, %v51_v54  ;;  %v2192_v54 = vld [vmem:[%s3195_s7 + $0xc8] sm:$0xff]  }
  0x22   :  { %v2161_v2 = vld [vmem:[#allocation2] ss:$0 sm:$0xff] }
  0x23   :  { %v191_v5 = vmul.f32 %v1666_v15, %v2161_v2  ;;  %v192_v14 = vmul.f32 %v1667_v17, %v2161_v2  ;;  %v193_v23 = vmul.f32 %v1670_v18, %v2161_v2  ;;  %v194_v8 = vmul.f32 %v1671_v19, %v2161_v2 }
  0x24   :  { %v195_v15 = vmul.f32 %v1674_v20, %v2161_v2  ;;  %v196_v9 = vmul.f32 %v1675_v24, %v2161_v2  ;;  %v197_v17 = vmul.f32 %v1678_v25, %v2161_v2  ;;  %v198_v10 = vmul.f32 %v1679_v26, %v2161_v2 }
  0x25   :  { %v199_v11 = vmul.f32 %v1682_v27, %v2161_v2  ;;  %v200_v24 = vmul.f32 %v1683_v31, %v2161_v2  ;;  %v2227_v27 = vld [vmem:[%s3195_s7 + $0xd0] sm:$0xff]   ;;  %v204_v16 = vmul.f32 %v1691_v38, %v2161_v2  ;;  %v207_v21 = vmul.f32 %v1698_v43, %v2161_v2 }
  0x26   :  { %v2210_v30 = vld [vmem:[#allocation3] ss:$0 sm:$0xff]  ;;  %v1771_v4 = vunpack.c.h.bf16 %v2227_v27  ;;  %v209_v22 = vmul.f32 %v1702_v45, %v2161_v2  ;;  %v211_v28 = vmul.f32 %v1706_v49, %v2161_v2  ;;  %v213_v49 = vmul.f32 %v1710_v51, %v2161_v2 }
  0x27   :  { %v262_v26 = vadd.f32 %v2210_v30, %v191_v5  ;;  %v263_v42 = vadd.f32 %v2210_v30, %v192_v14  ;;  %v264_v20 = vadd.f32 %v2210_v30, %v193_v23  ;;  %v265_v19 = vadd.f32 %v2210_v30, %v194_v8 }
  0x28   :  { %v266_v13 = vadd.f32 %v2210_v30, %v195_v15  ;;  %v267_v31 = vadd.f32 %v2210_v30, %v196_v9  ;;  %v268_v12 = vadd.f32 %v2210_v30, %v197_v17  ;;  %v269_v25 = vadd.f32 %v2210_v30, %v198_v10  ;;  %v2238_v15 = vld [vmem:[%s3195_s7 + $0xd8] sm:$0xff]  }
  0x29   :  { %v326_v5 = vmax.f32 %v262_v26, 0.0  ;;  %v327_v18 = vmax.f32 %v263_v42, 0.0  ;;  %v328_v14 = vmax.f32 %v264_v20, 0.0  ;;  %v329_v63 = vmax.f32 %v265_v19, 0.0  ;;  %v2245_v42 = vld [vmem:[%s3195_s7 + $0xe0] sm:$0xff]  }
  0x2a   :  { %v330_v23 = vmax.f32 %v266_v13, 0.0  ;;  %v331_v62 = vmax.f32 %v267_v31, 0.0  ;;  %v1770_v8 = vunpack.c.l.bf16 %v2227_v27  ;;  %v270_v17 = vadd.f32 %v2210_v30, %v199_v11 }
  0x2b   :  { %v390_v9 = vpack.c.bf16 %v327_v18, %v326_v5  ;;  %v391_v61 = vpack.c.bf16 %v329_v63, %v328_v14  ;;  %v271_v10 = vadd.f32 %v2210_v30, %v200_v24  ;;  %v332_v20 = vmax.f32 %v268_v12, 0.0  ;;  %v2262_v24 = vld [vmem:[%s3195_s7 + $0xe8] sm:$0xff]  }
  0x2c   :  { %v392_v19 = vpack.c.bf16 %v331_v62, %v330_v23  ;;  %v333_v26 = vmax.f32 %v269_v25, 0.0  ;;  %v201_v13 = vmul.f32 %v1686_v32, %v2161_v2  ;;  %v202_v63 = vmul.f32 %v1687_v33, %v2161_v2 }
  0x2d   :  { %1858 = vmatprep.mubr.msk.bf16.mxu0 %vm423_vm2, %v390_v9  ;;  %v203_v18 = vmul.f32 %v1690_v37, %v2161_v2  ;;  %v1774_v11 = vunpack.c.l.bf16 %v2238_v15  ;;  %v1775_v62 = vunpack.c.h.bf16 %v2238_v15  ;;  %v205_v32 = vmul.f32 %v1694_v39, %v2161_v2 }
  0x2e   :  { %1859 = vmatmul.mubr.msk.bf16.vlgmr.msra.gmra.mxu0 %vm423_vm2, %v391_v61  ;;  %v1778_v33 = vunpack.c.l.bf16 %v2245_v42  ;;  %v1779_v37 = vunpack.c.h.bf16 %v2245_v42  ;;  %v334_v12 = vmax.f32 %v270_v17, 0.0  ;;  %v335_v25 = vmax.f32 %v271_v10, 0.0 }
  0x2f   :  { %1862 = vmatprep.mubr.msk.bf16.mxu0 %vm423_vm2, %v392_v19  ;;  %v206_v61 = vmul.f32 %v1695_v40, %v2161_v2  ;;  %v393_v38 = vpack.c.bf16 %v333_v26, %v332_v20  ;;  %v272_v31 = vadd.f32 %v2210_v30, %v201_v13  ;;  %v208_v39 = vmul.f32 %v1699_v44, %v2161_v2 }
  0x30   :  { %v1782_v5 = vunpack.c.l.bf16 %v2262_v24  ;;  %v273_v14 = vadd.f32 %v2210_v30, %v202_v63  ;;  %v274_v23 = vadd.f32 %v2210_v30, %v203_v18  ;;  %v210_v40 = vmul.f32 %v1703_v48, %v2161_v2 }
  0x31   :  { %v275_v43 = vadd.f32 %v2210_v30, %v204_v16  ;;  %v276_v9 = vadd.f32 %v2210_v30, %v205_v32  ;;  %v212_v44 = vmul.f32 %v1707_v50, %v2161_v2  ;;  %v394_v17 = vpack.c.bf16 %v335_v25, %v334_v12 }
  0x32   :  { %v277_v10 = vadd.f32 %v2210_v30, %v206_v61  ;;  %v278_v45 = vadd.f32 %v2210_v30, %v207_v21  ;;  %v279_v29 = vadd.f32 %v2210_v30, %v208_v39  ;;  %v280_v48 = vadd.f32 %v2210_v30, %v209_v22 }
  0x33   :  { %v281_v19 = vadd.f32 %v2210_v30, %v210_v40  ;;  %v282_v20 = vadd.f32 %v2210_v30, %v211_v28  ;;  %v283_v34 = vadd.f32 %v2210_v30, %v212_v44  ;;  %v214_v50 = vmul.f32 %v1711_v55, %v2161_v2  ;;  %v2328_v55 = vld [vmem:[%s3195_s7 + $0xf8] sm:$0xff]  }
  0x34   :  { %v215_v26 = vmul.f32 %v1714_v56, %v2161_v2  ;;  %v1783_v13 = vunpack.c.h.bf16 %v2262_v24  ;;  %v336_v63 = vmax.f32 %v272_v31, 0.0  ;;  %v337_v18 = vmax.f32 %v273_v14, 0.0 }
  0x35   :  { %v338_v16 = vmax.f32 %v274_v23, 0.0  ;;  %v339_v32 = vmax.f32 %v275_v43, 0.0  ;;  %v340_v51 = vmax.f32 %v276_v9, 0.0  ;;  %v341_v12 = vmax.f32 %v277_v10, 0.0 }
  0x36   :  { %1863 = vmatmul.mubr.msk.bf16.gmra.mxu0 %vm423_vm2, %v393_v38  ;;  %v342_v25 = vmax.f32 %v278_v45, 0.0  ;;  %v343_v61 = vmax.f32 %v279_v29, 0.0  ;;  %v344_v56 = vmax.f32 %v280_v48, 0.0  ;;  %v345_v21 = vmax.f32 %v281_v19, 0.0 }
  0x37   :  { %1866 = vmatprep.mubr.msk.bf16.mxu0 %vm423_vm2, %v394_v17  ;;  %v346_v38 = vmax.f32 %v282_v20, 0.0  ;;  %v2331_v31 = vadd.f32 %v2210_v30, %v213_v49  ;;  %v347_v39 = vmax.f32 %v283_v34, 0.0  ;;  %v2334_v14 = vadd.f32 %v2210_v30, %v214_v50 }
  0x38   :  { %v216_v23 = vmul.f32 %v1715_v57, %v2161_v2  ;;  %v2340_v22 = vadd.f32 %v2210_v30, %v215_v26  ;;  %v395_v40 = vpack.c.bf16 %v337_v18, %v336_v63  ;;  %v1786_v43 = vunpack.c.l.bf16 %v2323_v35 }
  0x39   :  { %v1787_v9 = vunpack.c.h.bf16 %v2323_v35  ;;  %v1790_v28 = vunpack.c.l.bf16 %v2328_v55  ;;  %v396_v44 = vpack.c.bf16 %v339_v32, %v338_v16  ;;  %v397_v17 = vpack.c.bf16 %v341_v12, %v340_v51 }
  0x3a   :  { %v217_v10 = vmul.f32 %v1718_v60, %v2161_v2  ;;  %v218_v57 = vmul.f32 %v3203_v41, %v2161_v2  ;;  %v398_v45 = vpack.c.bf16 %v343_v61, %v342_v25  ;;  %v2351_v29 = vpack.c.bf16 %v345_v21, %v344_v56 }
  0x3b   :  { %v348_v48 = vmax.f32 %v2331_v31, 0.0  ;;  %v3204_v19 = vunpack.c.l.bf16 %v2109_v53  ;;  %v2357_v49 = vpack.c.bf16 %v347_v39, %v346_v38  ;;  %v349_v34 = vmax.f32 %v2334_v14, 0.0 }
  0x3c   :  { %v2361_v50 = vadd.f32 %v2210_v30, %v216_v23  ;;  %v350_v60 = vmax.f32 %v2340_v22, 0.0  ;;  %v219_v26 = vmul.f32 %v3205_v46, %v2161_v2  ;;  %v3206_v63 = vunpack.c.h.bf16 %v2095_v47 }
  0x3d   :  { %v223_v20 = vmul.f32 %v3204_v19, %v2161_v2  ;;  %v3207_v16 = vunpack.c.h.bf16 %v2109_v53  ;;  %v2377_v12 = vadd.f32 %v2210_v30, %v217_v10  ;;  %v2380_v25 = vadd.f32 %v2210_v30, %v218_v57 }
  0x3e   :  { %1867 = vmatmul.mubr.msk.bf16.gmra.mxu0 %vm423_vm2, %v395_v40  ;;  %v220_v18 = vmul.f32 %v3206_v63, %v2161_v2  ;;  %v3208_v61 = vunpack.c.l.bf16 %v2117_v58  ;;  %v3209_v47 = vunpack.c.h.bf16 %v2117_v58  ;;  %v3210_v39 = vunpack.c.l.bf16 %v2122_v59 }
  0x3f   :  { %v224_v32 = vmul.f32 %v3207_v16, %v2161_v2  ;;  %v294_v51 = vadd.f32 %v2210_v30, %v223_v20  ;;  %1870 = vmatprep.mubr.msk.bf16.mxu0 %vm423_vm2, %v396_v44  ;;  %v3211_v40 = vunpack.c.h.bf16 %v2122_v59  ;;  %v3212_v10 = vunpack.c.l.bf16 %v2104_v52 }
  0x40   :  { %v225_v56 = vmul.f32 %v3208_v61, %v2161_v2  ;;  %v226_v21 = vmul.f32 %v3209_v47, %v2161_v2  ;;  %v227_v23 = vmul.f32 %v3210_v39, %v2161_v2  ;;  %v3213_v19 = vunpack.c.l.bf16 %v2131_v0 }
  0x41   :  { %v295_v53 = vadd.f32 %v2210_v30, %v224_v32  ;;  %v358_v38 = vmax.f32 %v294_v51, 0.0  ;;  %v228_v44 = vmul.f32 %v3211_v40, %v2161_v2  ;;  %v221_v41 = vmul.f32 %v3212_v10, %v2161_v2 }
  0x42   :  { %v296_v57 = vadd.f32 %v2210_v30, %v225_v56  ;;  %v297_v58 = vadd.f32 %v2210_v30, %v226_v21  ;;  %v229_v20 = vmul.f32 %v3213_v19, %v2161_v2  ;;  %v298_v63 = vadd.f32 %v2210_v30, %v227_v23 }
  0x43   :  { %v359_v46 = vmax.f32 %v295_v53, 0.0  ;;  %v299_v16 = vadd.f32 %v2210_v30, %v228_v44  ;;  %v3214_v59 = vunpack.c.h.bf16 %v2131_v0  ;;  %v3215_v56 = vunpack.c.l.bf16 %v2136_v1 }
  0x44   :  { %v360_v51 = vmax.f32 %v296_v57, 0.0  ;;  %v361_v61 = vmax.f32 %v297_v58, 0.0  ;;  %v300_v47 = vadd.f32 %v2210_v30, %v229_v20  ;;  %v362_v40 = vmax.f32 %v298_v63, 0.0 }
  0x45   :  { %v230_v32 = vmul.f32 %v3214_v59, %v2161_v2  ;;  %v231_v21 = vmul.f32 %v3215_v56, %v2161_v2  ;;  %v406_v39 = vpack.c.bf16 %v359_v46, %v358_v38  ;;  %v363_v10 = vmax.f32 %v299_v16, 0.0 }
  0x46   :  { %v351_v23 = vmax.f32 %v2361_v50, 0.0  ;;  %v407_v44 = vpack.c.bf16 %v361_v61, %v360_v51  ;;  %v3216_v0 = vunpack.c.h.bf16 %v2136_v1  ;;  %1871 = vmatmul.mubr.msk.bf16.gmra.mxu0 %vm423_vm2, %v397_v17  ;;  %v364_v20 = vmax.f32 %v300_v47, 0.0 }
  0x47   :  { %v301_v53 = vadd.f32 %v2210_v30, %v230_v32  ;;  %v302_v57 = vadd.f32 %v2210_v30, %v231_v21  ;;  %1890 = vmatprep.mubr.msk.bf16.mxu1 %vm423_vm2, %v406_v39  ;;  %v408_v58 = vpack.c.bf16 %v363_v10, %v362_v40  ;;  %v3217_v38 = vunpack.c.l.bf16 %v2146_v6  ;;  %1874 = vmatprep.mubr.msk.bf16.mxu0 %vm423_vm2, %v398_v45 }
  0x48   :  { %v232_v19 = vmul.f32 %v3216_v0, %v2161_v2  ;;  %v3218_v50 = vunpack.c.h.bf16 %v2146_v6  ;;  %1891 = vmatmul.mubr.msk.bf16.vlgmr.msra.gmra.mxu1 %vm423_vm2, %v407_v44  ;;  %v3219_v17 = vunpack.c.l.bf16 %v2151_v7  ;;  %v3220_v32 = vunpack.c.h.bf16 %v2151_v7 }
  0x49   :  { %v233_v46 = vmul.f32 %v3217_v38, %v2161_v2  ;;  %v365_v1 = vmax.f32 %v301_v53, 0.0  ;;  %1894 = vmatprep.mubr.msk.bf16.mxu1 %vm423_vm2, %v408_v58  ;;  %v366_v61 = vmax.f32 %v302_v57, 0.0  ;;  %v3221_v47 = vunpack.c.l.bf16 %v2170_v36 }
  0x4a   :  { %v234_v63 = vmul.f32 %v3218_v50, %v2161_v2  ;;  %v303_v16 = vadd.f32 %v2210_v30, %v232_v19  ;;  %v235_v59 = vmul.f32 %v3219_v17, %v2161_v2  ;;  %v236_v51 = vmul.f32 %v3220_v32, %v2161_v2 }
  0x4b   :  { %v304_v6 = vadd.f32 %v2210_v30, %v233_v46  ;;  %v237_v56 = vmul.f32 %v3221_v47, %v2161_v2  ;;  %v3222_v7 = vunpack.c.h.bf16 %v2170_v36  ;;  %v2447_v53 = vadd.f32 %v2210_v30, %v219_v26 }
  0x4c   :  { %v305_v45 = vadd.f32 %v2210_v30, %v234_v63  ;;  %v367_v21 = vmax.f32 %v303_v16, 0.0  ;;  %v306_v39 = vadd.f32 %v2210_v30, %v235_v59  ;;  %v307_v40 = vadd.f32 %v2210_v30, %v236_v51 }
  0x4d   :  { %v238_v10 = vmul.f32 %v3222_v7, %v2161_v2  ;;  %v2450_v44 = vadd.f32 %v2210_v30, %v220_v18  ;;  %v3223_v0 = vunpack.c.h.bf16 %v2104_v52  ;;  %v3224_v57 = vunpack.c.l.bf16 %v2175_v3 }
  0x4e   :  { %v409_v38 = vpack.c.bf16 %v365_v1, %v364_v20  ;;  %v368_v46 = vmax.f32 %v304_v6, 0.0  ;;  %v369_v50 = vmax.f32 %v305_v45, 0.0  ;;  %v2459_v36 = vadd.f32 %v2210_v30, %v237_v56  ;;  %1875 = vmatmul.mubr.msk.bf16.gmra.mxu0 %vm423_vm2, %v2351_v29 }
  0x4f   :  { %v222_v19 = vmul.f32 %v3223_v0, %v2161_v2  ;;  %v239_v58 = vmul.f32 %v3224_v57, %v2161_v2  ;;  %v410_v63 = vpack.c.bf16 %v367_v21, %v366_v61  ;;  %v370_v26 = vmax.f32 %v306_v39, 0.0  ;;  %1878 = vmatprep.mubr.msk.bf16.mxu0 %vm423_vm2, %v2357_v49 }
  0x50   :  { %v371_v16 = vmax.f32 %v307_v40, 0.0  ;;  %v3225_v18 = vunpack.c.h.bf16 %v2175_v3  ;;  %v401_v52 = vpack.c.bf16 %v349_v34, %v348_v48  ;;  %v352_v59 = vmax.f32 %v2377_v12, 0.0  ;;  %1895 = vmatmul.mubr.msk.bf16.gmra.mxu1 %vm423_vm2, %v409_v38 }
  0x51   :  { %v2470_v20 = vadd.f32 %v2210_v30, %v238_v10  ;;  %v1791_v1 = vunpack.c.h.bf16 %v2328_v55  ;;  %v402_v32 = vpack.c.bf16 %v351_v23, %v350_v60  ;;  %v353_v3 = vmax.f32 %v2380_v25, 0.0  ;;  %1898 = vmatprep.mubr.msk.bf16.mxu1 %vm423_vm2, %v410_v63 }
  0x52   :  { %v240_v17 = vmul.f32 %v3225_v18, %v2161_v2  ;;  %v2479_v31 = vadd.f32 %v2210_v30, %v221_v41  ;;  %v310_v14 = vadd.f32 %v2210_v30, %v239_v58  ;;  %v354_v48 = vmax.f32 %v2447_v53, 0.0 }
  0x53   :  { %v355_v34 = vmax.f32 %v2450_v44, 0.0  ;;  %v2487_v12 = vadd.f32 %v2210_v30, %v222_v19  ;;  %v411_v22 = vpack.c.bf16 %v369_v50, %v368_v46  ;;  %v412_v29 = vpack.c.bf16 %v371_v16, %v370_v26 }
  0x54   :  { %v372_v60 = vmax.f32 %v2459_v36, 0.0  ;;  %v311_v25 = vadd.f32 %v2210_v30, %v240_v17  ;;  %v245_v49 = vmul.f32 %v1774_v11, %v2161_v2  ;;  %v373_v41 = vmax.f32 %v2470_v20, 0.0 }
  0x55   :  { %v3226_v23 = vunpack.c.l.bf16 %v2192_v54  ;;  %v246_v61 = vmul.f32 %v1775_v62, %v2161_v2  ;;  %v247_v6 = vmul.f32 %v1778_v33, %v2161_v2  ;;  %v374_v45 = vmax.f32 %v310_v14, 0.0 }
  0x56   :  { %v3227_v47 = vunpack.c.h.bf16 %v2192_v54  ;;  %v243_v11 = vmul.f32 %v1770_v8, %v2161_v2  ;;  %v316_v21 = vadd.f32 %v2210_v30, %v245_v49  ;;  %v244_v15 = vmul.f32 %v1771_v4, %v2161_v2  ;;  %1879 = vmatmul.mubr.msk.bf16.gmra.mxu0 %vm423_vm2, %v401_v52 }
  0x57   :  { %v241_v51 = vmul.f32 %v3226_v23, %v2161_v2  ;;  %v317_v62 = vadd.f32 %v2210_v30, %v246_v61  ;;  %v248_v33 = vmul.f32 %v1779_v37, %v2161_v2  ;;  %v318_v39 = vadd.f32 %v2210_v30, %v247_v6  ;;  %1882 = vmatprep.mubr.msk.bf16.mxu0 %vm423_vm2, %v402_v32 }
  0x58   :  { %v242_v56 = vmul.f32 %v3227_v47, %v2161_v2  ;;  %v375_v54 = vmax.f32 %v311_v25, 0.0  ;;  %v380_v40 = vmax.f32 %v316_v21, 0.0  ;;  %v249_v8 = vmul.f32 %v1782_v5, %v2161_v2  ;;  %1899 = vmatmul.mubr.msk.bf16.gmra.mxu1 %vm423_vm2, %v411_v22 }
  0x59   :  { %v250_v7 = vmul.f32 %v1783_v13, %v2161_v2  ;;  %v381_v27 = vmax.f32 %v317_v62, 0.0  ;;  %v319_v4 = vadd.f32 %v2210_v30, %v248_v33  ;;  %v382_v10 = vmax.f32 %v318_v39, 0.0  ;;  %1902 = vmatprep.mubr.msk.bf16.mxu1 %vm423_vm2, %v412_v29 }
  0x5a   :  { %v251_v42 = vmul.f32 %v1786_v43, %v2161_v2  ;;  %v320_v37 = vadd.f32 %v2210_v30, %v249_v8  ;;  %v252_v5 = vmul.f32 %v1787_v9, %v2161_v2  ;;  %v253_v24 = vmul.f32 %v1790_v28, %v2161_v2 }
  0x5b   :  { %v321_v53 = vadd.f32 %v2210_v30, %v250_v7  ;;  %v417_v13 = vpack.c.bf16 %v381_v27, %v380_v40  ;;  %v383_v43 = vmax.f32 %v319_v4, 0.0  ;;  %v254_v0 = vmul.f32 %v1791_v1, %v2161_v2 }
  0x5c   :  { %v322_v44 = vadd.f32 %v2210_v30, %v251_v42  ;;  %v384_v19 = vmax.f32 %v320_v37, 0.0  ;;  %v323_v35 = vadd.f32 %v2210_v30, %v252_v5  ;;  %v324_v9 = vadd.f32 %v2210_v30, %v253_v24 }
  0x5d   :  { %v385_v57 = vmax.f32 %v321_v53, 0.0  ;;  %v403_v55 = vpack.c.bf16 %v353_v3, %v352_v59  ;;  %v418_v28 = vpack.c.bf16 %v383_v43, %v382_v10  ;;  %v325_v38 = vadd.f32 %v2210_v30, %v254_v0 }
  0x5e   :  { %v386_v58 = vmax.f32 %v322_v44, 0.0  ;;  %v404_v46 = vpack.c.bf16 %v355_v34, %v354_v48  ;;  %v387_v36 = vmax.f32 %v323_v35, 0.0  ;;  %v388_v63 = vmax.f32 %v324_v9, 0.0 }
  0x5f   :  { %v419_v50 = vpack.c.bf16 %v385_v57, %v384_v19  ;;  %v413_v26 = vpack.c.bf16 %v373_v41, %v372_v60  ;;  %v312_v2 = vadd.f32 %v2210_v30, %v241_v51  ;;  %v313_v16 = vadd.f32 %v2210_v30, %v242_v56  ;;  %1883 = vmatmul.mubr.msk.bf16.gmra.mxu0 %vm423_vm2, %v403_v55 }
  0x60   :  { %v389_v18 = vmax.f32 %v325_v38, 0.0  ;;  %v414_v17 = vpack.c.bf16 %v375_v54, %v374_v45  ;;  %v314_v52 = vadd.f32 %v2210_v30, %v243_v11  ;;  %v315_v20 = vadd.f32 %v2210_v30, %v244_v15  ;;  %1886 = vmatprep.mubr.msk.bf16.mxu0 %vm423_vm2, %v404_v46 }
  0x61   :  { %v420_v59 = vpack.c.bf16 %v387_v36, %v386_v58  ;;  %v356_v32 = vmax.f32 %v2479_v31, 0.0  ;;  %v357_v3 = vmax.f32 %v2487_v12, 0.0  ;;  %1903 = vmatmul.mubr.msk.bf16.gmra.mxu1 %vm423_vm2, %v413_v26  ;;  %v376_v14 = vmax.f32 %v312_v2, 0.0 }
  0x62   :  { %v421_v1 = vpack.c.bf16 %v389_v18, %v388_v63  ;;  %v377_v48 = vmax.f32 %v313_v16, 0.0  ;;  %1906 = vmatprep.mubr.msk.bf16.mxu1 %vm423_vm2, %v414_v17  ;;  %v378_v34 = vmax.f32 %v314_v52, 0.0  ;;  %v379_v22 = vmax.f32 %v315_v20, 0.0 }
  0x63   :  { %v405_v29 = vpack.c.bf16 %v357_v3, %v356_v32  ;;  %v1931_v25 = vmov 0.0  }
  0x64   :  { %v415_v30 = vpack.c.bf16 %v377_v48, %v376_v14  ;;  %v416_v60 = vpack.c.bf16 %v379_v22, %v378_v34  ;;  %54 = vst.msk [vmem:[#allocation4] sm:$0x1] %vm53_vm4, %v1931_v25  ;;  %55 = vst.msk [vmem:[#allocation5] sm:$0x1] %vm53_vm4, %v1931_v25 }
  0x67   :  { %1887 = vmatmul.mubr.msk.bf16.gmra.mxu0 %vm423_vm2, %v405_v29 }
  0x69   :  { %1907 = vmatmul.mubr.msk.bf16.gmra.mxu1 %vm423_vm2, %v415_v30 }
  0x6a   :  { %1910 = vmatprep.mubr.msk.bf16.mxu1 %vm423_vm2, %v416_v60 }
  0x71   :  { %1911 = vmatmul.mubr.msk.bf16.gmra.mxu1 %vm423_vm2, %v417_v13 }
  0x72   :  { %1914 = vmatprep.mubr.msk.bf16.mxu1 %vm423_vm2, %v418_v28 }
  0x79   :  { %1915 = vmatmul.mubr.msk.bf16.gmra.mxu1 %vm423_vm2, %v419_v50 }
  0x7a   :  { %1918 = vmatprep.mubr.msk.bf16.mxu1 %vm423_vm2, %v420_v59 }
  0x81   :  { %1919 = vmatmul.mubr.msk.bf16.gmra.mxu1 %vm423_vm2, %v421_v1 }
  0xee   :  { %v1860_v31 = vpop.f32.mrf.mxu0 }
  0xef   :  { %v1602_v12 = vpack.c.bf16 %v1860_v31, %v1860_v31  ;;  %v1275_v6 = vmul.f32 %v1860_v31, %v1860_v31  ;;  %v1139_v15 = vsel %vm1135_vm5, %v1860_v31, 0.0 }
  0xf0   :  { %v558_v49 = vpop.f32.mrf.mxu0 }
  0xf1   :  { %1072 = vst.msk [vmem:[%s3198_s8 + $0x8] sm:$0xf] %vm1069_vm3, %v1602_v12  ;;  %v1600_v41 = vpack.c.bf16 %v558_v49, %v558_v49  ;;  %v1273_v51 = vmul.f32 %v558_v49, %v558_v49  ;;  %v1136_v47 = vsel %vm1135_vm5, %v558_v49, 0.0  ;;  %v1340_v10 = vsel %vm1135_vm5, %v1275_v6, 0.0 }
  0xf2   :  { %v1861_v23 = vpop.f32.mrf.mxu0 }
  0xf3   :  { %1070 = vst.msk [vmem:[%s3198_s8] sm:$0xf] %vm1069_vm3, %v1600_v41  ;;  %v1603_v61 = vpack.c.bf16 %v1861_v23, %v1861_v23  ;;  %v1337_v39 = vsel %vm1135_vm5, %v1273_v51, 0.0  ;;  %v1276_v54 = vmul.f32 %v1861_v23, %v1861_v23  ;;  %v1141_v42 = vsel %vm1135_vm5, %v1861_v23, 0.0 }
  0xf4   :  { %v561_v45 = vpop.f32.mrf.mxu0 }
  0xf5   :  { %1073 = vst.msk [vmem:[%s3198_s8 + $0xc] sm:$0xf] %vm1069_vm3, %v1603_v61  ;;  %v1601_v56 = vpack.c.bf16 %v561_v45, %v561_v45  ;;  %v1137_v11 = vsel %vm1135_vm5, %v561_v45, 0.0  ;;  %v1274_v21 = vmul.f32 %v561_v45, %v561_v45  ;;  %v1342_v43 = vsel %vm1135_vm5, %v1276_v54, 0.0 }
  0xf6   :  { %v1138_v62 = vadd.f32 %v1137_v11, %v1136_v47  ;;  %v1864_v33 = vpop.f32.mrf.mxu0 }
  0xf7   :  { %1071 = vst.msk [vmem:[%s3198_s8 + $0x4] sm:$0xf] %vm1069_vm3, %v1601_v56  ;;  %v1338_v40 = vsel %vm1135_vm5, %v1274_v21, 0.0  ;;  %v1606_v8 = vpack.c.bf16 %v1864_v33, %v1864_v33  ;;  %v1279_v19 = vmul.f32 %v1864_v33, %v1864_v33  ;;  %v1147_v63 = vsel %vm1135_vm5, %v1864_v33, 0.0 }
  0xf8   :  { %v1140_v7 = vadd.f32 %v1139_v15, %v1138_v62  ;;  %v1339_v27 = vadd.f32 %v1338_v40, %v1337_v39  ;;  %v574_v4 = vpop.f32.mrf.mxu0 }
  0xf9   :  { %1076 = vst.msk [vmem:[%s3198_s8 + $0x18] sm:$0xf] %vm1069_vm3, %v1606_v8  ;;  %v1604_v37 = vpack.c.bf16 %v574_v4, %v574_v4  ;;  %v1277_v53 = vmul.f32 %v574_v4, %v574_v4  ;;  %v1143_v44 = vsel %vm1135_vm5, %v574_v4, 0.0  ;;  %v1348_v20 = vsel %vm1135_vm5, %v1279_v19, 0.0 }
  0xfa   :  { %v1341_v5 = vadd.f32 %v1340_v10, %v1339_v27  ;;  %v1142_v24 = vadd.f32 %v1141_v42, %v1140_v7  ;;  %v1865_v13 = vpop.f32.mrf.mxu0 }
  0xfb   :  { %1074 = vst.msk [vmem:[%s3198_s8 + $0x10] sm:$0xf] %vm1069_vm3, %v1604_v37  ;;  %v1607_v0 = vpack.c.bf16 %v1865_v13, %v1865_v13  ;;  %v1344_v55 = vsel %vm1135_vm5, %v1277_v53, 0.0  ;;  %v1280_v26 = vmul.f32 %v1865_v13, %v1865_v13  ;;  %v1149_v59 = vsel %vm1135_vm5, %v1865_v13, 0.0 }
  0xfc   :  { %v1144_v57 = vadd.f32 %v1143_v44, %v1142_v24  ;;  %v1343_v35 = vadd.f32 %v1342_v43, %v1341_v5  ;;  %v577_v9 = vpop.f32.mrf.mxu0 }
  0xfd   :  { %1077 = vst.msk [vmem:[%s3198_s8 + $0x1c] sm:$0xf] %vm1069_vm3, %v1607_v0  ;;  %v1605_v28 = vpack.c.bf16 %v577_v9, %v577_v9  ;;  %v1145_v58 = vsel %vm1135_vm5, %v577_v9, 0.0  ;;  %v1278_v38 = vmul.f32 %v577_v9, %v577_v9  ;;  %v1350_v34 = vsel %vm1135_vm5, %v1280_v26, 0.0 }
  0xfe   :  { %v1345_v46 = vadd.f32 %v1344_v55, %v1343_v35  ;;  %v1146_v50 = vadd.f32 %v1145_v58, %v1144_v57  ;;  %v1868_v36 = vpop.f32.mrf.mxu0 }
  0xff   :  { %1075 = vst.msk [vmem:[%s3198_s8 + $0x14] sm:$0xf] %vm1069_vm3, %v1605_v28  ;;  %v1346_v2 = vsel %vm1135_vm5, %v1278_v38, 0.0  ;;  %v1610_v16 = vpack.c.bf16 %v1868_v36, %v1868_v36  ;;  %v1283_v30 = vmul.f32 %v1868_v36, %v1868_v36  ;;  %v1155_v45 = vsel %vm1135_vm5, %v1868_v36, 0.0 }
 0x100   :  { %v1148_v18 = vadd.f32 %v1147_v63, %v1146_v50  ;;  %v1347_v17 = vadd.f32 %v1346_v2, %v1345_v46  ;;  %v590_v52 = vpop.f32.mrf.mxu0 }
 0x101   :  { %1080 = vst.msk [vmem:[%s3198_s8 + $0x28] sm:$0xf] %vm1069_vm3, %v1610_v16  ;;  %v1608_v1 = vpack.c.bf16 %v590_v52, %v590_v52  ;;  %v1281_v32 = vmul.f32 %v590_v52, %v590_v52  ;;  %v1151_v22 = vsel %vm1135_vm5, %v590_v52, 0.0  ;;  %v1356_v54 = vsel %vm1135_vm5, %v1283_v30, 0.0 }
 0x102   :  { %v1349_v3 = vadd.f32 %v1348_v20, %v1347_v17  ;;  %v1150_v14 = vadd.f32 %v1149_v59, %v1148_v18  ;;  %v1869_v48 = vpop.f32.mrf.mxu0 }
 0x103   :  { %1078 = vst.msk [vmem:[%s3198_s8 + $0x20] sm:$0xf] %vm1069_vm3, %v1608_v1  ;;  %v1611_v29 = vpack.c.bf16 %v1869_v48, %v1869_v48  ;;  %v1352_v25 = vsel %vm1135_vm5, %v1281_v32, 0.0  ;;  %v1284_v47 = vmul.f32 %v1869_v48, %v1869_v48  ;;  %v1157_v40 = vsel %vm1135_vm5, %v1869_v48, 0.0 }
 0x104   :  { %v1152_v60 = vadd.f32 %v1151_v22, %v1150_v14  ;;  %v1351_v31 = vadd.f32 %v1350_v34, %v1349_v3  ;;  %v593_v12 = vpop.f32.mrf.mxu0 }
 0x105   :  { %1081 = vst.msk [vmem:[%s3198_s8 + $0x2c] sm:$0xf] %vm1069_vm3, %v1611_v29  ;;  %v1609_v49 = vpack.c.bf16 %v593_v12, %v593_v12  ;;  %v1153_v41 = vsel %vm1135_vm5, %v593_v12, 0.0  ;;  %v1282_v23 = vmul.f32 %v593_v12, %v593_v12  ;;  %v1358_v53 = vsel %vm1135_vm5, %v1284_v47, 0.0 }
 0x106   :  { %v1353_v51 = vadd.f32 %v1352_v25, %v1351_v31  ;;  %v1154_v61 = vadd.f32 %v1153_v41, %v1152_v60  ;;  %v1872_v6 = vpop.f32.mrf.mxu0 }
 0x107   :  { %1079 = vst.msk [vmem:[%s3198_s8 + $0x24] sm:$0xf] %vm1069_vm3, %v1609_v49  ;;  %v1354_v56 = vsel %vm1135_vm5, %v1282_v23, 0.0  ;;  %v1614_v11 = vpack.c.bf16 %v1872_v6, %v1872_v6  ;;  %v1287_v43 = vmul.f32 %v1872_v6, %v1872_v6  ;;  %v1163_v36 = vsel %vm1135_vm5, %v1872_v6, 0.0 }
 0x108   :  { %v2637_v21 = vpop.f32.mrf.mxu1  ;;  %v1156_v15 = vadd.f32 %v1155_v45, %v1154_v61  ;;  %v1355_v62 = vadd.f32 %v1354_v56, %v1353_v51  ;;  %v606_v33 = vpop.f32.mrf.mxu0 }
 0x109   :  { %v1634_v39 = vpack.c.bf16 %v2637_v21, %v2637_v21  ;;  %1084 = vst.msk [vmem:[%s3198_s8 + $0x38] sm:$0xf] %vm1069_vm3, %v1614_v11  ;;  %v1612_v8 = vpack.c.bf16 %v606_v33, %v606_v33  ;;  %v1285_v7 = vmul.f32 %v606_v33, %v606_v33  ;;  %v1159_v5 = vsel %vm1135_vm5, %v606_v33, 0.0 }
 0x10a   :  { %v2647_v27 = vpop.f32.mrf.mxu1  ;;  %v1357_v4 = vadd.f32 %v1356_v54, %v1355_v62  ;;  %v1158_v10 = vadd.f32 %v1157_v40, %v1156_v15  ;;  %v1873_v42 = vpop.f32.mrf.mxu0  ;;  %v1364_v20 = vsel %vm1135_vm5, %v1287_v43, 0.0 }
 0x10b   :  { %1104 = vst.msk [vmem:[%s3198_s8 + $0x88] sm:$0xf] %vm1069_vm3, %v1634_v39  ;;  %v1632_v37 = vpack.c.bf16 %v2647_v27, %v2647_v27  ;;  %1082 = vst.msk [vmem:[%s3198_s8 + $0x30] sm:$0xf] %vm1069_vm3, %v1612_v8  ;;  %v1615_v24 = vpack.c.bf16 %v1873_v42, %v1873_v42  ;;  %v1360_v57 = vsel %vm1135_vm5, %v1285_v7, 0.0  ;;  %v1288_v63 = vmul.f32 %v1873_v42, %v1873_v42 }
 0x10c   :  { %v2661_v13 = vpop.f32.mrf.mxu1  ;;  %v1160_v44 = vadd.f32 %v1159_v5, %v1158_v10  ;;  %v1359_v0 = vadd.f32 %v1358_v53, %v1357_v4  ;;  %v609_v19 = vpop.f32.mrf.mxu0  ;;  %v1165_v59 = vsel %vm1135_vm5, %v1873_v42, 0.0 }
 0x10d   :  { %1102 = vst.msk [vmem:[%s3198_s8 + $0x80] sm:$0xf] %vm1069_vm3, %v1632_v37  ;;  %1085 = vst.msk [vmem:[%s3198_s8 + $0x3c] sm:$0xf] %vm1069_vm3, %v1615_v24  ;;  %v1613_v35 = vpack.c.bf16 %v609_v19, %v609_v19  ;;  %v1161_v9 = vsel %vm1135_vm5, %v609_v19, 0.0  ;;  %v1286_v55 = vmul.f32 %v609_v19, %v609_v19  ;;  %v1635_v50 = vpack.c.bf16 %v2661_v13, %v2661_v13 }
 0x10e   :  { %v2673_v28 = vpop.f32.mrf.mxu1  ;;  %v1361_v58 = vadd.f32 %v1360_v57, %v1359_v0  ;;  %v1162_v38 = vadd.f32 %v1161_v9, %v1160_v44  ;;  %v1876_v46 = vpop.f32.mrf.mxu0  ;;  %v1366_v29 = vsel %vm1135_vm5, %v1288_v63, 0.0 }
 0x10f   :  { %1083 = vst.msk [vmem:[%s3198_s8 + $0x34] sm:$0xf] %vm1069_vm3, %v1613_v35  ;;  %v1362_v26 = vsel %vm1135_vm5, %v1286_v55, 0.0  ;;  %v1618_v2 = vpack.c.bf16 %v1876_v46, %v1876_v46  ;;  %1105 = vst.msk [vmem:[%s3198_s8 + $0x8c] sm:$0xf] %vm1069_vm3, %v1635_v50  ;;  %v1633_v22 = vpack.c.bf16 %v2673_v28, %v2673_v28  ;;  %v1291_v12 = vmul.f32 %v1876_v46, %v1876_v46 }
 0x110   :  { %v2683_v16 = vpop.f32.mrf.mxu1  ;;  %v1164_v18 = vadd.f32 %v1163_v36, %v1162_v38  ;;  %v1363_v17 = vadd.f32 %v1362_v26, %v1361_v58  ;;  %v622_v52 = vpop.f32.mrf.mxu0  ;;  %v1171_v62 = vsel %vm1135_vm5, %v1876_v46, 0.0 }
 0x111   :  { %1088 = vst.msk [vmem:[%s3198_s8 + $0x48] sm:$0xf] %vm1069_vm3, %v1618_v2  ;;  %v1616_v1 = vpack.c.bf16 %v622_v52, %v622_v52  ;;  %v1289_v32 = vmul.f32 %v622_v52, %v622_v52  ;;  %v1167_v30 = vsel %vm1135_vm5, %v622_v52, 0.0  ;;  %1103 = vst.msk [vmem:[%s3198_s8 + $0x84] sm:$0xf] %vm1069_vm3, %v1633_v22  ;;  %v1638_v15 = vpack.c.bf16 %v2683_v16, %v2683_v16 }
 0x112   :  { %v2695_v3 = vpop.f32.mrf.mxu1  ;;  %v1365_v14 = vadd.f32 %v1364_v20, %v1363_v17  ;;  %v1166_v48 = vadd.f32 %v1165_v59, %v1164_v18  ;;  %v1877_v34 = vpop.f32.mrf.mxu0  ;;  %v1372_v10 = vsel %vm1135_vm5, %v1291_v12, 0.0 }
 0x113   :  { %1086 = vst.msk [vmem:[%s3198_s8 + $0x40] sm:$0xf] %vm1069_vm3, %v1616_v1  ;;  %v1619_v60 = vpack.c.bf16 %v1877_v34, %v1877_v34  ;;  %v1368_v23 = vsel %vm1135_vm5, %v1289_v32, 0.0  ;;  %v1292_v33 = vmul.f32 %v1877_v34, %v1877_v34  ;;  %1108 = vst.msk [vmem:[%s3198_s8 + $0x98] sm:$0xf] %vm1069_vm3, %v1638_v15  ;;  %v1173_v42 = vsel %vm1135_vm5, %v1877_v34, 0.0 }
 0x114   :  { %v2705_v31 = vpop.f32.mrf.mxu1  ;;  %v1168_v25 = vadd.f32 %v1167_v30, %v1166_v48  ;;  %v1367_v49 = vadd.f32 %v1366_v29, %v1365_v14  ;;  %v625_v41 = vpop.f32.mrf.mxu0  ;;  %v1636_v0 = vpack.c.bf16 %v2695_v3, %v2695_v3 }
 0x115   :  { %1089 = vst.msk [vmem:[%s3198_s8 + $0x4c] sm:$0xf] %vm1069_vm3, %v1619_v60  ;;  %v1617_v51 = vpack.c.bf16 %v625_v41, %v625_v41  ;;  %v1169_v61 = vsel %vm1135_vm5, %v625_v41, 0.0  ;;  %v1290_v6 = vmul.f32 %v625_v41, %v625_v41  ;;  %v1374_v19 = vsel %vm1135_vm5, %v1292_v33, 0.0 }
 0x116   :  { %v2717_v45 = vpop.f32.mrf.mxu1  ;;  %v1369_v47 = vadd.f32 %v1368_v23, %v1367_v49  ;;  %v1170_v56 = vadd.f32 %v1169_v61, %v1168_v25  ;;  %v1880_v11 = vpop.f32.mrf.mxu0  ;;  %1106 = vst.msk [vmem:[%s3198_s8 + $0x90] sm:$0xf] %vm1069_vm3, %v1636_v0  ;;  %v1639_v20 = vpack.c.bf16 %v2705_v31, %v2705_v31 }
 0x117   :  { %1087 = vst.msk [vmem:[%s3198_s8 + $0x44] sm:$0xf] %vm1069_vm3, %v1617_v51  ;;  %v1370_v39 = vsel %vm1135_vm5, %v1290_v6, 0.0  ;;  %v1622_v54 = vpack.c.bf16 %v1880_v11, %v1880_v11  ;;  %v1295_v55 = vmul.f32 %v1880_v11, %v1880_v11  ;;  %v1179_v59 = vsel %vm1135_vm5, %v1880_v11, 0.0 }
 0x118   :  { %v2727_v40 = vpop.f32.mrf.mxu1  ;;  %v1172_v8 = vadd.f32 %v1171_v62, %v1170_v56  ;;  %v1371_v7 = vadd.f32 %v1370_v39, %v1369_v47  ;;  %v638_v4 = vpop.f32.mrf.mxu0  ;;  %1109 = vst.msk [vmem:[%s3198_s8 + $0x9c] sm:$0xf] %vm1069_vm3, %v1639_v20  ;;  %v1637_v61 = vpack.c.bf16 %v2717_v45, %v2717_v45 }
 0x119   :  { %1092 = vst.msk [vmem:[%s3198_s8 + $0x58] sm:$0xf] %vm1069_vm3, %v1622_v54  ;;  %v1620_v37 = vpack.c.bf16 %v638_v4, %v638_v4  ;;  %v1293_v53 = vmul.f32 %v638_v4, %v638_v4  ;;  %v1175_v57 = vsel %vm1135_vm5, %v638_v4, 0.0  ;;  %v1380_v30 = vsel %vm1135_vm5, %v1295_v55, 0.0 }
 0x11a   :  { %v2739_v5 = vpop.f32.mrf.mxu1  ;;  %v1373_v24 = vadd.f32 %v1372_v10, %v1371_v7  ;;  %v1174_v43 = vadd.f32 %v1173_v42, %v1172_v8  ;;  %v1881_v44 = vpop.f32.mrf.mxu0  ;;  %1107 = vst.msk [vmem:[%s3198_s8 + $0x94] sm:$0xf] %vm1069_vm3, %v1637_v61 }
 0x11b   :  { %1090 = vst.msk [vmem:[%s3198_s8 + $0x50] sm:$0xf] %vm1069_vm3, %v1620_v37  ;;  %v1623_v35 = vpack.c.bf16 %v1881_v44, %v1881_v44  ;;  %v1376_v50 = vsel %vm1135_vm5, %v1293_v53, 0.0  ;;  %v1296_v1 = vmul.f32 %v1881_v44, %v1881_v44  ;;  %v1181_v60 = vsel %vm1135_vm5, %v1881_v44, 0.0 }
 0x11c   :  { %v2749_v9 = vpop.f32.mrf.mxu1  ;;  %v1176_v58 = vadd.f32 %v1175_v57, %v1174_v43  ;;  %v1375_v38 = vadd.f32 %v1374_v19, %v1373_v24  ;;  %v641_v46 = vpop.f32.mrf.mxu0  ;;  %v1642_v24 = vpack.c.bf16 %v2727_v40, %v2727_v40 }
 0x11d   :  { %1093 = vst.msk [vmem:[%s3198_s8 + $0x5c] sm:$0xf] %vm1069_vm3, %v1623_v35  ;;  %v1621_v36 = vpack.c.bf16 %v641_v46, %v641_v46  ;;  %v1177_v63 = vsel %vm1135_vm5, %v641_v46, 0.0  ;;  %v1294_v26 = vmul.f32 %v641_v46, %v641_v46  ;;  %v1382_v6 = vsel %vm1135_vm5, %v1296_v1, 0.0 }
 0x11e   :  { %v2761_v2 = vpop.f32.mrf.mxu1  ;;  %v1377_v18 = vadd.f32 %v1376_v50, %v1375_v38  ;;  %v1178_v17 = vadd.f32 %v1177_v63, %v1176_v58  ;;  %1112 = vst.msk [vmem:[%s3198_s8 + $0xa8] sm:$0xf] %vm1069_vm3, %v1642_v24  ;;  %v1643_v61 = vpack.c.bf16 %v2749_v9, %v2749_v9 }
 0x11f   :  { %v1884_v52 = vpop.f32.mrf.mxu0  ;;  %1091 = vst.msk [vmem:[%s3198_s8 + $0x54] sm:$0xf] %vm1069_vm3, %v1621_v36  ;;  %v1378_v32 = vsel %vm1135_vm5, %v1294_v26, 0.0 }
 0x120   :  { %v1626_v14 = vpack.c.bf16 %v1884_v52, %v1884_v52  ;;  %v1180_v34 = vadd.f32 %v1179_v59, %v1178_v17  ;;  %v1379_v22 = vadd.f32 %v1378_v32, %v1377_v18  ;;  %v1299_v15 = vmul.f32 %v1884_v52, %v1884_v52  ;;  %1113 = vst.msk [vmem:[%s3198_s8 + $0xac] sm:$0xf] %vm1069_vm3, %v1643_v61 }
 0x121   :  { %v2771_v48 = vpop.f32.mrf.mxu1  ;;  %v654_v29 = vpop.f32.mrf.mxu0  ;;  %v1187_v43 = vsel %vm1135_vm5, %v1884_v52, 0.0  ;;  %v1640_v52 = vpack.c.bf16 %v2739_v5, %v2739_v5  ;;  %v1310_v61 = vmul.f32 %v2717_v45, %v2717_v45 }
 0x122   :  { %1096 = vst.msk [vmem:[%s3198_s8 + $0x68] sm:$0xf] %vm1069_vm3, %v1626_v14  ;;  %v1624_v12 = vpack.c.bf16 %v654_v29, %v654_v29  ;;  %v1297_v25 = vmul.f32 %v654_v29, %v654_v29  ;;  %v1381_v41 = vadd.f32 %v1380_v30, %v1379_v22  ;;  %v1182_v23 = vadd.f32 %v1181_v60, %v1180_v34 }
 0x123   :  { %v2783_v49 = vpop.f32.mrf.mxu1  ;;  %v1885_v51 = vpop.f32.mrf.mxu0  ;;  %v1183_v47 = vsel %vm1135_vm5, %v654_v29, 0.0  ;;  %v1388_v38 = vsel %vm1135_vm5, %v1299_v15, 0.0  ;;  %1110 = vst.msk [vmem:[%s3198_s8 + $0xa0] sm:$0xf] %vm1069_vm3, %v1640_v52  ;;  %v1641_v15 = vpack.c.bf16 %v2761_v2, %v2761_v2  ;;  %v1203_v52 = vsel %vm1135_vm5, %v2637_v21, 0.0 }
 0x124   :  { %1094 = vst.msk [vmem:[%s3198_s8 + $0x60] sm:$0xf] %vm1069_vm3, %v1624_v12  ;;  %v1627_v56 = vpack.c.bf16 %v1885_v51, %v1885_v51  ;;  %v1184_v62 = vadd.f32 %v1183_v47, %v1182_v23  ;;  %v1383_v33 = vadd.f32 %v1382_v6, %v1381_v41  ;;  %v1384_v54 = vsel %vm1135_vm5, %v1297_v25, 0.0 }
 0x125   :  { %v2793_v11 = vpop.f32.mrf.mxu1  ;;  %v657_v39 = vpop.f32.mrf.mxu0  ;;  %v1300_v44 = vmul.f32 %v1885_v51, %v1885_v51  ;;  %v1189_v46 = vsel %vm1135_vm5, %v1885_v51, 0.0  ;;  %1111 = vst.msk [vmem:[%s3198_s8 + $0xa4] sm:$0xf] %vm1069_vm3, %v1641_v15  ;;  %v1644_v24 = vpack.c.bf16 %v2783_v49, %v2783_v49 }
 0x126   :  { %1097 = vst.msk [vmem:[%s3198_s8 + $0x6c] sm:$0xf] %vm1069_vm3, %v1627_v56  ;;  %v1625_v8 = vpack.c.bf16 %v657_v39, %v657_v39  ;;  %v1185_v7 = vsel %vm1135_vm5, %v657_v39, 0.0  ;;  %v1298_v4 = vmul.f32 %v657_v39, %v657_v39  ;;  %v1385_v42 = vadd.f32 %v1384_v54, %v1383_v33 }
 0x127   :  { %v2805_v10 = vpop.f32.mrf.mxu1  ;;  %v1186_v37 = vadd.f32 %v1185_v7, %v1184_v62  ;;  %v1888_v53 = vpop.f32.mrf.mxu0  ;;  %v1390_v20 = vsel %vm1135_vm5, %v1300_v44, 0.0  ;;  %v1305_v7 = vmul.f32 %v2647_v27, %v2647_v27  ;;  %v1199_v44 = vsel %vm1135_vm5, %v2647_v27, 0.0  ;;  %1114 = vst.msk [vmem:[%s3198_s8 + $0xb0] sm:$0xf] %vm1069_vm3, %v1644_v24 }
 0x128   :  { %1095 = vst.msk [vmem:[%s3198_s8 + $0x64] sm:$0xf] %vm1069_vm3, %v1625_v8  ;;  %v1386_v0 = vsel %vm1135_vm5, %v1298_v4, 0.0  ;;  %v1630_v19 = vpack.c.bf16 %v1888_v53, %v1888_v53  ;;  %v1303_v14 = vmul.f32 %v1888_v53, %v1888_v53  ;;  %v1195_v6 = vsel %vm1135_vm5, %v1888_v53, 0.0 }
 0x129   :  { %v2815_v57 = vpop.f32.mrf.mxu1  ;;  %v1188_v35 = vadd.f32 %v1187_v43, %v1186_v37  ;;  %v1387_v55 = vadd.f32 %v1386_v0, %v1385_v42  ;;  %v670_v58 = vpop.f32.mrf.mxu0  ;;  %v1646_v4 = vpack.c.bf16 %v2771_v48, %v2771_v48  ;;  %v1306_v0 = vmul.f32 %v2673_v28, %v2673_v28 }
 0x12a   :  { %1100 = vst.msk [vmem:[%s3198_s8 + $0x78] sm:$0xf] %vm1069_vm3, %v1630_v19  ;;  %v1628_v50 = vpack.c.bf16 %v670_v58, %v670_v58  ;;  %v1301_v36 = vmul.f32 %v670_v58, %v670_v58  ;;  %v1191_v59 = vsel %vm1135_vm5, %v670_v58, 0.0  ;;  %v1396_v54 = vsel %vm1135_vm5, %v1303_v14, 0.0 }
 0x12b   :  { %v2827_v63 = vpop.f32.mrf.mxu1  ;;  %v1389_v26 = vadd.f32 %v1388_v38, %v1387_v55  ;;  %v1190_v18 = vadd.f32 %v1189_v46, %v1188_v35  ;;  %v1889_v17 = vpop.f32.mrf.mxu0  ;;  %1116 = vst.msk [vmem:[%s3198_s8 + $0xb8] sm:$0xf] %vm1069_vm3, %v1646_v4  ;;  %v1647_v19 = vpack.c.bf16 %v2793_v11, %v2793_v11  ;;  %v1307_v27 = vmul.f32 %v2637_v21, %v2637_v21 }
 0x12c   :  { %1098 = vst.msk [vmem:[%s3198_s8 + $0x70] sm:$0xf] %vm1069_vm3, %v1628_v50  ;;  %v1631_v1 = vpack.c.bf16 %v1889_v17, %v1889_v17  ;;  %v1392_v30 = vsel %vm1135_vm5, %v1301_v36, 0.0  ;;  %v1304_v47 = vmul.f32 %v1889_v17, %v1889_v17  ;;  %v1197_v8 = vsel %vm1135_vm5, %v1889_v17, 0.0 }
 0x12d   :  { %v2837_v32 = vpop.f32.mrf.mxu1  ;;  %v1192_v34 = vadd.f32 %v1191_v59, %v1190_v18  ;;  %v1391_v22 = vadd.f32 %v1390_v20, %v1389_v26  ;;  %v673_v29 = vpop.f32.mrf.mxu0  ;;  %v1400_v38 = vsel %vm1135_vm5, %v1305_v7, 0.0  ;;  %v1201_v46 = vsel %vm1135_vm5, %v2673_v28, 0.0  ;;  %1117 = vst.msk [vmem:[%s3198_s8 + $0xbc] sm:$0xf] %vm1069_vm3, %v1647_v19 }
 0x12e   :  { %1101 = vst.msk [vmem:[%s3198_s8 + $0x7c] sm:$0xf] %vm1069_vm3, %v1631_v1  ;;  %v1629_v60 = vpack.c.bf16 %v673_v29, %v673_v29  ;;  %v1193_v12 = vsel %vm1135_vm5, %v673_v29, 0.0  ;;  %v1302_v25 = vmul.f32 %v673_v29, %v673_v29  ;;  %v1398_v43 = vsel %vm1135_vm5, %v1304_v47, 0.0 }
 0x12f   :  { %v2849_v41 = vpop.f32.mrf.mxu1  ;;  %v1393_v23 = vadd.f32 %v1392_v30, %v1391_v22  ;;  %v1194_v51 = vadd.f32 %v1193_v12, %v1192_v34  ;;  %v1645_v50 = vpack.c.bf16 %v2805_v10, %v2805_v10  ;;  %v1650_v17 = vpack.c.bf16 %v2815_v57, %v2815_v57 }
 0x130   :  { %1099 = vst.msk [vmem:[%s3198_s8 + $0x74] sm:$0xf] %vm1069_vm3, %v1629_v60  ;;  %v1394_v56 = vsel %vm1135_vm5, %v1302_v25, 0.0  ;;  %v1308_v28 = vmul.f32 %v2661_v13, %v2661_v13  ;;  %v1402_v20 = vsel %vm1135_vm5, %v1306_v0, 0.0  ;;  %v1648_v59 = vpack.c.bf16 %v2827_v63, %v2827_v63 }
 0x131   :  { %v2861_v62 = vpop.f32.mrf.mxu1  ;;  %v1196_v33 = vadd.f32 %v1195_v6, %v1194_v51  ;;  %v1395_v39 = vadd.f32 %v1394_v56, %v1393_v23  ;;  %1115 = vst.msk [vmem:[%s3198_s8 + $0xb4] sm:$0xf] %vm1069_vm3, %v1645_v50  ;;  %1120 = vst.msk [vmem:[%s3198_s8 + $0xc8] sm:$0xf] %vm1069_vm3, %v1650_v17  ;;  %v1404_v21 = vsel %vm1135_vm5, %v1307_v27, 0.0  ;;  %v1205_v22 = vsel %vm1135_vm5, %v2661_v13, 0.0 }
 0x132   :  { %v1309_v29 = vmul.f32 %v2695_v3, %v2695_v3  ;;  %1118 = vst.msk [vmem:[%s3198_s8 + $0xc0] sm:$0xf] %vm1069_vm3, %v1648_v59  ;;  %v1651_v30 = vpack.c.bf16 %v2837_v32, %v2837_v32  ;;  %v1649_v23 = vpack.c.bf16 %v2849_v41, %v2849_v41  ;;  %v1406_v13 = vsel %vm1135_vm5, %v1308_v28, 0.0 }
 0x133   :  { %v2877_v42 = vpop.f32.mrf.mxu1  ;;  %v1198_v37 = vadd.f32 %v1197_v8, %v1196_v33  ;;  %v1397_v53 = vadd.f32 %v1396_v54, %v1395_v39  ;;  %v1207_v51 = vsel %vm1135_vm5, %v2695_v3, 0.0  ;;  %v1654_v6 = vpack.c.bf16 %v2861_v62, %v2861_v62 }
 0x134   :  { %1121 = vst.msk [vmem:[%s3198_s8 + $0xcc] sm:$0xf] %vm1069_vm3, %v1651_v30  ;;  %1119 = vst.msk [vmem:[%s3198_s8 + $0xc4] sm:$0xf] %vm1069_vm3, %v1649_v23  ;;  %v1311_v3 = vmul.f32 %v2683_v16, %v2683_v16  ;;  %v1408_v33 = vsel %vm1135_vm5, %v1309_v29, 0.0  ;;  %v1209_v39 = vsel %vm1135_vm5, %v2717_v45, 0.0  ;;  %v1652_v54 = vpack.c.bf16 %v2877_v42, %v2877_v42 }
 0x135   :  { %v2892_v35 = vpop.f32.mrf.mxu1  ;;  %v1399_v55 = vadd.f32 %v1398_v43, %v1397_v53  ;;  %v1200_v58 = vadd.f32 %v1199_v44, %v1198_v37  ;;  %1124 = vst.msk [vmem:[%s3198_s8 + $0xd8] sm:$0xf] %vm1069_vm3, %v1654_v6  ;;  %v1211_v53 = vsel %vm1135_vm5, %v2683_v16, 0.0  ;;  %v1312_v45 = vmul.f32 %v2705_v31, %v2705_v31 }
 0x136   :  { %v1655_v37 = vpack.c.bf16 %v2892_v35, %v2892_v35  ;;  %v1410_v24 = vsel %vm1135_vm5, %v1310_v61, 0.0  ;;  %1122 = vst.msk [vmem:[%s3198_s8 + $0xd0] sm:$0xf] %vm1069_vm3, %v1652_v54  ;;  %v1412_v16 = vsel %vm1135_vm5, %v1311_v3, 0.0  ;;  %v1314_v17 = vmul.f32 %v2761_v2, %v2761_v2 }
 0x137   :  { %v2909_v36 = vpop.f32.mrf.mxu1  ;;  %v1202_v26 = vadd.f32 %v1201_v46, %v1200_v58  ;;  %v1401_v18 = vadd.f32 %v1400_v38, %v1399_v55  ;;  %v1213_v55 = vsel %vm1135_vm5, %v2705_v31, 0.0  ;;  %v1313_v58 = vmul.f32 %v2739_v5, %v2739_v5 }
 0x138   :  { %v1653_v43 = vpack.c.bf16 %v2909_v36, %v2909_v36  ;;  %1125 = vst.msk [vmem:[%s3198_s8 + $0xdc] sm:$0xf] %vm1069_vm3, %v1655_v37  ;;  %v1414_v31 = vsel %vm1135_vm5, %v1312_v45, 0.0  ;;  %v1221_v6 = vsel %vm1135_vm5, %v2749_v9, 0.0  ;;  %v1225_v45 = vsel %vm1135_vm5, %v2805_v10, 0.0 }
 0x139   :  { %v2924_v1 = vpop.f32.mrf.mxu1  ;;  %v1204_v14 = vadd.f32 %v1203_v52, %v1202_v26  ;;  %v1403_v34 = vadd.f32 %v1402_v20, %v1401_v18  ;;  %v1215_v18 = vsel %vm1135_vm5, %v2739_v5, 0.0  ;;  %v1315_v5 = vmul.f32 %v2727_v40, %v2727_v40 }
 0x13a   :  { %1123 = vst.msk [vmem:[%s3198_s8 + $0xd4] sm:$0xf] %vm1069_vm3, %v1653_v43  ;;  %v1658_v27 = vpack.c.bf16 %v2924_v1, %v2924_v1 }
 0x13b   :  { %v2941_v60 = vpop.f32.mrf.mxu1  ;;  %v1405_v12 = vadd.f32 %v1404_v21, %v1403_v34  ;;  %v1206_v25 = vadd.f32 %v1205_v22, %v1204_v14  ;;  %v1416_v14 = vsel %vm1135_vm5, %v1313_v58, 0.0  ;;  %v1217_v34 = vsel %vm1135_vm5, %v2761_v2, 0.0 }
 0x13c   :  { %v1656_v26 = vpack.c.bf16 %v2941_v60, %v2941_v60  ;;  %1128 = vst.msk [vmem:[%s3198_s8 + $0xe8] sm:$0xf] %vm1069_vm3, %v1658_v27  ;;  %v1418_v2 = vsel %vm1135_vm5, %v1314_v17, 0.0 }
 0x13d   :  { %v2956_v47 = vpop.f32.mrf.mxu1  ;;  %v1208_v56 = vadd.f32 %v1207_v51, %v1206_v25  ;;  %v1407_v15 = vadd.f32 %v1406_v13, %v1405_v12  ;;  %v1219_v12 = vsel %vm1135_vm5, %v2727_v40, 0.0  ;;  %v1316_v25 = vmul.f32 %v2749_v9, %v2749_v9 }
 0x13e   :  { %v1659_v52 = vpack.c.bf16 %v2956_v47, %v2956_v47  ;;  %1126 = vst.msk [vmem:[%s3198_s8 + $0xe0] sm:$0xf] %vm1069_vm3, %v1656_v26  ;;  %v1420_v40 = vsel %vm1135_vm5, %v1315_v5, 0.0  ;;  %v1223_v9 = vsel %vm1135_vm5, %v2783_v49, 0.0 }
 0x13f   :  { %v2973_v8 = vpop.f32.mrf.mxu1  ;;  %v1409_v7 = vadd.f32 %v1408_v33, %v1407_v15  ;;  %v1210_v4 = vadd.f32 %v1209_v39, %v1208_v56  ;;  %v1317_v56 = vmul.f32 %v2783_v49, %v2783_v49  ;;  %v1422_v54 = vsel %vm1135_vm5, %v1316_v25, 0.0 }
 0x140   :  { %1129 = vst.msk [vmem:[%s3198_s8 + $0xec] sm:$0xf] %vm1069_vm3, %v1659_v52  ;;  %v1657_v21 = vpack.c.bf16 %v2973_v8, %v2973_v8 }
 0x141   :  { %v2988_v44 = vpop.f32.mrf.mxu1  ;;  %v1212_v0 = vadd.f32 %v1211_v53, %v1210_v4  ;;  %v1411_v19 = vadd.f32 %v1410_v24, %v1409_v7  ;;  %v1318_v7 = vmul.f32 %v2805_v10, %v2805_v10  ;;  %v1319_v53 = vmul.f32 %v2771_v48, %v2771_v48 }
 0x142   :  { %v1662_v30 = vpack.c.bf16 %v2988_v44, %v2988_v44  ;;  %1127 = vst.msk [vmem:[%s3198_s8 + $0xe4] sm:$0xf] %vm1069_vm3, %v1657_v21  ;;  %v1424_v49 = vsel %vm1135_vm5, %v1317_v56, 0.0  ;;  %v1321_v10 = vmul.f32 %v2827_v63, %v2827_v63  ;;  %v1241_v56 = vsel %vm1135_vm5, %v2909_v36, 0.0 }
 0x143   :  { %v3005_v38 = vpop.f32.mrf.mxu1  ;;  %v1413_v46 = vadd.f32 %v1412_v16, %v1411_v19  ;;  %v1214_v50 = vadd.f32 %v1213_v55, %v1212_v0  ;;  %v1227_v0 = vsel %vm1135_vm5, %v2771_v48, 0.0  ;;  %v1320_v19 = vmul.f32 %v2793_v11, %v2793_v11 }
 0x144   :  { %v1660_v23 = vpack.c.bf16 %v3005_v38, %v3005_v38  ;;  %1132 = vst.msk [vmem:[%s3198_s8 + $0xf8] sm:$0xf] %vm1069_vm3, %v1662_v30  ;;  %v1426_v16 = vsel %vm1135_vm5, %v1318_v7, 0.0  ;;  %v1428_v27 = vsel %vm1135_vm5, %v1319_v53, 0.0  ;;  %v1231_v48 = vsel %vm1135_vm5, %v2827_v63, 0.0 }
 0x145   :  { %v3020_v28 = vpop.f32.mrf.mxu1  ;;  %v1216_v20 = vadd.f32 %v1215_v18, %v1214_v50  ;;  %v1415_v59 = vadd.f32 %v1414_v31, %v1413_v46  ;;  %v1229_v46 = vsel %vm1135_vm5, %v2793_v11, 0.0  ;;  %v1430_v31 = vsel %vm1135_vm5, %v1320_v19, 0.0 }
 0x146   :  { %1130 = vst.msk [vmem:[%s3198_s8 + $0xf0] sm:$0xf] %vm1069_vm3, %v1660_v23  ;;  %v1663_v15 = vpack.c.bf16 %v3020_v28, %v3020_v28  ;;  %v1322_v18 = vmul.f32 %v2849_v41, %v2849_v41  ;;  %v1432_v11 = vsel %vm1135_vm5, %v1321_v10, 0.0  ;;  %v1324_v63 = vmul.f32 %v2837_v32, %v2837_v32 }
 0x147   :  { %v1417_v22 = vadd.f32 %v1416_v14, %v1415_v59  ;;  %v1218_v29 = vadd.f32 %v1217_v34, %v1216_v20  ;;  %v3050_v13 = vpop.f32.mrf.mxu1  ;;  %v1323_v20 = vmul.f32 %v2815_v57, %v2815_v57  ;;  %v1233_v59 = vsel %vm1135_vm5, %v2849_v41, 0.0 }
 0x148   :  { %v1661_v39 = vpack.c.bf16 %v3050_v13, %v3050_v13  ;;  %1133 = vst.msk [vmem:[%s3198_s8 + $0xfc] sm:$0xf] %vm1069_vm3, %v1663_v15  ;;  %v1235_v34 = vsel %vm1135_vm5, %v2815_v57, 0.0  ;;  %v1434_v21 = vsel %vm1135_vm5, %v1322_v18, 0.0  ;;  %v1325_v41 = vmul.f32 %v2877_v42, %v2877_v42 }
 0x149   :  { %v1220_v51 = vadd.f32 %v1219_v12, %v1218_v29  ;;  %v1419_v61 = vadd.f32 %v1418_v2, %v1417_v22  ;;  %v1436_v30 = vsel %vm1135_vm5, %v1323_v20, 0.0  ;;  %v1237_v12 = vsel %vm1135_vm5, %v2837_v32, 0.0 }
 0x14a   :  { %1131 = vst.msk [vmem:[%s3198_s8 + $0xf4] sm:$0xf] %vm1069_vm3, %v1661_v39  ;;  %v1438_v23 = vsel %vm1135_vm5, %v1324_v63, 0.0  ;;  %v1239_v57 = vsel %vm1135_vm5, %v2877_v42, 0.0  ;;  %v1440_v32 = vsel %vm1135_vm5, %v1325_v41, 0.0  ;;  %v1328_v42 = vmul.f32 %v2892_v35, %v2892_v35 }
 0x14b   :  { %v1421_v3 = vadd.f32 %v1420_v40, %v1419_v61  ;;  %v1222_v33 = vadd.f32 %v1221_v6, %v1220_v51  ;;  %v1326_v51 = vmul.f32 %v2909_v36, %v2909_v36  ;;  %v1327_v6 = vmul.f32 %v2861_v62, %v2861_v62 }
 0x14c   :  { %v1329_v36 = vmul.f32 %v2941_v60, %v2941_v60  ;;  %v1249_v19 = vsel %vm1135_vm5, %v2973_v8, 0.0 }
 0x14d   :  { %v1224_v4 = vadd.f32 %v1223_v9, %v1222_v33  ;;  %v1423_v37 = vadd.f32 %v1422_v54, %v1421_v3  ;;  %v1243_v33 = vsel %vm1135_vm5, %v2861_v62, 0.0  ;;  %v1442_v39 = vsel %vm1135_vm5, %v1326_v51, 0.0 }
 0x14e   :  { %v1444_v7 = vsel %vm1135_vm5, %v1327_v6, 0.0  ;;  %v1247_v62 = vsel %vm1135_vm5, %v2941_v60, 0.0  ;;  %v1332_v60 = vmul.f32 %v2956_v47, %v2956_v47 }
 0x14f   :  { %v1425_v24 = vadd.f32 %v1424_v49, %v1423_v37  ;;  %v1226_v43 = vadd.f32 %v1225_v45, %v1224_v4  ;;  %v1245_v4 = vsel %vm1135_vm5, %v2892_v35, 0.0  ;;  %v1446_v49 = vsel %vm1135_vm5, %v1328_v42, 0.0 }
 0x150   :  { %v1330_v45 = vmul.f32 %v2973_v8, %v2973_v8  ;;  %v1448_v35 = vsel %vm1135_vm5, %v1329_v36, 0.0  ;;  %v1333_v8 = vmul.f32 %v3005_v38, %v3005_v38  ;;  %v1454_v18 = vsel %vm1135_vm5, %v1332_v60, 0.0 }
 0x151   :  { %v1228_v55 = vadd.f32 %v1227_v0, %v1226_v43  ;;  %v1427_v58 = vadd.f32 %v1426_v16, %v1425_v24  ;;  %v1331_v0 = vmul.f32 %v2924_v1, %v2924_v1 }
 0x153   :  { %v1429_v50 = vadd.f32 %v1428_v27, %v1427_v58  ;;  %v1230_v26 = vadd.f32 %v1229_v46, %v1228_v55  ;;  %v1251_v58 = vsel %vm1135_vm5, %v2924_v1, 0.0  ;;  %v1450_v27 = vsel %vm1135_vm5, %v1330_v45, 0.0 }
 0x154   :  { %v1255_v1 = vsel %vm1135_vm5, %v3005_v38, 0.0  ;;  %v1336_v38 = vmul.f32 %v3020_v28, %v3020_v28 }
 0x155   :  { %v1232_v17 = vadd.f32 %v1231_v48, %v1230_v26  ;;  %v1431_v52 = vadd.f32 %v1430_v31, %v1429_v50  ;;  %v1452_v50 = vsel %vm1135_vm5, %v1331_v0, 0.0  ;;  %v1253_v26 = vsel %vm1135_vm5, %v2956_v47, 0.0 }
 0x156   :  { %v1456_v47 = vsel %vm1135_vm5, %v1333_v8, 0.0 }
 0x157   :  { %v1433_v5 = vadd.f32 %v1432_v11, %v1431_v52  ;;  %v1234_v14 = vadd.f32 %v1233_v59, %v1232_v17  ;;  %v1334_v17 = vmul.f32 %v3050_v13, %v3050_v13  ;;  %v1335_v11 = vmul.f32 %v2988_v44, %v2988_v44 }
 0x158   :  { %v1257_v59 = vsel %vm1135_vm5, %v3050_v13, 0.0  ;;  %v1462_v13 = vsel %vm1135_vm5, %v1336_v38, 0.0 }
 0x159   :  { %v1236_v22 = vadd.f32 %v1235_v34, %v1234_v14  ;;  %v1435_v29 = vadd.f32 %v1434_v21, %v1433_v5  ;;  %v1259_v34 = vsel %vm1135_vm5, %v2988_v44, 0.0  ;;  %v1458_v63 = vsel %vm1135_vm5, %v1334_v17, 0.0 }
 0x15b   :  { %v1437_v25 = vadd.f32 %v1436_v30, %v1435_v29  ;;  %v1238_v2 = vadd.f32 %v1237_v12, %v1236_v22  ;;  %v1460_v29 = vsel %vm1135_vm5, %v1335_v11, 0.0  ;;  %v1261_v30 = vsel %vm1135_vm5, %v3020_v28, 0.0 }
 0x15d   :  { %v1240_v61 = vadd.f32 %v1239_v57, %v1238_v2  ;;  %v1439_v40 = vadd.f32 %v1438_v23, %v1437_v25 }
 0x15f   :  { %v1441_v15 = vadd.f32 %v1440_v32, %v1439_v40  ;;  %v1242_v3 = vadd.f32 %v1241_v56, %v1240_v61  ;;  %v1134_v56 = vld [vmem:[#allocation4] sm:$0x1] }
 0x161   :  { %v1244_v54 = vadd.f32 %v1243_v33, %v1242_v3  ;;  %v1443_v9 = vadd.f32 %v1442_v39, %v1441_v15  ;;  %v1272_v33 = vld [vmem:[#allocation5] sm:$0x1] }
 0x163   :  { %v1445_v37 = vadd.f32 %v1444_v7, %v1443_v9  ;;  %v1246_v53 = vadd.f32 %v1245_v4, %v1244_v54 }
 0x165   :  { %v1248_v24 = vadd.f32 %v1247_v62, %v1246_v53  ;;  %v1447_v43 = vadd.f32 %v1446_v49, %v1445_v37  ;;  %v1481_v49 = vld [vmem:[%s3199_s5] sm:$0x1] }
 0x167   :  { %v1449_v16 = vadd.f32 %v1448_v35, %v1447_v43  ;;  %v1250_v55 = vadd.f32 %v1249_v19, %v1248_v24  ;;  %v1486_v24 = vld [vmem:[%s3200_s6] sm:$0x1] }
 0x169   :  { %v1252_v46 = vadd.f32 %v1251_v58, %v1250_v55  ;;  %v1451_v10 = vadd.f32 %v1450_v27, %v1449_v16 }
 0x16b   :  { %v1453_v31 = vadd.f32 %v1452_v50, %v1451_v10  ;;  %v1254_v48 = vadd.f32 %v1253_v26, %v1252_v46 }
 0x16d   :  { %v1256_v52 = vadd.f32 %v1255_v1, %v1254_v48  ;;  %v1455_v20 = vadd.f32 %v1454_v18, %v1453_v31 }
 0x16f   :  { %v1457_v5 = vadd.f32 %v1456_v47, %v1455_v20  ;;  %v1258_v14 = vadd.f32 %v1257_v59, %v1256_v52 }
 0x171   :  { %v1260_v21 = vadd.f32 %v1259_v34, %v1258_v14  ;;  %v1459_v22 = vadd.f32 %v1458_v63, %v1457_v5 }
 0x173   :  { %v1262_v12 = vadd.f32 %v1261_v30, %v1260_v21  ;;  %v1461_v41 = vadd.f32 %v1460_v29, %v1459_v22 }
 0x175   :  { %v1263_v25 = vrot.slane %v1262_v12, 4  ;;  %v1463_v2 = vadd.f32 %v1462_v13, %v1461_v41 }
 0x177   :  { %v1264_v23 = vadd.f32 %v1263_v25, %v1262_v12  ;;  %v1464_v44 = vrot.slane %v1463_v2, 4 }
 0x179   :  { %v1265_v57 = vrot.slane %v1264_v23, 2  ;;  %v1465_v51 = vadd.f32 %v1464_v44, %v1463_v2 }
 0x17b   :  { %v1266_v61 = vadd.f32 %v1265_v57, %v1264_v23  ;;  %v1466_v40 = vrot.slane %v1465_v51, 2 }
 0x17d   :  { %v1267_v6 = vrot.slane %v1266_v61, 1  ;;  %v1467_v32 = vadd.f32 %v1466_v40, %v1465_v51 }
 0x17f   :  { %v1268_v15 = vadd.f32 %v1267_v6, %v1266_v61  ;;  %v1468_v3 = vrot.slane %v1467_v32, 1 }
 0x181   :  { %v1269_v42 = vadd.f32 %v1268_v15, %v1134_v56  ;;  %v1469_v28 = vadd.f32 %v1468_v3, %v1467_v32 }
 0x183   :  { %1271 = vst.msk [vmem:[#allocation4] sm:$0x1] %vm53_vm4, %v1269_v42  ;;  %v1470_v39 = vadd.f32 %v1469_v28, %v1272_v33 }
 0x185   :  { %1471 = vst.msk [vmem:[#allocation5] sm:$0x1] %vm53_vm4, %v1470_v39 }
 0x18a   :  { %v1475_v54 = vld [vmem:[#allocation4] sm:$0x1] }
 0x18b   :  { %v1476_v9 = vmul.f32 0.001953125, %v1475_v54 }
 0x18c   :  { %v1477_v7 = vld [vmem:[#allocation5] sm:$0x1] }
 0x18d   :  { %v1478_v4 = vmul.f32 0.001953125, %v1477_v7  ;;  %v1479_v36 = vmul.f32 %v1476_v9, %v1476_v9 }
 0x18f   :  { %v1480_v37 = vsub.f32 %v1478_v4, %v1479_v36 }
 0x191   :  { %v1482_v53 = vadd.f32 1e-05, %v1480_v37 }
 0x193   :  { %1929 = vrsqrt.f32 %v1482_v53 }
 0x1a0   :  { %v1930_v62 = vpop.eup %1929 }
 0x1a1   :  { %v1484_v45 = vmul.f32 %v1930_v62, %v1481_v49 }
 0x1a3   :  { %1485 = vst.msk [vmem:[%s3201_s9] sm:$0x1] %vm53_vm4, %v1484_v45  ;;  %v1487_v43 = vmul.f32 %v1484_v45, %v1476_v9 }
 0x1a5   :  { %v1488_v0 = vsub.f32 %v1486_v24, %v1487_v43 }
 0x1a7   :  { %1489 = vst.msk [vmem:[%s3202_s10] sm:$0x1] %vm53_vm4, %v1488_v0 }

// kernel: dense_layer_forward.5
= control target key start
LH: loop header
LB: loop body
LE: loop exit
PB: predicated region body
PF: predicated region fallthrough
CT: control target
= control target key end

     0   :  { %s6940_s15 = smov 0   ;;  %s9598_s0 = inlined_call_operand.vmem [shape: bf16[2,16,16,32], index: 0, kind: input, shape index: {}]   ;;  %s9599_s1 = inlined_call_operand.vmem [shape: f32[1,32], index: 1, kind: input, shape index: {}]   ;;  %s9600_s2 = inlined_call_operand.vmem [shape: f32[1,32], index: 2, kind: input, shape index: {}]   ;;  %s9601_s3 = inlined_call_operand.vmem [shape: bf16[9,32,8], index: 3, kind: input, shape index: {}]   ;;  %s9602_s4 = inlined_call_operand.vmem [shape: f32[2,256,8], index: 4, kind: output, shape index: {}]  }
   0x1 LB: > { %s5782_s16 = sadd.s32 4294967295, %s6912_s15   ;;  %p5786_p0 = scmp.ge.s32.totalorder %s6912_s15, 1  ;;  %s6912_s15 = sphi %s6940_s15, %s14_s15  }
   0x2   : > { %p162_p1 = scmp.lt.s32.totalorder %s6912_s15, 3 }
   0x4   : > { %p163_p2 = pnand %p5786_p0, %p162_p1 }
   0x6   : > { %166 = sbr.rel (%p163_p2) target bundleno = 663 (0x297), region = 36 }
   0xb   : > { %v6825_v0 = vld [vmem:[%s9601_s3 + $0x18] sm:$0xff]   ;;  %vm389_vm0 = vcmask 257024   ;;  %v6826_v1 = vld [vmem:[%s9601_s3 + $0x10] sm:$0xff]   ;;  %v6914_v2 = vmov 0   ;;  %vm399_vm1 = vcmask 253952   ;;  %v9616_v3 = vmov 0 }
   0xc   : > { %6488 = vmatprep.subr.bf16.mxu0 %v6825_v0  ;;  %6812 = vmatprep.subr.bf16.mxu1 %v6825_v0  ;;  %390 = vst.msk [vmem:[#allocation2] sm:$0xf] %vm389_vm0, %v6914_v2  ;;  %391 = vst.msk [vmem:[#allocation2 + $0x4] sm:$0xf] %vm389_vm0, %v6914_v2  ;;  %vm400_vm2 = vsmask.f32 256 }
   0xd   : > { %392 = vst.msk [vmem:[#allocation2 + $0x8] sm:$0xf] %vm389_vm0, %v6914_v2  ;;  %vm456_vm3 = vsmask.f32 7938  ;;  %395 = vst.msk [vmem:[#allocation2 + $0x110] sm:$0xf] %vm389_vm0, %v6914_v2  ;;  %6489 = vmatpush3.bf16.msra.mxu0 %v6825_v0  ;;  %6814 = vmatpush3.bf16.msra.mxu1 %v6825_v0 }
   0xe   : > { %396 = vst.msk [vmem:[#allocation2 + $0x114] sm:$0xf] %vm389_vm0, %v6914_v2  ;;  %397 = vst.msk [vmem:[#allocation2 + $0x118] sm:$0xf] %vm389_vm0, %v6914_v2  ;;  %p188_p3 = scmp.lt.s32.totalorder %s5782_s16, 1  ;;  %6490 = vmatprep.subr.bf16.mxu0 %v6826_v1  ;;  %6813 = vmatprep.subr.bf16.mxu1 %v6826_v1  ;;  %v9619_v4 = vmov 0 }
   0xf   : > { %vm6961_vm4 = vmand %vm399_vm1, %vm400_vm2  ;;  %v6973_v5 = vld [vmem:[%s9601_s3 + $0x8] sm:$0xff]   ;;  %v405_v6 = vld [vmem:[#allocation2 + $0x10] sm:$0x1]  ;;  %vm1081_vm6 = vsmask.f32 3328  ;;  %vm1533_vm9 = vcmask 261120  }
  0x10   : > { %v9617_v3 = vsel %vm6961_vm4, 4294967295, %v9616_v3  ;;  %vm6966_vm5 = vmand %vm399_vm1, %vm456_vm3  ;;  %s9860_s16 = smov (!%p188_p3, %s5782_s16), 1  ;;  %v461_v7 = vld [vmem:[#allocation2 + $0x18] sm:$0x1]  ;;  %v406_v8 = vsel %vm6961_vm4, 0, %v405_v6  ;;  %v7014_v35 = vld [vmem:[%s9601_s3 + $0x28] sm:$0xff]  }
  0x11   : > { %9618 = vst [vmem:[#allocation3_spill] sm:$0xff] %v9617_v3  ;;  %v9620_v4 = vsel %vm6966_vm5, 4294967295, %v9619_v4  ;;  %v462_v9 = vsel %vm6966_vm5, 0, %v461_v7  ;;  %v426_v10 = vld [vmem:[#allocation2 + $0x80] sm:$0x1]  ;;  %6491 = vmatpush3.bf16.msra.mxu0 %v6826_v1  ;;  %6815 = vmatpush3.bf16.msra.mxu1 %v6826_v1  ;;  %s6213_s23 = sshll.u32 %s9860_s16, 7  ;;  %vm7059_vm12 = vmand %vm389_vm0, %vm456_vm3 }
  0x12   : > { %9621 = vst [vmem:[#allocation4_spill] sm:$0xff] %v9620_v4  ;;  %v482_v11 = vld [vmem:[#allocation2 + $0x88] sm:$0x1]  ;;  %407 = vst [vmem:[#allocation2 + $0x10] sm:$0x1] %v406_v8  ;;  %v427_v12 = vsel %vm6961_vm4, 0, %v426_v10  ;;  %s6989_s26 = scalar_lea.vmem %s9598_s0, %s6213_s23  ;;  %6524 = vmatprep.subr.bf16.mxu1 %v6973_v5  ;;  %6560 = vmatprep.subr.bf16.mxu0 %v7014_v35 }
  0x13   : > { %463 = vst [vmem:[#allocation2 + $0x18] sm:$0x1] %v462_v9  ;;  %v483_v13 = vsel %vm6966_vm5, 0, %v482_v11  ;;  %v6994_v14 = vld [vmem:[%s9599_s1] ss:$0 sm:$0xff]  ;;  %v6317_v24 = vld [vmem:[%s6989_s26 + $0x38] sm:$0xff]  }
  0x14   : > { %428 = vst [vmem:[#allocation2 + $0x80] sm:$0x1] %v427_v12  ;;  %484 = vst [vmem:[#allocation2 + $0x88] sm:$0x1] %v483_v13  ;;  %v402_v15 = vld [vmem:[#allocation2] sm:$0x1]  ;;  %v6277_v27 = vunpack.c.l.bf16 %v6317_v24  ;;  %v6278_v28 = vunpack.c.h.bf16 %v6317_v24 }
  0x15   : > { %v458_v16 = vld [vmem:[#allocation2 + $0x8] sm:$0x1]  ;;  %v1030_v17 = vld [vmem:[#allocation2 + $0x4] sm:$0xf]  ;;  %vm1082_vm7 = vsmask.f32 7440 }
  0x16   : > { %v429_v18 = vld [vmem:[#allocation2 + $0x90] sm:$0x1]  ;;  %v403_v19 = vsel %vm6961_vm4, 0, %v402_v15  ;;  %v459_v20 = vsel %vm6966_vm5, 0, %v458_v16  ;;  %v1094_v21 = vshll.u32 %v1030_v17, 16  ;;  %v1098_v22 = vshrl.u32 %v1030_v17, 16  ;;  %vm7045_vm10 = vmor %vm1081_vm6, %vm1082_vm7 }
  0x17   : > { %v6248_v23 = vld [vmem:[%s6989_s26] sm:$0xff]   ;;  %404 = vst [vmem:[#allocation2] sm:$0x1] %v403_v19  ;;  %460 = vst [vmem:[#allocation2 + $0x8] sm:$0x1] %v459_v20  ;;  %v284_v38 = vmul.f32 %v6277_v27, %v6994_v14  ;;  %v285_v39 = vmul.f32 %v6278_v28, %v6994_v14  ;;  %v430_v44 = vsel %vm6961_vm4, 0, %v429_v18 }
  0x18   : > { %v6249_v25 = vunpack.c.l.bf16 %v6248_v23  ;;  %v6250_v26 = vunpack.c.h.bf16 %v6248_v23  ;;  %v6318_v29 = vld [vmem:[%s6989_s26 + $0x40] sm:$0xff]   ;;  %v7004_v30 = vrot.slane %v1094_v21, 5  ;;  %v1100_v31 = vrot.slane %v1098_v22, 4  ;;  %v485_v40 = vld [vmem:[#allocation2 + $0x98] sm:$0x1]  ;;  %v7031_v49 = vld [vmem:[%s6989_s26 + $0x8] sm:$0xff]  }
  0x19   : > { %v7009_v32 = vld [vmem:[%s9600_s2] ss:$0 sm:$0xff]  ;;  %v6281_v33 = vunpack.c.l.bf16 %v6318_v29  ;;  %v6282_v34 = vunpack.c.h.bf16 %v6318_v29  ;;  %vm592_vm8 = vsmask.f32 4368  ;;  %431 = vst [vmem:[#allocation2 + $0x90] sm:$0x1] %v430_v44  ;;  %v6253_v62 = vunpack.c.l.bf16 %v7031_v49 }
  0x1a   : > { %v270_v36 = vmul.f32 %v6249_v25, %v6994_v14  ;;  %v271_v37 = vmul.f32 %v6250_v26, %v6994_v14  ;;  %v1101_v41 = vor.u32 %v1100_v31, %v7004_v30  ;;  %v323_v47 = vadd.f32 %v7009_v32, %v284_v38  ;;  %vm7053_vm11 = vmor %vm400_vm2, %vm592_vm8  ;;  %v917_v28 = vld [vmem:[#allocation2 + $0x10] sm:$0xf]  ;;  %s6214_s25 = sshll.u32 %s9860_s16, 8 }
  0x1b   : > { %v286_v42 = vmul.f32 %v6281_v33, %v6994_v14  ;;  %v287_v43 = vmul.f32 %v6282_v34, %v6994_v14  ;;  %v324_v48 = vadd.f32 %v7009_v32, %v285_v39  ;;  %v486_v53 = vsel %vm6966_vm5, 0, %v485_v40  ;;  %v966_v44 = vld [vmem:[#allocation2 + $0x80] sm:$0xf]  ;;  %s9443_s29 = scalar_lea.vmem %s9602_s4, %s6214_s25 }
  0x1c   : > { %v309_v45 = vadd.f32 %v7009_v32, %v270_v36  ;;  %v310_v46 = vadd.f32 %v7009_v32, %v271_v37  ;;  %v1102_v50 = vrot.slane %v1101_v41, 4  ;;  %v355_v56 = vmax.f32 %v323_v47, 0.0  ;;  %487 = vst [vmem:[#allocation2 + $0x98] sm:$0x1] %v486_v53  ;;  %v921_v36 = vld [vmem:[#allocation2 + $0x18] sm:$0x1] }
  0x1d   : > { %v325_v51 = vadd.f32 %v7009_v32, %v286_v42  ;;  %v326_v52 = vadd.f32 %v7009_v32, %v287_v43  ;;  %v356_v57 = vmax.f32 %v324_v48, 0.0  ;;  %v6254_v63 = vunpack.c.h.bf16 %v7031_v49 }
  0x1e   : > { %v341_v54 = vmax.f32 %v309_v45, 0.0  ;;  %v342_v55 = vmax.f32 %v310_v46, 0.0  ;;  %v1029_v58 = vld [vmem:[#allocation2] sm:$0xf]  ;;  %v7037_v59 = vld [vmem:[#allocation2 + $0x8] sm:$0x1]  ;;  %v6229_v10 = vpack.c.bf16 %v355_v56, %v355_v56 }
  0x1f   : > { %v357_v60 = vmax.f32 %v325_v51, 0.0  ;;  %v358_v61 = vmax.f32 %v326_v52, 0.0  ;;  %v1085_v0 = vshrl.u32 %v1029_v58, 16  ;;  %v1088_v1 = vshll.u32 %v1029_v58, 16  ;;  %v408_v58 = vld [vmem:[#allocation2 + $0x20] sm:$0x1] }
  0x20   : > { %v1104_v2 = vshll.u32 %v7037_v59, 16  ;;  %v2100_v6 = vrot.slane %v7037_v59, 5  ;;  %v6215_v8 = vpack.c.bf16 %v341_v54, %v341_v54  ;;  %v6216_v9 = vpack.c.bf16 %v342_v55, %v342_v55  ;;  %v970_v54 = vld [vmem:[#allocation2 + $0x88] sm:$0x1] }
  0x21   : > { %v6230_v11 = vpack.c.bf16 %v356_v57, %v356_v57  ;;  %v1087_v12 = vrot.slane %v1085_v0, 4  ;;  %v1090_v13 = vrot.slane %v1088_v1, 5  ;;  %v6231_v16 = vpack.c.bf16 %v357_v60, %v357_v60 }
  0x22   : > { %v1106_v15 = vrot.slane %v1104_v2, 5  ;;  %v595_v17 = vshrl.u32 %v6215_v8, 16  ;;  %v598_v18 = vshll.u32 %v6215_v8, 16  ;;  %v603_v19 = vshrl.u32 %v6216_v9, 16  ;;  %v464_v2 = vld [vmem:[#allocation2 + $0x28] sm:$0x1] }
  0x23   : > { %v606_v20 = vshll.u32 %v6216_v9, 16  ;;  %v1091_v21 = vor.u32 %v1090_v13, %v1087_v12  ;;  %v714_v23 = vshrl.u32 %v6229_v10, 16  ;;  %v717_v24 = vshll.u32 %v6229_v10, 16  ;;  %v6312_v8 = vld [vmem:[%s6989_s26 + $0x10] sm:$0xff]  }
  0x24   : > { %v1107_v22 = vsel %vm7045_vm10, %v1102_v50, %v1106_v15  ;;  %v9624_v25 = vmov 0  ;;  %v597_v26 = vrot.slane %v595_v17, 7  ;;  %v605_v27 = vrot.slane %v603_v19, 7  ;;  %v973_v12 = vld [vmem:[#allocation2 + $0x90] sm:$0xf] }
  0x25   : > { %v9625_v25 = vsel %vm7053_vm11, 4294967295, %v9624_v25  ;;  %v722_v29 = vshrl.u32 %v6230_v11, 16  ;;  %v725_v31 = vshll.u32 %v6230_v11, 16  ;;  %v1092_v33 = vrot.slane %v1091_v21, 4  ;;  %v977_v19 = vld [vmem:[#allocation2 + $0x98] sm:$0x1] }
  0x26   : > { %9626 = vst [vmem:[#allocation5_spill] sm:$0xff] %v9625_v25  ;;  %v9627_v34 = vmov 0  ;;  %v716_v37 = vrot.slane %v714_v23, 7  ;;  %v6232_v38 = vpack.c.bf16 %v358_v61, %v358_v61  ;;  %v731_v39 = vshrl.u32 %v6231_v16, 16 }
  0x27   : > { %v9628_v34 = vsel %vm7059_vm12, 4294967295, %v9627_v34  ;;  %v600_v40 = vor.u32 %v598_v18, %v597_v26  ;;  %v601_v41 = vrot.slane %v597_v26, 4  ;;  %v608_v42 = vor.u32 %v606_v20, %v605_v27  ;;  %v411_v18 = vld [vmem:[#allocation2 + $0x30] sm:$0x1] }
  0x28   : > { %9629 = vst [vmem:[#allocation6_spill] sm:$0xff] %v9628_v34  ;;  %v610_v43 = vrot.slane %v605_v27, 4  ;;  %v1097_v45 = vsel %vm7045_vm10, %v1092_v33, %v7004_v30  ;;  %v719_v46 = vor.u32 %v717_v24, %v716_v37  ;;  %v720_v47 = vrot.slane %v716_v37, 4 }
  0x29   : > { %v724_v48 = vrot.slane %v722_v29, 7  ;;  %v5829_v50 = vcombine.low %v1097_v45, %v1107_v22  ;;  %v609_v51 = vsel %vm7053_vm11, %v601_v41, %v608_v42  ;;  %v918_v52 = vsel %vm7059_vm12, %v600_v40, %v917_v28 }
  0x2a   : > { %v922_v53 = vsel %vm6961_vm4, %v610_v43, %v921_v36  ;;  %919 = vst [vmem:[#allocation2 + $0x10] sm:$0xf] %v918_v52  ;;  %920 = vst.msk [vmem:[#allocation2 + $0x14] sm:$0xf] %vm389_vm0, %v609_v51  ;;  %v967_v56 = vsel %vm7059_vm12, %v719_v46, %v966_v44  ;;  %v733_v57 = vrot.slane %v731_v39, 7  ;;  %v734_v60 = vshll.u32 %v6231_v16, 16 }
  0x2b   : > { %923 = vst [vmem:[#allocation2 + $0x18] sm:$0x1] %v922_v53  ;;  %v727_v30 = vor.u32 %v725_v31, %v724_v48  ;;  %v729_v55 = vrot.slane %v724_v48, 4  ;;  %6492 = vmatprep.mubr.msk.bf16.mxu0 %vm1533_vm9, %v5829_v50  ;;  %968 = vst [vmem:[#allocation2 + $0x80] sm:$0xf] %v967_v56  ;;  %v739_v61 = vshrl.u32 %v6232_v38, 16  ;;  %v272_v1 = vmul.f32 %v6253_v62, %v6994_v14 }
  0x2c   : > { %v742_v0 = vshll.u32 %v6232_v38, 16  ;;  %v737_v11 = vrot.slane %v733_v57, 4  ;;  %v273_v13 = vmul.f32 %v6254_v63, %v6994_v14  ;;  %v736_v15 = vor.u32 %v734_v60, %v733_v57  ;;  %v7110_v48 = vld [vmem:[%s6989_s26 + $0x48] sm:$0xff]  }
  0x2d   : > { %v728_v9 = vsel %vm7053_vm11, %v720_v47, %v727_v30  ;;  %v971_v10 = vsel %vm6961_vm4, %v729_v55, %v970_v54  ;;  %v741_v16 = vrot.slane %v739_v61, 7  ;;  %v311_v62 = vadd.f32 %v7009_v32, %v272_v1 }
  0x2e   : > { %969 = vst.msk [vmem:[#allocation2 + $0x84] sm:$0xf] %vm389_vm0, %v728_v9  ;;  %972 = vst [vmem:[#allocation2 + $0x88] sm:$0x1] %v971_v10  ;;  %v409_v17 = vsel %vm6961_vm4, 0, %v408_v58  ;;  %v312_v20 = vadd.f32 %v7009_v32, %v273_v13  ;;  %v465_v21 = vsel %vm6966_vm5, 0, %v464_v2  ;;  %v6257_v49 = vunpack.c.l.bf16 %v6312_v8 }
  0x2f   : > { %410 = vst [vmem:[#allocation2 + $0x20] sm:$0x1] %v409_v17  ;;  %v6258_v63 = vunpack.c.h.bf16 %v6312_v8  ;;  %v744_v22 = vor.u32 %v742_v0, %v741_v16  ;;  %v746_v23 = vrot.slane %v741_v16, 4  ;;  %v974_v24 = vsel %vm7059_vm12, %v736_v15, %v973_v12  ;;  %466 = vst [vmem:[#allocation2 + $0x28] sm:$0x1] %v465_v21 }
  0x30   : > { %v343_v26 = vmax.f32 %v311_v62, 0.0  ;;  %975 = vst [vmem:[#allocation2 + $0x90] sm:$0xf] %v974_v24  ;;  %v344_v27 = vmax.f32 %v312_v20, 0.0  ;;  %v412_v28 = vsel %vm6961_vm4, 0, %v411_v18  ;;  %v274_v38 = vmul.f32 %v6257_v49, %v6994_v14 }
  0x31   : > { %v1031_v29 = vld [vmem:[#allocation2 + $0x10] sm:$0xf]  ;;  %v1032_v31 = vld [vmem:[#allocation2 + $0x14] sm:$0xf]  ;;  %v745_v36 = vsel %vm7053_vm11, %v737_v11, %v744_v22  ;;  %v978_v37 = vsel %vm6961_vm4, %v746_v23, %v977_v19  ;;  %413 = vst [vmem:[#allocation2 + $0x30] sm:$0x1] %v412_v28  ;;  %v7107_v47 = vmul.f32 %v6258_v63, %v6994_v14  ;;  %v6285_v11 = vunpack.c.l.bf16 %v7110_v48 }
  0x32   : > { %v1066_v33 = vld [vmem:[#allocation2 + $0x18] sm:$0x1]  ;;  %v1109_v39 = vshrl.u32 %v1031_v29, 16  ;;  %v1112_v40 = vshll.u32 %v1031_v29, 16  ;;  %v1118_v41 = vshll.u32 %v1032_v31, 16  ;;  %v1122_v42 = vshrl.u32 %v1032_v31, 16 }
  0x33   : > { %v1045_v43 = vld [vmem:[#allocation2 + $0x80] sm:$0xf]  ;;  %976 = vst.msk [vmem:[#allocation2 + $0x94] sm:$0xf] %vm389_vm0, %v745_v36  ;;  %979 = vst [vmem:[#allocation2 + $0x98] sm:$0x1] %v978_v37  ;;  %v7104_v46 = vpack.c.bf16 %v343_v26, %v343_v26  ;;  %v6218_v10 = vpack.c.bf16 %v344_v27, %v344_v27  ;;  %v313_v21 = vadd.f32 %v7009_v32, %v274_v38 }
  0x34   : > { %v1128_v44 = vshll.u32 %v1066_v33, 16  ;;  %v1277_v45 = vshrl.u32 %v1045_v43, 16  ;;  %v1111_v50 = vrot.slane %v1109_v39, 4  ;;  %v1114_v51 = vrot.slane %v1112_v40, 5  ;;  %v6830_v29 = vld [vmem:[%s9601_s3 + $0x20] sm:$0xff]  }
  0x35   : > { %v1120_v52 = vrot.slane %v1118_v41, 5  ;;  %v1124_v53 = vrot.slane %v1122_v42, 4  ;;  %v1046_v54 = vld [vmem:[#allocation2 + $0x84] sm:$0xf]  ;;  %v1073_v55 = vld [vmem:[#allocation2 + $0x88] sm:$0x1] }
  0x36   : > { %v1130_v30 = vrot.slane %v1128_v44, 5  ;;  %v1279_v56 = vrot.slane %v1277_v45, 4  ;;  %v1280_v57 = vshll.u32 %v1045_v43, 16  ;;  %v1286_v58 = vshll.u32 %v1046_v54, 16  ;;  %v467_v38 = vld [vmem:[#allocation2 + $0x38] sm:$0x1] }
  0x37   : > { %v1115_v60 = vor.u32 %v1114_v51, %v1111_v50  ;;  %v1125_v61 = vor.u32 %v1124_v53, %v1120_v52  ;;  %v1290_v0 = vshrl.u32 %v1046_v54, 16  ;;  %v1296_v1 = vshll.u32 %v1073_v55, 16  ;;  %v1047_v9 = vld [vmem:[#allocation2 + $0x90] sm:$0xf]  ;;  %v924_v51 = vld [vmem:[#allocation2 + $0x20] sm:$0xf] }
  0x38   : > { %v1282_v2 = vrot.slane %v1280_v57, 5  ;;  %v1288_v8 = vrot.slane %v1286_v58, 5  ;;  %v1301_v19 = vshrl.u32 %v1047_v9, 16  ;;  %v1304_v20 = vshll.u32 %v1047_v9, 16  ;;  %v928_v55 = vld [vmem:[#allocation2 + $0x28] sm:$0x1] }
  0x39   : > { %v1116_v12 = vrot.slane %v1115_v60, 4  ;;  %v1126_v13 = vrot.slane %v1125_v61, 4  ;;  %v1292_v15 = vrot.slane %v1290_v0, 4  ;;  %v1298_v16 = vrot.slane %v1296_v1, 5  ;;  %v432_v1 = vld [vmem:[#allocation2 + $0xa0] sm:$0x1] }
  0x3a   : > { %v1283_v62 = vor.u32 %v1282_v2, %v1279_v56  ;;  %v1048_v17 = vld [vmem:[#allocation2 + $0x94] sm:$0xf]  ;;  %v1074_v18 = vld [vmem:[#allocation2 + $0x98] sm:$0x1]  ;;  %v1303_v27 = vrot.slane %v1301_v19, 4  ;;  %v1306_v28 = vrot.slane %v1304_v20, 5 }
  0x3b   : > { %v1121_v49 = vsel %vm7045_vm10, %v1116_v12, %v1120_v52  ;;  %v1131_v63 = vsel %vm7045_vm10, %v1126_v13, %v1130_v30  ;;  %v1293_v22 = vor.u32 %v1292_v15, %v1288_v8  ;;  %v1310_v23 = vshll.u32 %v1048_v17, 16  ;;  %v488_v12 = vld [vmem:[#allocation2 + $0xa8] sm:$0x1]  ;;  %v6320_v13 = vld [vmem:[%s6989_s26 + $0x50] sm:$0xff]  }
  0x3c   : > { %v5830_v24 = vcombine.low %v1121_v49, %v1131_v63  ;;  %v1284_v26 = vrot.slane %v1283_v62, 4  ;;  %v1314_v36 = vshrl.u32 %v1048_v17, 16  ;;  %v1320_v37 = vshll.u32 %v1074_v18, 16  ;;  %v435_v17 = vld [vmem:[#allocation2 + $0xb0] sm:$0x1]  ;;  %v6829_v18 = vld [vmem:[%s9601_s3] sm:$0xff]  }
  0x3d   : > { %v1294_v31 = vrot.slane %v1293_v22, 4  ;;  %v1312_v33 = vrot.slane %v1310_v23, 5  ;;  %v1307_v40 = vor.u32 %v1306_v28, %v1303_v27  ;;  %v612_v41 = vshrl.u32 %v7104_v46, 16 }
  0x3e   : > { %6493 = vmatmul.mubr.msk.bf16.vlgmr.msra.gmra.mxu0 %vm1533_vm9, %v5830_v24  ;;  %v1289_v39 = vsel %vm7045_vm10, %v1284_v26, %v1288_v8  ;;  %v615_v42 = vshll.u32 %v7104_v46, 16  ;;  %v1316_v44 = vrot.slane %v1314_v36, 4  ;;  %v1322_v45 = vrot.slane %v1320_v37, 5  ;;  %v931_v26 = vld [vmem:[#allocation2 + $0x30] sm:$0xf] }
  0x3f   : > { %v1299_v43 = vsel %vm7045_vm10, %v1294_v31, %v1298_v16  ;;  %6561 = vmatpush3.bf16.msra.mxu0 %v7014_v35  ;;  %v620_v50 = vshrl.u32 %v6218_v10, 16  ;;  %v1308_v53 = vrot.slane %v1307_v40, 4  ;;  %v614_v54 = vrot.slane %v612_v41, 7 }
  0x40   : > { %v5837_v52 = vcombine.low %v1289_v39, %v1299_v43  ;;  %v623_v30 = vshll.u32 %v6218_v10, 16  ;;  %6562 = vmatprep.subr.bf16.mxu0 %v6830_v29  ;;  %v1317_v56 = vor.u32 %v1316_v44, %v1312_v33  ;;  %v314_v46 = vadd.f32 %v7009_v32, %v7107_v47 }
  0x41   : > { %v622_v57 = vrot.slane %v620_v50, 7  ;;  %v345_v58 = vmax.f32 %v313_v21, 0.0  ;;  %v1313_v35 = vsel %vm7045_vm10, %v1308_v53, %v1312_v33  ;;  %v617_v60 = vor.u32 %v615_v42, %v614_v54 }
  0x42   : > { %6508 = vmatprep.mubr.msk.bf16.mxu1 %vm1533_vm9, %v5837_v52  ;;  %v618_v61 = vrot.slane %v614_v54, 4  ;;  %v468_v0 = vsel %vm6966_vm5, 0, %v467_v38  ;;  %v1318_v2 = vrot.slane %v1317_v56, 4  ;;  %v346_v10 = vmax.f32 %v314_v46, 0.0  ;;  %v6831_v54 = vld [vmem:[%s9601_s3 + $0x38] sm:$0xff]  }
  0x43   : > { %v625_v8 = vor.u32 %v623_v30, %v622_v57  ;;  %v627_v9 = vrot.slane %v622_v57, 4  ;;  %469 = vst [vmem:[#allocation2 + $0x38] sm:$0x1] %v468_v0  ;;  %6563 = vmatpush3.bf16.msra.mxu0 %v6830_v29  ;;  %v925_v47 = vsel %vm7059_vm12, %v617_v60, %v924_v51  ;;  %v6219_v15 = vpack.c.bf16 %v345_v58, %v345_v58  ;;  %v491_v29 = vld [vmem:[#allocation2 + $0xb8] sm:$0x1] }
  0x44   : > { %v6286_v16 = vunpack.c.h.bf16 %v7110_v48  ;;  %v288_v62 = vmul.f32 %v6285_v11, %v6994_v14  ;;  %v1323_v19 = vsel %vm7045_vm10, %v1318_v2, %v1322_v45  ;;  %926 = vst [vmem:[#allocation2 + $0x20] sm:$0xf] %v925_v47  ;;  %v6220_v49 = vpack.c.bf16 %v346_v10, %v346_v10 }
  0x45   : > { %v626_v20 = vsel %vm7053_vm11, %v618_v61, %v625_v8  ;;  %v929_v21 = vsel %vm6961_vm4, %v627_v9, %v928_v55  ;;  %v5838_v63 = vcombine.low %v1313_v35, %v1323_v19  ;;  %v629_v48 = vshrl.u32 %v6219_v15, 16 }
  0x46   : > { %927 = vst.msk [vmem:[#allocation2 + $0x24] sm:$0xf] %vm389_vm0, %v626_v20  ;;  %930 = vst [vmem:[#allocation2 + $0x28] sm:$0x1] %v929_v21  ;;  %v632_v11 = vshll.u32 %v6219_v15, 16  ;;  %v289_v22 = vmul.f32 %v6286_v16, %v6994_v14  ;;  %v637_v23 = vshrl.u32 %v6220_v49, 16  ;;  %v327_v27 = vadd.f32 %v7009_v32, %v288_v62 }
  0x47   : > { %v640_v24 = vshll.u32 %v6220_v49, 16  ;;  %v433_v28 = vsel %vm6961_vm4, 0, %v432_v1  ;;  %6509 = vmatmul.mubr.msk.bf16.vlgmr.msra.gmra.mxu1 %vm1533_vm9, %v5838_v63  ;;  %v631_v31 = vrot.slane %v629_v48, 7  ;;  %v489_v36 = vsel %vm6966_vm5, 0, %v488_v12  ;;  %v6313_v20 = vld [vmem:[%s6989_s26 + $0x18] sm:$0xff]  }
  0x48   : > { %v328_v33 = vadd.f32 %v7009_v32, %v289_v22  ;;  %434 = vst [vmem:[#allocation2 + $0xa0] sm:$0x1] %v433_v28  ;;  %v6289_v37 = vunpack.c.l.bf16 %v6320_v13  ;;  %6525 = vmatpush3.bf16.msra.mxu1 %v6973_v5  ;;  %v639_v38 = vrot.slane %v637_v23, 7  ;;  %v359_v39 = vmax.f32 %v327_v27, 0.0  ;;  %490 = vst [vmem:[#allocation2 + $0xa8] sm:$0x1] %v489_v36 }
  0x49   : > { %v6290_v40 = vunpack.c.h.bf16 %v6320_v13  ;;  %v436_v41 = vsel %vm6961_vm4, 0, %v435_v17  ;;  %v634_v42 = vor.u32 %v632_v11, %v631_v31  ;;  %v635_v43 = vrot.slane %v631_v31, 4  ;;  %6526 = vmatprep.subr.bf16.mxu1 %v6829_v18  ;;  %v6832_v31 = vld [vmem:[%s9601_s3 + $0x48] sm:$0xff]  }
  0x4a   : > { %v935_v44 = vld [vmem:[#allocation2 + $0x38] sm:$0x1]  ;;  %v360_v45 = vmax.f32 %v328_v33, 0.0  ;;  %v290_v50 = vmul.f32 %v6289_v37, %v6994_v14  ;;  %437 = vst [vmem:[#allocation2 + $0xb0] sm:$0x1] %v436_v41  ;;  %v642_v51 = vor.u32 %v640_v24, %v639_v38  ;;  %v644_v52 = vrot.slane %v639_v38, 4  ;;  %6632 = vmatprep.subr.bf16.mxu0 %v6832_v31 }
  0x4b   : > { %v6233_v53 = vpack.c.bf16 %v359_v39, %v359_v39  ;;  %v291_v5 = vmul.f32 %v6290_v40, %v6994_v14  ;;  %v1033_v30 = vld [vmem:[#allocation2 + $0x20] sm:$0xf]  ;;  %v932_v55 = vsel %vm7059_vm12, %v634_v42, %v931_v26  ;;  %v492_v46 = vsel %vm6966_vm5, 0, %v491_v29 }
  0x4c   : > { %v6234_v56 = vpack.c.bf16 %v360_v45, %v360_v45  ;;  %v329_v57 = vadd.f32 %v7009_v32, %v290_v50  ;;  %v1133_v60 = vshrl.u32 %v1033_v30, 16  ;;  %v1136_v61 = vshll.u32 %v1033_v30, 16  ;;  %933 = vst [vmem:[#allocation2 + $0x30] sm:$0xf] %v932_v55  ;;  %493 = vst [vmem:[#allocation2 + $0xb8] sm:$0x1] %v492_v46  ;;  %6527 = vmatpush3.bf16.msra.mxu1 %v6829_v18 }
  0x4d   : > { %v1034_v58 = vld [vmem:[#allocation2 + $0x24] sm:$0xf]  ;;  %v1067_v35 = vld [vmem:[#allocation2 + $0x28] sm:$0x1]  ;;  %v643_v0 = vsel %vm7053_vm11, %v635_v43, %v642_v51  ;;  %v936_v1 = vsel %vm6961_vm4, %v644_v52, %v935_v44  ;;  %v748_v10 = vshrl.u32 %v6233_v53, 16  ;;  %6596 = vmatprep.subr.bf16.mxu1 %v6831_v54  ;;  %v751_v47 = vshll.u32 %v6233_v53, 16 }
  0x4e   : > { %v1142_v2 = vshll.u32 %v1034_v58, 16  ;;  %v1146_v8 = vshrl.u32 %v1034_v58, 16  ;;  %v1152_v9 = vshll.u32 %v1067_v35, 16  ;;  %934 = vst.msk [vmem:[#allocation2 + $0x34] sm:$0xf] %vm389_vm0, %v643_v0  ;;  %v1135_v12 = vrot.slane %v1133_v60, 4 }
  0x4f   : > { %937 = vst [vmem:[#allocation2 + $0x38] sm:$0x1] %v936_v1  ;;  %v1138_v13 = vrot.slane %v1136_v61, 5  ;;  %v756_v15 = vshrl.u32 %v6234_v56, 16  ;;  %v750_v19 = vrot.slane %v748_v10, 7  ;;  %v759_v49 = vshll.u32 %v6234_v56, 16 }
  0x50   : > { %v1144_v16 = vrot.slane %v1142_v2, 5  ;;  %v1148_v62 = vrot.slane %v1146_v8, 4  ;;  %v1154_v17 = vrot.slane %v1152_v9, 5  ;;  %v980_v63 = vld [vmem:[#allocation2 + $0xa0] sm:$0xf]  ;;  %v330_v48 = vadd.f32 %v7009_v32, %v291_v5 }
  0x51   : > { %v1139_v21 = vor.u32 %v1138_v13, %v1135_v12  ;;  %v758_v18 = vrot.slane %v756_v15, 7  ;;  %v753_v22 = vor.u32 %v751_v47, %v750_v19  ;;  %v754_v23 = vrot.slane %v750_v19, 4  ;;  %v984_v38 = vld [vmem:[#allocation2 + $0xa8] sm:$0x1]  ;;  %v414_v54 = vld [vmem:[#allocation2 + $0x40] sm:$0x1] }
  0x52   : > { %v1149_v11 = vor.u32 %v1148_v62, %v1144_v16  ;;  %v361_v24 = vmax.f32 %v329_v57, 0.0  ;;  %v362_v29 = vmax.f32 %v330_v48, 0.0  ;;  %v6261_v40 = vunpack.c.l.bf16 %v6313_v20  ;;  %v470_v46 = vld [vmem:[#allocation2 + $0x48] sm:$0x1]  ;;  %v6314_v31 = vld [vmem:[%s6989_s26 + $0x20] sm:$0xff]  }
  0x53   : > { %v1140_v26 = vrot.slane %v1139_v21, 4  ;;  %v761_v27 = vor.u32 %v759_v49, %v758_v18  ;;  %v763_v28 = vrot.slane %v758_v18, 4  ;;  %v1035_v36 = vld [vmem:[#allocation2 + $0x30] sm:$0xf]  ;;  %v981_v37 = vsel %vm7059_vm12, %v753_v22, %v980_v63 }
  0x54   : > { %v1150_v33 = vrot.slane %v1149_v11, 4  ;;  %v6235_v39 = vpack.c.bf16 %v361_v24, %v361_v24  ;;  %v1157_v44 = vshrl.u32 %v1035_v36, 16  ;;  %v1160_v45 = vshll.u32 %v1035_v36, 16  ;;  %982 = vst [vmem:[#allocation2 + $0xa0] sm:$0xf] %v981_v37 }
  0x55   : > { %v1145_v41 = vsel %vm7045_vm10, %v1140_v26, %v1144_v16  ;;  %v1036_v42 = vld [vmem:[#allocation2 + $0x34] sm:$0xf]  ;;  %v762_v50 = vsel %vm7053_vm11, %v754_v23, %v761_v27  ;;  %v985_v57 = vsel %vm6961_vm4, %v763_v28, %v984_v38  ;;  %v6236_v61 = vpack.c.bf16 %v362_v29, %v362_v29  ;;  %v987_v18 = vld [vmem:[#allocation2 + $0xb0] sm:$0xf]  ;;  %v991_v24 = vld [vmem:[#allocation2 + $0xb8] sm:$0x1] }
  0x56   : > { %v1068_v43 = vld [vmem:[#allocation2 + $0x38] sm:$0x1]  ;;  %v1155_v51 = vsel %vm7045_vm10, %v1150_v33, %v1154_v17  ;;  %v1166_v52 = vshll.u32 %v1036_v42, 16  ;;  %v1170_v53 = vshrl.u32 %v1036_v42, 16  ;;  %983 = vst.msk [vmem:[#allocation2 + $0xa4] sm:$0xf] %vm389_vm0, %v762_v50  ;;  %v6262_v8 = vunpack.c.h.bf16 %v6313_v20 }
  0x57   : > { %v1176_v5 = vshll.u32 %v1068_v43, 16  ;;  %v5831_v30 = vcombine.low %v1145_v41, %v1155_v51  ;;  %v1159_v55 = vrot.slane %v1157_v44, 4  ;;  %v1162_v56 = vrot.slane %v1160_v45, 5  ;;  %986 = vst [vmem:[#allocation2 + $0xa8] sm:$0x1] %v985_v57 }
  0x58   : > { %v1168_v58 = vrot.slane %v1166_v52, 5  ;;  %v1172_v35 = vrot.slane %v1170_v53, 4  ;;  %v765_v1 = vshrl.u32 %v6235_v39, 16  ;;  %v768_v2 = vshll.u32 %v6235_v39, 16  ;;  %v417_v52 = vld [vmem:[#allocation2 + $0x50] sm:$0x1] }
  0x59   : > { %v1178_v60 = vrot.slane %v1176_v5, 5  ;;  %6496 = vmatprep.mubr.msk.bf16.mxu0 %vm1533_vm9, %v5831_v30  ;;  %v1163_v0 = vor.u32 %v1162_v56, %v1159_v55  ;;  %v773_v10 = vshrl.u32 %v6236_v61, 16  ;;  %v776_v12 = vshll.u32 %v6236_v61, 16  ;;  %v473_v53 = vld [vmem:[#allocation2 + $0x58] sm:$0x1] }
  0x5a   : > { %v1173_v9 = vor.u32 %v1172_v35, %v1168_v58  ;;  %v276_v13 = vmul.f32 %v6261_v40, %v6994_v14  ;;  %v767_v15 = vrot.slane %v765_v1, 7  ;;  %v277_v16 = vmul.f32 %v6262_v8, %v6994_v14  ;;  %v6321_v35 = vld [vmem:[%s6989_s26 + $0x58] sm:$0xff]  }
  0x5b   : > { %v1164_v47 = vrot.slane %v1163_v0, 4  ;;  %v415_v62 = vsel %vm6961_vm4, 0, %v414_v54  ;;  %v1049_v19 = vld [vmem:[#allocation2 + $0xa0] sm:$0xf]  ;;  %v775_v21 = vrot.slane %v773_v10, 7  ;;  %v471_v20 = vsel %vm6966_vm5, 0, %v470_v46 }
  0x5c   : > { %v1174_v17 = vrot.slane %v1173_v9, 4  ;;  %v315_v49 = vadd.f32 %v7009_v32, %v276_v13  ;;  %416 = vst [vmem:[#allocation2 + $0x40] sm:$0x1] %v415_v62  ;;  %v1325_v11 = vshrl.u32 %v1049_v19, 16  ;;  %v1328_v22 = vshll.u32 %v1049_v19, 16 }
  0x5d   : > { %v1169_v63 = vsel %vm7045_vm10, %v1164_v47, %v1168_v58  ;;  %v1050_v48 = vld [vmem:[#allocation2 + $0xa4] sm:$0xf]  ;;  %v770_v23 = vor.u32 %v768_v2, %v767_v15  ;;  %472 = vst [vmem:[#allocation2 + $0x48] sm:$0x1] %v471_v20  ;;  %v771_v29 = vrot.slane %v767_v15, 4  ;;  %v778_v39 = vor.u32 %v776_v12, %v775_v21 }
  0x5e   : > { %v1179_v26 = vsel %vm7045_vm10, %v1174_v17, %v1178_v60  ;;  %v1334_v27 = vshll.u32 %v1050_v48, 16  ;;  %v1338_v28 = vshrl.u32 %v1050_v48, 16  ;;  %v1075_v36 = vld [vmem:[#allocation2 + $0xa8] sm:$0x1]  ;;  %v1327_v37 = vrot.slane %v1325_v11, 4 }
  0x5f   : > { %v5832_v33 = vcombine.low %v1169_v63, %v1179_v26  ;;  %v1330_v38 = vrot.slane %v1328_v22, 5  ;;  %v1344_v42 = vshll.u32 %v1075_v36, 16  ;;  %v780_v43 = vrot.slane %v775_v21, 4 }
  0x60   : > { %v1336_v40 = vrot.slane %v1334_v27, 5  ;;  %v1340_v41 = vrot.slane %v1338_v28, 4  ;;  %v779_v45 = vsel %vm7053_vm11, %v771_v29, %v778_v39  ;;  %v988_v50 = vsel %vm7059_vm12, %v770_v23, %v987_v18 }
  0x61   : > { %6497 = vmatmul.mubr.msk.bf16.gmra.mxu0 %vm1533_vm9, %v5832_v33  ;;  %v1331_v44 = vor.u32 %v1330_v38, %v1327_v37  ;;  %v316_v51 = vadd.f32 %v7009_v32, %v277_v16  ;;  %v1346_v54 = vrot.slane %v1344_v42, 5  ;;  %989 = vst [vmem:[#allocation2 + $0xb0] sm:$0xf] %v988_v50  ;;  %990 = vst.msk [vmem:[#allocation2 + $0xb4] sm:$0xf] %vm389_vm0, %v779_v45  ;;  %v347_v55 = vmax.f32 %v315_v49, 0.0 }
  0x62   : > { %v1341_v5 = vor.u32 %v1340_v41, %v1336_v40  ;;  %v992_v30 = vsel %vm6961_vm4, %v780_v43, %v991_v24  ;;  %v6265_v46 = vunpack.c.l.bf16 %v6314_v31  ;;  %v6266_v58 = vunpack.c.h.bf16 %v6314_v31  ;;  %v7229_v16 = vld [vmem:[%s6989_s26 + $0x60] sm:$0xff]  }
  0x63   : > { %v1332_v56 = vrot.slane %v1331_v44, 4  ;;  %993 = vst [vmem:[#allocation2 + $0xb8] sm:$0x1] %v992_v30  ;;  %v348_v57 = vmax.f32 %v316_v51, 0.0  ;;  %v6221_v61 = vpack.c.bf16 %v347_v55, %v347_v55  ;;  %v418_v0 = vsel %vm6961_vm4, 0, %v417_v52 }
  0x64   : > { %v1342_v60 = vrot.slane %v1341_v5, 4  ;;  %v474_v1 = vsel %vm6966_vm5, 0, %v473_v53  ;;  %v278_v9 = vmul.f32 %v6265_v46, %v6994_v14  ;;  %v279_v10 = vmul.f32 %v6266_v58, %v6994_v14  ;;  %419 = vst [vmem:[#allocation2 + $0x50] sm:$0x1] %v418_v0  ;;  %v938_v49 = vld [vmem:[#allocation2 + $0x40] sm:$0xf] }
  0x65   : > { %v1337_v2 = vsel %vm7045_vm10, %v1332_v56, %v1336_v40  ;;  %v6222_v8 = vpack.c.bf16 %v348_v57, %v348_v57  ;;  %475 = vst [vmem:[#allocation2 + $0x58] sm:$0x1] %v474_v1  ;;  %v646_v13 = vshrl.u32 %v6221_v61, 16  ;;  %v649_v47 = vshll.u32 %v6221_v61, 16  ;;  %v942_v44 = vld [vmem:[#allocation2 + $0x48] sm:$0x1] }
  0x66   : > { %v1347_v12 = vsel %vm7045_vm10, %v1342_v60, %v1346_v54  ;;  %v6293_v15 = vunpack.c.l.bf16 %v6321_v35  ;;  %v317_v21 = vadd.f32 %v7009_v32, %v278_v9  ;;  %v318_v20 = vadd.f32 %v7009_v32, %v279_v10  ;;  %v494_v53 = vld [vmem:[#allocation2 + $0xc8] sm:$0x1]  ;;  %v7247_v57 = vld [vmem:[%s9599_s1] ss:$0 sm:$0xff] }
  0x67   : > { %v5839_v62 = vcombine.low %v1337_v2, %v1347_v12  ;;  %v654_v17 = vshrl.u32 %v6222_v8, 16  ;;  %v657_v19 = vshll.u32 %v6222_v8, 16  ;;  %v648_v18 = vrot.slane %v646_v13, 7  ;;  %v7253_v58 = vld [vmem:[%s9600_s2] ss:$0 sm:$0xff] }
  0x68   : > { %v6294_v63 = vunpack.c.h.bf16 %v6321_v35  ;;  %v292_v48 = vmul.f32 %v6293_v15, %v6994_v14  ;;  %v1051_v11 = vld [vmem:[#allocation2 + $0xb0] sm:$0xf]  ;;  %v1052_v22 = vld [vmem:[#allocation2 + $0xb4] sm:$0xf]  ;;  %v349_v24 = vmax.f32 %v317_v21, 0.0  ;;  %v6297_v26 = vunpack.c.l.bf16 %v7229_v16 }
  0x69   : > { %6512 = vmatprep.mubr.msk.bf16.mxu1 %vm1533_vm9, %v5839_v62  ;;  %v656_v23 = vrot.slane %v654_v17, 7  ;;  %v6298_v27 = vunpack.c.h.bf16 %v7229_v16  ;;  %v1349_v29 = vshrl.u32 %v1051_v11, 16  ;;  %v1352_v31 = vshll.u32 %v1051_v11, 16  ;;  %v438_v14 = vld [vmem:[#allocation2 + $0xc0] sm:$0x1] }
  0x6a   : > { %v1076_v28 = vld [vmem:[#allocation2 + $0xb8] sm:$0x1]  ;;  %v1358_v33 = vshll.u32 %v1052_v22, 16  ;;  %v1362_v36 = vshrl.u32 %v1052_v22, 16  ;;  %v651_v32 = vor.u32 %v649_v47, %v648_v18  ;;  %v652_v38 = vrot.slane %v648_v18, 4 }
  0x6b   : > { %v1368_v37 = vshll.u32 %v1076_v28, 16  ;;  %v659_v39 = vor.u32 %v657_v19, %v656_v23  ;;  %v1351_v40 = vrot.slane %v1349_v29, 4  ;;  %v1354_v41 = vrot.slane %v1352_v31, 5 }
  0x6c   : > { %v1360_v42 = vrot.slane %v1358_v33, 5  ;;  %v1364_v43 = vrot.slane %v1362_v36, 4  ;;  %v661_v51 = vrot.slane %v656_v23, 4  ;;  %v939_v52 = vsel %vm7059_vm12, %v651_v32, %v938_v49  ;;  %v949_v32 = vld [vmem:[#allocation2 + $0x58] sm:$0x1] }
  0x6d   : > { %v1370_v45 = vrot.slane %v1368_v37, 5  ;;  %v660_v50 = vsel %vm7053_vm11, %v652_v38, %v659_v39  ;;  %v1355_v5 = vor.u32 %v1354_v41, %v1351_v40  ;;  %940 = vst [vmem:[#allocation2 + $0x40] sm:$0xf] %v939_v52  ;;  %v350_v30 = vmax.f32 %v318_v20, 0.0 }
  0x6e   : > { %v1365_v54 = vor.u32 %v1364_v43, %v1360_v42  ;;  %941 = vst.msk [vmem:[#allocation2 + $0x44] sm:$0xf] %vm389_vm0, %v660_v50  ;;  %v6223_v55 = vpack.c.bf16 %v349_v24, %v349_v24  ;;  %v943_v56 = vsel %vm6961_vm4, %v661_v51, %v942_v44  ;;  %v293_v46 = vmul.f32 %v7247_v57, %v6294_v63 }
  0x6f   : > { %v331_v35 = vadd.f32 %v7253_v58, %v292_v48  ;;  %v439_v60 = vsel %vm6961_vm4, 0, %v438_v14  ;;  %v1356_v61 = vrot.slane %v1355_v5, 4  ;;  %944 = vst [vmem:[#allocation2 + $0x48] sm:$0x1] %v943_v56  ;;  %v6224_v1 = vpack.c.bf16 %v350_v30, %v350_v30  ;;  %v945_v48 = vld [vmem:[#allocation2 + $0x50] sm:$0xf] }
  0x70   : > { %v1366_v0 = vrot.slane %v1365_v54, 4  ;;  %v663_v2 = vshrl.u32 %v6223_v55, 16  ;;  %440 = vst [vmem:[#allocation2 + $0xc0] sm:$0x1] %v439_v60  ;;  %v666_v8 = vshll.u32 %v6223_v55, 16  ;;  %v332_v9 = vadd.f32 %v7253_v58, %v293_v46  ;;  %v7288_v54 = vld [vmem:[%s6989_s26 + $0x28] sm:$0xff]  }
  0x71   : > { %v363_v10 = vmax.f32 %v331_v35, 0.0  ;;  %v495_v12 = vsel %vm6966_vm5, 0, %v494_v53  ;;  %v1361_v13 = vsel %vm7045_vm10, %v1356_v61, %v1360_v42  ;;  %v671_v62 = vshrl.u32 %v6224_v1, 16  ;;  %v497_v5 = vld [vmem:[#allocation2 + $0xd8] sm:$0x1] }
  0x72   : > { %v1371_v47 = vsel %vm7045_vm10, %v1366_v0, %v1370_v45  ;;  %v665_v15 = vrot.slane %v663_v2, 7  ;;  %496 = vst [vmem:[#allocation2 + $0xc8] sm:$0x1] %v495_v12  ;;  %v674_v19 = vshll.u32 %v6224_v1, 16  ;;  %v364_v21 = vmax.f32 %v332_v9, 0.0 }
  0x73   : > { %v5840_v17 = vcombine.low %v1361_v13, %v1371_v47  ;;  %v6237_v18 = vpack.c.bf16 %v363_v10, %v363_v10  ;;  %v673_v63 = vrot.slane %v671_v62, 7  ;;  %v294_v11 = vmul.f32 %v7247_v57, %v6297_v26  ;;  %v441_v45 = vld [vmem:[#allocation2 + $0xd0] sm:$0x1] }
  0x74   : > { %v668_v49 = vor.u32 %v666_v8, %v665_v15  ;;  %v669_v20 = vrot.slane %v665_v15, 4  ;;  %v7267_v22 = vld [vmem:[#allocation2 + $0x40] sm:$0xf]  ;;  %v6238_v24 = vpack.c.bf16 %v364_v21, %v364_v21  ;;  %v295_v31 = vmul.f32 %v7247_v57, %v6298_v27 }
  0x75   : > { %6513 = vmatmul.mubr.msk.bf16.gmra.mxu1 %vm1533_vm9, %v5840_v17  ;;  %v7269_v23 = vld [vmem:[#allocation2 + $0x44] sm:$0xf]  ;;  %v782_v28 = vshrl.u32 %v6237_v18, 16  ;;  %v785_v29 = vshll.u32 %v6237_v18, 16  ;;  %v1181_v33 = vshrl.u32 %v7267_v22, 16  ;;  %v1184_v36 = vshll.u32 %v7267_v22, 16 }
  0x76   : > { %v1190_v37 = vshll.u32 %v7269_v23, 16  ;;  %v1194_v26 = vshrl.u32 %v7269_v23, 16  ;;  %v7278_v38 = vld [vmem:[#allocation2 + $0x48] sm:$0x1]  ;;  %v676_v39 = vor.u32 %v674_v19, %v673_v63  ;;  %v678_v14 = vrot.slane %v673_v63, 4 }
  0x77   : > { %v946_v40 = vsel %vm7059_vm12, %v668_v49, %v945_v48  ;;  %v784_v16 = vrot.slane %v782_v28, 7  ;;  %v994_v41 = vld [vmem:[#allocation2 + $0xc0] sm:$0xf]  ;;  %v1183_v27 = vrot.slane %v1181_v33, 4  ;;  %v1186_v42 = vrot.slane %v1184_v36, 5 }
  0x78   : > { %v1192_v43 = vrot.slane %v1190_v37, 5  ;;  %v1196_v44 = vrot.slane %v1194_v26, 4  ;;  %947 = vst [vmem:[#allocation2 + $0x50] sm:$0xf] %v946_v40  ;;  %v1200_v50 = vshll.u32 %v7278_v38, 16  ;;  %v677_v51 = vsel %vm7053_vm11, %v669_v20, %v676_v39 }
  0x79   : > { %v950_v52 = vsel %vm6961_vm4, %v678_v14, %v949_v32  ;;  %v787_v53 = vor.u32 %v785_v29, %v784_v16  ;;  %v1187_v30 = vor.u32 %v1186_v42, %v1183_v27  ;;  %948 = vst.msk [vmem:[#allocation2 + $0x54] sm:$0xf] %vm389_vm0, %v677_v51  ;;  %v788_v56 = vrot.slane %v784_v16, 4  ;;  %v998_v10 = vld [vmem:[#allocation2 + $0xc8] sm:$0x1] }
  0x7a   : > { %v1197_v55 = vor.u32 %v1196_v44, %v1192_v43  ;;  %951 = vst [vmem:[#allocation2 + $0x58] sm:$0x1] %v950_v52  ;;  %v790_v46 = vshrl.u32 %v6238_v24, 16  ;;  %v1202_v35 = vrot.slane %v1200_v50, 5  ;;  %v793_v60 = vshll.u32 %v6238_v24, 16 }
  0x7b   : > { %v995_v61 = vsel %vm7059_vm12, %v787_v53, %v994_v41  ;;  %v333_v0 = vadd.f32 %v7253_v58, %v294_v11  ;;  %v1188_v1 = vrot.slane %v1187_v30, 4  ;;  %v334_v9 = vadd.f32 %v7253_v58, %v295_v31 }
  0x7c   : > { %v1198_v2 = vrot.slane %v1197_v55, 4  ;;  %v792_v8 = vrot.slane %v790_v46, 7  ;;  %996 = vst [vmem:[#allocation2 + $0xc0] sm:$0xf] %v995_v61  ;;  %v442_v13 = vsel %vm6961_vm4, 0, %v441_v45  ;;  %v498_v47 = vsel %vm6966_vm5, 0, %v497_v5 }
  0x7d   : > { %v365_v12 = vmax.f32 %v333_v0, 0.0  ;;  %v6269_v15 = vunpack.c.l.bf16 %v7288_v54  ;;  %v1193_v62 = vsel %vm7045_vm10, %v1188_v1, %v1192_v43  ;;  %443 = vst [vmem:[#allocation2 + $0xd0] sm:$0x1] %v442_v13  ;;  %499 = vst [vmem:[#allocation2 + $0xd8] sm:$0x1] %v498_v47  ;;  %v366_v20 = vmax.f32 %v334_v9, 0.0 }
  0x7e   : > { %v1203_v17 = vsel %vm7045_vm10, %v1198_v2, %v1202_v35  ;;  %v795_v19 = vor.u32 %v793_v60, %v792_v8  ;;  %v797_v21 = vrot.slane %v792_v8, 4  ;;  %v6270_v48 = vunpack.c.h.bf16 %v7288_v54 }
  0x7f   : > { %v5833_v18 = vcombine.low %v1193_v62, %v1203_v17  ;;  %v7304_v49 = vld [vmem:[#allocation2 + $0x50] sm:$0xf]  ;;  %v6239_v63 = vpack.c.bf16 %v365_v12, %v365_v12  ;;  %v6240_v36 = vpack.c.bf16 %v366_v20, %v366_v20  ;;  %v280_v32 = vmul.f32 %v7247_v57, %v6269_v15 }
  0x80   : > { %v1205_v11 = vshrl.u32 %v7304_v49, 16  ;;  %v1208_v24 = vshll.u32 %v7304_v49, 16  ;;  %v796_v28 = vsel %vm7053_vm11, %v788_v56, %v795_v19  ;;  %v999_v29 = vsel %vm6961_vm4, %v797_v21, %v998_v10  ;;  %v7314_v31 = vld [vmem:[#allocation2 + $0x54] sm:$0xf] }
  0x81   : > { %6500 = vmatprep.mubr.msk.bf16.mxu0 %vm1533_vm9, %v5833_v18  ;;  %v7316_v33 = vld [vmem:[#allocation2 + $0x58] sm:$0x1]  ;;  %997 = vst.msk [vmem:[#allocation2 + $0xc4] sm:$0xf] %vm389_vm0, %v796_v28  ;;  %1000 = vst [vmem:[#allocation2 + $0xc8] sm:$0x1] %v999_v29  ;;  %v281_v2 = vmul.f32 %v7247_v57, %v6270_v48  ;;  %v319_v8 = vadd.f32 %v7253_v58, %v280_v32 }
  0x82   : > { %v799_v37 = vshrl.u32 %v6239_v63, 16  ;;  %v802_v26 = vshll.u32 %v6239_v63, 16  ;;  %v1207_v39 = vrot.slane %v1205_v11, 4  ;;  %v1210_v14 = vrot.slane %v1208_v24, 5  ;;  %v420_v18 = vld [vmem:[#allocation2 + $0x60] sm:$0x1] }
  0x83   : > { %v1214_v40 = vshll.u32 %v7314_v31, 16  ;;  %v1218_v16 = vshrl.u32 %v7314_v31, 16  ;;  %v1224_v41 = vshll.u32 %v7316_v33, 16  ;;  %v7323_v27 = vld [vmem:[#allocation2 + $0xc0] sm:$0xf]  ;;  %v807_v43 = vshrl.u32 %v6240_v36, 16 }
  0x84   : > { %v801_v42 = vrot.slane %v799_v37, 7  ;;  %v810_v44 = vshll.u32 %v6240_v36, 16  ;;  %v1211_v45 = vor.u32 %v1210_v14, %v1207_v39  ;;  %v1373_v52 = vshrl.u32 %v7323_v27, 16  ;;  %v1001_v55 = vld [vmem:[#allocation2 + $0xd0] sm:$0xf] }
  0x85   : > { %v1216_v50 = vrot.slane %v1214_v40, 5  ;;  %v1220_v51 = vrot.slane %v1218_v16, 4  ;;  %v1226_v53 = vrot.slane %v1224_v41, 5  ;;  %v1376_v5 = vshll.u32 %v7323_v27, 16  ;;  %v1005_v1 = vld [vmem:[#allocation2 + $0xd8] sm:$0x1] }
  0x86   : > { %v804_v54 = vor.u32 %v802_v26, %v801_v42  ;;  %v805_v30 = vrot.slane %v801_v42, 4  ;;  %v1212_v56 = vrot.slane %v1211_v45, 4  ;;  %v1375_v35 = vrot.slane %v1373_v52, 4  ;;  %v476_v24 = vld [vmem:[#allocation2 + $0x68] sm:$0x1]  ;;  %v6316_v28 = vld [vmem:[%s6989_s26 + $0x30] sm:$0xff]  }
  0x87   : > { %v1221_v46 = vor.u32 %v1220_v51, %v1216_v50  ;;  %v809_v60 = vrot.slane %v807_v43, 7  ;;  %v1378_v61 = vrot.slane %v1376_v5, 5  ;;  %v320_v11 = vadd.f32 %v7253_v58, %v281_v2  ;;  %v423_v29 = vld [vmem:[#allocation2 + $0x70] sm:$0x1]  ;;  %v479_v39 = vld [vmem:[#allocation2 + $0x78] sm:$0x1] }
  0x88   : > { %v1002_v0 = vsel %vm7059_vm12, %v804_v54, %v1001_v55  ;;  %v1217_v9 = vsel %vm7045_vm10, %v1212_v56, %v1216_v50  ;;  %v7333_v12 = vld [vmem:[#allocation2 + $0xc4] sm:$0xf]  ;;  %v7335_v13 = vld [vmem:[#allocation2 + $0xc8] sm:$0x1]  ;;  %v351_v40 = vmax.f32 %v319_v8, 0.0  ;;  %v421_v41 = vsel %vm6961_vm4, 0, %v420_v18 }
  0x89   : > { %v1222_v10 = vrot.slane %v1221_v46, 4  ;;  %v812_v47 = vor.u32 %v810_v44, %v809_v60  ;;  %v814_v15 = vrot.slane %v809_v60, 4  ;;  %1003 = vst [vmem:[#allocation2 + $0xd0] sm:$0xf] %v1002_v0  ;;  %v1379_v62 = vor.u32 %v1378_v61, %v1375_v35  ;;  %v7352_v42 = vld [vmem:[%s6989_s26 + $0x68] sm:$0xff]  }
  0x8a   : > { %v1382_v17 = vshll.u32 %v7333_v12, 16  ;;  %v1386_v19 = vshrl.u32 %v7333_v12, 16  ;;  %v1392_v21 = vshll.u32 %v7335_v13, 16  ;;  %v352_v16 = vmax.f32 %v320_v11, 0.0  ;;  %422 = vst [vmem:[#allocation2 + $0x60] sm:$0x1] %v421_v41 }
  0x8b   : > { %v1227_v20 = vsel %vm7045_vm10, %v1222_v10, %v1226_v53  ;;  %v813_v63 = vsel %vm7053_vm11, %v805_v30, %v812_v47  ;;  %v1006_v48 = vsel %vm6961_vm4, %v814_v15, %v1005_v1  ;;  %v1380_v37 = vrot.slane %v1379_v62, 4 }
  0x8c   : > { %v5834_v36 = vcombine.low %v1217_v9, %v1227_v20  ;;  %v1384_v26 = vrot.slane %v1382_v17, 5  ;;  %v1388_v32 = vrot.slane %v1386_v19, 4  ;;  %1004 = vst.msk [vmem:[#allocation2 + $0xd4] sm:$0xf] %vm389_vm0, %v813_v63  ;;  %1007 = vst [vmem:[#allocation2 + $0xd8] sm:$0x1] %v1006_v48  ;;  %v6273_v50 = vunpack.c.l.bf16 %v6316_v28 }
  0x8d   : > { %v1394_v14 = vrot.slane %v1392_v21, 5  ;;  %v477_v45 = vsel %vm6966_vm5, 0, %v476_v24  ;;  %v6225_v51 = vpack.c.bf16 %v351_v40, %v351_v40  ;;  %v6226_v52 = vpack.c.bf16 %v352_v16, %v352_v16 }
  0x8e   : > { %6501 = vmatmul.mubr.msk.bf16.gmra.mxu0 %vm1533_vm9, %v5834_v36  ;;  %v1385_v43 = vsel %vm7045_vm10, %v1380_v37, %v1384_v26  ;;  %v1389_v44 = vor.u32 %v1388_v32, %v1384_v26  ;;  %478 = vst [vmem:[#allocation2 + $0x68] sm:$0x1] %v477_v45  ;;  %v6274_v53 = vunpack.c.h.bf16 %v6316_v28  ;;  %v424_v5 = vsel %vm6961_vm4, 0, %v423_v29 }
  0x8f   : > { %v282_v55 = vmul.f32 %v7247_v57, %v6273_v50  ;;  %425 = vst [vmem:[#allocation2 + $0x70] sm:$0x1] %v424_v5  ;;  %v480_v56 = vsel %vm6966_vm5, 0, %v479_v39  ;;  %v6301_v46 = vunpack.c.l.bf16 %v7352_v42  ;;  %v680_v61 = vshrl.u32 %v6225_v51, 16 }
  0x90   : > { %v1390_v54 = vrot.slane %v1389_v44, 4  ;;  %v7361_v30 = vld [vmem:[#allocation2 + $0xd0] sm:$0xf]  ;;  %v683_v0 = vshll.u32 %v6225_v51, 16  ;;  %481 = vst [vmem:[#allocation2 + $0x78] sm:$0x1] %v480_v56  ;;  %v283_v9 = vmul.f32 %v7247_v57, %v6274_v53 }
  0x91   : > { %v1397_v35 = vshrl.u32 %v7361_v30, 16  ;;  %v1400_v60 = vshll.u32 %v7361_v30, 16  ;;  %v688_v2 = vshrl.u32 %v6226_v52, 16  ;;  %v691_v8 = vshll.u32 %v6226_v52, 16  ;;  %v952_v24 = vld [vmem:[#allocation2 + $0x60] sm:$0xf] }
  0x92   : > { %v1395_v1 = vsel %vm7045_vm10, %v1390_v54, %v1394_v14  ;;  %v321_v19 = vadd.f32 %v7253_v58, %v282_v55  ;;  %v682_v63 = vrot.slane %v680_v61, 7  ;;  %v322_v28 = vadd.f32 %v7253_v58, %v283_v9  ;;  %v444_v51 = vld [vmem:[#allocation2 + $0xe0] sm:$0x1]  ;;  %v500_v52 = vld [vmem:[#allocation2 + $0xe8] sm:$0x1] }
  0x93   : > { %v5841_v10 = vcombine.low %v1385_v43, %v1395_v1  ;;  %v7372_v47 = vld [vmem:[#allocation2 + $0xd4] sm:$0xf]  ;;  %v7374_v15 = vld [vmem:[#allocation2 + $0xd8] sm:$0x1]  ;;  %v1399_v62 = vrot.slane %v1397_v35, 4  ;;  %v1402_v17 = vrot.slane %v1400_v60, 5  ;;  %v6302_v55 = vunpack.c.h.bf16 %v7352_v42 }
  0x94   : > { %v1406_v21 = vshll.u32 %v7372_v47, 16  ;;  %v1410_v18 = vshrl.u32 %v7372_v47, 16  ;;  %v1416_v20 = vshll.u32 %v7374_v15, 16  ;;  %v690_v11 = vrot.slane %v688_v2, 7  ;;  %v447_v1 = vld [vmem:[#allocation2 + $0xf0] sm:$0x1] }
  0x95   : > { %6516 = vmatprep.mubr.msk.bf16.mxu1 %vm1533_vm9, %v5841_v10  ;;  %v1403_v48 = vor.u32 %v1402_v17, %v1399_v62  ;;  %v353_v29 = vmax.f32 %v321_v19, 0.0  ;;  %v685_v32 = vor.u32 %v683_v0, %v682_v63  ;;  %v956_v39 = vld [vmem:[#allocation2 + $0x68] sm:$0x1]  ;;  %v686_v40 = vrot.slane %v682_v63, 4  ;;  %v6324_v0 = vld [vmem:[%s6989_s26 + $0x70] sm:$0xff]  }
  0x96   : > { %v1408_v36 = vrot.slane %v1406_v21, 5  ;;  %v1412_v37 = vrot.slane %v1410_v18, 4  ;;  %v1418_v26 = vrot.slane %v1416_v20, 5  ;;  %v693_v16 = vor.u32 %v691_v8, %v690_v11  ;;  %v959_v2 = vld [vmem:[#allocation2 + $0x70] sm:$0xf] }
  0x97   : > { %v1404_v14 = vrot.slane %v1403_v48, 4  ;;  %v695_v41 = vrot.slane %v690_v11, 4  ;;  %v953_v44 = vsel %vm7059_vm12, %v685_v32, %v952_v24  ;;  %v354_v45 = vmax.f32 %v322_v28, 0.0 }
  0x98   : > { %v1413_v43 = vor.u32 %v1412_v37, %v1408_v36  ;;  %v6227_v50 = vpack.c.bf16 %v353_v29, %v353_v29  ;;  %v694_v5 = vsel %vm7053_vm11, %v686_v40, %v693_v16  ;;  %954 = vst [vmem:[#allocation2 + $0x60] sm:$0xf] %v953_v44  ;;  %v296_v8 = vmul.f32 %v7247_v57, %v6301_v46  ;;  %v963_v16 = vld [vmem:[#allocation2 + $0x78] sm:$0x1] }
  0x99   : > { %v1409_v53 = vsel %vm7045_vm10, %v1404_v14, %v1408_v36  ;;  %v957_v54 = vsel %vm6961_vm4, %v695_v41, %v956_v39  ;;  %955 = vst.msk [vmem:[#allocation2 + $0x64] sm:$0xf] %vm389_vm0, %v694_v5  ;;  %v6228_v35 = vpack.c.bf16 %v354_v45, %v354_v45  ;;  %v297_v9 = vmul.f32 %v7247_v57, %v6302_v55 }
  0x9a   : > { %v1414_v56 = vrot.slane %v1413_v43, 4  ;;  %958 = vst [vmem:[#allocation2 + $0x68] sm:$0x1] %v957_v54  ;;  %v697_v60 = vshrl.u32 %v6227_v50, 16  ;;  %v700_v61 = vshll.u32 %v6227_v50, 16  ;;  %v445_v10 = vsel %vm6961_vm4, 0, %v444_v51 }
  0x9b   : > { %v501_v42 = vsel %vm6966_vm5, 0, %v500_v52  ;;  %v705_v19 = vshrl.u32 %v6228_v35, 16  ;;  %v708_v21 = vshll.u32 %v6228_v35, 16  ;;  %446 = vst [vmem:[#allocation2 + $0xe0] sm:$0x1] %v445_v10  ;;  %v335_v20 = vadd.f32 %v7253_v58, %v296_v8 }
  0x9c   : > { %v1419_v62 = vsel %vm7045_vm10, %v1414_v56, %v1418_v26  ;;  %v699_v17 = vrot.slane %v697_v60, 7  ;;  %502 = vst [vmem:[#allocation2 + $0xe8] sm:$0x1] %v501_v42  ;;  %v336_v46 = vadd.f32 %v7253_v58, %v297_v9  ;;  %v6305_v63 = vunpack.c.l.bf16 %v6324_v0 }
  0x9d   : > { %v5842_v18 = vcombine.low %v1409_v53, %v1419_v62  ;;  %v707_v24 = vrot.slane %v705_v19, 7  ;;  %v6306_v28 = vunpack.c.h.bf16 %v6324_v0  ;;  %v367_v29 = vmax.f32 %v335_v20, 0.0 }
  0x9e   : > { %v702_v48 = vor.u32 %v700_v61, %v699_v17  ;;  %v703_v11 = vrot.slane %v699_v17, 4  ;;  %v368_v36 = vmax.f32 %v336_v46, 0.0  ;;  %v298_v37 = vmul.f32 %v7247_v57, %v6305_v63  ;;  %v503_v61 = vld [vmem:[#allocation2 + $0xf8] sm:$0x1] }
  0x9f   : > { %6517 = vmatmul.mubr.msk.bf16.gmra.mxu1 %vm1533_vm9, %v5842_v18  ;;  %v448_v26 = vsel %vm6961_vm4, 0, %v447_v1  ;;  %v7407_v32 = vld [vmem:[#allocation2 + $0x60] sm:$0xf]  ;;  %v710_v39 = vor.u32 %v708_v21, %v707_v24  ;;  %v712_v14 = vrot.slane %v707_v24, 4  ;;  %v299_v41 = vmul.f32 %v7247_v57, %v6306_v28 }
  0xa0   : > { %v960_v40 = vsel %vm7059_vm12, %v702_v48, %v959_v2  ;;  %449 = vst [vmem:[#allocation2 + $0xf0] sm:$0x1] %v448_v26  ;;  %v7412_v43 = vld [vmem:[#allocation2 + $0x64] sm:$0xf]  ;;  %v1229_v45 = vshrl.u32 %v7407_v32, 16  ;;  %v1232_v50 = vshll.u32 %v7407_v32, 16  ;;  %v6241_v51 = vpack.c.bf16 %v367_v29, %v367_v29 }
  0xa1   : > { %v7414_v44 = vld [vmem:[#allocation2 + $0x68] sm:$0x1]  ;;  %961 = vst [vmem:[#allocation2 + $0x70] sm:$0xf] %v960_v40  ;;  %v6242_v52 = vpack.c.bf16 %v368_v36, %v368_v36  ;;  %v1238_v53 = vshll.u32 %v7412_v43, 16  ;;  %v1242_v5 = vshrl.u32 %v7412_v43, 16  ;;  %v711_v57 = vsel %vm7053_vm11, %v703_v11, %v710_v39 }
  0xa2   : > { %v1248_v54 = vshll.u32 %v7414_v44, 16  ;;  %v1231_v55 = vrot.slane %v1229_v45, 4  ;;  %v1234_v56 = vrot.slane %v1232_v50, 5  ;;  %962 = vst.msk [vmem:[#allocation2 + $0x74] sm:$0xf] %vm389_vm0, %v711_v57  ;;  %v964_v35 = vsel %vm6961_vm4, %v712_v14, %v963_v16 }
  0xa3   : > { %v816_v60 = vshrl.u32 %v6241_v51, 16  ;;  %v1240_v0 = vrot.slane %v1238_v53, 5  ;;  %v1244_v1 = vrot.slane %v1242_v5, 4  ;;  %965 = vst [vmem:[#allocation2 + $0x78] sm:$0x1] %v964_v35  ;;  %v819_v8 = vshll.u32 %v6241_v51, 16 }
  0xa4   : > { %v1250_v2 = vrot.slane %v1248_v54, 5  ;;  %v1235_v9 = vor.u32 %v1234_v56, %v1231_v55  ;;  %v824_v42 = vshrl.u32 %v6242_v52, 16  ;;  %v827_v62 = vshll.u32 %v6242_v52, 16  ;;  %v1008_v11 = vld [vmem:[#allocation2 + $0xe0] sm:$0xf] }
  0xa5   : > { %v818_v10 = vrot.slane %v816_v60, 7  ;;  %v1245_v17 = vor.u32 %v1244_v1, %v1240_v0  ;;  %v337_v19 = vadd.f32 %v7253_v58, %v298_v37  ;;  %v338_v21 = vadd.f32 %v7253_v58, %v299_v41  ;;  %v1012_v14 = vld [vmem:[#allocation2 + $0xe8] sm:$0x1]  ;;  %v2044_v60 = vld [vmem:[#allocation2] sm:$0xe] }
  0xa6   : > { %v504_v18 = vsel %vm6966_vm5, 0, %v503_v61  ;;  %v1236_v20 = vrot.slane %v1235_v9, 4  ;;  %v826_v48 = vrot.slane %v824_v42, 7  ;;  %vm2092_vm13 = vcmask 1042432  }
  0xa7   : > { %v821_v46 = vor.u32 %v819_v8, %v818_v10  ;;  %v822_v63 = vrot.slane %v818_v10, 4  ;;  %505 = vst [vmem:[#allocation2 + $0xf8] sm:$0x1] %v504_v18  ;;  %v1246_v24 = vrot.slane %v1245_v17, 4  ;;  %v369_v29 = vmax.f32 %v337_v19, 0.0 }
  0xa8   : > { %v7430_v28 = vld [vmem:[#allocation2 + $0x70] sm:$0xf]  ;;  %v370_v36 = vmax.f32 %v338_v21, 0.0  ;;  %v1241_v37 = vsel %vm7045_vm10, %v1236_v20, %v1240_v0  ;;  %v829_v39 = vor.u32 %v827_v62, %v826_v48  ;;  %v831_v41 = vrot.slane %v826_v48, 4  ;;  %v7453_v8 = vld [vmem:[#allocation2 + $0x14] sm:$0xf] }
  0xa9   : > { %v1253_v58 = vshrl.u32 %v7430_v28, 16  ;;  %v1256_v26 = vshll.u32 %v7430_v28, 16  ;;  %v1251_v40 = vsel %vm7045_vm10, %v1246_v24, %v1250_v2  ;;  %v7438_v16 = vld [vmem:[#allocation2 + $0x74] sm:$0xf]  ;;  %v1009_v45 = vsel %vm7059_vm12, %v821_v46, %v1008_v11  ;;  %v7461_v48 = vld [vmem:[#allocation2 + $0x4] sm:$0xf] }
  0xaa   : > { %v6243_v50 = vpack.c.bf16 %v369_v29, %v369_v29  ;;  %v5835_v51 = vcombine.low %v1241_v37, %v1251_v40  ;;  %v7442_v52 = vld [vmem:[#allocation2 + $0x78] sm:$0x1]  ;;  %v1262_v54 = vshll.u32 %v7438_v16, 16  ;;  %1010 = vst [vmem:[#allocation2 + $0xe0] sm:$0xf] %v1009_v45  ;;  %v1266_v57 = vshrl.u32 %v7438_v16, 16 }
  0xab   : > { %v1255_v53 = vrot.slane %v1253_v58, 4  ;;  %v1258_v5 = vrot.slane %v1256_v26, 5  ;;  %v1272_v55 = vshll.u32 %v7442_v52, 16  ;;  %v830_v56 = vsel %vm7053_vm11, %v822_v63, %v829_v39  ;;  %v6880_v24 = vld [vmem:[#allocation2 + $0x18] sm:$0x1] }
  0xac   : > { %v1013_v35 = vsel %vm6961_vm4, %v831_v41, %v1012_v14  ;;  %6504 = vmatprep.mubr.msk.bf16.mxu0 %vm1533_vm9, %v5835_v51  ;;  %v1264_v0 = vrot.slane %v1262_v54, 5  ;;  %1011 = vst.msk [vmem:[#allocation2 + $0xe4] sm:$0xf] %vm389_vm0, %v830_v56  ;;  %v6244_v1 = vpack.c.bf16 %v370_v36, %v370_v36  ;;  %v833_v2 = vshrl.u32 %v6243_v50, 16  ;;  %v1015_v26 = vld [vmem:[#allocation2 + $0xf0] sm:$0xf] }
  0xad   : > { %v1259_v61 = vor.u32 %v1258_v5, %v1255_v53  ;;  %1014 = vst [vmem:[#allocation2 + $0xe8] sm:$0x1] %v1013_v35  ;;  %v2104_v9 = vrot.slane %v7453_v8, 5  ;;  %v1268_v10 = vrot.slane %v1266_v57, 4  ;;  %v836_v42 = vshll.u32 %v6243_v50, 16 }
  0xae   : > { %vm2093_vm14 = vcmask 1046532   ;;  %v835_v17 = vrot.slane %v833_v2, 7  ;;  %v841_v19 = vshrl.u32 %v6244_v1, 16  ;;  %v844_v21 = vshll.u32 %v6244_v1, 16  ;;  %v2045_v39 = vld [vmem:[#allocation2 + $0x10] sm:$0xe] }
  0xaf   : > { %v1260_v62 = vrot.slane %v1259_v61, 4  ;;  %vm7457_vm15 = vmor %vm2092_vm13, %vm2093_vm14  ;;  %v1269_v20 = vor.u32 %v1268_v10, %v1264_v0  ;;  %v1274_v46 = vrot.slane %v1272_v55, 5  ;;  %v5897_v63 = vrot.slane %v2044_v60, 9  ;;  %v1019_v57 = vld [vmem:[#allocation2 + $0xf8] sm:$0x1] }
  0xb0   : > { %v2097_v11 = vrot.slane %v7461_v48, 5  ;;  %v2107_v29 = vrot.slane %v6880_v24, 5  ;;  %v838_v37 = vor.u32 %v836_v42, %v835_v17  ;;  %v843_v58 = vrot.slane %v841_v19, 7 }
  0xb1   : > { %v1265_v36 = vsel %vm7045_vm10, %v1260_v62, %v1264_v0  ;;  %v1270_v14 = vrot.slane %v1269_v20, 4  ;;  %v7466_v40 = vld [vmem:[#allocation2 + $0xe0] sm:$0xf]  ;;  %v839_v41 = vrot.slane %v835_v17, 4  ;;  %v5898_v0 = vrot.slane %v2045_v39, 9 }
  0xb2   : > { %v2098_v45 = vsel %vm7457_vm15, %v5897_v63, %v2097_v11  ;;  %v2099_v50 = vrot.slane %v2097_v11, 4  ;;  %v1421_v51 = vshrl.u32 %v7466_v40, 16  ;;  %v1424_v53 = vshll.u32 %v7466_v40, 16  ;;  %v2046_v62 = vld [vmem:[#allocation2 + $0x20] sm:$0xe] }
  0xb3   : > { %v846_v5 = vor.u32 %v844_v21, %v843_v58  ;;  %v848_v54 = vrot.slane %v843_v58, 4  ;;  %v1275_v55 = vsel %vm7045_vm10, %v1270_v14, %v1274_v46  ;;  %v7474_v56 = vld [vmem:[#allocation2 + $0xe4] sm:$0xf]  ;;  %v1016_v60 = vsel %vm7059_vm12, %v838_v37, %v1015_v26  ;;  %v6882_v14 = vld [vmem:[#allocation2 + $0x28] sm:$0x1] }
  0xb4   : > { %v7476_v35 = vld [vmem:[#allocation2 + $0xe8] sm:$0x1]  ;;  %v2101_v61 = vsel %vm7457_vm15, %v2099_v50, %v2100_v6  ;;  %v5836_v1 = vcombine.low %v1265_v36, %v1275_v55  ;;  %v1423_v2 = vrot.slane %v1421_v51, 4  ;;  %v1426_v10 = vrot.slane %v1424_v53, 5  ;;  %1017 = vst [vmem:[#allocation2 + $0xf0] sm:$0xf] %v1016_v60 }
  0xb5   : > { %v1430_v42 = vshll.u32 %v7474_v56, 16  ;;  %v1434_v17 = vshrl.u32 %v7474_v56, 16  ;;  %v1440_v19 = vshll.u32 %v7476_v35, 16  ;;  %v847_v21 = vsel %vm7053_vm11, %v839_v41, %v846_v5  ;;  %v7498_v26 = vld [vmem:[#allocation2 + $0x24] sm:$0xf] }
  0xb6   : > { %v1020_v59 = vsel %vm6961_vm4, %v848_v54, %v1019_v57  ;;  %6505 = vmatmul.mubr.msk.bf16.gmra.mxu0 %vm1533_vm9, %v5836_v1  ;;  %v1427_v6 = vor.u32 %v1426_v10, %v1423_v2  ;;  %1018 = vst.msk [vmem:[#allocation2 + $0xf4] sm:$0xf] %vm389_vm0, %v847_v21  ;;  %v5917_v46 = vcombine.low %v2098_v45, %v2101_v61  ;;  %v2106_v63 = vrot.slane %v2104_v9, 4  ;;  %v2047_v50 = vld [vmem:[#allocation2 + $0x30] sm:$0xe] }
  0xb7   : > { %v1432_v20 = vrot.slane %v1430_v42, 5  ;;  %1021 = vst [vmem:[#allocation2 + $0xf8] sm:$0x1] %v1020_v59  ;;  %v1436_v11 = vrot.slane %v1434_v17, 4  ;;  %v2105_v24 = vsel %vm7457_vm15, %v5898_v0, %v2104_v9  ;;  %v5899_v36 = vrot.slane %v2046_v62, 9 }
  0xb8   : > { %v1428_v37 = vrot.slane %v1427_v6, 4  ;;  %6564 = vmatprep.mubr.msk.bf16.mxu0 %vm1533_vm9, %v5917_v46  ;;  %v2108_v58 = vsel %vm7457_vm15, %v2106_v63, %v2107_v29  ;;  %v2111_v39 = vrot.slane %v7498_v26, 5  ;;  %v2114_v41 = vrot.slane %v6882_v14, 5  ;;  %v2048_v53 = vld [vmem:[#allocation2 + $0x40] sm:$0xe]  ;;  %v6885_v14 = vld [vmem:[%s9601_s3 + $0x48] sm:$0xff]  }
  0xb9   : > { %v1437_v45 = vor.u32 %v1436_v11, %v1432_v20  ;;  %v1442_v51 = vrot.slane %v1440_v19, 5  ;;  %v5918_v5 = vcombine.low %v2105_v24, %v2108_v58  ;;  %v7503_v57 = vld [vmem:[#allocation2 + $0x34] sm:$0xf]  ;;  %v5900_v0 = vrot.slane %v2047_v50, 9  ;;  %v6884_v1 = vld [vmem:[#allocation2 + $0x38] sm:$0x1] }
  0xba   : > { %v2112_v9 = vsel %vm7457_vm15, %v5899_v36, %v2111_v39  ;;  %v2113_v54 = vrot.slane %v2111_v39, 4  ;;  %v2118_v55 = vrot.slane %v7503_v57, 5  ;;  %v1433_v29 = vsel %vm7045_vm10, %v1428_v37, %v1432_v20  ;;  %v6834_v19 = vld [vmem:[%s9601_s3 + $0x40] sm:$0xff]  }
  0xbb   : > { %v1438_v60 = vrot.slane %v1437_v45, 4  ;;  %v7508_v61 = vld [vmem:[#allocation2 + $0xf0] sm:$0xf]  ;;  %v2121_v2 = vrot.slane %v6884_v1, 5  ;;  %v5901_v17 = vrot.slane %v2048_v53, 9  ;;  %v2125_v63 = vrot.slane %v7269_v23, 5 }
  0xbc   : > { %v1445_v10 = vshrl.u32 %v7508_v61, 16  ;;  %v1448_v42 = vshll.u32 %v7508_v61, 16  ;;  %v2115_v62 = vsel %vm7457_vm15, %v2113_v54, %v2114_v41  ;;  %v2120_v46 = vrot.slane %v2118_v55, 4  ;;  %v2049_v45 = vld [vmem:[#allocation2 + $0x50] sm:$0xe] }
  0xbd   : > { %v1443_v21 = vsel %vm7045_vm10, %v1438_v60, %v1442_v51  ;;  %v7519_v59 = vld [vmem:[#allocation2 + $0xf4] sm:$0xf]  ;;  %v5919_v20 = vcombine.low %v2112_v9, %v2115_v62  ;;  %v2119_v41 = vsel %vm7457_vm15, %v5900_v0, %v2118_v55  ;;  %v7536_v51 = vld [vmem:[#allocation2 + $0x88] sm:$0x1]  ;;  %v2127_v54 = vrot.slane %v2125_v63, 4 }
  0xbe   : > { %v7521_v6 = vld [vmem:[#allocation2 + $0xf8] sm:$0x1]  ;;  %v5843_v11 = vcombine.low %v1433_v29, %v1443_v21  ;;  %v1447_v24 = vrot.slane %v1445_v10, 4  ;;  %v1450_v36 = vrot.slane %v1448_v42, 5  ;;  %v1454_v37 = vshll.u32 %v7519_v59, 16  ;;  %6565 = vmatmul.mubr.msk.bf16.vlgmr.msra.gmra.mxu0 %vm1533_vm9, %v5918_v5  ;;  %v7543_v29 = vld [vmem:[%s9601_s3 + $0x68] sm:$0xff]  }
  0xbf   : > { %v1458_v58 = vshrl.u32 %v7519_v59, 16  ;;  %v1464_v39 = vshll.u32 %v7521_v6, 16  ;;  %6633 = vmatpush3.bf16.msra.mxu0 %v6885_v14  ;;  %6568 = vmatprep.mubr.msk.bf16.mxu0 %vm1533_vm9, %v5919_v20  ;;  %v2122_v50 = vsel %vm7457_vm15, %v2120_v46, %v2121_v2  ;;  %v2156_v53 = vrot.slane %v7536_v51, 5  ;;  %v6887_v60 = vld [vmem:[#allocation2] sm:$0xf] }
  0xc0   : > { %6520 = vmatprep.mubr.msk.bf16.mxu1 %vm1533_vm9, %v5843_v11  ;;  %v1451_v5 = vor.u32 %v1450_v36, %v1447_v24  ;;  %v1456_v9 = vrot.slane %v1454_v37, 5  ;;  %6634 = vmatprep.subr.bf16.mxu0 %v6834_v19  ;;  %v5863_v0 = vcombine.low %v6887_v60, %v7461_v48  ;;  %v2126_v1 = vsel %vm7457_vm15, %v5901_v17, %v2125_v63  ;;  %v2050_v10 = vld [vmem:[#allocation2 + $0x60] sm:$0xe]  ;;  %v2051_v46 = vld [vmem:[#allocation2 + $0x70] sm:$0xe] }
  0xc1   : > { %v1460_v55 = vrot.slane %v1458_v58, 4  ;;  %v2128_v2 = vrot.slane %v7278_v38, 5  ;;  %v1466_v62 = vrot.slane %v1464_v39, 5  ;;  %v5920_v21 = vcombine.low %v2119_v41, %v2122_v50  ;;  %v2052_v58 = vld [vmem:[#allocation2 + $0x80] sm:$0xe] }
  0xc2   : > { %v1452_v42 = vrot.slane %v1451_v5, 4  ;;  %v2132_v20 = vrot.slane %v7314_v31, 5  ;;  %v5902_v36 = vrot.slane %v2049_v45, 9  ;;  %v2135_v37 = vrot.slane %v7316_v33, 5  ;;  %v7560_v45 = vld [vmem:[#allocation2 + $0x10] sm:$0xf] }
  0xc3   : > { %v1461_v11 = vor.u32 %v1460_v55, %v1456_v9  ;;  %v2129_v24 = vsel %vm7457_vm15, %v2127_v54, %v2128_v2  ;;  %6635 = vmatpush3.bf16.msra.mxu0 %v6834_v19  ;;  %v5903_v63 = vrot.slane %v2050_v10, 9  ;;  %v2139_v14 = vrot.slane %v7412_v43, 5  ;;  %v2053_v54 = vld [vmem:[#allocation2 + $0x90] sm:$0xe]  ;;  %v7574_v10 = vld [vmem:[#allocation2 + $0x20] sm:$0xf] }
  0xc4   : > { %v1457_v48 = vsel %vm7045_vm10, %v1452_v42, %v1456_v9  ;;  %v5921_v17 = vcombine.low %v2126_v1, %v2129_v24  ;;  %v2134_v38 = vrot.slane %v2132_v20, 4  ;;  %6704 = vmatprep.subr.bf16.mxu0 %v7543_v29  ;;  %v2142_v41 = vrot.slane %v7414_v44, 5  ;;  %v7586_v24 = vld [vmem:[#allocation2 + $0x84] sm:$0xf]  ;;  %v7646_v42 = vld [vmem:[#allocation2 + $0xa0] sm:$0xf] }
  0xc5   : > { %v1462_v39 = vrot.slane %v1461_v11, 4  ;;  %v5864_v33 = vcombine.low %v7560_v45, %v7453_v8  ;;  %v5904_v19 = vrot.slane %v2051_v46, 9  ;;  %v2146_v5 = vrot.slane %v7438_v16, 5 }
  0xc6   : > { %6569 = vmatmul.mubr.msk.bf16.gmra.mxu0 %vm1533_vm9, %v5920_v21  ;;  %v2149_v9 = vrot.slane %v7442_v52, 5  ;;  %v2133_v44 = vsel %vm7457_vm15, %v5902_v36, %v2132_v20  ;;  %v2136_v60 = vsel %vm7457_vm15, %v2134_v38, %v2135_v37  ;;  %v2141_v1 = vrot.slane %v2139_v14, 4  ;;  %v7598_v38 = vld [vmem:[#allocation2 + $0x94] sm:$0xf] }
  0xc7   : > { %v1467_v55 = vsel %vm7045_vm10, %v1462_v39, %v1466_v62  ;;  %6572 = vmatprep.mubr.msk.bf16.mxu0 %vm1533_vm9, %v5921_v17  ;;  %v2140_v52 = vsel %vm7457_vm15, %v5903_v63, %v2139_v14  ;;  %v2148_v21 = vrot.slane %v2146_v5, 4  ;;  %v7580_v62 = vld [vmem:[#allocation2 + $0x30] sm:$0xf]  ;;  %v5905_v11 = vrot.slane %v2052_v58, 9  ;;  %v6899_v58 = vld [vmem:[#allocation2 + $0xb8] sm:$0x1] }
  0xc8   : > { %v5844_v2 = vcombine.low %v1457_v48, %v1467_v55  ;;  %v2143_v20 = vsel %vm7457_vm15, %v2141_v1, %v2142_v41  ;;  %v2153_v36 = vrot.slane %v7586_v24, 5  ;;  %v5922_v37 = vcombine.low %v2133_v44, %v2136_v60  ;;  %v2054_v55 = vld [vmem:[#allocation2 + $0xa0] sm:$0xe]  ;;  %v6893_v44 = vld [vmem:[#allocation2 + $0x98] sm:$0x1] }
  0xc9   : > { %v7592_v48 = vsel %vm7457_vm15, %v5904_v19, %v2146_v5  ;;  %v7596_v17 = vsel %vm7457_vm15, %v2148_v21, %v2149_v9  ;;  %v2160_v63 = vrot.slane %v7598_v38, 5  ;;  %v5923_v39 = vcombine.low %v2140_v52, %v2143_v20  ;;  %v2055_v1 = vld [vmem:[#allocation2 + $0xb0] sm:$0xe]  ;;  %v7614_v52 = vld [vmem:[#allocation2 + $0x80] sm:$0xf] }
  0xca   : > { %6521 = vmatmul.mubr.msk.bf16.gmra.mxu1 %vm1533_vm9, %v5844_v2  ;;  %v2155_v14 = vrot.slane %v2153_v36, 4  ;;  %v5906_v41 = vrot.slane %v2053_v54, 9  ;;  %v2163_v60 = vrot.slane %v6893_v44, 5  ;;  %v7612_v2 = vsel %vm7457_vm15, %v5905_v11, %v2153_v36  ;;  %v7618_v21 = vld [vmem:[#allocation2 + $0xa4] sm:$0xf] }
  0xcb   : > { %6528 = vmatprep.mubr.msk.bf16.mxu1 %vm1533_vm9, %v5863_v0  ;;  %v2162_v9 = vrot.slane %v2160_v63, 4  ;;  %v5924_v0 = vcombine.low %v7592_v48, %v7596_v17  ;;  %v2167_v20 = vrot.slane %v7618_v21, 5  ;;  %v2056_v5 = vld [vmem:[#allocation2 + $0xc0] sm:$0xe]  ;;  %v5907_v17 = vrot.slane %v2054_v55, 9 }
  0xcc   : > { %v2157_v48 = vsel %vm7457_vm15, %v2155_v14, %v2156_v53  ;;  %v6896_v11 = vld [vmem:[#allocation2 + $0xa8] sm:$0x1]  ;;  %v7626_v44 = vld [vmem:[#allocation2 + $0xb4] sm:$0xf]  ;;  %v7632_v54 = vsel %vm7457_vm15, %v5906_v41, %v2160_v63  ;;  %v7634_v19 = vld [vmem:[#allocation2 + $0x90] sm:$0xf]  ;;  %v9632_v8 = vcombine.low %v7574_v10, %v7498_v26  ;;  %v9638_v45 = vcombine.low %v7267_v22, %v7269_v23 }
  0xcd   : > { %v2170_v36 = vrot.slane %v6896_v11, 5  ;;  %v2174_v50 = vrot.slane %v7626_v44, 5  ;;  %v5908_v53 = vrot.slane %v2055_v1, 9  ;;  %v2057_v14 = vld [vmem:[#allocation2 + $0xd0] sm:$0xe]  ;;  %v7640_v55 = vsel %vm7457_vm15, %v2162_v9, %v2163_v60 }
  0xce   : > { %6573 = vmatmul.mubr.msk.bf16.gmra.mxu0 %vm1533_vm9, %v5922_v37  ;;  %v2169_v37 = vrot.slane %v2167_v20, 4  ;;  %v2177_v63 = vrot.slane %v6899_v58, 5  ;;  %v5909_v41 = vrot.slane %v2056_v5, 9  ;;  %v5925_v46 = vcombine.low %v7612_v2, %v2157_v48 }
  0xcf   : > { %6576 = vmatprep.mubr.msk.bf16.mxu0 %vm1533_vm9, %v5923_v39  ;;  %v6833_v39 = vld [vmem:[%s9601_s3 + $0x30] sm:$0xff]   ;;  %v2176_v11 = vrot.slane %v2174_v50, 4  ;;  %v2181_v51 = vrot.slane %v7333_v12, 5  ;;  %v2184_v9 = vrot.slane %v7335_v13, 5  ;;  %v7658_v58 = vsel %vm7457_vm15, %v5907_v17, %v2167_v20  ;;  %v6901_v13 = vld [vmem:[%s9601_s3 + $0x38] sm:$0xff]  }
  0xd0   : > { %v7662_v5 = vsel %vm7457_vm15, %v2169_v37, %v2170_v36  ;;  %v5910_v60 = vrot.slane %v2057_v14, 9  ;;  %v2188_v2 = vrot.slane %v7372_v47, 5  ;;  %v2191_v48 = vrot.slane %v7374_v15, 5  ;;  %v2058_v17 = vld [vmem:[#allocation2 + $0xe0] sm:$0xe]  ;;  %v7694_v15 = vld [vmem:[%s9601_s3 + $0x58] sm:$0xff]  }
  0xd1   : > { %v2183_v20 = vrot.slane %v2181_v51, 4  ;;  %v7681_v36 = vsel %vm7457_vm15, %v2176_v11, %v2177_v63  ;;  %v7683_v37 = vld [vmem:[#allocation2 + $0xb0] sm:$0xf]  ;;  %v7689_v10 = vsel %vm7457_vm15, %v5909_v41, %v2181_v51  ;;  %9633 = vst [vmem:[#allocation7_spill] sm:$0xff] %v7694_v15 }
  0xd2   : > { %6529 = vmatmul.mubr.msk.bf16.vlgmr.msra.gmra.mxu1 %vm1533_vm9, %v5864_v33  ;;  %v7676_v33 = vsel %vm7457_vm15, %v5908_v53, %v2174_v50  ;;  %v2190_v50 = vrot.slane %v2188_v2, 4  ;;  %v5927_v53 = vcombine.low %v7658_v58, %v7662_v5  ;;  %v2059_v63 = vld [vmem:[#allocation2 + $0xf0] sm:$0xe]  ;;  %v2195_v5 = vrot.slane %v7474_v56, 5 }
  0xd3   : > { %6597 = vmatpush3.bf16.msra.mxu1 %v6901_v13  ;;  %6532 = vmatprep.mubr.msk.bf16.mxu1 %vm1533_vm9, %v9632_v8  ;;  %v7700_v14 = vsel %vm7457_vm15, %v2183_v20, %v2184_v9  ;;  %v2883_v41 = vld [vmem:[#allocation2 + $0x10] sm:$0xf]  ;;  %v7709_v13 = vsel %vm7457_vm15, %v5910_v60, %v2188_v2  ;;  %v5911_v9 = vrot.slane %v2058_v17, 9  ;;  %v7716_v8 = vld [vmem:[#allocation2 + $0x14] sm:$0xf]  ;;  %v2198_v2 = vrot.slane %v7476_v35, 5 }
  0xd4   : > { %6598 = vmatprep.subr.bf16.mxu1 %v6833_v39  ;;  %v7713_v58 = vsel %vm7457_vm15, %v2190_v50, %v2191_v48  ;;  %9634 = vst [vmem:[#allocation8_spill] sm:$0xff] %v7716_v8  ;;  %v2885_v48 = vld [vmem:[#allocation2 + $0x18] sm:$0x1]  ;;  %v5912_v17 = vrot.slane %v2059_v63, 9  ;;  %v2202_v50 = vrot.slane %v7519_v59, 5  ;;  %v2935_v26 = vshll.u32 %v2883_v41, 16 }
  0xd5   : > { %v2941_v1 = vshll.u32 %v7716_v8, 16  ;;  %v2945_v60 = vshrl.u32 %v7716_v8, 16  ;;  %v7734_v35 = vld [vmem:[#allocation2 + $0x24] sm:$0xf]  ;;  %v9636_v63 = vcombine.low %v7580_v62, %v7503_v57  ;;  %v7742_v51 = vsel %vm7457_vm15, %v5911_v9, %v2195_v5 }
  0xd6   : > { %6577 = vmatmul.mubr.msk.bf16.gmra.mxu0 %vm1533_vm9, %v5924_v0  ;;  %9635 = vst [vmem:[#allocation9_spill] sm:$0xff] %v7734_v35  ;;  %v2197_v0 = vrot.slane %v2195_v5, 4  ;;  %v2205_v20 = vrot.slane %v7521_v6, 5  ;;  %v2937_v25 = vrot.slane %v2935_v26, 5  ;;  %v2951_v62 = vshll.u32 %v2885_v48, 16 }
  0xd7   : > { %6580 = vmatprep.mubr.msk.bf16.mxu0 %vm1533_vm9, %v5925_v46  ;;  %6599 = vmatpush3.bf16.msra.mxu1 %v6833_v39  ;;  %v2932_v46 = vshrl.u32 %v2883_v41, 16  ;;  %v2886_v39 = vld [vmem:[#allocation2 + $0x20] sm:$0xf]  ;;  %v7745_v41 = vld [vmem:[#allocation2 + $0x28] sm:$0x1]  ;;  %v7751_v34 = vrot.slane %v2941_v1, 5  ;;  %v7755_v9 = vsel %vm7457_vm15, %v5912_v17, %v2202_v50 }
  0xd8   : > { %6668 = vmatprep.subr.bf16.mxu1 %v7694_v15  ;;  %9637 = vst [vmem:[#allocation10_spill] sm:$0xff] %v7745_v41  ;;  %v2947_v57 = vrot.slane %v2945_v60, 4  ;;  %v2956_v5 = vshrl.u32 %v2886_v39, 16  ;;  %v2959_v6 = vshll.u32 %v2886_v39, 16  ;;  %v2969_v22 = vshrl.u32 %v7734_v35, 16 }
  0xd9   : > { %v2934_v11 = vrot.slane %v2932_v46, 4  ;;  %v2965_v46 = vshll.u32 %v7734_v35, 16  ;;  %v2975_v23 = vshll.u32 %v7745_v41, 16  ;;  %v7761_v1 = vld [vmem:[#allocation2 + $0x34] sm:$0xf]  ;;  %v2953_v39 = vrot.slane %v2951_v62, 5 }
  0xda   : > { %6533 = vmatmul.mubr.msk.bf16.gmra.mxu1 %vm1533_vm9, %v9636_v63  ;;  %v2889_v63 = vld [vmem:[#allocation2 + $0x30] sm:$0xf]  ;;  %v2948_v4 = vor.u32 %v2947_v57, %v7751_v34  ;;  %v2958_v26 = vrot.slane %v2956_v5, 4  ;;  %v2961_v60 = vrot.slane %v2959_v6, 5  ;;  %v2971_v57 = vrot.slane %v2969_v22, 4 }
  0xdb   : > { %6536 = vmatprep.mubr.msk.bf16.mxu1 %vm1533_vm9, %v9638_v45  ;;  %v2938_v8 = vor.u32 %v2937_v25, %v2934_v11  ;;  %v9639_v45 = vcombine.low %v7632_v54, %v7640_v55  ;;  %v2967_v48 = vrot.slane %v2965_v46, 5  ;;  %v2980_v17 = vshrl.u32 %v2889_v63, 16  ;;  %v2892_v55 = vld [vmem:[#allocation2 + $0x40] sm:$0xf]  ;;  %v7774_v15 = vld [vmem:[#allocation2 + $0x44] sm:$0xf] }
  0xdc   : > { %v7770_v25 = vsel %vm7457_vm15, %v2197_v0, %v2198_v2  ;;  %v2204_v11 = vrot.slane %v2202_v50, 4  ;;  %v2962_v35 = vor.u32 %v2961_v60, %v2958_v26  ;;  %v2983_v3 = vshll.u32 %v2889_v63, 16  ;;  %v7780_v2 = vld [vmem:[#allocation2 + $0x38] sm:$0x1] }
  0xdd   : > { %v2939_v41 = vrot.slane %v2938_v8, 4  ;;  %v2989_v54 = vshll.u32 %v7761_v1, 16  ;;  %v2972_v5 = vor.u32 %v2971_v57, %v2967_v48  ;;  %v2977_v6 = vrot.slane %v2975_v23, 5 }
  0xde   : > { %6581 = vmatmul.mubr.msk.bf16.gmra.mxu0 %vm1533_vm9, %v9639_v45  ;;  %v2949_v45 = vrot.slane %v2948_v4, 4  ;;  %v2993_v46 = vshrl.u32 %v7761_v1, 16  ;;  %v2963_v0 = vrot.slane %v2962_v35, 4  ;;  %v2982_v8 = vrot.slane %v2980_v17, 4  ;;  %v7803_v17 = vld [vmem:[#allocation2 + $0x48] sm:$0x1] }
  0xdf   : > { %6584 = vmatprep.mubr.msk.bf16.mxu0 %vm1533_vm9, %v5927_v53  ;;  %v9640_v53 = vcombine.low %v7304_v49, %v7314_v31  ;;  %v2985_v50 = vrot.slane %v2983_v3, 5  ;;  %v7782_v62 = vrot.slane %v2989_v54, 5  ;;  %v9641_v4 = vcombine.low %v7407_v32, %v7412_v43  ;;  %v2895_v32 = vld [vmem:[#allocation2 + $0x50] sm:$0xf] }
  0xe0   : > { %v5931_v63 = vcombine.low %v7742_v51, %v7770_v25  ;;  %v2973_v22 = vrot.slane %v2972_v5, 4  ;;  %v2995_v23 = vrot.slane %v2993_v46, 4  ;;  %v3004_v49 = vshrl.u32 %v2892_v55, 16  ;;  %v7805_v25 = vld [vmem:[#allocation2 + $0x54] sm:$0xf] }
  0xe1   : > { %v7792_v31 = vsel %vm7457_vm15, %v2204_v11, %v2205_v20  ;;  %v2944_v3 = vsel %vm7045_vm10, %v2939_v41, %v7751_v34  ;;  %v3007_v35 = vshll.u32 %v2892_v55, 16  ;;  %v3013_v26 = vshll.u32 %v7774_v15, 16 }
  0xe2   : > { %6537 = vmatmul.mubr.msk.bf16.gmra.mxu1 %vm1533_vm9, %v9640_v53  ;;  %v2954_v43 = vsel %vm7045_vm10, %v2949_v45, %v2953_v39  ;;  %v2968_v51 = vsel %vm7045_vm10, %v2963_v0, %v2967_v48  ;;  %v2999_v60 = vshll.u32 %v7780_v2, 16  ;;  %v3006_v20 = vrot.slane %v3004_v49, 4  ;;  %v2898_v53 = vld [vmem:[#allocation2 + $0x60] sm:$0xf]  ;;  %v7835_v49 = vld [vmem:[#allocation2 + $0x58] sm:$0x1] }
  0xe3   : > { %6540 = vmatprep.mubr.msk.bf16.mxu1 %vm1533_vm9, %v9641_v4  ;;  %v9642_v34 = vcombine.low %v7676_v33, %v7681_v36  ;;  %v2978_v41 = vsel %vm7045_vm10, %v2973_v22, %v2977_v6  ;;  %v2986_v11 = vor.u32 %v2985_v50, %v2982_v8  ;;  %v2996_v39 = vor.u32 %v2995_v23, %v7782_v62  ;;  %v7829_v50 = vld [vmem:[#allocation2 + $0x64] sm:$0xf] }
  0xe4   : > { %v3009_v57 = vrot.slane %v3007_v35, 5  ;;  %v9643_v48 = vcombine.low %v7689_v10, %v7700_v14  ;;  %v5932_v54 = vcombine.low %v7755_v9, %v7792_v31  ;;  %v7820_v55 = vrot.slane %v3013_v26, 5 }
  0xe5   : > { %v3017_v33 = vshrl.u32 %v7774_v15, 16  ;;  %v3028_v36 = vshrl.u32 %v2895_v32, 16  ;;  %v3023_v5 = vshll.u32 %v7803_v17, 16  ;;  %v3031_v6 = vshll.u32 %v2895_v32, 16 }
  0xe6   : > { %6585 = vmatmul.mubr.msk.bf16.gmra.mxu0 %vm1533_vm9, %v9642_v34  ;;  %v3010_v45 = vor.u32 %v3009_v57, %v3006_v20  ;;  %v3037_v46 = vshll.u32 %v7805_v25, 16  ;;  %v7825_v0 = vcombine.low %v2944_v3, %v2954_v43  ;;  %v7827_v10 = vcombine.low %v2968_v51, %v2978_v41  ;;  %v2901_v41 = vld [vmem:[#allocation2 + $0x70] sm:$0xf] }
  0xe7   : > { %6588 = vmatprep.mubr.msk.bf16.mxu0 %vm1533_vm9, %v9643_v48  ;;  %v3001_v14 = vrot.slane %v2999_v60, 5  ;;  %v3019_v8 = vrot.slane %v3017_v33, 4  ;;  %v9644_v4 = vcombine.low %v7430_v28, %v7438_v16  ;;  %v2987_v22 = vrot.slane %v2986_v11, 4 }
  0xe8   : > { %v2997_v23 = vrot.slane %v2996_v39, 4  ;;  %v3030_v35 = vrot.slane %v3028_v36, 4  ;;  %v3033_v26 = vrot.slane %v3031_v6, 5  ;;  %v9645_v3 = vcombine.low %v7614_v52, %v7586_v24  ;;  %v7847_v24 = vld [vmem:[#allocation2 + $0x68] sm:$0x1] }
  0xe9   : > { %v3020_v32 = vor.u32 %v3019_v8, %v7820_v55  ;;  %v7842_v43 = vrot.slane %v3037_v46, 5  ;;  %v3041_v51 = vshrl.u32 %v7805_v25, 16  ;;  %v3052_v28 = vshrl.u32 %v2898_v53, 16 }
  0xea   : > { %6541 = vmatmul.mubr.msk.bf16.gmra.mxu1 %vm1533_vm9, %v9644_v4  ;;  %v3011_v16 = vrot.slane %v3010_v45, 4  ;;  %v3025_v60 = vrot.slane %v3023_v5, 5  ;;  %v3055_v20 = vshll.u32 %v2898_v53, 16  ;;  %v3061_v34 = vshll.u32 %v7829_v50, 16 }
  0xeb   : > { %6544 = vmatprep.mubr.msk.bf16.mxu1 %vm1533_vm9, %v9645_v3  ;;  %v3021_v11 = vrot.slane %v3020_v32, 4  ;;  %v3043_v39 = vrot.slane %v3041_v51, 4  ;;  %v3047_v57 = vshll.u32 %v7835_v49, 16  ;;  %v3054_v52 = vrot.slane %v3052_v28, 4 }
  0xec   : > { %v9646_v48 = vcombine.low %v7709_v13, %v7713_v58  ;;  %v3034_v33 = vor.u32 %v3033_v26, %v3030_v35  ;;  %v3057_v36 = vrot.slane %v3055_v20, 5  ;;  %v7853_v45 = vrot.slane %v3061_v34, 5  ;;  %v7863_v13 = vld [vmem:[#allocation2 + $0x74] sm:$0xf]  ;;  %v2904_v26 = vld [vmem:[#allocation2 + $0x80] sm:$0xf] }
  0xed   : > { %v3065_v5 = vshrl.u32 %v7829_v50, 16  ;;  %v2992_v6 = vsel %vm7045_vm10, %v2987_v22, %v7782_v62  ;;  %v3002_v46 = vsel %vm7045_vm10, %v2997_v23, %v3001_v14  ;;  %v3044_v53 = vor.u32 %v3043_v39, %v7842_v43 }
  0xee   : > { %6589 = vmatmul.mubr.msk.bf16.gmra.mxu0 %vm1533_vm9, %v9646_v48  ;;  %v3076_v58 = vshrl.u32 %v2901_v41, 16  ;;  %v3016_v8 = vsel %vm7045_vm10, %v3011_v16, %v7820_v55  ;;  %v3058_v4 = vor.u32 %v3057_v36, %v3054_v52  ;;  %v3026_v62 = vsel %vm7045_vm10, %v3021_v11, %v3025_v60  ;;  %v7876_v55 = vld [vmem:[#allocation2 + $0x78] sm:$0x1] }
  0xef   : > { %6592 = vmatprep.mubr.msk.bf16.mxu0 %vm1533_vm9, %v5931_v63  ;;  %v3067_v35 = vrot.slane %v3065_v5, 4  ;;  %v3071_v63 = vshll.u32 %v7847_v24, 16  ;;  %v3049_v22 = vrot.slane %v3047_v57, 5  ;;  %v3079_v14 = vshll.u32 %v2901_v41, 16 }
  0xf0   : > { %v3078_v3 = vrot.slane %v3076_v58, 4  ;;  %v9647_v23 = vcombine.low %v7634_v19, %v7598_v38  ;;  %v3035_v32 = vrot.slane %v3034_v33, 4  ;;  %v3085_v28 = vshll.u32 %v7863_v13, 16  ;;  %v7884_v38 = vld [vmem:[#allocation2 + $0x84] sm:$0xf] }
  0xf1   : > { %v3068_v51 = vor.u32 %v3067_v35, %v7853_v45  ;;  %v3089_v16 = vshrl.u32 %v7863_v13, 16  ;;  %v9648_v60 = vcombine.low %v7646_v42, %v7618_v21  ;;  %v3045_v20 = vrot.slane %v3044_v53, 4  ;;  %v2907_v42 = vld [vmem:[#allocation2 + $0x90] sm:$0xf] }
  0xf2   : > { %6545 = vmatmul.mubr.msk.bf16.gmra.mxu1 %vm1533_vm9, %v9647_v23  ;;  %v3059_v34 = vrot.slane %v3058_v4, 4  ;;  %v3081_v41 = vrot.slane %v3079_v14, 5  ;;  %v3100_v19 = vshrl.u32 %v2904_v26, 16  ;;  %v5995_v11 = vcombine.low %v2992_v6, %v3002_v46 }
  0xf3   : > { %6548 = vmatprep.mubr.msk.bf16.mxu1 %vm1533_vm9, %v9648_v60  ;;  %v7886_v39 = vcombine.low %v3016_v8, %v3026_v62  ;;  %v3073_v57 = vrot.slane %v3071_v63, 5  ;;  %v7888_v52 = vrot.slane %v3085_v28, 5  ;;  %v3069_v48 = vrot.slane %v3068_v51, 4  ;;  %v7910_v8 = vld [vmem:[#allocation2 + $0x94] sm:$0xf] }
  0xf4   : > { %v3082_v33 = vor.u32 %v3081_v41, %v3078_v3  ;;  %v3091_v36 = vrot.slane %v3089_v16, 4  ;;  %v3095_v5 = vshll.u32 %v7876_v55, 16  ;;  %v3040_v21 = vsel %vm7045_vm10, %v3035_v32, %v7842_v43  ;;  %v7916_v3 = vld [vmem:[#allocation2 + $0x98] sm:$0x1]  ;;  %v2910_v16 = vld [vmem:[#allocation2 + $0xa0] sm:$0xf] }
  0xf5   : > { %v3103_v6 = vshll.u32 %v2904_v26, 16  ;;  %v3109_v46 = vshll.u32 %v7884_v38, 16  ;;  %v3113_v53 = vshrl.u32 %v7884_v38, 16  ;;  %v3050_v58 = vsel %vm7045_vm10, %v3045_v20, %v3049_v22 }
  0xf6   : > { %6593 = vmatmul.mubr.msk.bf16.gmra.mxu0 %vm1533_vm9, %v5932_v54  ;;  %v3064_v9 = vsel %vm7045_vm10, %v3059_v34, %v7853_v45  ;;  %v3092_v31 = vor.u32 %v3091_v36, %v7888_v52  ;;  %v7908_v54 = vld [vmem:[#allocation2 + $0x88] sm:$0x1]  ;;  %v3102_v43 = vrot.slane %v3100_v19, 4  ;;  %v3124_v26 = vshrl.u32 %v2907_v42, 16 }
  0xf7   : > { %6636 = vmatprep.mubr.msk.bf16.mxu0 %vm1533_vm9, %v7825_v0  ;;  %v3105_v4 = vrot.slane %v3103_v6, 5  ;;  %v7912_v35 = vrot.slane %v3109_v46, 5  ;;  %v3115_v63 = vrot.slane %v3113_v53, 4  ;;  %v3074_v0 = vsel %vm7045_vm10, %v3069_v48, %v3073_v57 }
  0xf8   : > { %v3083_v62 = vrot.slane %v3082_v33, 4  ;;  %v3097_v22 = vrot.slane %v3095_v5, 5  ;;  %v3127_v45 = vshll.u32 %v2907_v42, 16  ;;  %v9649_v14 = vcombine.low %v7683_v37, %v7626_v44  ;;  %v7930_v37 = vld [vmem:[#allocation2 + $0xa4] sm:$0xf] }
  0xf9   : > { %v3093_v23 = vrot.slane %v3092_v31, 4  ;;  %v3119_v32 = vshll.u32 %v7908_v54, 16  ;;  %v3126_v51 = vrot.slane %v3124_v26, 4  ;;  %v3133_v28 = vshll.u32 %v7910_v8, 16  ;;  %v7945_v42 = vld [vmem:[#allocation2 + $0xa8] sm:$0x1] }
  0xfa   : > { %6549 = vmatmul.mubr.msk.bf16.gmra.mxu1 %vm1533_vm9, %v9649_v14  ;;  %v9650_v60 = vcombine.low %v7323_v27, %v7333_v12  ;;  %v3106_v20 = vor.u32 %v3105_v4, %v3102_v43  ;;  %v3116_v34 = vor.u32 %v3115_v63, %v7912_v35  ;;  %v3129_v41 = vrot.slane %v3127_v45, 5  ;;  %v6849_v27 = vld [vmem:[%s9601_s3 + $0x60] sm:$0xff]   ;;  %v7957_v63 = vld [vmem:[#allocation2 + $0xb4] sm:$0xf] }
  0xfb   : > { %v3137_v44 = vshrl.u32 %v7910_v8, 16  ;;  %v7932_v19 = vcombine.low %v3040_v21, %v3050_v58  ;;  %v7934_v57 = vcombine.low %v3064_v9, %v3074_v0  ;;  %v7936_v48 = vrot.slane %v3133_v28, 5  ;;  %v2913_v9 = vld [vmem:[#allocation2 + $0xb0] sm:$0xf] }
  0xfc   : > { %6552 = vmatprep.mubr.msk.bf16.mxu1 %vm1533_vm9, %v9650_v60  ;;  %v3143_v33 = vshll.u32 %v7916_v3, 16  ;;  %v3088_v12 = vsel %vm7045_vm10, %v3083_v62, %v7888_v52  ;;  %v3130_v36 = vor.u32 %v3129_v41, %v3126_v51  ;;  %v3148_v21 = vshrl.u32 %v2910_v16, 16  ;;  %v2916_v60 = vld [vmem:[#allocation2 + $0xc0] sm:$0xf] }
  0xfd   : > { %v3139_v5 = vrot.slane %v3137_v44, 4  ;;  %v3098_v6 = vsel %vm7045_vm10, %v3093_v23, %v3097_v22  ;;  %v7951_v46 = vrot.slane %v3119_v32, 5  ;;  %v3151_v53 = vshll.u32 %v2910_v16, 16 }
  0xfe   : > { %6637 = vmatmul.mubr.msk.bf16.vlgmr.msra.gmra.mxu0 %vm1533_vm9, %v7827_v10  ;;  %v3157_v58 = vshll.u32 %v7930_v37, 16  ;;  %v3107_v52 = vrot.slane %v3106_v20, 4  ;;  %v3117_v31 = vrot.slane %v3116_v34, 4  ;;  %v3150_v4 = vrot.slane %v3148_v21, 4 }
  0xff   : > { %6705 = vmatpush3.bf16.msra.mxu0 %v7543_v29  ;;  %6640 = vmatprep.mubr.msk.bf16.mxu0 %vm1533_vm9, %v5995_v11  ;;  %v3140_v43 = vor.u32 %v3139_v5, %v7936_v48  ;;  %v3145_v10 = vrot.slane %v3143_v33, 5  ;;  %v3153_v26 = vrot.slane %v3151_v53, 5  ;;  %v3161_v62 = vshrl.u32 %v7930_v37, 16  ;;  %v7965_v29 = vld [vmem:[%s9601_s3 + $0x88] sm:$0xff]  }
 0x100   : > { %v7959_v0 = vrot.slane %v3157_v58, 5  ;;  %6706 = vmatprep.subr.bf16.mxu0 %v6849_v27  ;;  %9651 = vst [vmem:[#allocation11_spill] sm:$0xff] %v7965_v29  ;;  %v3131_v11 = vrot.slane %v3130_v36, 4  ;;  %v3167_v22 = vshll.u32 %v7945_v42, 16  ;;  %v3172_v45 = vshrl.u32 %v2913_v9, 16 }
 0x101   : > { %v3175_v14 = vshll.u32 %v2913_v9, 16  ;;  %v9652_v23 = vcombine.low %v7361_v30, %v7372_v47  ;;  %v3141_v32 = vrot.slane %v3140_v43, 4  ;;  %v3154_v51 = vor.u32 %v3153_v26, %v3150_v4  ;;  %v7980_v47 = vld [vmem:[#allocation2 + $0xc4] sm:$0xf]  ;;  %v8001_v53 = vld [vmem:[#allocation2 + $0xc8] sm:$0x1] }
 0x102   : > { %v3163_v28 = vrot.slane %v3161_v62, 4  ;;  %v3181_v16 = vshll.u32 %v7957_v63, 16  ;;  %v9653_v20 = vcombine.low %v7466_v40, %v7474_v56  ;;  %v7977_v34 = vcombine.low %v3088_v12, %v3098_v6  ;;  %v7989_v56 = vld [vmem:[#allocation2 + $0xb8] sm:$0x1]  ;;  %v2919_v26 = vld [vmem:[#allocation2 + $0xd0] sm:$0xf] }
 0x103   : > { %6553 = vmatmul.mubr.msk.bf16.gmra.mxu1 %vm1533_vm9, %v9652_v23  ;;  %6707 = vmatpush3.bf16.msra.mxu0 %v6849_v27  ;;  %v3174_v41 = vrot.slane %v3172_v45, 4  ;;  %v3177_v44 = vrot.slane %v3175_v14, 5  ;;  %v3185_v30 = vshrl.u32 %v7957_v63, 16  ;;  %v3112_v33 = vsel %vm7045_vm10, %v3107_v52, %v7912_v35  ;;  %v6836_v52 = vld [vmem:[#allocation2 + $0x10] sm:$0xff]  }
 0x104   : > { %6556 = vmatprep.mubr.msk.bf16.mxu1 %vm1533_vm9, %v9653_v20  ;;  %v3122_v36 = vsel %vm7045_vm10, %v3117_v31, %v7951_v46  ;;  %v3164_v40 = vor.u32 %v3163_v28, %v7959_v0  ;;  %v7991_v12 = vrot.slane %v3181_v16, 5  ;;  %6776 = vmatprep.subr.bf16.mxu0 %v7965_v29  ;;  %v3136_v27 = vsel %vm7045_vm10, %v3131_v11, %v7936_v48  ;;  %v8025_v16 = vld [vmem:[#allocation2 + $0xd8] sm:$0x1] }
 0x105   : > { %v3155_v5 = vrot.slane %v3154_v51, 4  ;;  %v3187_v21 = vrot.slane %v3185_v30, 4  ;;  %v3196_v6 = vshrl.u32 %v2916_v60, 16  ;;  %v3146_v35 = vsel %vm7045_vm10, %v3141_v32, %v3145_v10 }
 0x106   : > { %6641 = vmatmul.mubr.msk.bf16.gmra.mxu0 %vm1533_vm9, %v7886_v39  ;;  %v3169_v46 = vrot.slane %v3167_v22, 5  ;;  %v3199_v58 = vshll.u32 %v2916_v60, 16  ;;  %v3205_v9 = vshll.u32 %v7980_v47, 16  ;;  %v3165_v48 = vrot.slane %v3164_v40, 4  ;;  %v8011_v22 = vld [vmem:[#allocation2 + $0xd4] sm:$0xf] }
 0x107   : > { %6644 = vmatprep.mubr.msk.bf16.mxu0 %vm1533_vm9, %v7932_v19  ;;  %v3178_v31 = vor.u32 %v3177_v44, %v3174_v41  ;;  %v3191_v43 = vshll.u32 %v7989_v56, 16  ;;  %v3198_v4 = vrot.slane %v3196_v6, 4  ;;  %v3188_v39 = vor.u32 %v3187_v21, %v7991_v12 }
 0x108   : > { %v3201_v62 = vrot.slane %v3199_v58, 5  ;;  %v8008_v10 = vrot.slane %v3205_v9, 5  ;;  %v3209_v11 = vshrl.u32 %v7980_v47, 16  ;;  %v8013_v45 = vcombine.low %v3112_v33, %v3122_v36 }
 0x109   : > { %v8015_v14 = vcombine.low %v3136_v27, %v3146_v35  ;;  %v3160_v19 = vsel %vm7045_vm10, %v3155_v5, %v7959_v0  ;;  %v3215_v23 = vshll.u32 %v8001_v53, 16  ;;  %v9654_v32 = vcombine.low %v7508_v61, %v7519_v59  ;;  %v2922_v61 = vld [vmem:[#allocation2 + $0xe0] sm:$0xf]  ;;  %v8039_v27 = vld [vmem:[#allocation2 + $0xe4] sm:$0xf] }
 0x10a   : > { %v3202_v51 = vor.u32 %v3201_v62, %v3198_v4  ;;  %v3211_v28 = vrot.slane %v3209_v11, 4  ;;  %v3220_v60 = vshrl.u32 %v2919_v26, 16  ;;  %v3223_v20 = vshll.u32 %v2919_v26, 16  ;;  %v6847_v11 = vld [vmem:[%s9601_s3 + $0x50] sm:$0xff]  }
 0x10b   : > { %6557 = vmatmul.mubr.msk.bf16.gmra.mxu1 %vm1533_vm9, %v9654_v32  ;;  %v3170_v41 = vsel %vm7045_vm10, %v3165_v48, %v3169_v46  ;;  %v8030_v44 = vrot.slane %v3178_v31, 4  ;;  %v3229_v0 = vshll.u32 %v8011_v22, 16  ;;  %v3233_v30 = vshrl.u32 %v8011_v22, 16  ;;  %v6838_v46 = vld [vmem:[#allocation2 + $0x20] sm:$0xff]  }
 0x10c   : > { %6600 = vmatprep.mubr.msk.bf16.mxu1 %vm1533_vm9, %v6836_v52  ;;  %v8034_v59 = vrot.slane %v3188_v39, 4  ;;  %v8036_v33 = vrot.slane %v3191_v43, 5  ;;  %v3212_v36 = vor.u32 %v3211_v28, %v8008_v10  ;;  %v3222_v40 = vrot.slane %v3220_v60, 4  ;;  %v8051_v52 = vld [vmem:[#allocation2 + $0xe8] sm:$0x1]  ;;  %v6840_v43 = vld [vmem:[#allocation2 + $0x30] sm:$0xff]  }
 0x10d   : > { %v8041_v5 = vrot.slane %v3202_v51, 4  ;;  %v3225_v21 = vrot.slane %v3223_v20, 5  ;;  %v8043_v6 = vrot.slane %v3229_v0, 5  ;;  %v3235_v35 = vrot.slane %v3233_v30, 4  ;;  %v8064_v28 = vld [vmem:[#allocation2 + $0xf4] sm:$0xf] }
 0x10e   : > { %6645 = vmatmul.mubr.msk.bf16.gmra.mxu0 %vm1533_vm9, %v7934_v57  ;;  %v8047_v58 = vcombine.low %v3160_v19, %v3170_v41  ;;  %v8049_v9 = vrot.slane %v3215_v23, 5  ;;  %v3244_v48 = vshrl.u32 %v2922_v61, 16  ;;  %v3247_v31 = vshll.u32 %v2922_v61, 16  ;;  %v2925_v57 = vld [vmem:[#allocation2 + $0xf0] sm:$0xf] }
 0x10f   : > { %6648 = vmatprep.mubr.msk.bf16.mxu0 %vm1533_vm9, %v7977_v34  ;;  %v8055_v4 = vrot.slane %v3212_v36, 4  ;;  %v3226_v26 = vor.u32 %v3225_v21, %v3222_v40  ;;  %v3239_v39 = vshll.u32 %v8025_v16, 16  ;;  %v3253_v62 = vshll.u32 %v8039_v27, 16  ;;  %v8088_v36 = vld [vmem:[#allocation2 + $0xf8] sm:$0x1] }
 0x110   : > { %v3236_v19 = vor.u32 %v3235_v35, %v8043_v6  ;;  %v3246_v23 = vrot.slane %v3244_v48, 4  ;;  %v3249_v32 = vrot.slane %v3247_v31, 5  ;;  %v3257_v51 = vshrl.u32 %v8039_v27, 16  ;;  %v6325_v35 = vld [vmem:[%s6989_s26 + $0x78] sm:$0xff]  }
 0x111   : > { %v3184_v34 = vsel %vm7045_vm10, %v8030_v44, %v7991_v12  ;;  %v3194_v60 = vsel %vm7045_vm10, %v8034_v59, %v8036_v33  ;;  %v8078_v41 = vrot.slane %v3253_v62, 5  ;;  %v3263_v61 = vshll.u32 %v8051_v52, 16  ;;  %v9655_v44 = vld [vmem:[#allocation7_spill] sm:$0xff] }
 0x112   : > { %v3250_v0 = vor.u32 %v3249_v32, %v3246_v23  ;;  %v3259_v30 = vrot.slane %v3257_v51, 4  ;;  %v3268_v12 = vshrl.u32 %v2925_v57, 16  ;;  %v3218_v59 = vsel %vm7045_vm10, %v8055_v4, %v8049_v9  ;;  %9656 = vst [vmem:[#allocation7_spill] sm:$0xff] %v8088_v36  ;;  %v450_v23 = vld [vmem:[#allocation2 + $0x100] sm:$0x1] }
 0x113   : > { %6601 = vmatmul.mubr.msk.bf16.vlgmr.msra.gmra.mxu1 %vm1533_vm9, %v6838_v46  ;;  %v3241_v33 = vrot.slane %v3239_v39, 5  ;;  %v3271_v40 = vshll.u32 %v2925_v57, 16  ;;  %v3277_v21 = vshll.u32 %v8064_v28, 16  ;;  %v3227_v46 = vrot.slane %v3226_v26, 4  ;;  %v506_v32 = vld [vmem:[#allocation2 + $0x108] sm:$0x1] }
 0x114   : > { %6669 = vmatpush3.bf16.msra.mxu1 %v9655_v44  ;;  %6604 = vmatprep.mubr.msk.bf16.mxu1 %vm1533_vm9, %v6840_v43  ;;  %v3237_v48 = vrot.slane %v3236_v19, 4  ;;  %v3251_v31 = vrot.slane %v3250_v0, 4  ;;  %v3260_v62 = vor.u32 %v3259_v30, %v8078_v41  ;;  %v8096_v43 = vld [vmem:[%s9601_s3 + $0x78] sm:$0xff]   ;;  %v3270_v9 = vrot.slane %v3268_v12, 4  ;;  %v6841_v51 = vld [vmem:[#allocation2 + $0x40] sm:$0xff]   ;;  %v6842_v44 = vld [vmem:[#allocation2 + $0x50] sm:$0xff]  }
 0x115   : > { %6670 = vmatprep.subr.bf16.mxu1 %v6847_v11  ;;  %v3273_v4 = vrot.slane %v3271_v40, 5  ;;  %v3279_v39 = vrot.slane %v3277_v21, 5  ;;  %v3281_v57 = vshrl.u32 %v8064_v28, 16  ;;  %v3265_v19 = vrot.slane %v3263_v61, 5 }
 0x116   : > { %6649 = vmatmul.mubr.msk.bf16.gmra.mxu0 %vm1533_vm9, %v8013_v45  ;;  %v3261_v26 = vrot.slane %v3260_v62, 4  ;;  %v3287_v0 = vshll.u32 %v8088_v36, 16  ;;  %v6309_v30 = vunpack.c.l.bf16 %v6325_v35  ;;  %v6310_v21 = vunpack.c.h.bf16 %v6325_v35  ;;  %v6903_v62 = vld [vmem:[%s9599_s1] ss:$0 sm:$0xff]  ;;  %v3622_v35 = vld [vmem:[#allocation2 + $0x20] sm:$0xe] }
 0x117   : > { %6652 = vmatprep.mubr.msk.bf16.mxu0 %vm1533_vm9, %v8015_v14  ;;  %v3274_v12 = vor.u32 %v3273_v4, %v3270_v9  ;;  %v3283_v40 = vrot.slane %v3281_v57, 4  ;;  %v451_v29 = vsel %vm6961_vm4, 0, %v450_v23  ;;  %v3232_v45 = vsel %vm7045_vm10, %v3227_v46, %v8043_v6  ;;  %v6904_v46 = vld [vmem:[%s9600_s2] ss:$0 sm:$0xff] }
 0x118   : > { %6671 = vmatpush3.bf16.msra.mxu1 %v6847_v11  ;;  %v3242_v61 = vsel %vm7045_vm10, %v3237_v48, %v3241_v33  ;;  %v300_v36 = vmul.f32 %v6903_v62, %v6309_v30  ;;  %452 = vst [vmem:[#allocation2 + $0x100] sm:$0x1] %v451_v29  ;;  %v507_v11 = vsel %vm6966_vm5, 0, %v506_v32  ;;  %v3289_v4 = vrot.slane %v3287_v0, 5  ;;  %v3623_v32 = vld [vmem:[#allocation2 + $0x30] sm:$0xe] }
 0x119   : > { %6740 = vmatprep.subr.bf16.mxu1 %v8096_v43  ;;  %v3275_v23 = vrot.slane %v3274_v12, 4  ;;  %v3284_v9 = vor.u32 %v3283_v40, %v3279_v39  ;;  %v301_v57 = vmul.f32 %v6903_v62, %v6310_v21  ;;  %508 = vst [vmem:[#allocation2 + $0x108] sm:$0x1] %v507_v11  ;;  %v6003_v6 = vcombine.low %v3184_v34, %v3194_v60  ;;  %v9660_v30 = vld [vmem:[#allocation9_spill] sm:$0xff]  ;;  %v9661_v40 = vld [vmem:[#allocation10_spill] sm:$0xff]  ;;  %v6843_v11 = vld [vmem:[#allocation2 + $0x60] sm:$0xff]  }
 0x11a   : > { %v3256_v33 = vsel %vm7045_vm10, %v3251_v31, %v8078_v41  ;;  %v3266_v29 = vsel %vm7045_vm10, %v3261_v26, %v3265_v19  ;;  %v339_v48 = vadd.f32 %v6904_v46, %v300_v36  ;;  %v6028_v60 = vrot.slane %v3622_v35, 9  ;;  %v3624_v62 = vld [vmem:[#allocation2 + $0x40] sm:$0xe] }
 0x11b   : > { %6605 = vmatmul.mubr.msk.bf16.gmra.mxu1 %vm1533_vm9, %v6841_v51  ;;  %v3280_v0 = vsel %vm7045_vm10, %v3275_v23, %v3279_v39  ;;  %v3285_v51 = vrot.slane %v3284_v9, 4  ;;  %v340_v34 = vadd.f32 %v6904_v46, %v301_v57  ;;  %v9659_v41 = vsel %vm7045_vm10, %v8041_v5, %v8008_v10  ;;  %v4486_v14 = vld [vmem:[#allocation2 + $0x60] sm:$0xf] }
 0x11c   : > { %6608 = vmatprep.mubr.msk.bf16.mxu1 %vm1533_vm9, %v6842_v44  ;;  %v6004_v31 = vcombine.low %v9659_v41, %v3218_v59  ;;  %v6005_v26 = vcombine.low %v3232_v45, %v3242_v61  ;;  %v371_v19 = vmax.f32 %v339_v48, 0.0  ;;  %v3694_v12 = vrot.slane %v9660_v30, 5  ;;  %v9662_v59 = vld [vmem:[#allocation8_spill] sm:$0xff]  ;;  %v6844_v61 = vld [vmem:[#allocation2 + $0x70] sm:$0xff]  }
 0x11d   : > { %v3290_v36 = vsel %vm7045_vm10, %v3285_v51, %v3289_v4  ;;  %v372_v44 = vmax.f32 %v340_v34, 0.0  ;;  %v3697_v21 = vrot.slane %v9661_v40, 5  ;;  %v6029_v39 = vrot.slane %v3623_v32, 9  ;;  %v3625_v48 = vld [vmem:[#allocation2 + $0x50] sm:$0xe] }
 0x11e   : > { %6653 = vmatmul.mubr.msk.bf16.gmra.mxu0 %vm1533_vm9, %v8047_v58  ;;  %v8140_v35 = vcombine.low %v3256_v33, %v3266_v29  ;;  %v8142_v10 = vcombine.low %v3280_v0, %v3290_v36  ;;  %v6245_v5 = vpack.c.bf16 %v371_v19, %v371_v19  ;;  %v3687_v45 = vrot.slane %v9662_v59, 5 }
 0x11f   : > { %6656 = vmatprep.mubr.msk.bf16.mxu0 %vm1533_vm9, %v6003_v6  ;;  %v6246_v23 = vpack.c.bf16 %v372_v44, %v372_v44  ;;  %v8148_v9 = vsel %vm7457_vm15, %v6028_v60, %v3694_v12  ;;  %v3696_v4 = vrot.slane %v3694_v12, 4  ;;  %v3701_v57 = vrot.slane %v7761_v1, 5  ;;  %v1022_v19 = vld [vmem:[#allocation2 + $0x100] sm:$0xf] }
 0x120   : > { %v850_v46 = vshrl.u32 %v6245_v5, 16  ;;  %v853_v58 = vshll.u32 %v6245_v5, 16  ;;  %v3704_v33 = vrot.slane %v7780_v2, 5  ;;  %v6030_v29 = vrot.slane %v3624_v62, 9 }
 0x121   : > { %v858_v32 = vshrl.u32 %v6246_v23, 16  ;;  %v861_v0 = vshll.u32 %v6246_v23, 16  ;;  %v8154_v51 = vsel %vm7457_vm15, %v3696_v4, %v3697_v21  ;;  %v8158_v6 = vsel %vm7457_vm15, %v6029_v39, %v3701_v57  ;;  %v1026_v21 = vld [vmem:[#allocation2 + $0x108] sm:$0x1]  ;;  %v6845_v23 = vld [vmem:[#allocation2 + $0x80] sm:$0xff]  }
 0x122   : > { %v852_v34 = vrot.slane %v850_v46, 7  ;;  %v6048_v1 = vcombine.low %v8148_v9, %v8154_v51  ;;  %v3703_v60 = vrot.slane %v3701_v57, 4  ;;  %v3708_v2 = vrot.slane %v7774_v15, 5  ;;  %v3626_v15 = vld [vmem:[#allocation2 + $0x60] sm:$0xe] }
 0x123   : > { %6609 = vmatmul.mubr.msk.bf16.gmra.mxu1 %vm1533_vm9, %v6843_v11  ;;  %v860_v41 = vrot.slane %v858_v32, 7  ;;  %v3711_v30 = vrot.slane %v7803_v17, 5  ;;  %v6031_v12 = vrot.slane %v3625_v48, 9  ;;  %v3715_v36 = vrot.slane %v7805_v25, 5  ;;  %v5213_v9 = vld [vmem:[#allocation2 + $0x30] sm:$0xe] }
 0x124   : > { %6612 = vmatprep.mubr.msk.bf16.mxu1 %vm1533_vm9, %v6844_v61  ;;  %v855_v44 = vor.u32 %v853_v58, %v852_v34  ;;  %v856_v40 = vrot.slane %v852_v34, 4  ;;  %v8169_v39 = vsel %vm7457_vm15, %v3703_v60, %v3704_v33  ;;  %v8173_v62 = vsel %vm7457_vm15, %v6030_v29, %v3708_v2  ;;  %v3627_v33 = vld [vmem:[#allocation2 + $0x70] sm:$0xe]  ;;  %v3628_v60 = vld [vmem:[#allocation2 + $0x80] sm:$0xe] }
 0x125   : > { %v863_v11 = vor.u32 %v861_v0, %v860_v41  ;;  %v865_v5 = vrot.slane %v860_v41, 4  ;;  %v6049_v17 = vcombine.low %v8158_v6, %v8169_v39  ;;  %v3710_v61 = vrot.slane %v3708_v2, 4  ;;  %v6846_v29 = vld [vmem:[#allocation2 + $0x90] sm:$0xff]   ;;  %v4480_v39 = vld [vmem:[#allocation2 + $0x40] sm:$0xf] }
 0x126   : > { %6657 = vmatmul.mubr.msk.bf16.gmra.mxu0 %vm1533_vm9, %v6004_v31  ;;  %v1023_v4 = vsel %vm7059_vm12, %v855_v44, %v1022_v19  ;;  %v8182_v57 = vsel %vm7457_vm15, %v6031_v12, %v3715_v36  ;;  %v3717_v46 = vrot.slane %v3715_v36, 4  ;;  %v3718_v58 = vrot.slane %v7835_v49, 5  ;;  %v3629_v19 = vld [vmem:[#allocation2 + $0x90] sm:$0xe] }
 0x127   : > { %6660 = vmatprep.mubr.msk.bf16.mxu0 %vm1533_vm9, %v6005_v26  ;;  %v864_v32 = vsel %vm7053_vm11, %v856_v40, %v863_v11  ;;  %1024 = vst [vmem:[#allocation2 + $0x100] sm:$0xf] %v1023_v4  ;;  %v1027_v31 = vsel %vm6961_vm4, %v865_v5, %v1026_v21  ;;  %v8192_v0 = vsel %vm7457_vm15, %v3710_v61, %v3711_v30  ;;  %v6032_v34 = vrot.slane %v3626_v15, 9  ;;  %v6848_v4 = vld [vmem:[#allocation2 + $0xa0] sm:$0xff]  }
 0x128   : > { %1025 = vst.msk [vmem:[#allocation2 + $0x104] sm:$0xf] %vm389_vm0, %v864_v32  ;;  %1028 = vst [vmem:[#allocation2 + $0x108] sm:$0x1] %v1027_v31  ;;  %v6050_v49 = vcombine.low %v8173_v62, %v8192_v0  ;;  %v8199_v26 = vsel %vm7457_vm15, %v3717_v46, %v3718_v58  ;;  %v3722_v2 = vrot.slane %v7829_v50, 5  ;;  %v3725_v41 = vrot.slane %v7847_v24, 5 }
 0x129   : > { %v6033_v12 = vrot.slane %v3627_v33, 9  ;;  %v3729_v36 = vrot.slane %v7863_v13, 5  ;;  %v3732_v44 = vrot.slane %v7876_v55, 5  ;;  %v6034_v15 = vrot.slane %v3628_v60, 9  ;;  %v3630_v24 = vld [vmem:[#allocation2 + $0xa0] sm:$0xe] }
 0x12a   : > { %v8210_v40 = vsel %vm7457_vm15, %v6032_v34, %v3722_v2  ;;  %v3724_v21 = vrot.slane %v3722_v2, 4  ;;  %v3736_v50 = vrot.slane %v7884_v38, 5  ;;  %v3739_v55 = vrot.slane %v7908_v54, 5  ;;  %v3631_v60 = vld [vmem:[#allocation2 + $0xb0] sm:$0xe]  ;;  %v6866_v30 = vld [vmem:[#allocation2 + $0xa0] sm:$0xff]  }
 0x12b   : > { %6613 = vmatmul.mubr.msk.bf16.gmra.mxu1 %vm1533_vm9, %v6845_v23  ;;  %v8216_v11 = vsel %vm7457_vm15, %v6033_v12, %v3729_v36  ;;  %v3731_v13 = vrot.slane %v3729_v36, 4  ;;  %v6035_v5 = vrot.slane %v3629_v19, 9  ;;  %v3743_v25 = vrot.slane %v7910_v8, 5  ;;  %v3632_v12 = vld [vmem:[#allocation2 + $0xc0] sm:$0xe] }
 0x12c   : > { %6616 = vmatprep.mubr.msk.bf16.mxu1 %vm1533_vm9, %v6846_v29  ;;  %v8221_v61 = vsel %vm7457_vm15, %v3724_v21, %v3725_v41  ;;  %v8225_v23 = vsel %vm7457_vm15, %v6034_v15, %v3736_v50  ;;  %v3738_v38 = vrot.slane %v3736_v50, 4  ;;  %v3746_v54 = vrot.slane %v7916_v3, 5  ;;  %v6850_v29 = vld [vmem:[#allocation2 + $0xb0] sm:$0xff]   ;;  %v4482_v62 = vld [vmem:[#allocation2 + $0x48] sm:$0x1] }
 0x12d   : > { %v8232_v58 = vsel %vm7457_vm15, %v3731_v13, %v3732_v44  ;;  %v6036_v33 = vrot.slane %v3630_v24, 9  ;;  %v8245_v31 = vsel %vm7457_vm15, %v6035_v5, %v3743_v25  ;;  %v3745_v34 = vrot.slane %v3743_v25, 4 }
 0x12e   : > { %6661 = vmatmul.mubr.msk.bf16.gmra.mxu0 %vm1533_vm9, %v8140_v35  ;;  %v2928_v48 = vld [vmem:[#allocation2 + $0x100] sm:$0xf]  ;;  %v8241_v8 = vsel %vm7457_vm15, %v3738_v38, %v3739_v55  ;;  %v3750_v13 = vrot.slane %v7930_v37, 5  ;;  %v3753_v25 = vrot.slane %v7945_v42, 5  ;;  %v3757_v24 = vrot.slane %v7957_v63, 5 }
 0x12f   : > { %6664 = vmatprep.mubr.msk.bf16.mxu0 %vm1533_vm9, %v8142_v10  ;;  %v8249_v3 = vld [vmem:[#allocation2 + $0x104] sm:$0xf]  ;;  %v8251_v35 = vld [vmem:[#allocation2 + $0x108] sm:$0x1]  ;;  %v3292_v2 = vshrl.u32 %v2928_v48, 16  ;;  %v3295_v41 = vshll.u32 %v2928_v48, 16  ;;  %v8260_v15 = vsel %vm7457_vm15, %v3745_v34, %v3746_v54 }
 0x130   : > { %v3301_v36 = vshll.u32 %v8249_v3, 16  ;;  %v3305_v44 = vshrl.u32 %v8249_v3, 16  ;;  %v3311_v21 = vshll.u32 %v8251_v35, 16  ;;  %v8270_v54 = vsel %vm7457_vm15, %v6036_v33, %v3750_v13  ;;  %v6851_v33 = vld [vmem:[#allocation2 + $0xc0] sm:$0xff]  }
 0x131   : > { %v3294_v10 = vrot.slane %v3292_v2, 4  ;;  %v3297_v50 = vrot.slane %v3295_v41, 5  ;;  %v3752_v34 = vrot.slane %v3750_v13, 4  ;;  %v6037_v2 = vrot.slane %v3631_v60, 9 }
 0x132   : > { %v3303_v55 = vrot.slane %v3301_v36, 5  ;;  %v3307_v5 = vrot.slane %v3305_v44, 4  ;;  %v3313_v38 = vrot.slane %v3311_v21, 5  ;;  %v3760_v37 = vrot.slane %v7989_v56, 5  ;;  %v3633_v36 = vld [vmem:[#allocation2 + $0xd0] sm:$0xe] }
 0x133   : > { %6617 = vmatmul.mubr.msk.bf16.gmra.mxu1 %vm1533_vm9, %v6848_v4  ;;  %v3298_v48 = vor.u32 %v3297_v50, %v3294_v10  ;;  %v6038_v4 = vrot.slane %v3632_v12, 9  ;;  %v8276_v42 = vsel %vm7457_vm15, %v3752_v34, %v3753_v25  ;;  %v3767_v21 = vrot.slane %v8001_v53, 5  ;;  %v3634_v12 = vld [vmem:[#allocation2 + $0xe0] sm:$0xe]  ;;  %v6852_v50 = vld [vmem:[#allocation2 + $0xd0] sm:$0xff]  }
 0x134   : > { %6620 = vmatprep.mubr.msk.bf16.mxu1 %vm1533_vm9, %v6850_v29  ;;  %v3308_v41 = vor.u32 %v3307_v5, %v3303_v55  ;;  %v3764_v29 = vrot.slane %v7980_v47, 5  ;;  %v8284_v63 = vsel %vm7457_vm15, %v6037_v2, %v3757_v24  ;;  %v3759_v56 = vrot.slane %v3757_v24, 4 }
 0x135   : > { %v3299_v44 = vrot.slane %v3298_v48, 4  ;;  %v6039_v5 = vrot.slane %v3633_v36, 9  ;;  %v6856_v48 = vld [vmem:[#allocation2 + $0x20] sm:$0xff]   ;;  %v3771_v24 = vrot.slane %v8011_v22, 5  ;;  %v3774_v2 = vrot.slane %v8025_v16, 5 }
 0x136   : > { %v3309_v10 = vrot.slane %v3308_v41, 4  ;;  %v8290_v47 = vsel %vm7457_vm15, %v6038_v4, %v3764_v29  ;;  %v3766_v53 = vrot.slane %v3764_v29, 4  ;;  %v8296_v34 = vsel %vm7457_vm15, %v3759_v56, %v3760_v37  ;;  %v3635_v41 = vld [vmem:[#allocation2 + $0xf0] sm:$0xe] }
 0x137   : > { %v3304_v13 = vsel %vm7045_vm10, %v3299_v44, %v3303_v55  ;;  %v6040_v44 = vrot.slane %v3634_v12, 9  ;;  %v8311_v22 = vsel %vm7457_vm15, %v6039_v5, %v3771_v24  ;;  %v3773_v16 = vrot.slane %v3771_v24, 4  ;;  %v9665_v12 = vld [vmem:[#allocation7_spill] sm:$0xff] }
 0x138   : > { %v3314_v25 = vsel %vm7045_vm10, %v3309_v10, %v3313_v38  ;;  %v8304_v36 = vsel %vm7457_vm15, %v3766_v53, %v3767_v21  ;;  %v453_v38 = vld [vmem:[#allocation2 + $0x110] sm:$0x1]  ;;  %v3778_v29 = vrot.slane %v8039_v27, 5  ;;  %v3636_v10 = vld [vmem:[#allocation2 + $0x100] sm:$0xe]  ;;  %v3781_v21 = vrot.slane %v8051_v52, 5 }
 0x139   : > { %v6008_v55 = vcombine.low %v3304_v13, %v3314_v25  ;;  %v6041_v56 = vrot.slane %v3635_v41, 9  ;;  %v3788_v13 = vrot.slane %v9665_v12, 5  ;;  %v3621_v53 = vld [vmem:[#allocation2 + $0x10] sm:$0xe]  ;;  %v8322_v5 = vsel %vm7457_vm15, %v3773_v16, %v3774_v2  ;;  %v6853_v2 = vld [vmem:[#allocation2 + $0xe0] sm:$0xff]  }
 0x13a   : > { %v8326_v27 = vsel %vm7457_vm15, %v6040_v44, %v3778_v29  ;;  %v454_v52 = vsel %vm6961_vm4, 0, %v453_v38  ;;  %v6042_v24 = vrot.slane %v3636_v10, 9  ;;  %v3795_v20 = vrot.slane %v8251_v35, 5  ;;  %v6854_v44 = vld [vmem:[#allocation2 + $0xf0] sm:$0xff]   ;;  %v6905_v16 = vld [vmem:[#allocation2 + $0x18] sm:$0x1] }
 0x13b   : > { %6621 = vmatmul.mubr.msk.bf16.gmra.mxu1 %vm1533_vm9, %v6851_v33  ;;  %6665 = vmatmul.mubr.msk.bf16.gmra.mxu0 %vm1533_vm9, %v6008_v55  ;;  %v3785_v33 = vrot.slane %v8064_v28, 5  ;;  %455 = vst [vmem:[#allocation2 + $0x110] sm:$0x1] %v454_v52  ;;  %v3792_v55 = vrot.slane %v8249_v3, 5  ;;  %v6027_v38 = vrot.slane %v3621_v53, 9  ;;  %v6857_v12 = vld [vmem:[#allocation2 + $0x30] sm:$0xff]  }
 0x13c   : > { %6624 = vmatprep.mubr.msk.bf16.mxu1 %vm1533_vm9, %v6852_v50  ;;  %6708 = vmatprep.mubr.msk.bf16.mxu0 %vm1533_vm9, %v6856_v48  ;;  %v3780_v50 = vrot.slane %v3778_v29, 4  ;;  %v3690_v29 = vrot.slane %v6905_v16, 5  ;;  %v6861_v16 = vld [vmem:[#allocation2 + $0x50] sm:$0xff]   ;;  %v4476_v52 = vld [vmem:[#allocation2 + $0x28] sm:$0x1]  ;;  %v4571_v60 = vshrl.u32 %v4480_v39, 16 }
 0x13d   : > { %v8334_v25 = vsel %vm7457_vm15, %v6041_v56, %v3785_v33  ;;  %v3787_v48 = vrot.slane %v3785_v33, 4  ;;  %v6860_v33 = vld [vmem:[#allocation2 + $0x40] sm:$0xff]   ;;  %v8354_v35 = vsel %vm7457_vm15, %v6042_v24, %v3792_v55  ;;  %v3794_v53 = vrot.slane %v3792_v55, 4 }
 0x13e   : > { %v8338_v41 = vsel %vm7457_vm15, %v3780_v50, %v3781_v21  ;;  %v3689_v21 = vrot.slane %v3687_v45, 4  ;;  %v6869_v50 = vld [vmem:[%s9601_s3 + $0x80] sm:$0xff]   ;;  %v5281_v28 = vrot.slane %v4476_v52, 5  ;;  %v4574_v19 = vshll.u32 %v4480_v39, 16 }
 0x13f   : > { %v8346_v10 = vsel %vm7457_vm15, %v3787_v48, %v3788_v13  ;;  %v8362_v13 = vsel %vm7457_vm15, %v3794_v53, %v3795_v20  ;;  %v3688_v48 = vsel %vm7457_vm15, %v6027_v38, %v3687_v45  ;;  %v6855_v55 = vld [vmem:[#allocation2 + $0x100] sm:$0xff]   ;;  %v8376_v20 = vpop.f32.mrf.mxu0  ;;  %vm5694_vm0 = vcmask 64512  }
 0x140   : > { %v3691_v24 = vsel %vm7457_vm15, %v3689_v21, %v3690_v29  ;;  %9667 = vst [vmem:[#allocation3_spill] sm:$0xff] %v8376_v20  ;;  %v4474_v45 = vld [vmem:[#allocation2 + $0x20] sm:$0xf]  ;;  %v4475_v38 = vld [vmem:[#allocation2 + $0x24] sm:$0xf] }
 0x141   : > { %v8379_v59 = vpop.f32.mrf.mxu0  ;;  %v4523_v29 = vshrl.u32 %v4474_v45, 16  ;;  %v4526_v21 = vshll.u32 %v4474_v45, 16  ;;  %v5212_v53 = vld [vmem:[#allocation2 + $0x20] sm:$0xe]  ;;  %v4478_v45 = vld [vmem:[#allocation2 + $0x34] sm:$0xf] }
 0x142   : > { %9668 = vst [vmem:[#allocation9_spill] sm:$0xff] %v8379_v59  ;;  %v6157_v3 = vrot.slane %v5212_v53, 9  ;;  %v5285_v6 = vrot.slane %v4478_v45, 5  ;;  %v4556_v4 = vshll.u32 %v4478_v45, 16 }
 0x143   : > { %6625 = vmatmul.mubr.msk.bf16.gmra.mxu1 %vm1533_vm9, %v6853_v2  ;;  %6709 = vmatmul.mubr.msk.bf16.vlgmr.msra.gmra.mxu0 %vm1533_vm9, %v6857_v12  ;;  %v9666_v2 = vld [vmem:[#allocation11_spill] sm:$0xff]  ;;  %v4528_v56 = vrot.slane %v4526_v21, 5  ;;  %v4477_v21 = vld [vmem:[#allocation2 + $0x30] sm:$0xf] }
 0x144   : > { %6628 = vmatprep.mubr.msk.bf16.mxu1 %vm1533_vm9, %v6854_v44  ;;  %6777 = vmatpush3.bf16.msra.mxu0 %v9666_v2  ;;  %v6047_v44 = vcombine.low %v3688_v48, %v3691_v24  ;;  %v6862_v12 = vld [vmem:[#allocation2 + $0x60] sm:$0xff]   ;;  %v5278_v48 = vrot.slane %v4475_v38, 5  ;;  %v4532_v24 = vshll.u32 %v4475_v38, 16  ;;  %v6863_v2 = vld [vmem:[#allocation2 + $0x70] sm:$0xff]   ;;  %v4550_v37 = vshll.u32 %v4477_v21, 16 }
 0x145   : > { %6712 = vmatprep.mubr.msk.bf16.mxu0 %vm1533_vm9, %v6860_v33  ;;  %6778 = vmatprep.subr.bf16.mxu0 %v6869_v50  ;;  %v8384_v33 = vpop.f32.mrf.mxu0 }
 0x146   : > { %9669 = vst [vmem:[#allocation10_spill] sm:$0xff] %v8384_v33  ;;  %v8400_v53 = vrot.slane %v4532_v24, 5  ;;  %v4479_v24 = vld [vmem:[#allocation2 + $0x38] sm:$0x1]  ;;  %v9677_v33 = vcombine.low %v8210_v40, %v8221_v61 }
 0x148   : > { %6779 = vmatpush3.bf16.msra.mxu0 %v6869_v50  ;;  %v4536_v50 = vshrl.u32 %v4475_v38, 16  ;;  %v5280_v38 = vrot.slane %v5278_v48, 4 }
 0x14b   : > { %6629 = vmatmul.mubr.msk.bf16.gmra.mxu1 %vm1533_vm9, %v6855_v55  ;;  %6713 = vmatmul.mubr.msk.bf16.gmra.mxu0 %vm1533_vm9, %v6861_v16  ;;  %v6868_v55 = vld [vmem:[%s9601_s3 + $0x70] sm:$0xff]   ;;  %v4525_v16 = vrot.slane %v4523_v29, 4  ;;  %v4538_v29 = vrot.slane %v4536_v50, 4  ;;  %v4547_v50 = vshrl.u32 %v4477_v21, 16 }
 0x14c   : > { %6672 = vmatprep.mubr.msk.bf16.mxu1 %vm1533_vm9, %v6047_v44  ;;  %6716 = vmatprep.mubr.msk.bf16.mxu0 %vm1533_vm9, %v6862_v12  ;;  %v6864_v44 = vld [vmem:[#allocation2 + $0x80] sm:$0xff]   ;;  %v8393_v12 = vpop.f32.mrf.mxu0 }
 0x14d   : > { %9670 = vst [vmem:[#allocation8_spill] sm:$0xff] %v8393_v12  ;;  %v4529_v51 = vor.u32 %v4528_v56, %v4525_v16  ;;  %v6158_v56 = vrot.slane %v5213_v9, 9  ;;  %v6865_v16 = vld [vmem:[#allocation2 + $0x90] sm:$0xff]   ;;  %v8429_v9 = vrot.slane %v4556_v4, 5 }
 0x14e   : > { %v8445_v4 = vld [vmem:[#allocation2 + $0x54] sm:$0xf] }
 0x14f   : > { %v8419_v21 = vrot.slane %v4529_v51, 4  ;;  %v9674_v51 = vcombine.low %v8182_v57, %v8199_v26  ;;  %v4576_v57 = vrot.slane %v4574_v19, 5  ;;  %v5299_v12 = vrot.slane %v8445_v4, 5 }
 0x153   : > { %6673 = vmatmul.mubr.msk.bf16.vlgmr.msra.gmra.mxu1 %vm1533_vm9, %v6048_v1  ;;  %6717 = vmatmul.mubr.msk.bf16.gmra.mxu0 %vm1533_vm9, %v6863_v2  ;;  %v8408_v1 = vld [vmem:[#allocation2 + $0x44] sm:$0xf]  ;;  %v4560_v2 = vshrl.u32 %v4478_v45, 16  ;;  %v5287_v45 = vrot.slane %v5285_v6, 4 }
 0x154   : > { %6741 = vmatpush3.bf16.msra.mxu1 %v8096_v43  ;;  %6676 = vmatprep.mubr.msk.bf16.mxu1 %vm1533_vm9, %v6049_v17  ;;  %v8406_v43 = vsel %vm7457_vm15, %v6157_v3, %v5278_v48  ;;  %v8410_v17 = vpop.f32.mrf.mxu0  ;;  %v4539_v3 = vor.u32 %v4538_v29, %v8400_v53  ;;  %v4542_v48 = vshll.u32 %v4476_v52, 16  ;;  %v4580_v32 = vshll.u32 %v8408_v1, 16 }
 0x155   : > { %6742 = vmatprep.subr.bf16.mxu1 %v6868_v55  ;;  %6720 = vmatprep.mubr.msk.bf16.mxu0 %vm1533_vm9, %v6864_v44  ;;  %9671 = vst [vmem:[#allocation6_spill] sm:$0xff] %v8410_v17  ;;  %v8414_v44 = vsel %vm7457_vm15, %v5280_v38, %v5281_v28  ;;  %v4584_v46 = vshrl.u32 %v8408_v1, 16  ;;  %v8425_v28 = vpop.f32.mrf.mxu1  ;;  %v4549_v38 = vrot.slane %v4547_v50, 4  ;;  %v4552_v29 = vrot.slane %v4550_v37, 5  ;;  %v4483_v17 = vld [vmem:[#allocation2 + $0x50] sm:$0xf] }
 0x156   : > { %9672 = vst [vmem:[#allocation5_spill] sm:$0xff] %v8425_v28  ;;  %v8427_v52 = vpop.f32.mrf.mxu0  ;;  %v4562_v39 = vrot.slane %v4560_v2, 4  ;;  %v8437_v0 = vrot.slane %v4539_v3, 4  ;;  %v8443_v50 = vsel %vm7457_vm15, %v6158_v56, %v5285_v6  ;;  %v5214_v37 = vld [vmem:[#allocation2 + $0x40] sm:$0xe]  ;;  %v4573_v2 = vrot.slane %v4571_v60, 4 }
 0x157   : > { %9673 = vst [vmem:[#allocation7_spill] sm:$0xff] %v8427_v52  ;;  %v8448_v26 = vrot.slane %v4580_v32, 5  ;;  %v4595_v6 = vshrl.u32 %v4483_v17, 16  ;;  %v4598_v56 = vshll.u32 %v4483_v17, 16  ;;  %v8455_v28 = vpop.f32.mrf.mxu1  ;;  %v5292_v19 = vrot.slane %v8408_v1, 5 }
 0x158   : > { %6743 = vmatpush3.bf16.msra.mxu1 %v6868_v55  ;;  %v5288_v55 = vrot.slane %v4479_v24, 5  ;;  %9675 = vst [vmem:[#allocation11_spill] sm:$0xff] %v8455_v28  ;;  %v8457_v52 = vpop.f32.mrf.mxu0  ;;  %v6159_v17 = vrot.slane %v5214_v37, 9  ;;  %v5215_v1 = vld [vmem:[#allocation2 + $0x50] sm:$0xe]  ;;  %v5295_v32 = vrot.slane %v4482_v62, 5 }
 0x159   : > { %9676 = vst [vmem:[#allocation12_spill] sm:$0xff] %v8457_v52  ;;  %v4485_v52 = vld [vmem:[#allocation2 + $0x58] sm:$0x1]  ;;  %v4597_v60 = vrot.slane %v4595_v6, 4  ;;  %v4600_v37 = vrot.slane %v4598_v56, 5  ;;  %v8479_v59 = vpop.f32.mrf.mxu1  ;;  %v6160_v40 = vrot.slane %v5215_v1, 9 }
 0x15a   : > { %v8453_v3 = vsel %vm7457_vm15, %v5287_v45, %v5288_v55  ;;  %v6867_v45 = vld [vmem:[#allocation2 + $0xb0] sm:$0xff]   ;;  %v6870_v55 = vld [vmem:[#allocation2 + $0xc0] sm:$0xff]   ;;  %9678 = vst [vmem:[#allocation13_spill] sm:$0xff] %v8479_v59  ;;  %v8481_v20 = vpop.f32.mrf.mxu0  ;;  %v4619_v59 = vshrl.u32 %v4486_v14, 16 }
 0x15b   : > { %6677 = vmatmul.mubr.msk.bf16.gmra.mxu1 %vm1533_vm9, %v6050_v49  ;;  %v8439_v49 = vrot.slane %v4542_v48, 5  ;;  %6721 = vmatmul.mubr.msk.bf16.gmra.mxu0 %vm1533_vm9, %v6865_v16  ;;  %v4566_v48 = vshll.u32 %v4479_v24, 16  ;;  %v4604_v24 = vshll.u32 %v8445_v4, 16  ;;  %v4608_v16 = vshrl.u32 %v8445_v4, 16  ;;  %9679 = vst [vmem:[#allocation14_spill] sm:$0xff] %v8481_v20  ;;  %v6871_v1 = vld [vmem:[#allocation2 + $0xd0] sm:$0xff]  }
 0x15c   : > { %6680 = vmatprep.mubr.msk.bf16.mxu1 %vm1533_vm9, %v9674_v51  ;;  %v4586_v51 = vrot.slane %v4584_v46, 4  ;;  %6724 = vmatprep.mubr.msk.bf16.mxu0 %vm1533_vm9, %v6866_v30  ;;  %v4553_v46 = vor.u32 %v4552_v29, %v4549_v38  ;;  %v4563_v30 = vor.u32 %v4562_v39, %v8429_v9  ;;  %v4577_v38 = vor.u32 %v4576_v57, %v4573_v2 }
 0x15d   : > { %v4590_v39 = vshll.u32 %v4482_v62, 16  ;;  %v4568_v28 = vrot.slane %v4566_v48, 5  ;;  %v9680_v48 = vcombine.low %v8216_v11, %v8232_v58  ;;  %v8489_v4 = vsel %vm7457_vm15, %v6159_v17, %v5292_v19  ;;  %v8497_v17 = vpop.f32.mrf.mxu0 }
 0x15e   : > { %v4587_v29 = vor.u32 %v4586_v51, %v8448_v26  ;;  %v4554_v2 = vrot.slane %v4553_v46, 4  ;;  %v4564_v57 = vrot.slane %v4563_v30, 4  ;;  %v5294_v51 = vrot.slane %v5292_v19, 4  ;;  %v4487_v30 = vld [vmem:[#allocation2 + $0x64] sm:$0xf]  ;;  %v8495_v19 = vpop.f32.mrf.mxu1  ;;  %9682 = vst [vmem:[#allocation16_spill] sm:$0xff] %v8497_v17 }
 0x15f   : > { %v8491_v61 = vrot.slane %v4604_v24, 5  ;;  %v4578_v6 = vrot.slane %v4577_v38, 4  ;;  %v4592_v46 = vrot.slane %v4590_v39, 5  ;;  %v5302_v62 = vrot.slane %v4485_v52, 5  ;;  %9681 = vst [vmem:[#allocation15_spill] sm:$0xff] %v8495_v19 }
 0x160   : > { %v4588_v56 = vrot.slane %v4587_v29, 4  ;;  %v5301_v11 = vrot.slane %v5299_v12, 4  ;;  %v4601_v58 = vor.u32 %v4600_v37, %v4597_v60  ;;  %v4622_v20 = vshll.u32 %v4486_v14, 16  ;;  %v8509_v14 = vld [vmem:[#allocation2 + $0x68] sm:$0x1] }
 0x161   : > { %v4559_v24 = vsel %vm7045_vm10, %v4554_v2, %v8429_v9  ;;  %v4614_v38 = vshll.u32 %v4485_v52, 16  ;;  %v4628_v29 = vshll.u32 %v4487_v30, 16  ;;  %v4632_v39 = vshrl.u32 %v4487_v30, 16  ;;  %v6872_v2 = vld [vmem:[#allocation2 + $0xe0] sm:$0xff]  }
 0x162   : > { %v4583_v9 = vsel %vm7045_vm10, %v4578_v6, %v8448_v26  ;;  %v8522_v52 = vsel %vm7457_vm15, %v5301_v11, %v5302_v62  ;;  %v9683_v26 = vcombine.low %v8225_v23, %v8241_v8  ;;  %v8530_v6 = vpop.f32.mrf.mxu1  ;;  %v5309_v8 = vrot.slane %v8509_v14, 5 }
 0x163   : > { %6681 = vmatmul.mubr.msk.bf16.gmra.mxu1 %vm1533_vm9, %v9677_v33  ;;  %v4610_v33 = vrot.slane %v4608_v16, 4  ;;  %6725 = vmatmul.mubr.msk.bf16.gmra.mxu0 %vm1533_vm9, %v6867_v45  ;;  %v4569_v16 = vsel %vm7045_vm10, %v4564_v57, %v4568_v28  ;;  %v8506_v45 = vsel %vm7457_vm15, %v5294_v51, %v5295_v32  ;;  %v4593_v28 = vsel %vm7045_vm10, %v4588_v56, %v4592_v46  ;;  %v8532_v56 = vpop.f32.mrf.mxu0  ;;  %v4489_v46 = vld [vmem:[#allocation2 + $0x70] sm:$0xf] }
 0x164   : > { %6684 = vmatprep.mubr.msk.bf16.mxu1 %vm1533_vm9, %v9680_v48  ;;  %6728 = vmatprep.mubr.msk.bf16.mxu0 %vm1533_vm9, %v6870_v55  ;;  %v5216_v48 = vld [vmem:[#allocation2 + $0x60] sm:$0xe]  ;;  %v5306_v55 = vrot.slane %v4487_v30, 5  ;;  %v8518_v32 = vsel %vm7457_vm15, %v6160_v40, %v5299_v12  ;;  %v8524_v57 = vrot.slane %v4601_v58, 4  ;;  %v4621_v51 = vrot.slane %v4619_v59, 4  ;;  %9684 = vst [vmem:[#allocation17_spill] sm:$0xff] %v8530_v6 }
 0x165   : > { %v4611_v60 = vor.u32 %v4610_v33, %v8491_v61  ;;  %v6161_v37 = vrot.slane %v5216_v48, 9  ;;  %v4624_v33 = vrot.slane %v4622_v20, 5  ;;  %9685 = vst [vmem:[#allocation18_spill] sm:$0xff] %v8532_v56  ;;  %v9686_v12 = vsel %vm7045_vm10, %v8437_v0, %v8439_v49  ;;  %v4490_v48 = vld [vmem:[#allocation2 + $0x74] sm:$0xf] }
 0x166   : > { %v9687_v59 = vsel %vm7045_vm10, %v8419_v21, %v8400_v53  ;;  %v8546_v40 = vcombine.low %v4559_v24, %v4569_v16  ;;  %v5308_v23 = vrot.slane %v5306_v55, 4  ;;  %v9688_v62 = vcombine.low %v8245_v31, %v8260_v15  ;;  %v5217_v21 = vld [vmem:[#allocation2 + $0x70] sm:$0xe] }
 0x167   : > { %v8544_v20 = vcombine.low %v9687_v59, %v9686_v12  ;;  %v8553_v30 = vrot.slane %v4611_v60, 4  ;;  %v8555_v0 = vrot.slane %v4614_v38, 5  ;;  %v8557_v49 = vrot.slane %v4628_v29, 5  ;;  %v8575_v29 = vld [vmem:[#allocation2 + $0x84] sm:$0xf] }
 0x168   : > { %v4634_v53 = vrot.slane %v4632_v39, 4  ;;  %v8562_v58 = vcombine.low %v4583_v9, %v4593_v28  ;;  %v8568_v15 = vsel %vm7457_vm15, %v6161_v37, %v5306_v55  ;;  %v4625_v16 = vor.u32 %v4624_v33, %v4621_v51  ;;  %v4492_v39 = vld [vmem:[#allocation2 + $0x80] sm:$0xf]  ;;  %v8579_v9 = vpop.f32.mrf.mxu0 }
 0x169   : > { %v4643_v60 = vshrl.u32 %v4489_v46, 16  ;;  %v4646_v38 = vshll.u32 %v4489_v46, 16  ;;  %9691 = vst [vmem:[#allocation21_spill] sm:$0xff] %v8579_v9  ;;  %v8583_v55 = vsel %vm7457_vm15, %v5308_v23, %v5309_v8  ;;  %v4638_v28 = vshll.u32 %v8509_v14, 16  ;;  %v6873_v46 = vld [vmem:[#allocation2 + $0xf0] sm:$0xff]   ;;  %v6874_v14 = vld [vmem:[#allocation2 + $0x100] sm:$0xff]  }
 0x16a   : > { %9689 = vst [vmem:[#allocation19_spill] sm:$0xff] %v8562_v58  ;;  %v6162_v37 = vrot.slane %v5217_v21, 9  ;;  %v4635_v33 = vor.u32 %v4634_v53, %v8557_v49  ;;  %v4652_v12 = vshll.u32 %v4490_v48, 16  ;;  %v4656_v59 = vshrl.u32 %v4490_v48, 16  ;;  %v6875_v58 = vld [vmem:[#allocation2 + $0x110] sm:$0xff]  }
 0x16b   : > { %6685 = vmatmul.mubr.msk.bf16.gmra.mxu1 %vm1533_vm9, %v9683_v26  ;;  %6729 = vmatmul.mubr.msk.bf16.gmra.mxu0 %vm1533_vm9, %v6871_v1  ;;  %v8577_v1 = vpop.f32.mrf.mxu1  ;;  %v4491_v26 = vld [vmem:[#allocation2 + $0x78] sm:$0x1]  ;;  %v4670_v31 = vshll.u32 %v4492_v39, 16  ;;  %v4676_v23 = vshll.u32 %v8575_v29, 16  ;;  %v4680_v8 = vshrl.u32 %v8575_v29, 16  ;;  %v8595_v11 = vrot.slane %v4625_v16, 4 }
 0x16c   : > { %6688 = vmatprep.mubr.msk.bf16.mxu1 %vm1533_vm9, %v9688_v62  ;;  %6732 = vmatprep.mubr.msk.bf16.mxu0 %vm1533_vm9, %v6872_v2  ;;  %9690 = vst [vmem:[#allocation20_spill] sm:$0xff] %v8577_v1  ;;  %v5313_v2 = vrot.slane %v4490_v48, 5  ;;  %v4667_v62 = vshrl.u32 %v4492_v39, 16  ;;  %v4645_v24 = vrot.slane %v4643_v60, 4  ;;  %v4648_v51 = vrot.slane %v4646_v38, 5  ;;  %v8605_v39 = vpop.f32.mrf.mxu0 }
 0x16d   : > { %v8597_v1 = vld [vmem:[#allocation2 + $0x94] sm:$0xf]  ;;  %v9692_v53 = vcombine.low %v8270_v54, %v8276_v42  ;;  %v8603_v48 = vpop.f32.mrf.mxu1  ;;  %9694 = vst [vmem:[#allocation23_spill] sm:$0xff] %v8605_v39  ;;  %v8607_v6 = vrot.slane %v4638_v28, 5  ;;  %v5316_v60 = vrot.slane %v4491_v26, 5  ;;  %v9695_v19 = vcombine.low %v8284_v63, %v8296_v34 }
 0x16e   : > { %9693 = vst [vmem:[#allocation22_spill] sm:$0xff] %v8603_v48  ;;  %v8611_v21 = vsel %vm7457_vm15, %v6162_v37, %v5313_v2  ;;  %v5315_v16 = vrot.slane %v5313_v2, 4  ;;  %v5218_v38 = vld [vmem:[#allocation2 + $0x80] sm:$0xe]  ;;  %v8617_v54 = vrot.slane %v4635_v33, 4  ;;  %v8619_v42 = vrot.slane %v4652_v12, 5 }
 0x16f   : > { %v5320_v28 = vrot.slane %v8575_v29, 5  ;;  %v4495_v48 = vld [vmem:[#allocation2 + $0x90] sm:$0xf]  ;;  %v4494_v37 = vld [vmem:[#allocation2 + $0x88] sm:$0x1]  ;;  %v4669_v39 = vrot.slane %v4667_v62, 4  ;;  %v4631_v63 = vsel %vm7045_vm10, %v8595_v11, %v8557_v49  ;;  %v4649_v34 = vor.u32 %v4648_v51, %v4645_v24  ;;  %v8630_v29 = vpop.f32.mrf.mxu1 }
 0x170   : > { %v4672_v2 = vrot.slane %v4670_v31, 5  ;;  %v8623_v9 = vrot.slane %v4676_v23, 5  ;;  %v4682_v56 = vrot.slane %v4680_v8, 4  ;;  %v6163_v33 = vrot.slane %v5218_v38, 9  ;;  %9696 = vst [vmem:[#allocation24_spill] sm:$0xff] %v8630_v29 }
 0x171   : > { %v4700_v31 = vshll.u32 %v8597_v1, 16  ;;  %v4704_v62 = vshrl.u32 %v8597_v1, 16  ;;  %v5322_v8 = vrot.slane %v5320_v28, 4  ;;  %v4686_v17 = vshll.u32 %v4494_v37, 16 }
 0x172   : > { %v8641_v11 = vsel %vm7457_vm15, %v5315_v16, %v5316_v60  ;;  %v4673_v24 = vor.u32 %v4672_v2, %v4669_v39  ;;  %v4683_v51 = vor.u32 %v4682_v56, %v8623_v9  ;;  %v4641_v38 = vsel %vm7045_vm10, %v8617_v54, %v8607_v6  ;;  %v8657_v56 = vpop.f32.mrf.mxu1  ;;  %v4498_v54 = vld [vmem:[#allocation2 + $0xa0] sm:$0xf] }
 0x173   : > { %6689 = vmatmul.mubr.msk.bf16.gmra.mxu1 %vm1533_vm9, %v9692_v53  ;;  %v4658_v53 = vrot.slane %v4656_v59, 4  ;;  %6733 = vmatmul.mubr.msk.bf16.gmra.mxu0 %vm1533_vm9, %v6873_v46  ;;  %v4691_v59 = vshrl.u32 %v4495_v48, 16  ;;  %v4694_v46 = vshll.u32 %v4495_v48, 16  ;;  %v5327_v48 = vrot.slane %v8597_v1, 5  ;;  %9699 = vst [vmem:[#allocation26_spill] sm:$0xff] %v8657_v56 }
 0x174   : > { %6692 = vmatprep.mubr.msk.bf16.mxu1 %vm1533_vm9, %v9695_v19  ;;  %6736 = vmatprep.mubr.msk.bf16.mxu0 %vm1533_vm9, %v6874_v14  ;;  %v4662_v19 = vshll.u32 %v4491_v26, 16  ;;  %v5323_v14 = vrot.slane %v4494_v37, 5  ;;  %v5219_v26 = vld [vmem:[#allocation2 + $0x90] sm:$0xe]  ;;  %v8651_v29 = vsel %vm7457_vm15, %v6163_v33, %v5320_v28  ;;  %v9698_v39 = vcombine.low %v8290_v47, %v8304_v36 }
 0x175   : > { %v4659_v23 = vor.u32 %v4658_v53, %v8619_v42  ;;  %v4650_v53 = vrot.slane %v4649_v34, 4  ;;  %v4693_v16 = vrot.slane %v4691_v59, 4  ;;  %v4696_v60 = vrot.slane %v4694_v46, 5 }
 0x176   : > { %v8632_v12 = vpop.f32.mrf.mxu0  ;;  %v4664_v37 = vrot.slane %v4662_v19, 5  ;;  %v8661_v2 = vrot.slane %v4700_v31, 5  ;;  %v4706_v6 = vrot.slane %v4704_v62, 4  ;;  %v9700_v28 = vcombine.low %v8311_v22, %v8322_v5 }
 0x177   : > { %v4660_v34 = vrot.slane %v4659_v23, 4  ;;  %v8669_v47 = vsel %vm7457_vm15, %v5322_v8, %v5323_v14  ;;  %v4688_v36 = vrot.slane %v4686_v17, 5  ;;  %v6164_v19 = vrot.slane %v5219_v26, 9  ;;  %v5220_v8 = vld [vmem:[#allocation2 + $0xa0] sm:$0xe] }
 0x178   : > { %v8637_v49 = vpop.f32.mrf.mxu0  ;;  %v4674_v59 = vrot.slane %v4673_v24, 4  ;;  %v4684_v46 = vrot.slane %v4683_v51, 4  ;;  %v5329_v31 = vrot.slane %v5327_v48, 4  ;;  %v9702_v22 = vcombine.low %v8406_v43, %v8414_v44  ;;  %v8692_v44 = vpop.f32.mrf.mxu1 }
 0x179   : > { %9697 = vst [vmem:[#allocation25_spill] sm:$0xff] %v8637_v49  ;;  %v4497_v49 = vld [vmem:[#allocation2 + $0x98] sm:$0x1]  ;;  %v9703_v5 = vsel %vm7045_vm10, %v8553_v30, %v8555_v0  ;;  %v9704_v17 = vsel %vm7045_vm10, %v8524_v57, %v8491_v61  ;;  %v4715_v14 = vshrl.u32 %v4498_v54, 16  ;;  %v4718_v43 = vshll.u32 %v4498_v54, 16  ;;  %9705 = vst [vmem:[#allocation28_spill] sm:$0xff] %v8692_v44 }
 0x17a   : > { %v8659_v1 = vpop.f32.mrf.mxu0  ;;  %v5330_v62 = vrot.slane %v4497_v49, 5  ;;  %v8696_v51 = vcombine.low %v4631_v63, %v4641_v38  ;;  %v4697_v30 = vor.u32 %v4696_v60, %v4693_v16  ;;  %v4707_v0 = vor.u32 %v4706_v6, %v8661_v2  ;;  %v4501_v16 = vld [vmem:[#allocation2 + $0xb0] sm:$0xf]  ;;  %v4500_v60 = vld [vmem:[#allocation2 + $0xa8] sm:$0x1] }
 0x17b   : > { %6693 = vmatmul.mubr.msk.bf16.gmra.mxu1 %vm1533_vm9, %v9698_v39  ;;  %6737 = vmatmul.mubr.msk.bf16.gmra.mxu0 %vm1533_vm9, %v6875_v58  ;;  %v8688_v58 = vcombine.low %v9704_v17, %v9703_v5  ;;  %v4710_v26 = vshll.u32 %v4497_v49, 16  ;;  %v4499_v39 = vld [vmem:[#allocation2 + $0xa4] sm:$0xf]  ;;  %v4655_v61 = vsel %vm7045_vm10, %v4650_v53, %v8619_v42  ;;  %v4665_v57 = vsel %vm7045_vm10, %v4660_v34, %v4664_v37  ;;  %v8721_v37 = vld [vmem:[#allocation2 + $0xb4] sm:$0xf] }
 0x17c   : > { %6696 = vmatprep.mubr.msk.bf16.mxu1 %vm1533_vm9, %v9700_v28  ;;  %v8672_v33 = vpop.f32.mrf.mxu0  ;;  %6780 = vmatprep.mubr.msk.bf16.mxu0 %vm1533_vm9, %v9702_v22  ;;  %v8708_v28 = vsel %vm7457_vm15, %v6164_v19, %v5327_v48  ;;  %v4679_v49 = vsel %vm7045_vm10, %v4674_v59, %v8623_v9  ;;  %v4689_v38 = vsel %vm7045_vm10, %v4684_v46, %v4688_v36  ;;  %v6165_v53 = vrot.slane %v5220_v8, 9  ;;  %v8727_v9 = vpop.f32.mrf.mxu1 }
 0x17d   : > { %9701 = vst [vmem:[#allocation27_spill] sm:$0xff] %v8672_v33  ;;  %v8719_v42 = vsel %vm7457_vm15, %v5329_v31, %v5330_v62  ;;  %v4717_v48 = vrot.slane %v4715_v14, 4  ;;  %v4720_v6 = vrot.slane %v4718_v43, 5  ;;  %v4724_v34 = vshll.u32 %v4499_v39, 16  ;;  %9707 = vst [vmem:[#allocation29_spill] sm:$0xff] %v8727_v9 }
 0x17e   : > { %v8694_v24 = vpop.f32.mrf.mxu0  ;;  %v4728_v19 = vshrl.u32 %v4499_v39, 16  ;;  %v9706_v22 = vcombine.low %v8326_v27, %v8338_v41  ;;  %v4698_v59 = vrot.slane %v4697_v30, 4  ;;  %v4708_v46 = vrot.slane %v4707_v0, 4 }
 0x17f   : > { %v4712_v31 = vrot.slane %v4710_v26, 5  ;;  %v5334_v62 = vrot.slane %v4499_v39, 5  ;;  %v9708_v5 = vcombine.low %v8334_v25, %v8346_v10  ;;  %v8735_v17 = vcombine.low %v4655_v61, %v4665_v57  ;;  %v5221_v25 = vld [vmem:[#allocation2 + $0xb0] sm:$0xe] }
 0x180   : > { %v8710_v63 = vpop.f32.mrf.mxu0  ;;  %v8737_v8 = vcombine.low %v4679_v49, %v4689_v38  ;;  %v4739_v27 = vshrl.u32 %v4501_v16, 16  ;;  %v4742_v41 = vshll.u32 %v4501_v16, 16  ;;  %v9709_v14 = vcombine.low %v8443_v50, %v8453_v3  ;;  %v4504_v49 = vld [vmem:[#allocation2 + $0xc0] sm:$0xf]  ;;  %v8759_v38 = vpop.f32.mrf.mxu1 }
 0x181   : > { %v5337_v0 = vrot.slane %v4500_v60, 5  ;;  %v4748_v10 = vshll.u32 %v8721_v37, 16  ;;  %v4752_v26 = vshrl.u32 %v8721_v37, 16  ;;  %v9710_v39 = vcombine.low %v8489_v4, %v8506_v45  ;;  %9711 = vst [vmem:[#allocation30_spill] sm:$0xff] %v8759_v38  ;;  %v5223_v38 = vld [vmem:[#allocation2 + $0xd0] sm:$0xe] }
 0x182   : > { %v8729_v36 = vpop.f32.mrf.mxu0  ;;  %v8755_v50 = vsel %vm7457_vm15, %v6165_v53, %v5334_v62  ;;  %v4721_v3 = vor.u32 %v4720_v6, %v4717_v48  ;;  %v8757_v61 = vrot.slane %v4724_v34, 5  ;;  %v4730_v57 = vrot.slane %v4728_v19, 4  ;;  %v8768_v53 = vld [vmem:[#allocation2 + $0xc4] sm:$0xf]  ;;  %v8770_v48 = vld [vmem:[#allocation2 + $0xb8] sm:$0x1] }
 0x183   : > { %6697 = vmatmul.mubr.msk.bf16.gmra.mxu1 %vm1533_vm9, %v9706_v22  ;;  %6781 = vmatmul.mubr.msk.bf16.vlgmr.msra.gmra.mxu0 %vm1533_vm9, %v9709_v14  ;;  %v4703_v22 = vsel %vm7045_vm10, %v4698_v59, %v8661_v2  ;;  %v4713_v4 = vsel %vm7045_vm10, %v4708_v46, %v4712_v31  ;;  %v5336_v45 = vrot.slane %v5334_v62, 4  ;;  %v6166_v6 = vrot.slane %v5221_v25, 9 }
 0x184   : > { %6700 = vmatprep.mubr.msk.bf16.mxu1 %vm1533_vm9, %v9708_v5  ;;  %v8743_v43 = vpop.f32.mrf.mxu0  ;;  %6784 = vmatprep.mubr.msk.bf16.mxu0 %vm1533_vm9, %v9710_v39  ;;  %v4734_v5 = vshll.u32 %v4500_v60, 16  ;;  %v5341_v34 = vrot.slane %v8721_v37, 5  ;;  %v4741_v19 = vrot.slane %v4739_v27, 4  ;;  %v4744_v14 = vrot.slane %v4742_v41, 5 }
 0x185   : > { %v8775_v30 = vrot.slane %v4748_v10, 5  ;;  %v4754_v54 = vrot.slane %v4752_v26, 4  ;;  %v4763_v2 = vshrl.u32 %v4504_v49, 16  ;;  %v4766_v59 = vshll.u32 %v4504_v49, 16  ;;  %v5222_v49 = vld [vmem:[#allocation2 + $0xc0] sm:$0xe] }
 0x186   : > { %v8761_v16 = vpop.f32.mrf.mxu0  ;;  %v8777_v23 = vrot.slane %v4721_v3, 4  ;;  %v4731_v60 = vor.u32 %v4730_v57, %v8757_v61  ;;  %v4772_v46 = vshll.u32 %v8768_v53, 16  ;;  %v4776_v31 = vshrl.u32 %v8768_v53, 16  ;;  %v8806_v57 = vld [vmem:[#allocation2 + $0xc8] sm:$0x1] }
 0x187   : > { %v9713_v37 = vcombine.low %v8354_v35, %v8362_v13  ;;  %v8790_v41 = vcombine.low %v4703_v22, %v4713_v4  ;;  %v8794_v25 = vsel %vm7457_vm15, %v5336_v45, %v5337_v0  ;;  %v8796_v10 = vrot.slane %v4734_v5, 5 }
 0x188   : > { %v8773_v39 = vpop.f32.mrf.mxu0  ;;  %v4758_v26 = vshll.u32 %v8770_v48, 16  ;;  %v8803_v35 = vsel %vm7457_vm15, %v6166_v6, %v5341_v34  ;;  %v5344_v13 = vrot.slane %v8770_v48, 5  ;;  %v4745_v3 = vor.u32 %v4744_v14, %v4741_v19  ;;  %v4507_v19 = vld [vmem:[#allocation2 + $0xd0] sm:$0xf] }
 0x189   : > { %v5348_v0 = vrot.slane %v8768_v53, 5  ;;  %v9715_v4 = vcombine.low %v8518_v32, %v8522_v52  ;;  %v5343_v45 = vrot.slane %v5341_v34, 4  ;;  %v4755_v5 = vor.u32 %v4754_v54, %v8775_v30  ;;  %v4508_v34 = vld [vmem:[#allocation2 + $0xd4] sm:$0xf] }
 0x18a   : > { %v8782_v62 = vpop.f32.mrf.mxu1  ;;  %v8788_v27 = vpop.f32.mrf.mxu0  ;;  %v4765_v6 = vrot.slane %v4763_v2, 4  ;;  %v4768_v48 = vrot.slane %v4766_v59, 5  ;;  %v9716_v14 = vcombine.low %v8568_v15, %v8583_v55  ;;  %v4727_v32 = vsel %vm7045_vm10, %v8777_v23, %v8757_v61  ;;  %v8833_v55 = vld [vmem:[#allocation2 + $0xd8] sm:$0x1] }
 0x18b   : > { %9712 = vst [vmem:[#allocation31_spill] sm:$0xff] %v8782_v62  ;;  %6701 = vmatmul.mubr.msk.bf16.gmra.mxu1 %vm1533_vm9, %v9713_v37  ;;  %6785 = vmatmul.mubr.msk.bf16.gmra.mxu0 %vm1533_vm9, %v9715_v4  ;;  %v4732_v52 = vrot.slane %v4731_v60, 4  ;;  %v8826_v53 = vrot.slane %v4772_v46, 5  ;;  %v4778_v37 = vrot.slane %v4776_v31, 4  ;;  %v4760_v2 = vrot.slane %v4758_v26, 5 }
 0x18c   : > { %6744 = vmatprep.mubr.msk.bf16.mxu1 %vm1533_vm9, %v8544_v20  ;;  %v8809_v22 = vpop.f32.mrf.mxu1  ;;  %v8815_v20 = vpop.f32.mrf.mxu0  ;;  %6788 = vmatprep.mubr.msk.bf16.mxu0 %vm1533_vm9, %v9716_v14  ;;  %v6167_v59 = vrot.slane %v5222_v49, 9  ;;  %v5351_v15 = vrot.slane %v8806_v57, 5  ;;  %v5355_v14 = vrot.slane %v4508_v34, 5  ;;  %v5350_v62 = vrot.slane %v5348_v0, 4 }
 0x18d   : > { %9714 = vst [vmem:[#allocation32_spill] sm:$0xff] %v8809_v22  ;;  %v4746_v22 = vrot.slane %v4745_v3, 4  ;;  %v4787_v23 = vshrl.u32 %v4507_v19, 16  ;;  %v4790_v61 = vshll.u32 %v4507_v19, 16  ;;  %v4756_v31 = vrot.slane %v4755_v5, 4 }
 0x18e   : > { %v8828_v4 = vpop.f32.mrf.mxu1  ;;  %v8830_v54 = vpop.f32.mrf.mxu0  ;;  %v4796_v9 = vshll.u32 %v4508_v34, 16  ;;  %v4800_v44 = vshrl.u32 %v4508_v34, 16  ;;  %v4737_v26 = vsel %vm7045_vm10, %v4732_v52, %v8796_v10  ;;  %v8844_v49 = vsel %vm7457_vm15, %v5343_v45, %v5344_v13  ;;  %v9719_v13 = vld [vmem:[#allocation19_spill] sm:$0xff] }
 0x18f   : > { %9717 = vst [vmem:[#allocation33_spill] sm:$0xff] %v8828_v4  ;;  %v4769_v4 = vor.u32 %v4768_v48, %v4765_v6  ;;  %v4779_v3 = vor.u32 %v4778_v37, %v8826_v53  ;;  %v4782_v19 = vshll.u32 %v8806_v57, 16  ;;  %v8854_v6 = vsel %vm7457_vm15, %v6167_v59, %v5348_v0 }
 0x190   : > { %v8835_v60 = vpop.f32.mrf.mxu1  ;;  %v8837_v46 = vpop.f32.mrf.mxu0  ;;  %v6168_v48 = vrot.slane %v5223_v38, 9  ;;  %v5357_v10 = vrot.slane %v5355_v14, 4  ;;  %v5358_v52 = vrot.slane %v8833_v55, 5  ;;  %v4751_v57 = vsel %vm7045_vm10, %v4746_v22, %v8775_v30 }
 0x191   : > { %9718 = vst [vmem:[#allocation34_spill] sm:$0xff] %v8835_v60  ;;  %v4789_v45 = vrot.slane %v4787_v23, 4  ;;  %v4792_v37 = vrot.slane %v4790_v61, 5  ;;  %v9720_v38 = vcombine.low %v8611_v21, %v8641_v11  ;;  %v4761_v59 = vsel %vm7045_vm10, %v4756_v31, %v4760_v2 }
 0x192   : > { %v6530_v56 = vpop.f32.mrf.mxu1  ;;  %v8850_v5 = vpop.f32.mrf.mxu0  ;;  %v8876_v30 = vrot.slane %v4796_v9, 5  ;;  %v4802_v22 = vrot.slane %v4800_v44, 4  ;;  %v6185_v21 = vcombine.low %v8755_v50, %v8794_v25  ;;  %v8886_v23 = vrot.slane %v4779_v3, 4  ;;  %v509_v25 = vld [vmem:[#allocation2 + $0x118] sm:$0x1] }
 0x193   : > { %6745 = vmatmul.mubr.msk.bf16.vlgmr.msra.gmra.mxu1 %vm1533_vm9, %v8546_v40  ;;  %v8864_v40 = vsel %vm7457_vm15, %v5350_v62, %v5351_v15  ;;  %6789 = vmatmul.mubr.msk.bf16.gmra.mxu0 %vm1533_vm9, %v9720_v38  ;;  %v4510_v62 = vld [vmem:[#allocation2 + $0xe0] sm:$0xf]  ;;  %v9721_v15 = vcombine.low %v8651_v29, %v8669_v47  ;;  %v8888_v2 = vrot.slane %v4782_v19, 5  ;;  %v8892_v44 = vcombine.low %v4727_v32, %v4737_v26  ;;  %v4511_v19 = vld [vmem:[#allocation2 + $0xe4] sm:$0xf] }
 0x194   : > { %6748 = vmatprep.mubr.msk.bf16.mxu1 %vm1533_vm9, %v9719_v13  ;;  %v1917_v34 = vpop.f32.mrf.mxu1  ;;  %v8870_v0 = vpop.f32.mrf.mxu0  ;;  %v8874_v13 = vrot.slane %v4769_v4, 4  ;;  %v5224_v4 = vld [vmem:[#allocation2 + $0xe0] sm:$0xe]  ;;  %v8898_v47 = vsel %vm7457_vm15, %v6168_v48, %v5355_v14  ;;  %v8902_v50 = vsel %vm7457_vm15, %v5357_v10, %v5358_v52  ;;  %v8904_v31 = vcombine.low %v4751_v57, %v4761_v59 }
 0x195   : > { %6792 = vmatprep.mubr.msk.bf16.mxu0 %vm1533_vm9, %v9721_v15  ;;  %v4793_v3 = vor.u32 %v4792_v37, %v4789_v45  ;;  %v4811_v38 = vshrl.u32 %v4510_v62, 16  ;;  %v4814_v15 = vshll.u32 %v4510_v62, 16  ;;  %v4803_v48 = vor.u32 %v4802_v22, %v8876_v30  ;;  %v9724_v29 = vld [vmem:[#allocation3_spill] sm:$0xff] }
 0x196   : > { %v6531_v9 = vpop.f32.mrf.mxu1  ;;  %v8890_v61 = vpop.f32.mrf.mxu0  ;;  %9722 = vst [vmem:[#allocation19_spill] sm:$0xff] %v8904_v31  ;;  %v4775_v14 = vsel %vm7045_vm10, %v8874_v13, %v8826_v53  ;;  %v4806_v10 = vshll.u32 %v8833_v55, 16  ;;  %v6169_v52 = vrot.slane %v5224_v4, 9  ;;  %v4785_v57 = vsel %vm7045_vm10, %v8886_v23, %v8888_v2  ;;  %v9725_v53 = vld [vmem:[#allocation9_spill] sm:$0xff]  ;;  %v4512_v4 = vld [vmem:[#allocation2 + $0xe8] sm:$0x1] }
 0x197   : > { %v5362_v37 = vrot.slane %v4511_v19, 5  ;;  %v510_v62 = vsel %vm6966_vm5, 0, %v509_v25  ;;  %v1926_v11 = vadd.f32 %v6530_v56, %v9724_v29  ;;  %v1918_v13 = vadd.f32 %v1917_v34, %v9725_v53  ;;  %v9727_v2 = vld [vmem:[#allocation10_spill] sm:$0xff]  ;;  %v9728_v29 = vld [vmem:[#allocation8_spill] sm:$0xff] }
 0x198   : > { %v1920_v32 = vpop.f32.mrf.mxu1  ;;  %v8906_v26 = vpop.f32.mrf.mxu0  ;;  %v4820_v60 = vshll.u32 %v4511_v19, 16  ;;  %v4824_v23 = vshrl.u32 %v4511_v19, 16  ;;  %511 = vst [vmem:[#allocation2 + $0x118] sm:$0x1] %v510_v62  ;;  %v1929_v45 = vadd.f32 %v6531_v9, %v9727_v2  ;;  %v4794_v25 = vrot.slane %v4793_v3, 4  ;;  %v9729_v53 = vld [vmem:[#allocation6_spill] sm:$0xff] }
 0x199   : > { %v4813_v59 = vrot.slane %v4811_v38, 4  ;;  %v4816_v56 = vrot.slane %v4814_v15, 5  ;;  %v1921_v34 = vadd.f32 %v1920_v32, %v9728_v29  ;;  %v4804_v62 = vrot.slane %v4803_v48, 4  ;;  %v9731_v2 = vld [vmem:[#allocation7_spill] sm:$0xff] }
 0x19a   : > { %v6534_v22 = vpop.f32.mrf.mxu1  ;;  %v8926_v55 = vpop.f32.mrf.mxu0  ;;  %v4808_v9 = vrot.slane %v4806_v10, 5  ;;  %v5364_v3 = vrot.slane %v5362_v37, 4  ;;  %v5365_v38 = vrot.slane %v4512_v4, 5  ;;  %v8953_v48 = vadd.f32 %v8710_v63, %v1918_v13  ;;  %v4513_v63 = vld [vmem:[#allocation2 + $0xf0] sm:$0xf] }
 0x19b   : > { %6749 = vmatmul.mubr.msk.bf16.gmra.mxu1 %vm1533_vm9, %v8688_v58  ;;  %9726 = vst [vmem:[#allocation4_spill] sm:$0xff] %v8926_v55  ;;  %v1942_v31 = vadd.f32 %v6534_v22, %v9729_v53  ;;  %v9730_v58 = vcombine.low %v8708_v28, %v8719_v42  ;;  %v8947_v28 = vrot.slane %v4820_v60, 5  ;;  %v4826_v42 = vrot.slane %v4824_v23, 4 }
 0x19c   : > { %6752 = vmatprep.mubr.msk.bf16.mxu1 %vm1533_vm9, %v8696_v51  ;;  %v1933_v33 = vpop.f32.mrf.mxu1  ;;  %v8937_v19 = vpop.f32.mrf.mxu0  ;;  %v8943_v51 = vsel %vm7457_vm15, %v6169_v52, %v5362_v37  ;;  %v8950_v22 = vadd.f32 %v8694_v24, %v1926_v11  ;;  %v4799_v10 = vsel %vm7045_vm10, %v4794_v25, %v8876_v30  ;;  %v4817_v52 = vor.u32 %v4816_v56, %v4813_v59  ;;  %v5225_v37 = vld [vmem:[#allocation2 + $0xf0] sm:$0xe]  ;;  %v9733_v30 = vld [vmem:[#allocation14_spill] sm:$0xff] }
 0x19d   : > { %6793 = vmatmul.mubr.msk.bf16.gmra.mxu0 %vm1533_vm9, %v9730_v58  ;;  %v1934_v55 = vadd.f32 %v1933_v33, %v9731_v2  ;;  %v9732_v33 = vld [vmem:[#allocation12_spill] sm:$0xff]  ;;  %v8960_v29 = vadd.f32 %v8729_v36, %v1929_v45  ;;  %v4809_v24 = vsel %vm7045_vm10, %v4804_v62, %v4808_v9  ;;  %v4830_v11 = vshll.u32 %v4512_v4, 16  ;;  %v8977_v45 = vld [vmem:[#allocation2 + $0xf4] sm:$0xf]  ;;  %v8979_v59 = vld [vmem:[#allocation2 + $0xf8] sm:$0x1] }
 0x19e   : > { %6796 = vmatprep.mubr.msk.bf16.mxu0 %vm1533_vm9, %v6185_v21  ;;  %v6535_v15 = vpop.f32.mrf.mxu1  ;;  %v8945_v32 = vpop.f32.mrf.mxu0  ;;  %v8967_v13 = vadd.f32 %v8743_v43, %v1921_v34  ;;  %v8970_v23 = vadd.f32 %v8761_v16, %v1942_v31  ;;  %v8975_v36 = vsel %vm7457_vm15, %v5364_v3, %v5365_v38  ;;  %v8991_v31 = vcombine.low %v4775_v14, %v4785_v57  ;;  %v9734_v9 = vld [vmem:[#allocation16_spill] sm:$0xff] }
 0x19f   : > { %v1945_v21 = vadd.f32 %v6535_v15, %v9732_v33  ;;  %v8982_v56 = vadd.f32 %v8773_v39, %v1934_v55  ;;  %v4827_v34 = vor.u32 %v4826_v42, %v8947_v28  ;;  %v6170_v58 = vrot.slane %v5225_v37, 9  ;;  %v4517_v42 = vld [vmem:[#allocation2 + $0x104] sm:$0xf]  ;;  %v9736_v33 = vld [vmem:[#allocation18_spill] sm:$0xff]  ;;  %v4516_v37 = vld [vmem:[#allocation2 + $0x100] sm:$0xf] }
 0x1a0   : > { %v1936_v60 = vpop.f32.mrf.mxu1  ;;  %v8962_v53 = vpop.f32.mrf.mxu0  ;;  %v5369_v62 = vrot.slane %v8977_v45, 5  ;;  %v8998_v39 = vrot.slane %v4817_v52, 4  ;;  %v9735_v14 = vcombine.low %v8803_v35, %v8844_v49  ;;  %v9009_v3 = vcombine.low %v4799_v10, %v4809_v24  ;;  %v5226_v49 = vld [vmem:[#allocation2 + $0x100] sm:$0xe] }
 0x1a1   : > { %v1937_v25 = vadd.f32 %v1936_v60, %v9733_v30  ;;  %v8985_v4 = vadd.f32 %v8788_v27, %v1945_v21  ;;  %v4835_v27 = vshrl.u32 %v4513_v63, 16  ;;  %v6189_v38 = vcombine.low %v8943_v51, %v8975_v36 }
 0x1a2   : > { %v6538_v43 = vpop.f32.mrf.mxu1  ;;  %v8989_v16 = vpop.f32.mrf.mxu0  ;;  %v5372_v15 = vrot.slane %v8979_v59, 5  ;;  %v9737_v21 = vcombine.low %v8854_v6, %v8864_v40  ;;  %v4838_v35 = vshll.u32 %v4513_v63, 16  ;;  %v5376_v52 = vrot.slane %v4517_v42, 5  ;;  %v9029_v40 = vld [vmem:[#allocation2 + $0x108] sm:$0x1]  ;;  %v9738_v63 = vld [vmem:[#allocation21_spill] sm:$0xff] }
 0x1a3   : > { %6753 = vmatmul.mubr.msk.bf16.gmra.mxu1 %vm1533_vm9, %v8735_v17  ;;  %v1958_v2 = vadd.f32 %v6538_v43, %v9734_v9  ;;  %v9001_v55 = vadd.f32 %v8815_v20, %v1937_v25  ;;  %v4828_v24 = vrot.slane %v4827_v34, 4  ;;  %v5371_v30 = vrot.slane %v5369_v62, 4 }
 0x1a4   : > { %6756 = vmatprep.mubr.msk.bf16.mxu1 %vm1533_vm9, %v8737_v8  ;;  %v1949_v17 = vpop.f32.mrf.mxu1  ;;  %v9007_v57 = vpop.f32.mrf.mxu0  ;;  %v4832_v8 = vrot.slane %v4830_v11, 5  ;;  %v9026_v11 = vsel %vm7457_vm15, %v6170_v58, %v5369_v62  ;;  %v4844_v6 = vshll.u32 %v8977_v45, 16  ;;  %v9036_v36 = vrot.slane %v4835_v27, 4 }
 0x1a5   : > { %6797 = vmatmul.mubr.msk.bf16.gmra.mxu0 %vm1533_vm9, %v9735_v14  ;;  %v1950_v20 = vadd.f32 %v1949_v17, %v9736_v33  ;;  %v9020_v10 = vadd.f32 %v8830_v54, %v1958_v2  ;;  %v4823_v54 = vsel %vm7045_vm10, %v8998_v39, %v8947_v28  ;;  %v4848_v62 = vshrl.u32 %v8977_v45, 16  ;;  %v9739_v14 = vld [vmem:[#allocation23_spill] sm:$0xff] }
 0x1a6   : > { %6800 = vmatprep.mubr.msk.bf16.mxu0 %vm1533_vm9, %v9737_v21  ;;  %v6539_v60 = vpop.f32.mrf.mxu1  ;;  %v9022_v51 = vpop.f32.mrf.mxu0  ;;  %v6171_v9 = vrot.slane %v5226_v49, 9  ;;  %v4859_v2 = vshrl.u32 %v4516_v37, 16  ;;  %v4862_v17 = vshll.u32 %v4516_v37, 16  ;;  %v5378_v21 = vrot.slane %v5376_v52, 4 }
 0x1a7   : > { %v1961_v25 = vadd.f32 %v6539_v60, %v9738_v63  ;;  %v9039_v43 = vadd.f32 %v8837_v46, %v1950_v20  ;;  %v5379_v60 = vrot.slane %v9029_v40, 5  ;;  %v4840_v27 = vrot.slane %v4838_v35, 5 }
 0x1a8   : > { %v1952_v34 = vpop.f32.mrf.mxu1  ;;  %v9041_v58 = vpop.f32.mrf.mxu0  ;;  %v9053_v20 = vrot.slane %v4844_v6, 5  ;;  %v4868_v45 = vshll.u32 %v4517_v42, 16  ;;  %v4872_v49 = vshrl.u32 %v4517_v42, 16  ;;  %v5373_v63 = vsel %vm7457_vm15, %v5371_v30, %v5372_v15  ;;  %v5227_v30 = vld [vmem:[#allocation2 + $0x110] sm:$0xe] }
 0x1a9   : > { %v1953_v33 = vadd.f32 %v1952_v34, %v9739_v14  ;;  %v9047_v28 = vadd.f32 %v8850_v5, %v1961_v25  ;;  %v4833_v5 = vsel %vm7045_vm10, %v4828_v24, %v4832_v8  ;;  %v9740_v35 = vcombine.low %v8898_v47, %v8902_v50  ;;  %v4520_v24 = vld [vmem:[#allocation2 + $0x114] sm:$0xf] }
 0x1aa   : > { %v6542_v39 = vpop.f32.mrf.mxu1  ;;  %v9051_v46 = vpop.f32.mrf.mxu0  ;;  %v4861_v6 = vrot.slane %v4859_v2, 4  ;;  %v4864_v8 = vrot.slane %v4862_v17, 5  ;;  %v9741_v34 = vld [vmem:[#allocation25_spill] sm:$0xff]  ;;  %v5383_v47 = vrot.slane %v4520_v24, 5  ;;  %v4874_v2 = vrot.slane %v4872_v49, 4 }
 0x1ab   : > { %6757 = vmatmul.mubr.msk.bf16.gmra.mxu1 %vm1533_vm9, %v8790_v41  ;;  %v1974_v37 = vadd.f32 %v6542_v39, %v8632_v12  ;;  %v9063_v41 = vadd.f32 %v8870_v0, %v1953_v33  ;;  %v4850_v12 = vrot.slane %v4848_v62, 4  ;;  %v5380_v0 = vsel %vm7457_vm15, %v5378_v21, %v5379_v60  ;;  %v9087_v17 = vld [vmem:[#allocation2 + $0x118] sm:$0x1] }
 0x1ac   : > { %6760 = vmatprep.mubr.msk.bf16.mxu1 %vm1533_vm9, %v8892_v44  ;;  %v1965_v25 = vpop.f32.mrf.mxu1  ;;  %v9069_v42 = vpop.f32.mrf.mxu0  ;;  %v5377_v44 = vsel %vm7457_vm15, %v6171_v9, %v5376_v52  ;;  %v9082_v33 = vcombine.low %v4823_v54, %v4833_v5  ;;  %v4854_v52 = vshll.u32 %v8979_v59, 16  ;;  %v9085_v9 = vrot.slane %v4868_v45, 5 }
 0x1ad   : > { %6801 = vmatmul.mubr.msk.bf16.gmra.mxu0 %vm1533_vm9, %v9740_v35  ;;  %v1966_v15 = vadd.f32 %v1965_v25, %v9741_v34  ;;  %v9078_v50 = vadd.f32 %v8890_v61, %v1974_v37  ;;  %v6190_v21 = vcombine.low %v9026_v11, %v5373_v63  ;;  %v4841_v60 = vor.u32 %v4840_v27, %v9036_v36  ;;  %v4519_v61 = vld [vmem:[#allocation2 + $0x110] sm:$0xf]  ;;  %v9742_v25 = vld [vmem:[#allocation27_spill] sm:$0xff]  ;;  %v9743_v11 = vld [vmem:[#allocation4_spill] sm:$0xff] }
 0x1ae   : > { %6804 = vmatprep.mubr.msk.bf16.mxu0 %vm1533_vm9, %v6189_v38  ;;  %v6543_v14 = vpop.f32.mrf.mxu1  ;;  %v9080_v62 = vpop.f32.mrf.mxu0  ;;  %v4851_v54 = vor.u32 %v4850_v12, %v9053_v20  ;;  %v6191_v59 = vcombine.low %v5377_v44, %v5380_v0  ;;  %v4865_v45 = vor.u32 %v4864_v8, %v4861_v6  ;;  %v6172_v49 = vrot.slane %v5227_v30, 9  ;;  %v9745_v27 = vld [vmem:[#allocation19_spill] sm:$0xff] }
 0x1af   : > { %v1977_v38 = vadd.f32 %v6543_v14, %v8659_v1  ;;  %v9093_v39 = vadd.f32 %v8906_v26, %v1966_v15  ;;  %v5385_v34 = vrot.slane %v5383_v47, 4  ;;  %v5386_v1 = vrot.slane %v9087_v17, 5  ;;  %v9746_v15 = vld [vmem:[#allocation5_spill] sm:$0xff] }
 0x1b0   : > { %v1968_v37 = vpop.f32.mrf.mxu1  ;;  %v9096_v5 = vpop.f32.mrf.mxu0  ;;  %v4875_v12 = vor.u32 %v4874_v2, %v9085_v9  ;;  %v4878_v44 = vshll.u32 %v9029_v40, 16  ;;  %v4883_v6 = vshrl.u32 %v4519_v61, 16  ;;  %v4886_v8 = vshll.u32 %v4519_v61, 16  ;;  %v9747_v61 = vld [vmem:[#allocation11_spill] sm:$0xff] }
 0x1b1   : > { %v1969_v35 = vadd.f32 %v1968_v37, %v9742_v25  ;;  %v9101_v63 = vadd.f32 %v9743_v11, %v1977_v38  ;;  %v4892_v30 = vshll.u32 %v4520_v24, 16  ;;  %v4896_v14 = vshrl.u32 %v4520_v24, 16 }
 0x1b2   : > { %v6546_v36 = vpop.f32.mrf.mxu1  ;;  %v9105_v26 = vpop.f32.mrf.mxu0  ;;  %v4842_v25 = vrot.slane %v4841_v60, 4  ;;  %v4852_v11 = vrot.slane %v4851_v54, 4  ;;  %v4856_v2 = vrot.slane %v4854_v52, 5  ;;  %v4866_v40 = vrot.slane %v4865_v45, 4 }
 0x1b3   : > { %9744 = vst [vmem:[#allocation3_spill] sm:$0xff] %v9101_v63  ;;  %6761 = vmatmul.mubr.msk.bf16.gmra.mxu1 %vm1533_vm9, %v9745_v27  ;;  %v1990_v0 = vadd.f32 %v6546_v36, %v9746_v15  ;;  %v9113_v38 = vadd.f32 %v8937_v19, %v1969_v35  ;;  %v5387_v19 = vsel %vm7457_vm15, %v5385_v34, %v5386_v1  ;;  %v4876_v52 = vrot.slane %v4875_v12, 4  ;;  %v9748_v36 = vld [vmem:[#allocation13_spill] sm:$0xff] }
 0x1b4   : > { %6764 = vmatprep.mubr.msk.bf16.mxu1 %vm1533_vm9, %v8991_v31  ;;  %v1981_v37 = vpop.f32.mrf.mxu1  ;;  %v9116_v27 = vpop.f32.mrf.mxu0  ;;  %v5384_v31 = vsel %vm7457_vm15, %v6172_v49, %v5383_v47  ;;  %v4880_v54 = vrot.slane %v4878_v44, 5  ;;  %v4885_v35 = vrot.slane %v4883_v6, 4  ;;  %v4888_v45 = vrot.slane %v4886_v8, 5 }
 0x1b5   : > { %6805 = vmatmul.mubr.msk.bf16.gmra.mxu0 %vm1533_vm9, %v6190_v21  ;;  %v1982_v63 = vadd.f32 %v1981_v37, %v9747_v61  ;;  %v9125_v24 = vadd.f32 %v8945_v32, %v1990_v0  ;;  %v4894_v37 = vrot.slane %v4892_v30, 5  ;;  %v6192_v18 = vcombine.low %v5384_v31, %v5387_v19  ;;  %v9749_v32 = vld [vmem:[#allocation15_spill] sm:$0xff] }
 0x1b6   : > { %6808 = vmatprep.mubr.msk.bf16.mxu0 %vm1533_vm9, %v6191_v59  ;;  %v6547_v21 = vpop.f32.mrf.mxu1  ;;  %v9127_v60 = vpop.f32.mrf.mxu0  ;;  %v4898_v59 = vrot.slane %v4896_v14, 4  ;;  %v4847_v1 = vsel %vm7045_vm10, %v4842_v25, %v9053_v20  ;;  %v4881_v6 = vsel %vm7045_vm10, %v4876_v52, %v4880_v54  ;;  %v4889_v8 = vor.u32 %v4888_v45, %v4885_v35  ;;  %v9750_v20 = vld [vmem:[#allocation17_spill] sm:$0xff]  ;;  %v9752_v54 = vld [vmem:[#allocation22_spill] sm:$0xff] }
 0x1b7   : > { %v1993_v15 = vadd.f32 %v6547_v21, %v9748_v36  ;;  %v9131_v61 = vadd.f32 %v8962_v53, %v1982_v63  ;;  %v4857_v53 = vsel %vm7045_vm10, %v4852_v11, %v4856_v2  ;;  %v4871_v63 = vsel %vm7045_vm10, %v4866_v40, %v9085_v9  ;;  %v9751_v11 = vld [vmem:[#allocation20_spill] sm:$0xff] }
 0x1b8   : > { %v1984_v47 = vpop.f32.mrf.mxu1  ;;  %v9133_v49 = vpop.f32.mrf.mxu0  ;;  %v6136_v19 = vcombine.low %v4847_v1, %v4857_v53  ;;  %v6137_v21 = vcombine.low %v4871_v63, %v4881_v6  ;;  %v4890_v52 = vrot.slane %v4889_v8, 4  ;;  %v9755_v6 = vld [vmem:[#allocation28_spill] sm:$0xff] }
 0x1b9   : > { %v1985_v34 = vadd.f32 %v1984_v47, %v9749_v32  ;;  %v9140_v12 = vadd.f32 %v8989_v16, %v1993_v15  ;;  %v4899_v16 = vor.u32 %v4898_v59, %v4894_v37  ;;  %v9753_v59 = vld [vmem:[#allocation24_spill] sm:$0xff] }
 0x1ba   : > { %v6550_v44 = vpop.f32.mrf.mxu1  ;;  %v6595_v0 = vpop.f32.mrf.mxu0 }
 0x1bb   : > { %6765 = vmatmul.mubr.msk.bf16.gmra.mxu1 %vm1533_vm9, %v9009_v3  ;;  %v2006_v30 = vadd.f32 %v6550_v44, %v9750_v20  ;;  %v4902_v3 = vshll.u32 %v9087_v17, 16  ;;  %v9156_v14 = vadd.f32 %v9007_v57, %v1985_v34  ;;  %v4900_v17 = vrot.slane %v4899_v16, 4  ;;  %v9754_v34 = vld [vmem:[#allocation26_spill] sm:$0xff] }
 0x1bc   : > { %6768 = vmatprep.mubr.msk.bf16.mxu1 %vm1533_vm9, %v9082_v33  ;;  %v1997_v25 = vpop.f32.mrf.mxu1  ;;  %v2469_v9 = vpop.f32.mrf.mxu0  ;;  %v4895_v44 = vsel %vm7045_vm10, %v4890_v52, %v4894_v37  ;;  %v9758_v52 = vld [vmem:[#allocation31_spill] sm:$0xff] }
 0x1bd   : > { %6809 = vmatmul.mubr.msk.bf16.gmra.mxu0 %vm1533_vm9, %v6192_v18  ;;  %v1998_v2 = vadd.f32 %v1997_v25, %v9751_v11  ;;  %v9161_v40 = vadd.f32 %v9022_v51, %v2006_v30  ;;  %v4904_v45 = vrot.slane %v4902_v3, 5  ;;  %v9756_v25 = vld [vmem:[#allocation29_spill] sm:$0xff] }
 0x1be   : > { %v6551_v31 = vpop.f32.mrf.mxu1  ;;  %v6638_v33 = vpop.f32.mrf.mxu0 }
 0x1bf   : > { %v2009_v35 = vadd.f32 %v6551_v31, %v9752_v54  ;;  %v9165_v57 = vadd.f32 %v9041_v58, %v1998_v2  ;;  %v4905_v58 = vsel %vm7045_vm10, %v4900_v17, %v4904_v45  ;;  %v9757_v31 = vld [vmem:[#allocation30_spill] sm:$0xff] }
 0x1c0   : > { %v2000_v36 = vpop.f32.mrf.mxu1  ;;  %v3462_v15 = vpop.f32.mrf.mxu0  ;;  %v6138_v16 = vcombine.low %v4895_v44, %v4905_v58 }
 0x1c1   : > { %v2001_v47 = vadd.f32 %v2000_v36, %v9753_v59  ;;  %v9169_v18 = vadd.f32 %v9051_v46, %v2009_v35 }
 0x1c2   : > { %v6639_v32 = vpop.f32.mrf.mxu0 }
 0x1c3   : > { %v6554_v51 = vpop.f32.mrf.mxu1  ;;  %6769 = vmatmul.mubr.msk.bf16.gmra.mxu1 %vm1533_vm9, %v6136_v19  ;;  %v9179_v53 = vadd.f32 %v9069_v42, %v2001_v47 }
 0x1c4   : > { %v2022_v1 = vadd.f32 %v6554_v51, %v9754_v34  ;;  %6772 = vmatprep.mubr.msk.bf16.mxu1 %vm1533_vm9, %v6137_v21  ;;  %v3465_v46 = vpop.f32.mrf.mxu0 }
 0x1c5   : > { %v2013_v63 = vpop.f32.mrf.mxu1 }
 0x1c6   : > { %v2014_v8 = vadd.f32 %v2013_v63, %v9755_v6  ;;  %v9183_v20 = vadd.f32 %v9080_v62, %v2022_v1  ;;  %v6642_v3 = vpop.f32.mrf.mxu0  ;;  %v9761_v63 = vld [vmem:[#allocation34_spill] sm:$0xff] }
 0x1c7   : > { %v6555_v30 = vpop.f32.mrf.mxu1 }
 0x1c8   : > { %v2025_v11 = vadd.f32 %v6555_v30, %v9756_v25  ;;  %v9187_v37 = vadd.f32 %v9096_v5, %v2014_v8  ;;  %v3478_v2 = vpop.f32.mrf.mxu0  ;;  %v9759_v5 = vld [vmem:[#allocation32_spill] sm:$0xff] }
 0x1c9   : > { %v2016_v7 = vpop.f32.mrf.mxu1 }
 0x1ca   : > { %v2017_v42 = vadd.f32 %v2016_v7, %v9757_v31  ;;  %v9191_v19 = vadd.f32 %v9105_v26, %v2025_v11  ;;  %v6643_v62 = vpop.f32.mrf.mxu0  ;;  %v9760_v26 = vld [vmem:[#allocation33_spill] sm:$0xff] }
 0x1cb   : > { %v6558_v21 = vpop.f32.mrf.mxu1  ;;  %6773 = vmatmul.mubr.msk.bf16.gmra.mxu1 %vm1533_vm9, %v6138_v16 }
 0x1cc   : > { %v2038_v54 = vadd.f32 %v6558_v21, %v9758_v52  ;;  %v9196_v35 = vadd.f32 %v9116_v27, %v2017_v42  ;;  %v3481_v45 = vpop.f32.mrf.mxu0 }
 0x1cd   : > { %v2029_v17 = vpop.f32.mrf.mxu1 }
 0x1ce   : > { %v2030_v36 = vadd.f32 %v2029_v17, %v9759_v5  ;;  %v9200_v59 = vadd.f32 %v9127_v60, %v2038_v54  ;;  %v6646_v51 = vpop.f32.mrf.mxu0 }
 0x1cf   : > { %v6559_v47 = vpop.f32.mrf.mxu1 }
 0x1d0   : > { %v2041_v34 = vadd.f32 %v6559_v47, %v9760_v26  ;;  %v9204_v1 = vadd.f32 %v9133_v49, %v2030_v36  ;;  %v3494_v58 = vpop.f32.mrf.mxu0 }
 0x1d1   : > { %v2032_v44 = vpop.f32.mrf.mxu1 }
 0x1d2   : > { %v2033_v6 = vadd.f32 %v2032_v44, %v9761_v63  ;;  %v9207_v27 = vadd.f32 %v6595_v0, %v2041_v34  ;;  %v6647_v30 = vpop.f32.mrf.mxu0 }
 0x1d3   : > { %v6602_v8 = vpop.f32.mrf.mxu1 }
 0x1d4   : > { %v2853_v16 = vadd.f32 %v6602_v8, %v8950_v22  ;;  %v9210_v25 = vadd.f32 %v2469_v9, %v2033_v6  ;;  %v3497_v11 = vpop.f32.mrf.mxu0 }
 0x1d5   : > { %v2724_v60 = vpop.f32.mrf.mxu1 }
 0x1d6   : > { %v2851_v7 = vadd.f32 %v2724_v60, %v8953_v48  ;;  %v9213_v31 = vadd.f32 %v6638_v33, %v2853_v16  ;;  %v6650_v42 = vpop.f32.mrf.mxu0 }
 0x1d7   : > { %v6603_v49 = vpop.f32.mrf.mxu1 }
 0x1d8   : > { %v2854_v21 = vadd.f32 %v6603_v49, %v8960_v29  ;;  %v9216_v52 = vadd.f32 %v3462_v15, %v2851_v7  ;;  %v3510_v54 = vpop.f32.mrf.mxu0 }
 0x1d9   : > { %v2727_v0 = vpop.f32.mrf.mxu1 }
 0x1da   : > { %v2852_v17 = vadd.f32 %v2727_v0, %v8967_v13  ;;  %v9219_v5 = vadd.f32 %v6639_v32, %v2854_v21  ;;  %v6651_v9 = vpop.f32.mrf.mxu0 }
 0x1db   : > { %v6606_v22 = vpop.f32.mrf.mxu1 }
 0x1dc   : > { %v2857_v36 = vadd.f32 %v6606_v22, %v8970_v23  ;;  %v9222_v47 = vadd.f32 %v3465_v46, %v2852_v17  ;;  %v3513_v33 = vpop.f32.mrf.mxu0 }
 0x1dd   : > { %v2740_v48 = vpop.f32.mrf.mxu1 }
 0x1de   : > { %v2855_v26 = vadd.f32 %v2740_v48, %v8982_v56  ;;  %v9225_v34 = vadd.f32 %v6642_v3, %v2857_v36  ;;  %v6654_v15 = vpop.f32.mrf.mxu0 }
 0x1df   : > { %v6607_v29 = vpop.f32.mrf.mxu1 }
 0x1e0   : > { %v2858_v44 = vadd.f32 %v6607_v29, %v8985_v4  ;;  %v9228_v63 = vadd.f32 %v3478_v2, %v2855_v26  ;;  %v3526_v32 = vpop.f32.mrf.mxu0 }
 0x1e1   : > { %v2743_v13 = vpop.f32.mrf.mxu1 }
 0x1e2   : > { %v2856_v6 = vadd.f32 %v2743_v13, %v9001_v55  ;;  %v9231_v8 = vadd.f32 %v6643_v62, %v2858_v44  ;;  %v6655_v46 = vpop.f32.mrf.mxu0  ;;  %v9762_v44 = vld [vmem:[#allocation3_spill] sm:$0xff] }
 0x1e3   : > { %v6610_v23 = vpop.f32.mrf.mxu1 }
 0x1e4   : > { %v2861_v16 = vadd.f32 %v6610_v23, %v9020_v10  ;;  %v9234_v60 = vadd.f32 %v3481_v45, %v2856_v6  ;;  %v3529_v3 = vpop.f32.mrf.mxu0 }
 0x1e5   : > { %v2756_v56 = vpop.f32.mrf.mxu1 }
 0x1e6   : > { %v2859_v7 = vadd.f32 %v2756_v56, %v9039_v43  ;;  %v9237_v49 = vadd.f32 %v6646_v51, %v2861_v16  ;;  %v6658_v2 = vpop.f32.mrf.mxu0 }
 0x1e7   : > { %v6611_v4 = vpop.f32.mrf.mxu1 }
 0x1e8   : > { %v2862_v21 = vadd.f32 %v6611_v4, %v9047_v28  ;;  %v9240_v0 = vadd.f32 %v3494_v58, %v2859_v7  ;;  %v3542_v62 = vpop.f32.mrf.mxu0 }
 0x1e9   : > { %v2759_v55 = vpop.f32.mrf.mxu1 }
 0x1ea   : > { %v2860_v17 = vadd.f32 %v2759_v55, %v9063_v41  ;;  %v9243_v22 = vadd.f32 %v6647_v30, %v2862_v21  ;;  %v6659_v45 = vpop.f32.mrf.mxu0 }
 0x1eb   : > { %v6614_v10 = vpop.f32.mrf.mxu1 }
 0x1ec   : > { %v2865_v36 = vadd.f32 %v6614_v10, %v9078_v50  ;;  %v9246_v48 = vadd.f32 %v3497_v11, %v2860_v17  ;;  %v3545_v51 = vpop.f32.mrf.mxu0 }
 0x1ed   : > { %v2772_v43 = vpop.f32.mrf.mxu1 }
 0x1ee   : > { %v2863_v26 = vadd.f32 %v2772_v43, %v9093_v39  ;;  %v9249_v29 = vadd.f32 %v6650_v42, %v2865_v36  ;;  %v6662_v58 = vpop.f32.mrf.mxu0 }
 0x1ef   : > { %v6615_v28 = vpop.f32.mrf.mxu1 }
 0x1f0   : > { %v2866_v13 = vadd.f32 %v6615_v28, %v9762_v44  ;;  %v9252_v6 = vadd.f32 %v3510_v54, %v2863_v26  ;;  %v3558_v30 = vpop.f32.mrf.mxu0 }
 0x1f1   : > { %v2775_v41 = vpop.f32.mrf.mxu1 }
 0x1f2   : > { %v2864_v23 = vadd.f32 %v2775_v41, %v9113_v38  ;;  %v9255_v16 = vadd.f32 %v6651_v9, %v2866_v13  ;;  %v6663_v56 = vpop.f32.mrf.mxu0 }
 0x1f3   : > { %v6618_v50 = vpop.f32.mrf.mxu1 }
 0x1f4   : > { %v2869_v11 = vadd.f32 %v6618_v50, %v9125_v24  ;;  %v9258_v7 = vadd.f32 %v3513_v33, %v2864_v23  ;;  %v3561_v55 = vpop.f32.mrf.mxu0 }
 0x1f5   : > { %v2788_v39 = vpop.f32.mrf.mxu1 }
 0x1f6   : > { %v2867_v42 = vadd.f32 %v2788_v39, %v9131_v61  ;;  %v9261_v4 = vadd.f32 %v6654_v15, %v2869_v11 }
 0x1f7   : > { %v6619_v21 = vpop.f32.mrf.mxu1 }
 0x1f8   : > { %v2870_v54 = vadd.f32 %v6619_v21, %v9140_v12  ;;  %v9264_v17 = vadd.f32 %v3526_v32, %v2867_v42 }
 0x1f9   : > { %v2791_v38 = vpop.f32.mrf.mxu1 }
 0x1fa   : > { %9763 = vst [vmem:[#allocation9_spill] sm:$0xff] %v9264_v17  ;;  %v2868_v9 = vadd.f32 %v2791_v38, %v9156_v14  ;;  %v9267_v10 = vadd.f32 %v6655_v46, %v2870_v54 }
 0x1fb   : > { %v6622_v24 = vpop.f32.mrf.mxu1  ;;  %v6666_v36 = vpop.f32.mrf.mxu0 }
 0x1fc   : > { %9764 = vst [vmem:[#allocation10_spill] sm:$0xff] %v9267_v10  ;;  %v2873_v33 = vadd.f32 %v6622_v24, %v9161_v40  ;;  %v9270_v43 = vadd.f32 %v3529_v3, %v2868_v9 }
 0x1fd   : > { %v2804_v61 = vpop.f32.mrf.mxu1  ;;  %v3574_v26 = vpop.f32.mrf.mxu0 }
 0x1fe   : > { %9765 = vst [vmem:[#allocation8_spill] sm:$0xff] %v9270_v43  ;;  %v2871_v15 = vadd.f32 %v2804_v61, %v9165_v57  ;;  %v9273_v28 = vadd.f32 %v6658_v2, %v2873_v33 }
 0x1ff   : > { %v6623_v12 = vpop.f32.mrf.mxu1  ;;  %v6667_v44 = vpop.f32.mrf.mxu0 }
 0x200   : > { %9766 = vst [vmem:[#allocation6_spill] sm:$0xff] %v9273_v28  ;;  %v2874_v32 = vadd.f32 %v6623_v12, %v9169_v18  ;;  %v9276_v13 = vadd.f32 %v3542_v62, %v2871_v15 }
 0x201   : > { %v2807_v14 = vpop.f32.mrf.mxu1  ;;  %v3577_v41 = vpop.f32.mrf.mxu0 }
 0x202   : > { %9767 = vst [vmem:[#allocation7_spill] sm:$0xff] %v9276_v13  ;;  %v2872_v46 = vadd.f32 %v2807_v14, %v9179_v53  ;;  %v9279_v40 = vadd.f32 %v6659_v45, %v2874_v32 }
 0x203   : > { %v6626_v3 = vpop.f32.mrf.mxu1  ;;  %v9282_v50 = vpop.f32.mrf.mxu0 }
 0x204   : > { %9768 = vst [vmem:[#allocation12_spill] sm:$0xff] %v9279_v40  ;;  %v2877_v23 = vadd.f32 %v6626_v3, %v9183_v20  ;;  %v9284_v57 = vadd.f32 %v3545_v51, %v2872_v46 }
 0x205   : > { %v2820_v2 = vpop.f32.mrf.mxu1  ;;  %v9287_v18 = vpop.f32.mrf.mxu0 }
 0x206   : > { %9769 = vst [vmem:[#allocation14_spill] sm:$0xff] %v9284_v57  ;;  %v2875_v11 = vadd.f32 %v2820_v2, %v9187_v37  ;;  %v9289_v62 = vadd.f32 %v6662_v58, %v2877_v23 }
 0x207   : > { %v6627_v39 = vpop.f32.mrf.mxu1  ;;  %v9292_v42 = vpop.f32.mrf.mxu0 }
 0x208   : > { %9770 = vst [vmem:[#allocation16_spill] sm:$0xff] %v9289_v62  ;;  %v2878_v53 = vadd.f32 %v6627_v39, %v9191_v19  ;;  %v9294_v45 = vadd.f32 %v3558_v30, %v2875_v11 }
 0x209   : > { %v2823_v21 = vpop.f32.mrf.mxu1  ;;  %v9297_v54 = vpop.f32.mrf.mxu0 }
 0x20a   : > { %9771 = vst [vmem:[#allocation18_spill] sm:$0xff] %v9294_v45  ;;  %v2876_v20 = vadd.f32 %v2823_v21, %v9196_v35  ;;  %v9299_v51 = vadd.f32 %v6663_v56, %v2878_v53 }
 0x20b   : > { %v6630_v38 = vpop.f32.mrf.mxu1  ;;  %v9302_v9 = vpop.f32.mrf.mxu0 }
 0x20c   : > { %9772 = vst [vmem:[#allocation21_spill] sm:$0xff] %v9299_v51  ;;  %v2881_v37 = vadd.f32 %v6630_v38, %v9200_v59  ;;  %v9304_v58 = vadd.f32 %v3561_v55, %v2876_v20 }
 0x20d   : > { %v2836_v24 = vpop.f32.mrf.mxu1  ;;  %v9307_v33 = vpop.f32.mrf.mxu0 }
 0x20e   : > { %9773 = vst [vmem:[#allocation23_spill] sm:$0xff] %v9304_v58  ;;  %v2879_v19 = vadd.f32 %v2836_v24, %v9204_v1  ;;  %v9309_v30 = vadd.f32 %v6666_v36, %v2881_v37 }
 0x20f   : > { %v6631_v61 = vpop.f32.mrf.mxu1  ;;  %v9312_v15 = vpop.f32.mrf.mxu0 }
 0x210   : > { %9774 = vst [vmem:[#allocation25_spill] sm:$0xff] %v9309_v30  ;;  %v2882_v35 = vadd.f32 %v6631_v61, %v9207_v27  ;;  %v9314_v56 = vadd.f32 %v3574_v26, %v2879_v19 }
 0x211   : > { %v2839_v12 = vpop.f32.mrf.mxu1  ;;  %v9317_v32 = vpop.f32.mrf.mxu0 }
 0x212   : > { %9775 = vst [vmem:[#allocation27_spill] sm:$0xff] %v9314_v56  ;;  %v2880_v59 = vadd.f32 %v2839_v12, %v9210_v25  ;;  %v9319_v55 = vadd.f32 %v6667_v44, %v2882_v35 }
 0x213   : > { %v6674_v14 = vpop.f32.mrf.mxu1  ;;  %v9323_v36 = vpop.f32.mrf.mxu0 }
 0x214   : > { %9776 = vst [vmem:[#allocation4_spill] sm:$0xff] %v9319_v55  ;;  %v9321_v1 = vadd.f32 %v3577_v41, %v2880_v59 }
 0x215   : > { %v3944_v46 = vpop.f32.mrf.mxu1  ;;  %v9327_v27 = vpop.f32.mrf.mxu0 }
 0x216   : > { %9777 = vst [vmem:[#allocation19_spill] sm:$0xff] %v9321_v1 }
 0x217   : > { %v9325_v3 = vpop.f32.mrf.mxu1  ;;  %v9331_v26 = vpop.f32.mrf.mxu0 }
 0x219   : > { %v9329_v23 = vpop.f32.mrf.mxu1  ;;  %v9335_v25 = vpop.f32.mrf.mxu0 }
 0x21b   : > { %v9333_v2 = vpop.f32.mrf.mxu1  ;;  %v9339_v11 = vpop.f32.mrf.mxu0 }
 0x21d   : > { %v9337_v44 = vpop.f32.mrf.mxu1  ;;  %v9343_v39 = vpop.f32.mrf.mxu0 }
 0x21f   : > { %v9341_v41 = vpop.f32.mrf.mxu1  ;;  %v9347_v21 = vpop.f32.mrf.mxu0 }
 0x220   : > { %9778 = vst [vmem:[#allocation5_spill] sm:$0xff] %v9347_v21 }
 0x221   : > { %v9345_v53 = vpop.f32.mrf.mxu1  ;;  %v9351_v38 = vpop.f32.mrf.mxu0 }
 0x222   : > { %9779 = vst [vmem:[#allocation11_spill] sm:$0xff] %v9351_v38 }
 0x223   : > { %v9349_v20 = vpop.f32.mrf.mxu1  ;;  %v9355_v24 = vpop.f32.mrf.mxu0 }
 0x224   : > { %9780 = vst [vmem:[#allocation13_spill] sm:$0xff] %v9355_v24 }
 0x225   : > { %v9353_v37 = vpop.f32.mrf.mxu1  ;;  %v9359_v61 = vpop.f32.mrf.mxu0 }
 0x226   : > { %9781 = vst [vmem:[#allocation15_spill] sm:$0xff] %v9359_v61 }
 0x227   : > { %v9357_v19 = vpop.f32.mrf.mxu1  ;;  %v9363_v12 = vpop.f32.mrf.mxu0 }
 0x228   : > { %9782 = vst [vmem:[#allocation17_spill] sm:$0xff] %v9363_v12 }
 0x229   : > { %v9361_v35 = vpop.f32.mrf.mxu1  ;;  %v9367_v1 = vpop.f32.mrf.mxu0 }
 0x22a   : > { %9783 = vst [vmem:[#allocation20_spill] sm:$0xff] %v9367_v1 }
 0x22b   : > { %v9365_v59 = vpop.f32.mrf.mxu1  ;;  %v9371_v56 = vpop.f32.mrf.mxu0 }
 0x22c   : > { %9784 = vst [vmem:[#allocation22_spill] sm:$0xff] %v9371_v56 }
 0x22d   : > { %v9369_v55 = vpop.f32.mrf.mxu1  ;;  %v9375_v58 = vpop.f32.mrf.mxu0 }
 0x22e   : > { %9785 = vst [vmem:[#allocation24_spill] sm:$0xff] %v9375_v58 }
 0x22f   : > { %v9373_v30 = vpop.f32.mrf.mxu1  ;;  %v9379_v45 = vpop.f32.mrf.mxu0 }
 0x230   : > { %9786 = vst [vmem:[#allocation26_spill] sm:$0xff] %v9379_v45 }
 0x231   : > { %v9377_v51 = vpop.f32.mrf.mxu1  ;;  %v9383_v57 = vpop.f32.mrf.mxu0 }
 0x232   : > { %9787 = vst [vmem:[#allocation28_spill] sm:$0xff] %v9383_v57 }
 0x233   : > { %v9381_v62 = vpop.f32.mrf.mxu1  ;;  %v9387_v13 = vpop.f32.mrf.mxu0 }
 0x234   : > { %9789 = vst [vmem:[#allocation30_spill] sm:$0xff] %v9387_v13 }
 0x235   : > { %v9385_v40 = vpop.f32.mrf.mxu1  ;;  %v9391_v12 = vpop.f32.mrf.mxu0 }
 0x236   : > { %9788 = vst [vmem:[#allocation29_spill] sm:$0xff] %v9385_v40  ;;  %9791 = vst [vmem:[#allocation32_spill] sm:$0xff] %v9391_v12 }
 0x237   : > { %v9389_v1 = vpop.f32.mrf.mxu1  ;;  %v9395_v28 = vpop.f32.mrf.mxu0 }
 0x238   : > { %9790 = vst [vmem:[#allocation31_spill] sm:$0xff] %v9389_v1  ;;  %9793 = vst [vmem:[#allocation34_spill] sm:$0xff] %v9395_v28 }
 0x239   : > { %v9393_v56 = vpop.f32.mrf.mxu1  ;;  %v9399_v61 = vpop.f32.mrf.mxu0 }
 0x23a   : > { %9792 = vst [vmem:[#allocation33_spill] sm:$0xff] %v9393_v56  ;;  %9795 = vst [vmem:[#allocation35_spill] sm:$0xff] %v9399_v61 }
 0x23b   : > { %v9397_v58 = vpop.f32.mrf.mxu1  ;;  %v9403_v43 = vpop.f32.mrf.mxu0 }
 0x23c   : > { %9794 = vst [vmem:[#allocation3_spill] sm:$0xff] %v9397_v58  ;;  %9797 = vst [vmem:[#allocation37_spill] sm:$0xff] %v9403_v43 }
 0x23d   : > { %v9401_v45 = vpop.f32.mrf.mxu1  ;;  %v9407_v24 = vpop.f32.mrf.mxu0 }
 0x23e   : > { %9796 = vst [vmem:[#allocation36_spill] sm:$0xff] %v9401_v45  ;;  %9799 = vst [vmem:[#allocation39_spill] sm:$0xff] %v9407_v24 }
 0x23f   : > { %v9405_v57 = vpop.f32.mrf.mxu1  ;;  %v9411_v1 = vpop.f32.mrf.mxu0 }
 0x240   : > { %9798 = vst [vmem:[#allocation38_spill] sm:$0xff] %v9405_v57  ;;  %9801 = vst [vmem:[#allocation41_spill] sm:$0xff] %v9411_v1 }
 0x241   : > { %v9409_v13 = vpop.f32.mrf.mxu1  ;;  %v9415_v56 = vpop.f32.mrf.mxu0 }
 0x242   : > { %9800 = vst [vmem:[#allocation40_spill] sm:$0xff] %v9409_v13  ;;  %9803 = vst [vmem:[#allocation43_spill] sm:$0xff] %v9415_v56 }
 0x243   : > { %v9413_v12 = vpop.f32.mrf.mxu1  ;;  %v6782_v61 = vpop.f32.mrf.mxu0 }
 0x244   : > { %9802 = vst [vmem:[#allocation42_spill] sm:$0xff] %v9413_v12  ;;  %v4073_v12 = vadd.f32 %v6674_v14, %v9213_v31 }
 0x245   : > { %v9417_v28 = vpop.f32.mrf.mxu1  ;;  %v5535_v45 = vpop.f32.mrf.mxu0 }
 0x246   : > { %9804 = vst [vmem:[#allocation44_spill] sm:$0xff] %v9417_v28  ;;  %v4071_v28 = vadd.f32 %v3944_v46, %v9216_v52 }
 0x247   : > { %v9419_v58 = vpop.f32.mrf.mxu1  ;;  %v6783_v57 = vpop.f32.mrf.mxu0 }
 0x248   : > { %9805 = vst [vmem:[#allocation45_spill] sm:$0xff] %v9419_v58  ;;  %v4442_v14 = vadd.f32 %v9287_v18, %v4071_v28  ;;  %v4075_v28 = vadd.f32 %v9337_v44, %v9228_v63 }
 0x249   : > { %v9421_v43 = vpop.f32.mrf.mxu1  ;;  %v5538_v24 = vpop.f32.mrf.mxu0 }
 0x24a   : > { %9806 = vst [vmem:[#allocation46_spill] sm:$0xff] %v9421_v43  ;;  %v4074_v43 = vadd.f32 %v9325_v3, %v9219_v5  ;;  %v4446_v44 = vadd.f32 %v9307_v33, %v4075_v28 }
 0x24b   : > { %v9423_v10 = vpop.f32.mrf.mxu1  ;;  %v6786_v1 = vpop.f32.mrf.mxu0 }
 0x24c   : > { %9807 = vst [vmem:[#allocation47_spill] sm:$0xff] %v9423_v10  ;;  %v4444_v10 = vadd.f32 %v9282_v50, %v4073_v12  ;;  %v4077_v50 = vadd.f32 %v9333_v2, %v9225_v34  ;;  %v4078_v34 = vadd.f32 %v9341_v41, %v9231_v8 }
 0x24d   : > { %v9425_v13 = vpop.f32.mrf.mxu1  ;;  %v5551_v56 = vpop.f32.mrf.mxu0 }
 0x24e   : > { %9808 = vst [vmem:[#allocation48_spill] sm:$0xff] %v9425_v13  ;;  %v4072_v13 = vadd.f32 %v9329_v23, %v9222_v47  ;;  %v4445_v47 = vadd.f32 %v9292_v42, %v4074_v43  ;;  %v4448_v2 = vadd.f32 %v9302_v9, %v4077_v50  ;;  %v4449_v41 = vadd.f32 %v9312_v15, %v4078_v34 }
 0x24f   : > { %v9428_v38 = vpop.f32.mrf.mxu1  ;;  %v6787_v58 = vpop.f32.mrf.mxu0 }
 0x250   : > { %9809 = vst [vmem:[#allocation49_spill] sm:$0xff] %v9428_v38  ;;  %v4443_v12 = vadd.f32 %v9297_v54, %v4072_v13 }
 0x251   : > { %v9431_v40 = vpop.f32.mrf.mxu1  ;;  %v5554_v21 = vpop.f32.mrf.mxu0 }
 0x252   : > { %9810 = vst [vmem:[#allocation50_spill] sm:$0xff] %v9431_v40 }
 0x253   : > { %v6746_v17 = vpop.f32.mrf.mxu1  ;;  %v6790_v5 = vpop.f32.mrf.mxu0 }
 0x254   : > { %v5182_v31 = vadd.f32 %v6746_v17, %v4444_v10 }
 0x255   : > { %v5053_v52 = vpop.f32.mrf.mxu1  ;;  %v5567_v10 = vpop.f32.mrf.mxu0 }
 0x256   : > { %v5664_v46 = vadd.f32 %v6782_v61, %v5182_v31  ;;  %v5180_v3 = vadd.f32 %v5053_v52, %v4442_v14 }
 0x257   : > { %v6747_v17 = vpop.f32.mrf.mxu1  ;;  %v6791_v38 = vpop.f32.mrf.mxu0 }
 0x258   : > { %5697 = vst.msk [vmem:[%s9443_s29 + $0x10] sm:$0xff] %vm5694_vm0, %v5664_v46  ;;  %v5662_v18 = vadd.f32 %v5535_v45, %v5180_v3  ;;  %v5183_v23 = vadd.f32 %v6747_v17, %v4445_v47  ;;  %v4076_v45 = vadd.f32 %v9345_v53, %v9234_v60  ;;  %v4079_v53 = vadd.f32 %v9353_v37, %v9240_v0 }
 0x259   : > { %v5056_v40 = vpop.f32.mrf.mxu1  ;;  %v5570_v63 = vpop.f32.mrf.mxu0 }
 0x25a   : > { %5695 = vst.msk [vmem:[%s9443_s29] sm:$0xff] %vm5694_vm0, %v5662_v18  ;;  %v5665_v43 = vadd.f32 %v6783_v57, %v5183_v23  ;;  %v5181_v42 = vadd.f32 %v5056_v40, %v4443_v12  ;;  %v4081_v40 = vadd.f32 %v9349_v20, %v9237_v49  ;;  %v4447_v52 = vadd.f32 %v9317_v32, %v4076_v45 }
 0x25b   : > { %v6750_v61 = vpop.f32.mrf.mxu1  ;;  %v4450_v47 = vadd.f32 %v9327_v27, %v4079_v53  ;;  %v9817_v53 = vld [vmem:[#allocation13_spill] sm:$0xff] }
 0x25c   : > { %5698 = vst.msk [vmem:[%s9443_s29 + $0x18] sm:$0xff] %vm5694_vm0, %v5665_v43  ;;  %v5663_v13 = vadd.f32 %v5538_v24, %v5181_v42  ;;  %v5186_v54 = vadd.f32 %v6750_v61, %v4448_v2  ;;  %v4452_v46 = vadd.f32 %v9323_v36, %v4081_v40  ;;  %v9811_v61 = vld [vmem:[#allocation5_spill] sm:$0xff] }
 0x25d   : > { %v5069_v31 = vpop.f32.mrf.mxu1  ;;  %v6794_v8 = vpop.f32.mrf.mxu0 }
 0x25e   : > { %5696 = vst.msk [vmem:[%s9443_s29 + $0x8] sm:$0xff] %vm5694_vm0, %v5663_v13  ;;  %v5668_v57 = vadd.f32 %v6786_v1, %v5186_v54  ;;  %v5184_v9 = vadd.f32 %v5069_v31, %v4446_v44  ;;  %v4082_v1 = vadd.f32 %v9357_v19, %v9243_v22  ;;  %v9813_v54 = vld [vmem:[#allocation29_spill] sm:$0xff]  ;;  %v9814_v31 = vld [vmem:[#allocation11_spill] sm:$0xff] }
 0x25f   : > { %v6751_v14 = vpop.f32.mrf.mxu1  ;;  %v5583_v60 = vpop.f32.mrf.mxu0 }
 0x260   : > { %5701 = vst.msk [vmem:[%s9443_s29 + $0x30] sm:$0xff] %vm5694_vm0, %v5668_v57  ;;  %v5666_v33 = vadd.f32 %v5551_v56, %v5184_v9  ;;  %v5187_v24 = vadd.f32 %v6751_v14, %v4449_v41  ;;  %v4080_v56 = vadd.f32 %v9361_v35, %v9246_v48  ;;  %v4453_v28 = vadd.f32 %v9331_v26, %v4082_v1 }
 0x261   : > { %v5072_v50 = vpop.f32.mrf.mxu1  ;;  %v6795_v49 = vpop.f32.mrf.mxu0 }
 0x262   : > { %5699 = vst.msk [vmem:[%s9443_s29 + $0x20] sm:$0xff] %vm5694_vm0, %v5666_v33  ;;  %v5669_v15 = vadd.f32 %v6787_v58, %v5187_v24  ;;  %v5185_v20 = vadd.f32 %v5072_v50, %v4447_v52  ;;  %v4085_v58 = vadd.f32 %v9365_v59, %v9249_v29  ;;  %v4451_v23 = vadd.f32 %v9335_v25, %v4080_v56  ;;  %v9818_v50 = vld [vmem:[#allocation8_spill] sm:$0xff] }
 0x263   : > { %v6754_v3 = vpop.f32.mrf.mxu1  ;;  %v5586_v0 = vpop.f32.mrf.mxu0  ;;  %v4086_v59 = vadd.f32 %v9373_v30, %v9255_v16  ;;  %v4089_v30 = vadd.f32 %v9381_v62, %v9261_v4  ;;  %v9815_v62 = vld [vmem:[#allocation10_spill] sm:$0xff] }
 0x264   : > { %5702 = vst.msk [vmem:[%s9443_s29 + $0x38] sm:$0xff] %vm5694_vm0, %v5669_v15  ;;  %v5667_v32 = vadd.f32 %v5554_v21, %v5185_v20  ;;  %v5190_v37 = vadd.f32 %v6754_v3, %v4452_v46  ;;  %v4083_v21 = vadd.f32 %v9369_v55, %v9252_v6  ;;  %v4456_v34 = vadd.f32 %v9339_v11, %v4085_v58  ;;  %v9820_v46 = vld [vmem:[#allocation15_spill] sm:$0xff]  ;;  %v9823_v58 = vld [vmem:[#allocation17_spill] sm:$0xff] }
 0x265   : > { %v5085_v17 = vpop.f32.mrf.mxu1  ;;  %v6798_v22 = vpop.f32.mrf.mxu0  ;;  %v4084_v55 = vadd.f32 %v9377_v51, %v9258_v7  ;;  %v4457_v45 = vadd.f32 %v9811_v61, %v4086_v59  ;;  %v9812_v51 = vld [vmem:[#allocation9_spill] sm:$0xff]  ;;  %v4460_v33 = vadd.f32 %v9817_v53, %v4089_v30  ;;  %v9831_v30 = vld [vmem:[#allocation40_spill] sm:$0xff] }
 0x266   : > { %5700 = vst.msk [vmem:[%s9443_s29 + $0x28] sm:$0xff] %vm5694_vm0, %v5667_v32  ;;  %v5672_v36 = vadd.f32 %v6790_v5, %v5190_v37  ;;  %v5188_v19 = vadd.f32 %v5085_v17, %v4450_v47  ;;  %v4454_v42 = vadd.f32 %v9343_v39, %v4083_v21  ;;  %v9821_v32 = vld [vmem:[#allocation6_spill] sm:$0xff]  ;;  %v9822_v37 = vld [vmem:[#allocation3_spill] sm:$0xff]  ;;  %v9825_v21 = vld [vmem:[#allocation36_spill] sm:$0xff] }
 0x267   : > { %v6755_v18 = vpop.f32.mrf.mxu1  ;;  %v5599_v48 = vpop.f32.mrf.mxu0  ;;  %v4455_v40 = vadd.f32 %v9814_v31, %v4084_v55  ;;  %v9829_v55 = vld [vmem:[#allocation22_spill] sm:$0xff]  ;;  %v9832_v61 = vld [vmem:[#allocation24_spill] sm:$0xff] }
 0x268   : > { %5705 = vst.msk [vmem:[%s9443_s29 + $0x50] sm:$0xff] %vm5694_vm0, %v5672_v36  ;;  %v5670_v27 = vadd.f32 %v5567_v10, %v5188_v19  ;;  %v5191_v35 = vadd.f32 %v6755_v18, %v4453_v28  ;;  %v9824_v18 = vld [vmem:[#allocation7_spill] sm:$0xff] }
 0x269   : > { %v5088_v12 = vpop.f32.mrf.mxu1  ;;  %v6799_v29 = vpop.f32.mrf.mxu0 }
 0x26a   : > { %5703 = vst.msk [vmem:[%s9443_s29 + $0x40] sm:$0xff] %vm5694_vm0, %v5670_v27  ;;  %v5673_v26 = vadd.f32 %v6791_v38, %v5191_v35  ;;  %v5189_v5 = vadd.f32 %v5088_v12, %v4451_v23  ;;  %v9826_v23 = vld [vmem:[#allocation20_spill] sm:$0xff] }
 0x26b   : > { %v6758_v43 = vpop.f32.mrf.mxu1  ;;  %v5602_v6 = vpop.f32.mrf.mxu0 }
 0x26c   : > { %5706 = vst.msk [vmem:[%s9443_s29 + $0x58] sm:$0xff] %vm5694_vm0, %v5673_v26  ;;  %v5671_v25 = vadd.f32 %v5570_v63, %v5189_v5  ;;  %v5194_v10 = vadd.f32 %v6758_v43, %v4456_v34  ;;  %v4087_v63 = vadd.f32 %v9813_v54, %v9812_v51  ;;  %v9827_v26 = vld [vmem:[#allocation12_spill] sm:$0xff]  ;;  %v9828_v5 = vld [vmem:[#allocation38_spill] sm:$0xff] }
 0x26d   : > { %v5101_v2 = vpop.f32.mrf.mxu1  ;;  %v6802_v16 = vpop.f32.mrf.mxu0  ;;  %v9833_v51 = vld [vmem:[#allocation16_spill] sm:$0xff]  ;;  %v9834_v54 = vld [vmem:[#allocation42_spill] sm:$0xff] }
 0x26e   : > { %5704 = vst.msk [vmem:[%s9443_s29 + $0x48] sm:$0xff] %vm5694_vm0, %v5671_v25  ;;  %v5676_v11 = vadd.f32 %v6794_v8, %v5194_v10  ;;  %v5192_v38 = vadd.f32 %v5101_v2, %v4454_v42  ;;  %v9816_v8 = vld [vmem:[#allocation31_spill] sm:$0xff]  ;;  %v4458_v3 = vadd.f32 %v9820_v46, %v4087_v63  ;;  %v9830_v2 = vld [vmem:[#allocation14_spill] sm:$0xff] }
 0x26f   : > { %v6759_v13 = vpop.f32.mrf.mxu1  ;;  %v5615_v7 = vpop.f32.mrf.mxu0  ;;  %v4090_v9 = vadd.f32 %v9816_v8, %v9815_v62  ;;  %v9836_v62 = vld [vmem:[#allocation18_spill] sm:$0xff]  ;;  %v9837_v8 = vld [vmem:[#allocation44_spill] sm:$0xff] }
 0x270   : > { %5709 = vst.msk [vmem:[%s9443_s29 + $0x70] sm:$0xff] %vm5694_vm0, %v5676_v11  ;;  %v5674_v39 = vadd.f32 %v5583_v60, %v5192_v38  ;;  %v5195_v44 = vadd.f32 %v6759_v13, %v4457_v45  ;;  %v9819_v60 = vld [vmem:[#allocation33_spill] sm:$0xff] }
 0x271   : > { %v5104_v57 = vpop.f32.mrf.mxu1  ;;  %v6803_v4 = vpop.f32.mrf.mxu0  ;;  %v4088_v1 = vadd.f32 %v9819_v60, %v9818_v50  ;;  %v4461_v36 = vadd.f32 %v9823_v58, %v4090_v9  ;;  %v9840_v50 = vld [vmem:[#allocation45_spill] sm:$0xff] }
 0x272   : > { %5707 = vst.msk [vmem:[%s9443_s29 + $0x60] sm:$0xff] %vm5694_vm0, %v5674_v39  ;;  %v5677_v41 = vadd.f32 %v6795_v49, %v5195_v44  ;;  %v5193_v14 = vadd.f32 %v5104_v57, %v4455_v40  ;;  %v4093_v49 = vadd.f32 %v9822_v37, %v9821_v32  ;;  %v9835_v44 = vld [vmem:[#allocation26_spill] sm:$0xff] }
 0x273   : > { %v6762_v24 = vpop.f32.mrf.mxu1  ;;  %v5618_v52 = vpop.f32.mrf.mxu0  ;;  %v4459_v12 = vadd.f32 %v9826_v23, %v4088_v1  ;;  %v9843_v32 = vld [vmem:[#allocation46_spill] sm:$0xff] }
 0x274   : > { %5710 = vst.msk [vmem:[%s9443_s29 + $0x78] sm:$0xff] %vm5694_vm0, %v5677_v41  ;;  %v5675_v15 = vadd.f32 %v5586_v0, %v5193_v14  ;;  %v5198_v20 = vadd.f32 %v6762_v24, %v4460_v33  ;;  %v4091_v0 = vadd.f32 %v9825_v21, %v9824_v18  ;;  %v4464_v25 = vadd.f32 %v9829_v55, %v4093_v49  ;;  %v9838_v14 = vld [vmem:[#allocation28_spill] sm:$0xff]  ;;  %v9839_v24 = vld [vmem:[#allocation21_spill] sm:$0xff] }
 0x275   : > { %v5117_v56 = vpop.f32.mrf.mxu1  ;;  %v6806_v28 = vpop.f32.mrf.mxu0  ;;  %v9851_v55 = vld [vmem:[#allocation4_spill] sm:$0xff] }
 0x276   : > { %5708 = vst.msk [vmem:[%s9443_s29 + $0x68] sm:$0xff] %vm5694_vm0, %v5675_v15  ;;  %v5680_v47 = vadd.f32 %v6798_v22, %v5198_v20  ;;  %v5196_v17 = vadd.f32 %v5117_v56, %v4458_v3  ;;  %v4094_v22 = vadd.f32 %v9828_v5, %v9827_v26  ;;  %v4462_v45 = vadd.f32 %v9832_v61, %v4091_v0  ;;  %v9841_v15 = vld [vmem:[#allocation30_spill] sm:$0xff]  ;;  %v9842_v56 = vld [vmem:[#allocation23_spill] sm:$0xff] }
 0x277   : > { %v6763_v19 = vpop.f32.mrf.mxu1  ;;  %v5631_v42 = vpop.f32.mrf.mxu0  ;;  %v9847_v0 = vld [vmem:[#allocation34_spill] sm:$0xff]  ;;  %v9854_v61 = vld [vmem:[#allocation19_spill] sm:$0xff] }
 0x278   : > { %5713 = vst.msk [vmem:[%s9443_s29 + $0x90] sm:$0xff] %vm5694_vm0, %v5680_v47  ;;  %v5678_v27 = vadd.f32 %v5599_v48, %v5196_v17  ;;  %v5199_v35 = vadd.f32 %v6763_v19, %v4461_v36  ;;  %v4092_v48 = vadd.f32 %v9831_v30, %v9830_v2  ;;  %v4465_v31 = vadd.f32 %v9835_v44, %v4094_v22  ;;  %v9844_v47 = vld [vmem:[#allocation32_spill] sm:$0xff]  ;;  %v9845_v36 = vld [vmem:[#allocation25_spill] sm:$0xff]  ;;  %v9846_v19 = vld [vmem:[#allocation47_spill] sm:$0xff] }
 0x279   : > { %v5120_v59 = vpop.f32.mrf.mxu1  ;;  %v6807_v57 = vpop.f32.mrf.mxu0  ;;  %v9850_v22 = vld [vmem:[#allocation35_spill] sm:$0xff]  ;;  %v9853_v30 = vld [vmem:[#allocation37_spill] sm:$0xff] }
 0x27a   : > { %5711 = vst.msk [vmem:[%s9443_s29 + $0x80] sm:$0xff] %vm5694_vm0, %v5678_v27  ;;  %v5681_v34 = vadd.f32 %v6799_v29, %v5199_v35  ;;  %v5197_v43 = vadd.f32 %v5120_v59, %v4459_v12  ;;  %v4097_v29 = vadd.f32 %v9834_v54, %v9833_v51  ;;  %v4463_v53 = vadd.f32 %v9838_v14, %v4092_v48  ;;  %v9848_v12 = vld [vmem:[#allocation27_spill] sm:$0xff]  ;;  %v9849_v59 = vld [vmem:[#allocation48_spill] sm:$0xff] }
 0x27b   : > { %v6766_v10 = vpop.f32.mrf.mxu1  ;;  %v5634_v3 = vpop.f32.mrf.mxu0  ;;  %v9856_v54 = vld [vmem:[#allocation39_spill] sm:$0xff] }
 0x27c   : > { %5714 = vst.msk [vmem:[%s9443_s29 + $0x98] sm:$0xff] %vm5694_vm0, %v5681_v34  ;;  %v5679_v11 = vadd.f32 %v5602_v6, %v5197_v43  ;;  %v5202_v38 = vadd.f32 %v6766_v10, %v4464_v25  ;;  %v4095_v6 = vadd.f32 %v9837_v8, %v9836_v62  ;;  %v4468_v20 = vadd.f32 %v9841_v15, %v4097_v29  ;;  %v9852_v25 = vld [vmem:[#allocation49_spill] sm:$0xff] }
 0x27d   : > { %v5133_v13 = vpop.f32.mrf.mxu1  ;;  %v6810_v23 = vpop.f32.mrf.mxu0 }
 0x27e   : > { %5712 = vst.msk [vmem:[%s9443_s29 + $0x88] sm:$0xff] %vm5694_vm0, %v5679_v11  ;;  %v5684_v63 = vadd.f32 %v6802_v16, %v5202_v38  ;;  %v5200_v39 = vadd.f32 %v5133_v13, %v4462_v45  ;;  %v4098_v16 = vadd.f32 %v9840_v50, %v9839_v24  ;;  %v4466_v17 = vadd.f32 %v9844_v47, %v4095_v6  ;;  %v9855_v45 = vld [vmem:[#allocation50_spill] sm:$0xff] }
 0x27f   : > { %v6767_v40 = vpop.f32.mrf.mxu1  ;;  %v5647_v38 = vpop.f32.mrf.mxu0 }
 0x280   : > { %5717 = vst.msk [vmem:[%s9443_s29 + $0xb0] sm:$0xff] %vm5694_vm0, %v5684_v63  ;;  %v5682_v9 = vadd.f32 %v5615_v7, %v5200_v39  ;;  %v5203_v41 = vadd.f32 %v6767_v40, %v4465_v31  ;;  %v4096_v7 = vadd.f32 %v9843_v32, %v9842_v56  ;;  %v4469_v27 = vadd.f32 %v9847_v0, %v4098_v16  ;;  %v9857_v31 = vld [vmem:[#allocation41_spill] sm:$0xff] }
 0x281   : > { %v5136_v33 = vpop.f32.mrf.mxu1 }
 0x282   : > { %5715 = vst.msk [vmem:[%s9443_s29 + $0xa0] sm:$0xff] %vm5694_vm0, %v5682_v9  ;;  %v5685_v60 = vadd.f32 %v6803_v4, %v5203_v41  ;;  %v5201_v1 = vadd.f32 %v5136_v33, %v4463_v53  ;;  %v4101_v4 = vadd.f32 %v9846_v19, %v9845_v36  ;;  %v4467_v34 = vadd.f32 %v9850_v22, %v4096_v7  ;;  %v9858_v9 = vld [vmem:[#allocation43_spill] sm:$0xff] }
 0x283   : > { %v6770_v46 = vpop.f32.mrf.mxu1 }
 0x284   : > { %5718 = vst.msk [vmem:[%s9443_s29 + $0xb8] sm:$0xff] %vm5694_vm0, %v5685_v60  ;;  %v5683_v37 = vadd.f32 %v5618_v52, %v5201_v1  ;;  %v5206_v49 = vadd.f32 %v6770_v46, %v4468_v20  ;;  %v4099_v52 = vadd.f32 %v9849_v59, %v9848_v12  ;;  %v4472_v48 = vadd.f32 %v9853_v30, %v4101_v4 }
 0x285   : > { %v5149_v58 = vpop.f32.mrf.mxu1 }
 0x286   : > { %5716 = vst.msk [vmem:[%s9443_s29 + $0xa8] sm:$0xff] %vm5694_vm0, %v5683_v37  ;;  %v5688_v18 = vadd.f32 %v6806_v28, %v5206_v49  ;;  %v5204_v21 = vadd.f32 %v5149_v58, %v4466_v17  ;;  %v4102_v28 = vadd.f32 %v9852_v25, %v9851_v55  ;;  %v4470_v29 = vadd.f32 %v9856_v54, %v4099_v52 }
 0x287   : > { %v6771_v35 = vpop.f32.mrf.mxu1 }
 0x288   : > { %5721 = vst.msk [vmem:[%s9443_s29 + $0xd0] sm:$0xff] %vm5694_vm0, %v5688_v18  ;;  %v5686_v26 = vadd.f32 %v5631_v42, %v5204_v21  ;;  %v5207_v5 = vadd.f32 %v6771_v35, %v4469_v27  ;;  %v4100_v42 = vadd.f32 %v9855_v45, %v9854_v61  ;;  %v4473_v40 = vadd.f32 %v9857_v31, %v4102_v28 }
 0x289   : > { %v5152_v43 = vpop.f32.mrf.mxu1 }
 0x28a   : > { %5719 = vst.msk [vmem:[%s9443_s29 + $0xc0] sm:$0xff] %vm5694_vm0, %v5686_v26  ;;  %v5689_v10 = vadd.f32 %v6807_v57, %v5207_v5  ;;  %v5205_v2 = vadd.f32 %v5152_v43, %v4467_v34  ;;  %v6811_v57 = vpop.f32.mrf.mxu0  ;;  %v4471_v41 = vadd.f32 %v9858_v9, %v4100_v42 }
 0x28b   : > { %v6774_v11 = vpop.f32.mrf.mxu1 }
 0x28c   : > { %5722 = vst.msk [vmem:[%s9443_s29 + $0xd8] sm:$0xff] %vm5694_vm0, %v5689_v10  ;;  %v5687_v13 = vadd.f32 %v5634_v3, %v5205_v2  ;;  %v5210_v51 = vadd.f32 %v6774_v11, %v4472_v48  ;;  %v5650_v24 = vpop.f32.mrf.mxu0 }
 0x28d   : > { %v5165_v63 = vpop.f32.mrf.mxu1 }
 0x28e   : > { %5720 = vst.msk [vmem:[%s9443_s29 + $0xc8] sm:$0xff] %vm5694_vm0, %v5687_v13  ;;  %v5692_v39 = vadd.f32 %v6810_v23, %v5210_v51  ;;  %v5208_v44 = vadd.f32 %v5165_v63, %v4470_v29 }
 0x28f   : > { %v6775_v62 = vpop.f32.mrf.mxu1 }
 0x290   : > { %5725 = vst.msk [vmem:[%s9443_s29 + $0xf0] sm:$0xff] %vm5694_vm0, %v5692_v39  ;;  %v5690_v8 = vadd.f32 %v5647_v38, %v5208_v44  ;;  %v5211_v6 = vadd.f32 %v6775_v62, %v4473_v40 }
 0x291   : > { %v5168_v14 = vpop.f32.mrf.mxu1 }
 0x292   : > { %5723 = vst.msk [vmem:[%s9443_s29 + $0xe0] sm:$0xff] %vm5694_vm0, %v5690_v8  ;;  %v5693_v53 = vadd.f32 %v6811_v57, %v5211_v6  ;;  %v5209_v33 = vadd.f32 %v5168_v14, %v4471_v41 }
 0x294   : > { %5726 = vst.msk [vmem:[%s9443_s29 + $0xf8] sm:$0xff] %vm5694_vm0, %v5693_v53  ;;  %v5691_v50 = vadd.f32 %v5650_v24, %v5209_v33 }
 0x296   : > { %5724 = vst.msk [vmem:[%s9443_s29 + $0xe8] sm:$0xff] %vm5694_vm0, %v5691_v50 }
 0x297 PF: > { %s14_s15 = sadd.s32 1, %s6912_s15  }
 0x298   : > { %p11_p4 = scmp.ge.s32.totalorder %s14_s15, 4  }
 0x29a   :  { %13 = sbr.rel (!%p11_p4) target bundleno = 1 (0x1), region = 77 }

</bundles_post_ra>
